<compile_context>
chip_gen: v5e
topology: v5e:2x2
jax: 0.10.0
libtpu: 0.0.40
codegen_flags: <defaults>
</compile_context>

<pallas_src>
import functools
import math

import numpy as np
import jax
import jax.numpy as jnp
from jax import lax
from jax.experimental import pallas as pl
from jax.experimental.pallas import tpu as pltpu

KSIZE = 5
PAD = KSIZE // 2


def _regression_head_kernel(
    x_ref,            # (1, C, H*W)   input, channels-first, spatial flattened
    mask_ref,         # (5, H*W)      x-boundary masks, one per horizontal tap
    w1_ref, b1_ref,   # (C, 25*C), (C, 1)
    w2_ref, b2_ref,   # (C, 25*C), (C, 1)
    w3_ref, b3_ref,   # (Cout, C), (Cout, 1)
    out_ref,          # (1, Cout, H*W)
    buf_ref,          # scratch (C, H*W + 4*W + 4)  zero-guarded flat image
    col_ref,          # scratch (25*C, H*W)         im2col columns
    *, W,
):
    C = x_ref.shape[1]
    HW = x_ref.shape[2]
    OFF = PAD * W + PAD          # flat offset of pixel (0, 0) inside buf_ref

    # Zero the guard region once; the centre is overwritten below.
    buf_ref[...] = jnp.zeros_like(buf_ref)
    buf_ref[:, OFF:OFF + HW] = x_ref[0]

    def conv5x5_relu(w_ref, b_ref):
        # im2col: row-block k = tap (dy, dx).  A (dy, dx) shift of the padded
        # image is the lane-slice of buf at offset dy*W + dx; the vertical
        # out-of-bounds reads land in the zero guards, the horizontal ones are
        # killed by the precomputed mask for that dx.
        for dy in range(KSIZE):
            for dx in range(KSIZE):
                k = dy * KSIZE + dx
                start = dy * W + dx
                win = buf_ref[:, start:start + HW]                    # (C, HW)
                col_ref[k * C:(k + 1) * C, :] = win * mask_ref[dx:dx + 1, :]
        # Single fused MXU matmul: (C, 25C) @ (25C, HW), f32 accumulation.
        h = jnp.dot(w_ref[...], col_ref[...],
                    preferred_element_type=jnp.float32)
        return jnp.maximum(h + b_ref[...], 0.0)                       # (C, HW)

    h1 = conv5x5_relu(w1_ref, b1_ref)
    buf_ref[:, OFF:OFF + HW] = h1        # guards are still zero
    h2 = conv5x5_relu(w2_ref, b2_ref)

    # conv3: 1x1 conv == (Cout, C) @ (C, HW) + bias, stored lane-dense.
    y = jnp.dot(w3_ref[...], h2, preferred_element_type=jnp.float32) + b3_ref[...]
    out_ref[0] = y


def regression_head_forward(x_nchw, params):
    """x_nchw: (N, C, H, W) float32 -> (N, Cout, H, W) float32 (NCHW)."""
    N, C, H, W = x_nchw.shape
    Cout = params["w3"].shape[0]
    HW = H * W

    # Torch OIHW 5x5 weights -> (Cout, 25*Cin); column block k = dy*5 + dx.
    w1_2d = params["w1"].transpose(0, 2, 3, 1).reshape(C, KSIZE * KSIZE * C)
    w2_2d = params["w2"].transpose(0, 2, 3, 1).reshape(C, KSIZE * KSIZE * C)
    w3_2d = params["w3"][:, :, 0, 0]
    b1 = params["b1"].reshape(C, 1)
    b2 = params["b2"].reshape(C, 1)
    b3 = params["b3"].reshape(Cout, 1)

    # Horizontal-boundary masks: mask[dx, y*W + x] = 1 iff 0 <= x + dx - PAD < W.
    xs = np.arange(HW) % W
    masks = jnp.asarray(np.stack(
        [((xs + dx - PAD >= 0) & (xs + dx - PAD < W)).astype(np.float32)
         for dx in range(KSIZE)], axis=0))                            # (5, HW)

    x_flat = x_nchw.reshape(N, C, HW)

    full = lambda shape: pl.BlockSpec(shape, lambda n: (0,) * len(shape))

    out = pl.pallas_call(
        functools.partial(_regression_head_kernel, W=W),
        out_shape=jax.ShapeDtypeStruct((N, Cout, HW), jnp.float32),
        grid_spec=pltpu.PrefetchScalarGridSpec(
            num_scalar_prefetch=0,
            grid=(N,),
            in_specs=[
                pl.BlockSpec((1, C, HW), lambda n: (n, 0, 0)),
                full((KSIZE, HW)),
                full((C, KSIZE * KSIZE * C)), full((C, 1)),
                full((C, KSIZE * KSIZE * C)), full((C, 1)),
                full((Cout, C)), full((Cout, 1)),
            ],
            out_specs=pl.BlockSpec((1, Cout, HW), lambda n: (n, 0, 0)),
            scratch_shapes=[
                pltpu.VMEM((C, HW + 2 * PAD * (W + 1)), jnp.float32),
                pltpu.VMEM((KSIZE * KSIZE * C, HW), jnp.float32),
            ],
        ),
        compiler_params=pltpu.CompilerParams(
            dimension_semantics=("parallel",),
        ),
    )(x_flat, masks, w1_2d, b1, w2_2d, b2, w3_2d, b3)

    # Lane-dense (N, Cout, H*W) -> NCHW via a free reshape (no transpose).
    return out.reshape(N, Cout, H, W)


# ----------------------------------------------------------------------------
# Deterministic parameter init (torch-like OIHW layout).
# ----------------------------------------------------------------------------
def init_params(key, in_channels, out_channels):
    ks = jax.random.split(key, 6)
    std5 = 1.0 / math.sqrt(in_channels * KSIZE * KSIZE)
    std1 = 1.0 / math.sqrt(in_channels)
    return {
        "w1": jax.random.normal(ks[0], (in_channels, in_channels, KSIZE, KSIZE),
                                jnp.float32) * std5,
        "b1": jax.random.normal(ks[1], (in_channels,), jnp.float32) * 0.1,
        "w2": jax.random.normal(ks[2], (in_channels, in_channels, KSIZE, KSIZE),
                                jnp.float32) * std5,
        "b2": jax.random.normal(ks[3], (in_channels,), jnp.float32) * 0.1,
        "w3": jax.random.normal(ks[4], (out_channels, in_channels, 1, 1),
                                jnp.float32) * std1,
        "b3": jax.random.normal(ks[5], (out_channels,), jnp.float32) * 0.1,
    }


# ----------------------------------------------------------------------------
# Pure-JAX reference (mirrors the PyTorch forward).
# ----------------------------------------------------------------------------
def reference_forward(x, params):
    dn = ("NCHW", "OIHW", "NCHW")
    hp = lax.Precision.HIGHEST
    h = lax.conv_general_dilated(x, params["w1"], (1, 1),
                                 [(PAD, PAD), (PAD, PAD)],
                                 dimension_numbers=dn, precision=hp)
    h = jax.nn.relu(h + params["b1"][None, :, None, None])
    h = lax.conv_general_dilated(h, params["w2"], (1, 1),
                                 [(PAD, PAD), (PAD, PAD)],
                                 dimension_numbers=dn, precision=hp)
    h = jax.nn.relu(h + params["b2"][None, :, None, None])
    y = lax.conv_general_dilated(h, params["w3"], (1, 1), [(0, 0), (0, 0)],
                                 dimension_numbers=dn, precision=hp)
    return y + params["b3"][None, :, None, None]


if __name__ == "__main__":
    # Small shapes: batch=2, in_channels=32, 16x16 feature map, 2-D offset out.
    N, C, H, W = 2, 32, 16, 16
    out_channels = 2

    key = jax.random.PRNGKey(0)
    k_x, k_p = jax.random.split(key)
    x = jax.random.normal(k_x, (N, C, H, W), jnp.float32)
    params = init_params(k_p, C, out_channels)

    y = jax.block_until_ready(regression_head_forward(x, params))
    assert y.shape == (N, out_channels, H, W), y.shape

    y_ref = reference_forward(x, params)
    max_err = float(jnp.max(jnp.abs(y - y_ref)))
    assert max_err < 1e-2, f"max abs err {max_err}"

    print("KERNEL_OK")
</pallas_src>

<mosaic_0001>
module attributes {stable_mosaic.version = 11 : i64} {
  func.func @_regression_head_kernel(%arg0: i32, %arg1: memref<1x32x256xf32, #tpu.memory_space<vmem>>, %arg2: memref<5x256xf32, #tpu.memory_space<vmem>>, %arg3: memref<32x800xf32, #tpu.memory_space<vmem>>, %arg4: memref<32x1xf32, #tpu.memory_space<vmem>>, %arg5: memref<32x800xf32, #tpu.memory_space<vmem>>, %arg6: memref<32x1xf32, #tpu.memory_space<vmem>>, %arg7: memref<2x32xf32, #tpu.memory_space<vmem>>, %arg8: memref<2x1xf32, #tpu.memory_space<vmem>>, %arg9: memref<1x2x256xf32, #tpu.memory_space<vmem>>, %arg10: memref<32x324xf32, #tpu.memory_space<vmem>>, %arg11: memref<800x256xf32, #tpu.memory_space<vmem>>) attributes {dimension_semantics = [#tpu.dimension_semantics<parallel>], iteration_bounds = array<i64: 2>, scalar_prefetch = 0 : i64, scratch_operands = 2 : i64, tpu.core_type = #tpu.core_type<tc>, window_params = [{transform_indices = @transform_0, window_bounds = array<i64: 1, 32, 256>}, {pipeline_mode = #tpu.pipeline_mode<synchronous>, transform_indices = @transform_1, window_bounds = array<i64: 5, 256>}, {pipeline_mode = #tpu.pipeline_mode<synchronous>, transform_indices = @transform_2, window_bounds = array<i64: 32, 800>}, {pipeline_mode = #tpu.pipeline_mode<synchronous>, transform_indices = @transform_3, window_bounds = array<i64: 32, 1>}, {pipeline_mode = #tpu.pipeline_mode<synchronous>, transform_indices = @transform_4, window_bounds = array<i64: 32, 800>}, {pipeline_mode = #tpu.pipeline_mode<synchronous>, transform_indices = @transform_5, window_bounds = array<i64: 32, 1>}, {pipeline_mode = #tpu.pipeline_mode<synchronous>, transform_indices = @transform_6, window_bounds = array<i64: 2, 32>}, {pipeline_mode = #tpu.pipeline_mode<synchronous>, transform_indices = @transform_7, window_bounds = array<i64: 2, 1>}, {transform_indices = @transform_8, window_bounds = array<i64: 1, 2, 256>}]} {
    %cst = arith.constant 0.000000e+00 : f32
    %0 = vector.broadcast %cst : f32 to vector<32x324xf32>
    %c0 = arith.constant 0 : index
    %c0_0 = arith.constant 0 : index
    %1 = vector.load %arg10[%c0, %c0_0] : memref<32x324xf32, #tpu.memory_space<vmem>>, vector<32x324xf32>
    tpu.vector_store %arg10[%c0, %c0_0], %0 {strides = array<i32>} : memref<32x324xf32, #tpu.memory_space<vmem>>, vector<32x324xf32>,
    %c0_1 = arith.constant 0 : index
    %c0_2 = arith.constant 0 : index
    %c0_3 = arith.constant 0 : index
    %2 = vector.load %arg1[%c0_1, %c0_2, %c0_3] : memref<1x32x256xf32, #tpu.memory_space<vmem>>, vector<1x32x256xf32>
    %3 = vector.shape_cast %2 : vector<1x32x256xf32> to vector<32x256xf32>
    %c0_4 = arith.constant 0 : index
    %c34 = arith.constant 34 : index
    %4 = vector.load %arg10[%c0_4, %c34] : memref<32x324xf32, #tpu.memory_space<vmem>>, vector<32x256xf32>
    tpu.vector_store %arg10[%c0_4, %c34], %3 {strides = array<i32>} : memref<32x324xf32, #tpu.memory_space<vmem>>, vector<32x256xf32>,
    %c0_5 = arith.constant 0 : index
    %c0_6 = arith.constant 0 : index
    %5 = vector.load %arg10[%c0_5, %c0_6] : memref<32x324xf32, #tpu.memory_space<vmem>>, vector<32x256xf32>
    %c0_7 = arith.constant 0 : index
    %c0_8 = arith.constant 0 : index
    %6 = vector.load %arg2[%c0_7, %c0_8] : memref<5x256xf32, #tpu.memory_space<vmem>>, vector<1x256xf32>
    %7 = vector.broadcast %6 : vector<1x256xf32> to vector<32x256xf32>
    %8 = arith.mulf %5, %7 : vector<32x256xf32>
    %c0_9 = arith.constant 0 : index
    %c0_10 = arith.constant 0 : index
    %9 = vector.load %arg11[%c0_9, %c0_10] : memref<800x256xf32, #tpu.memory_space<vmem>>, vector<32x256xf32>
    tpu.vector_store %arg11[%c0_9, %c0_10], %8 {strides = array<i32>} : memref<800x256xf32, #tpu.memory_space<vmem>>, vector<32x256xf32>,
    %c0_11 = arith.constant 0 : index
    %c1 = arith.constant 1 : index
    %10 = vector.load %arg10[%c0_11, %c1] : memref<32x324xf32, #tpu.memory_space<vmem>>, vector<32x256xf32>
    %c1_12 = arith.constant 1 : index
    %c0_13 = arith.constant 0 : index
    %11 = vector.load %arg2[%c1_12, %c0_13] : memref<5x256xf32, #tpu.memory_space<vmem>>, vector<1x256xf32>
    %12 = vector.broadcast %11 : vector<1x256xf32> to vector<32x256xf32>
    %13 = arith.mulf %10, %12 : vector<32x256xf32>
    %c32 = arith.constant 32 : index
    %c0_14 = arith.constant 0 : index
    %14 = vector.load %arg11[%c32, %c0_14] : memref<800x256xf32, #tpu.memory_space<vmem>>, vector<32x256xf32>
    tpu.vector_store %arg11[%c32, %c0_14], %13 {strides = array<i32>} : memref<800x256xf32, #tpu.memory_space<vmem>>, vector<32x256xf32>,
    %c0_15 = arith.constant 0 : index
    %c2 = arith.constant 2 : index
    %15 = vector.load %arg10[%c0_15, %c2] : memref<32x324xf32, #tpu.memory_space<vmem>>, vector<32x256xf32>
    %c2_16 = arith.constant 2 : index
    %c0_17 = arith.constant 0 : index
    %16 = vector.load %arg2[%c2_16, %c0_17] : memref<5x256xf32, #tpu.memory_space<vmem>>, vector<1x256xf32>
    %17 = vector.broadcast %16 : vector<1x256xf32> to vector<32x256xf32>
    %18 = arith.mulf %15, %17 : vector<32x256xf32>
    %c64 = arith.constant 64 : index
    %c0_18 = arith.constant 0 : index
    %19 = vector.load %arg11[%c64, %c0_18] : memref<800x256xf32, #tpu.memory_space<vmem>>, vector<32x256xf32>
    tpu.vector_store %arg11[%c64, %c0_18], %18 {strides = array<i32>} : memref<800x256xf32, #tpu.memory_space<vmem>>, vector<32x256xf32>,
    %c0_19 = arith.constant 0 : index
    %c3 = arith.constant 3 : index
    %20 = vector.load %arg10[%c0_19, %c3] : memref<32x324xf32, #tpu.memory_space<vmem>>, vector<32x256xf32>
    %c3_20 = arith.constant 3 : index
    %c0_21 = arith.constant 0 : index
    %21 = vector.load %arg2[%c3_20, %c0_21] : memref<5x256xf32, #tpu.memory_space<vmem>>, vector<1x256xf32>
    %22 = vector.broadcast %21 : vector<1x256xf32> to vector<32x256xf32>
    %23 = arith.mulf %20, %22 : vector<32x256xf32>
    %c96 = arith.constant 96 : index
    %c0_22 = arith.constant 0 : index
    %24 = vector.load %arg11[%c96, %c0_22] : memref<800x256xf32, #tpu.memory_space<vmem>>, vector<32x256xf32>
    tpu.vector_store %arg11[%c96, %c0_22], %23 {strides = array<i32>} : memref<800x256xf32, #tpu.memory_space<vmem>>, vector<32x256xf32>,
    %c0_23 = arith.constant 0 : index
    %c4 = arith.constant 4 : index
    %25 = vector.load %arg10[%c0_23, %c4] : memref<32x324xf32, #tpu.memory_space<vmem>>, vector<32x256xf32>
    %c4_24 = arith.constant 4 : index
    %c0_25 = arith.constant 0 : index
    %26 = vector.load %arg2[%c4_24, %c0_25] : memref<5x256xf32, #tpu.memory_space<vmem>>, vector<1x256xf32>
    %27 = vector.broadcast %26 : vector<1x256xf32> to vector<32x256xf32>
    %28 = arith.mulf %25, %27 : vector<32x256xf32>
    %c128 = arith.constant 128 : index
    %c0_26 = arith.constant 0 : index
    %29 = vector.load %arg11[%c128, %c0_26] : memref<800x256xf32, #tpu.memory_space<vmem>>, vector<32x256xf32>
    tpu.vector_store %arg11[%c128, %c0_26], %28 {strides = array<i32>} : memref<800x256xf32, #tpu.memory_space<vmem>>, vector<32x256xf32>,
    %c0_27 = arith.constant 0 : index
    %c16 = arith.constant 16 : index
    %30 = vector.load %arg10[%c0_27, %c16] : memref<32x324xf32, #tpu.memory_space<vmem>>, vector<32x256xf32>
    %c0_28 = arith.constant 0 : index
    %c0_29 = arith.constant 0 : index
    %31 = vector.load %arg2[%c0_28, %c0_29] : memref<5x256xf32, #tpu.memory_space<vmem>>, vector<1x256xf32>
    %32 = vector.broadcast %31 : vector<1x256xf32> to vector<32x256xf32>
    %33 = arith.mulf %30, %32 : vector<32x256xf32>
    %c160 = arith.constant 160 : index
    %c0_30 = arith.constant 0 : index
    %34 = vector.load %arg11[%c160, %c0_30] : memref<800x256xf32, #tpu.memory_space<vmem>>, vector<32x256xf32>
    tpu.vector_store %arg11[%c160, %c0_30], %33 {strides = array<i32>} : memref<800x256xf32, #tpu.memory_space<vmem>>, vector<32x256xf32>,
    %c0_31 = arith.constant 0 : index
    %c17 = arith.constant 17 : index
    %35 = vector.load %arg10[%c0_31, %c17] : memref<32x324xf32, #tpu.memory_space<vmem>>, vector<32x256xf32>
    %c1_32 = arith.constant 1 : index
    %c0_33 = arith.constant 0 : index
    %36 = vector.load %arg2[%c1_32, %c0_33] : memref<5x256xf32, #tpu.memory_space<vmem>>, vector<1x256xf32>
    %37 = vector.broadcast %36 : vector<1x256xf32> to vector<32x256xf32>
    %38 = arith.mulf %35, %37 : vector<32x256xf32>
    %c192 = arith.constant 192 : index
    %c0_34 = arith.constant 0 : index
    %39 = vector.load %arg11[%c192, %c0_34] : memref<800x256xf32, #tpu.memory_space<vmem>>, vector<32x256xf32>
    tpu.vector_store %arg11[%c192, %c0_34], %38 {strides = array<i32>} : memref<800x256xf32, #tpu.memory_space<vmem>>, vector<32x256xf32>,
    %c0_35 = arith.constant 0 : index
    %c18 = arith.constant 18 : index
    %40 = vector.load %arg10[%c0_35, %c18] : memref<32x324xf32, #tpu.memory_space<vmem>>, vector<32x256xf32>
    %c2_36 = arith.constant 2 : index
    %c0_37 = arith.constant 0 : index
    %41 = vector.load %arg2[%c2_36, %c0_37] : memref<5x256xf32, #tpu.memory_space<vmem>>, vector<1x256xf32>
    %42 = vector.broadcast %41 : vector<1x256xf32> to vector<32x256xf32>
    %43 = arith.mulf %40, %42 : vector<32x256xf32>
    %c224 = arith.constant 224 : index
    %c0_38 = arith.constant 0 : index
    %44 = vector.load %arg11[%c224, %c0_38] : memref<800x256xf32, #tpu.memory_space<vmem>>, vector<32x256xf32>
    tpu.vector_store %arg11[%c224, %c0_38], %43 {strides = array<i32>} : memref<800x256xf32, #tpu.memory_space<vmem>>, vector<32x256xf32>,
    %c0_39 = arith.constant 0 : index
    %c19 = arith.constant 19 : index
    %45 = vector.load %arg10[%c0_39, %c19] : memref<32x324xf32, #tpu.memory_space<vmem>>, vector<32x256xf32>
    %c3_40 = arith.constant 3 : index
    %c0_41 = arith.constant 0 : index
    %46 = vector.load %arg2[%c3_40, %c0_41] : memref<5x256xf32, #tpu.memory_space<vmem>>, vector<1x256xf32>
    %47 = vector.broadcast %46 : vector<1x256xf32> to vector<32x256xf32>
    %48 = arith.mulf %45, %47 : vector<32x256xf32>
    %c256 = arith.constant 256 : index
    %c0_42 = arith.constant 0 : index
    %49 = vector.load %arg11[%c256, %c0_42] : memref<800x256xf32, #tpu.memory_space<vmem>>, vector<32x256xf32>
    tpu.vector_store %arg11[%c256, %c0_42], %48 {strides = array<i32>} : memref<800x256xf32, #tpu.memory_space<vmem>>, vector<32x256xf32>,
    %c0_43 = arith.constant 0 : index
    %c20 = arith.constant 20 : index
    %50 = vector.load %arg10[%c0_43, %c20] : memref<32x324xf32, #tpu.memory_space<vmem>>, vector<32x256xf32>
    %c4_44 = arith.constant 4 : index
    %c0_45 = arith.constant 0 : index
    %51 = vector.load %arg2[%c4_44, %c0_45] : memref<5x256xf32, #tpu.memory_space<vmem>>, vector<1x256xf32>
    %52 = vector.broadcast %51 : vector<1x256xf32> to vector<32x256xf32>
    %53 = arith.mulf %50, %52 : vector<32x256xf32>
    %c288 = arith.constant 288 : index
    %c0_46 = arith.constant 0 : index
    %54 = vector.load %arg11[%c288, %c0_46] : memref<800x256xf32, #tpu.memory_space<vmem>>, vector<32x256xf32>
    tpu.vector_store %arg11[%c288, %c0_46], %53 {strides = array<i32>} : memref<800x256xf32, #tpu.memory_space<vmem>>, vector<32x256xf32>,
    %c0_47 = arith.constant 0 : index
    %c32_48 = arith.constant 32 : index
    %55 = vector.load %arg10[%c0_47, %c32_48] : memref<32x324xf32, #tpu.memory_space<vmem>>, vector<32x256xf32>
    %c0_49 = arith.constant 0 : index
    %c0_50 = arith.constant 0 : index
    %56 = vector.load %arg2[%c0_49, %c0_50] : memref<5x256xf32, #tpu.memory_space<vmem>>, vector<1x256xf32>
    %57 = vector.broadcast %56 : vector<1x256xf32> to vector<32x256xf32>
    %58 = arith.mulf %55, %57 : vector<32x256xf32>
    %c320 = arith.constant 320 : index
    %c0_51 = arith.constant 0 : index
    %59 = vector.load %arg11[%c320, %c0_51] : memref<800x256xf32, #tpu.memory_space<vmem>>, vector<32x256xf32>
    tpu.vector_store %arg11[%c320, %c0_51], %58 {strides = array<i32>} : memref<800x256xf32, #tpu.memory_space<vmem>>, vector<32x256xf32>,
    %c0_52 = arith.constant 0 : index
    %c33 = arith.constant 33 : index
    %60 = vector.load %arg10[%c0_52, %c33] : memref<32x324xf32, #tpu.memory_space<vmem>>, vector<32x256xf32>
    %c1_53 = arith.constant 1 : index
    %c0_54 = arith.constant 0 : index
    %61 = vector.load %arg2[%c1_53, %c0_54] : memref<5x256xf32, #tpu.memory_space<vmem>>, vector<1x256xf32>
    %62 = vector.broadcast %61 : vector<1x256xf32> to vector<32x256xf32>
    %63 = arith.mulf %60, %62 : vector<32x256xf32>
    %c352 = arith.constant 352 : index
    %c0_55 = arith.constant 0 : index
    %64 = vector.load %arg11[%c352, %c0_55] : memref<800x256xf32, #tpu.memory_space<vmem>>, vector<32x256xf32>
    tpu.vector_store %arg11[%c352, %c0_55], %63 {strides = array<i32>} : memref<800x256xf32, #tpu.memory_space<vmem>>, vector<32x256xf32>,
    %c0_56 = arith.constant 0 : index
    %c34_57 = arith.constant 34 : index
    %65 = vector.load %arg10[%c0_56, %c34_57] : memref<32x324xf32, #tpu.memory_space<vmem>>, vector<32x256xf32>
    %c2_58 = arith.constant 2 : index
    %c0_59 = arith.constant 0 : index
    %66 = vector.load %arg2[%c2_58, %c0_59] : memref<5x256xf32, #tpu.memory_space<vmem>>, vector<1x256xf32>
    %67 = vector.broadcast %66 : vector<1x256xf32> to vector<32x256xf32>
    %68 = arith.mulf %65, %67 : vector<32x256xf32>
    %c384 = arith.constant 384 : index
    %c0_60 = arith.constant 0 : index
    %69 = vector.load %arg11[%c384, %c0_60] : memref<800x256xf32, #tpu.memory_space<vmem>>, vector<32x256xf32>
    tpu.vector_store %arg11[%c384, %c0_60], %68 {strides = array<i32>} : memref<800x256xf32, #tpu.memory_space<vmem>>, vector<32x256xf32>,
    %c0_61 = arith.constant 0 : index
    %c35 = arith.constant 35 : index
    %70 = vector.load %arg10[%c0_61, %c35] : memref<32x324xf32, #tpu.memory_space<vmem>>, vector<32x256xf32>
    %c3_62 = arith.constant 3 : index
    %c0_63 = arith.constant 0 : index
    %71 = vector.load %arg2[%c3_62, %c0_63] : memref<5x256xf32, #tpu.memory_space<vmem>>, vector<1x256xf32>
    %72 = vector.broadcast %71 : vector<1x256xf32> to vector<32x256xf32>
    %73 = arith.mulf %70, %72 : vector<32x256xf32>
    %c416 = arith.constant 416 : index
    %c0_64 = arith.constant 0 : index
    %74 = vector.load %arg11[%c416, %c0_64] : memref<800x256xf32, #tpu.memory_space<vmem>>, vector<32x256xf32>
    tpu.vector_store %arg11[%c416, %c0_64], %73 {strides = array<i32>} : memref<800x256xf32, #tpu.memory_space<vmem>>, vector<32x256xf32>,
    %c0_65 = arith.constant 0 : index
    %c36 = arith.constant 36 : index
    %75 = vector.load %arg10[%c0_65, %c36] : memref<32x324xf32, #tpu.memory_space<vmem>>, vector<32x256xf32>
    %c4_66 = arith.constant 4 : index
    %c0_67 = arith.constant 0 : index
    %76 = vector.load %arg2[%c4_66, %c0_67] : memref<5x256xf32, #tpu.memory_space<vmem>>, vector<1x256xf32>
    %77 = vector.broadcast %76 : vector<1x256xf32> to vector<32x256xf32>
    %78 = arith.mulf %75, %77 : vector<32x256xf32>
    %c448 = arith.constant 448 : index
    %c0_68 = arith.constant 0 : index
    %79 = vector.load %arg11[%c448, %c0_68] : memref<800x256xf32, #tpu.memory_space<vmem>>, vector<32x256xf32>
    tpu.vector_store %arg11[%c448, %c0_68], %78 {strides = array<i32>} : memref<800x256xf32, #tpu.memory_space<vmem>>, vector<32x256xf32>,
    %c0_69 = arith.constant 0 : index
    %c48 = arith.constant 48 : index
    %80 = vector.load %arg10[%c0_69, %c48] : memref<32x324xf32, #tpu.memory_space<vmem>>, vector<32x256xf32>
    %c0_70 = arith.constant 0 : index
    %c0_71 = arith.constant 0 : index
    %81 = vector.load %arg2[%c0_70, %c0_71] : memref<5x256xf32, #tpu.memory_space<vmem>>, vector<1x256xf32>
    %82 = vector.broadcast %81 : vector<1x256xf32> to vector<32x256xf32>
    %83 = arith.mulf %80, %82 : vector<32x256xf32>
    %c480 = arith.constant 480 : index
    %c0_72 = arith.constant 0 : index
    %84 = vector.load %arg11[%c480, %c0_72] : memref<800x256xf32, #tpu.memory_space<vmem>>, vector<32x256xf32>
    tpu.vector_store %arg11[%c480, %c0_72], %83 {strides = array<i32>} : memref<800x256xf32, #tpu.memory_space<vmem>>, vector<32x256xf32>,
    %c0_73 = arith.constant 0 : index
    %c49 = arith.constant 49 : index
    %85 = vector.load %arg10[%c0_73, %c49] : memref<32x324xf32, #tpu.memory_space<vmem>>, vector<32x256xf32>
    %c1_74 = arith.constant 1 : index
    %c0_75 = arith.constant 0 : index
    %86 = vector.load %arg2[%c1_74, %c0_75] : memref<5x256xf32, #tpu.memory_space<vmem>>, vector<1x256xf32>
    %87 = vector.broadcast %86 : vector<1x256xf32> to vector<32x256xf32>
    %88 = arith.mulf %85, %87 : vector<32x256xf32>
    %c512 = arith.constant 512 : index
    %c0_76 = arith.constant 0 : index
    %89 = vector.load %arg11[%c512, %c0_76] : memref<800x256xf32, #tpu.memory_space<vmem>>, vector<32x256xf32>
    tpu.vector_store %arg11[%c512, %c0_76], %88 {strides = array<i32>} : memref<800x256xf32, #tpu.memory_space<vmem>>, vector<32x256xf32>,
    %c0_77 = arith.constant 0 : index
    %c50 = arith.constant 50 : index
    %90 = vector.load %arg10[%c0_77, %c50] : memref<32x324xf32, #tpu.memory_space<vmem>>, vector<32x256xf32>
    %c2_78 = arith.constant 2 : index
    %c0_79 = arith.constant 0 : index
    %91 = vector.load %arg2[%c2_78, %c0_79] : memref<5x256xf32, #tpu.memory_space<vmem>>, vector<1x256xf32>
    %92 = vector.broadcast %91 : vector<1x256xf32> to vector<32x256xf32>
    %93 = arith.mulf %90, %92 : vector<32x256xf32>
    %c544 = arith.constant 544 : index
    %c0_80 = arith.constant 0 : index
    %94 = vector.load %arg11[%c544, %c0_80] : memref<800x256xf32, #tpu.memory_space<vmem>>, vector<32x256xf32>
    tpu.vector_store %arg11[%c544, %c0_80], %93 {strides = array<i32>} : memref<800x256xf32, #tpu.memory_space<vmem>>, vector<32x256xf32>,
    %c0_81 = arith.constant 0 : index
    %c51 = arith.constant 51 : index
    %95 = vector.load %arg10[%c0_81, %c51] : memref<32x324xf32, #tpu.memory_space<vmem>>, vector<32x256xf32>
    %c3_82 = arith.constant 3 : index
    %c0_83 = arith.constant 0 : index
    %96 = vector.load %arg2[%c3_82, %c0_83] : memref<5x256xf32, #tpu.memory_space<vmem>>, vector<1x256xf32>
    %97 = vector.broadcast %96 : vector<1x256xf32> to vector<32x256xf32>
    %98 = arith.mulf %95, %97 : vector<32x256xf32>
    %c576 = arith.constant 576 : index
    %c0_84 = arith.constant 0 : index
    %99 = vector.load %arg11[%c576, %c0_84] : memref<800x256xf32, #tpu.memory_space<vmem>>, vector<32x256xf32>
    tpu.vector_store %arg11[%c576, %c0_84], %98 {strides = array<i32>} : memref<800x256xf32, #tpu.memory_space<vmem>>, vector<32x256xf32>,
    %c0_85 = arith.constant 0 : index
    %c52 = arith.constant 52 : index
    %100 = vector.load %arg10[%c0_85, %c52] : memref<32x324xf32, #tpu.memory_space<vmem>>, vector<32x256xf32>
    %c4_86 = arith.constant 4 : index
    %c0_87 = arith.constant 0 : index
    %101 = vector.load %arg2[%c4_86, %c0_87] : memref<5x256xf32, #tpu.memory_space<vmem>>, vector<1x256xf32>
    %102 = vector.broadcast %101 : vector<1x256xf32> to vector<32x256xf32>
    %103 = arith.mulf %100, %102 : vector<32x256xf32>
    %c608 = arith.constant 608 : index
    %c0_88 = arith.constant 0 : index
    %104 = vector.load %arg11[%c608, %c0_88] : memref<800x256xf32, #tpu.memory_space<vmem>>, vector<32x256xf32>
    tpu.vector_store %arg11[%c608, %c0_88], %103 {strides = array<i32>} : memref<800x256xf32, #tpu.memory_space<vmem>>, vector<32x256xf32>,
    %c0_89 = arith.constant 0 : index
    %c64_90 = arith.constant 64 : index
    %105 = vector.load %arg10[%c0_89, %c64_90] : memref<32x324xf32, #tpu.memory_space<vmem>>, vector<32x256xf32>
    %c0_91 = arith.constant 0 : index
    %c0_92 = arith.constant 0 : index
    %106 = vector.load %arg2[%c0_91, %c0_92] : memref<5x256xf32, #tpu.memory_space<vmem>>, vector<1x256xf32>
    %107 = vector.broadcast %106 : vector<1x256xf32> to vector<32x256xf32>
    %108 = arith.mulf %105, %107 : vector<32x256xf32>
    %c640 = arith.constant 640 : index
    %c0_93 = arith.constant 0 : index
    %109 = vector.load %arg11[%c640, %c0_93] : memref<800x256xf32, #tpu.memory_space<vmem>>, vector<32x256xf32>
    tpu.vector_store %arg11[%c640, %c0_93], %108 {strides = array<i32>} : memref<800x256xf32, #tpu.memory_space<vmem>>, vector<32x256xf32>,
    %c0_94 = arith.constant 0 : index
    %c65 = arith.constant 65 : index
    %110 = vector.load %arg10[%c0_94, %c65] : memref<32x324xf32, #tpu.memory_space<vmem>>, vector<32x256xf32>
    %c1_95 = arith.constant 1 : index
    %c0_96 = arith.constant 0 : index
    %111 = vector.load %arg2[%c1_95, %c0_96] : memref<5x256xf32, #tpu.memory_space<vmem>>, vector<1x256xf32>
    %112 = vector.broadcast %111 : vector<1x256xf32> to vector<32x256xf32>
    %113 = arith.mulf %110, %112 : vector<32x256xf32>
    %c672 = arith.constant 672 : index
    %c0_97 = arith.constant 0 : index
    %114 = vector.load %arg11[%c672, %c0_97] : memref<800x256xf32, #tpu.memory_space<vmem>>, vector<32x256xf32>
    tpu.vector_store %arg11[%c672, %c0_97], %113 {strides = array<i32>} : memref<800x256xf32, #tpu.memory_space<vmem>>, vector<32x256xf32>,
    %c0_98 = arith.constant 0 : index
    %c66 = arith.constant 66 : index
    %115 = vector.load %arg10[%c0_98, %c66] : memref<32x324xf32, #tpu.memory_space<vmem>>, vector<32x256xf32>
    %c2_99 = arith.constant 2 : index
    %c0_100 = arith.constant 0 : index
    %116 = vector.load %arg2[%c2_99, %c0_100] : memref<5x256xf32, #tpu.memory_space<vmem>>, vector<1x256xf32>
    %117 = vector.broadcast %116 : vector<1x256xf32> to vector<32x256xf32>
    %118 = arith.mulf %115, %117 : vector<32x256xf32>
    %c704 = arith.constant 704 : index
    %c0_101 = arith.constant 0 : index
    %119 = vector.load %arg11[%c704, %c0_101] : memref<800x256xf32, #tpu.memory_space<vmem>>, vector<32x256xf32>
    tpu.vector_store %arg11[%c704, %c0_101], %118 {strides = array<i32>} : memref<800x256xf32, #tpu.memory_space<vmem>>, vector<32x256xf32>,
    %c0_102 = arith.constant 0 : index
    %c67 = arith.constant 67 : index
    %120 = vector.load %arg10[%c0_102, %c67] : memref<32x324xf32, #tpu.memory_space<vmem>>, vector<32x256xf32>
    %c3_103 = arith.constant 3 : index
    %c0_104 = arith.constant 0 : index
    %121 = vector.load %arg2[%c3_103, %c0_104] : memref<5x256xf32, #tpu.memory_space<vmem>>, vector<1x256xf32>
    %122 = vector.broadcast %121 : vector<1x256xf32> to vector<32x256xf32>
    %123 = arith.mulf %120, %122 : vector<32x256xf32>
    %c736 = arith.constant 736 : index
    %c0_105 = arith.constant 0 : index
    %124 = vector.load %arg11[%c736, %c0_105] : memref<800x256xf32, #tpu.memory_space<vmem>>, vector<32x256xf32>
    tpu.vector_store %arg11[%c736, %c0_105], %123 {strides = array<i32>} : memref<800x256xf32, #tpu.memory_space<vmem>>, vector<32x256xf32>,
    %c0_106 = arith.constant 0 : index
    %c68 = arith.constant 68 : index
    %125 = vector.load %arg10[%c0_106, %c68] : memref<32x324xf32, #tpu.memory_space<vmem>>, vector<32x256xf32>
    %c4_107 = arith.constant 4 : index
    %c0_108 = arith.constant 0 : index
    %126 = vector.load %arg2[%c4_107, %c0_108] : memref<5x256xf32, #tpu.memory_space<vmem>>, vector<1x256xf32>
    %127 = vector.broadcast %126 : vector<1x256xf32> to vector<32x256xf32>
    %128 = arith.mulf %125, %127 : vector<32x256xf32>
    %c768 = arith.constant 768 : index
    %c0_109 = arith.constant 0 : index
    %129 = vector.load %arg11[%c768, %c0_109] : memref<800x256xf32, #tpu.memory_space<vmem>>, vector<32x256xf32>
    tpu.vector_store %arg11[%c768, %c0_109], %128 {strides = array<i32>} : memref<800x256xf32, #tpu.memory_space<vmem>>, vector<32x256xf32>,
    %c0_110 = arith.constant 0 : index
    %c0_111 = arith.constant 0 : index
    %130 = vector.load %arg3[%c0_110, %c0_111] : memref<32x800xf32, #tpu.memory_space<vmem>>, vector<32x800xf32>
    %c0_112 = arith.constant 0 : index
    %c0_113 = arith.constant 0 : index
    %131 = vector.load %arg11[%c0_112, %c0_113] : memref<800x256xf32, #tpu.memory_space<vmem>>, vector<800x256xf32>
    %cst_114 = arith.constant dense<0.000000e+00> : vector<32x256xf32>
    %132 = tpu.matmul %130, %131, %cst_114 {dimension_numbers = #tpu.dot_dimension_numbers<[1], [0], [0], [1], [0, 0, 1, 1], [], []>} : vector<32x800xf32>, vector<800x256xf32>, vector<32x256xf32> -> vector<32x256xf32>
    %c0_115 = arith.constant 0 : index
    %c0_116 = arith.constant 0 : index
    %133 = vector.load %arg4[%c0_115, %c0_116] : memref<32x1xf32, #tpu.memory_space<vmem>>, vector<32x1xf32>
    %134 = vector.broadcast %133 : vector<32x1xf32> to vector<32x256xf32>
    %135 = arith.addf %132, %134 : vector<32x256xf32>
    %cst_117 = arith.constant 0.000000e+00 : f32
    %136 = vector.broadcast %cst_117 : f32 to vector<32x256xf32>
    %137 = arith.maximumf %135, %136 : vector<32x256xf32>
    %c0_118 = arith.constant 0 : index
    %c34_119 = arith.constant 34 : index
    %138 = vector.load %arg10[%c0_118, %c34_119] : memref<32x324xf32, #tpu.memory_space<vmem>>, vector<32x256xf32>
    tpu.vector_store %arg10[%c0_118, %c34_119], %137 {strides = array<i32>} : memref<32x324xf32, #tpu.memory_space<vmem>>, vector<32x256xf32>,
    %c0_120 = arith.constant 0 : index
    %c0_121 = arith.constant 0 : index
    %139 = vector.load %arg10[%c0_120, %c0_121] : memref<32x324xf32, #tpu.memory_space<vmem>>, vector<32x256xf32>
    %c0_122 = arith.constant 0 : index
    %c0_123 = arith.constant 0 : index
    %140 = vector.load %arg2[%c0_122, %c0_123] : memref<5x256xf32, #tpu.memory_space<vmem>>, vector<1x256xf32>
    %141 = vector.broadcast %140 : vector<1x256xf32> to vector<32x256xf32>
    %142 = arith.mulf %139, %141 : vector<32x256xf32>
    %c0_124 = arith.constant 0 : index
    %c0_125 = arith.constant 0 : index
    %143 = vector.load %arg11[%c0_124, %c0_125] : memref<800x256xf32, #tpu.memory_space<vmem>>, vector<32x256xf32>
    tpu.vector_store %arg11[%c0_124, %c0_125], %142 {strides = array<i32>} : memref<800x256xf32, #tpu.memory_space<vmem>>, vector<32x256xf32>,
    %c0_126 = arith.constant 0 : index
    %c1_127 = arith.constant 1 : index
    %144 = vector.load %arg10[%c0_126, %c1_127] : memref<32x324xf32, #tpu.memory_space<vmem>>, vector<32x256xf32>
    %c1_128 = arith.constant 1 : index
    %c0_129 = arith.constant 0 : index
    %145 = vector.load %arg2[%c1_128, %c0_129] : memref<5x256xf32, #tpu.memory_space<vmem>>, vector<1x256xf32>
    %146 = vector.broadcast %145 : vector<1x256xf32> to vector<32x256xf32>
    %147 = arith.mulf %144, %146 : vector<32x256xf32>
    %c32_130 = arith.constant 32 : index
    %c0_131 = arith.constant 0 : index
    %148 = vector.load %arg11[%c32_130, %c0_131] : memref<800x256xf32, #tpu.memory_space<vmem>>, vector<32x256xf32>
    tpu.vector_store %arg11[%c32_130, %c0_131], %147 {strides = array<i32>} : memref<800x256xf32, #tpu.memory_space<vmem>>, vector<32x256xf32>,
    %c0_132 = arith.constant 0 : index
    %c2_133 = arith.constant 2 : index
    %149 = vector.load %arg10[%c0_132, %c2_133] : memref<32x324xf32, #tpu.memory_space<vmem>>, vector<32x256xf32>
    %c2_134 = arith.constant 2 : index
    %c0_135 = arith.constant 0 : index
    %150 = vector.load %arg2[%c2_134, %c0_135] : memref<5x256xf32, #tpu.memory_space<vmem>>, vector<1x256xf32>
    %151 = vector.broadcast %150 : vector<1x256xf32> to vector<32x256xf32>
    %152 = arith.mulf %149, %151 : vector<32x256xf32>
    %c64_136 = arith.constant 64 : index
    %c0_137 = arith.constant 0 : index
    %153 = vector.load %arg11[%c64_136, %c0_137] : memref<800x256xf32, #tpu.memory_space<vmem>>, vector<32x256xf32>
    tpu.vector_store %arg11[%c64_136, %c0_137], %152 {strides = array<i32>} : memref<800x256xf32, #tpu.memory_space<vmem>>, vector<32x256xf32>,
    %c0_138 = arith.constant 0 : index
    %c3_139 = arith.constant 3 : index
    %154 = vector.load %arg10[%c0_138, %c3_139] : memref<32x324xf32, #tpu.memory_space<vmem>>, vector<32x256xf32>
    %c3_140 = arith.constant 3 : index
    %c0_141 = arith.constant 0 : index
    %155 = vector.load %arg2[%c3_140, %c0_141] : memref<5x256xf32, #tpu.memory_space<vmem>>, vector<1x256xf32>
    %156 = vector.broadcast %155 : vector<1x256xf32> to vector<32x256xf32>
    %157 = arith.mulf %154, %156 : vector<32x256xf32>
    %c96_142 = arith.constant 96 : index
    %c0_143 = arith.constant 0 : index
    %158 = vector.load %arg11[%c96_142, %c0_143] : memref<800x256xf32, #tpu.memory_space<vmem>>, vector<32x256xf32>
    tpu.vector_store %arg11[%c96_142, %c0_143], %157 {strides = array<i32>} : memref<800x256xf32, #tpu.memory_space<vmem>>, vector<32x256xf32>,
    %c0_144 = arith.constant 0 : index
    %c4_145 = arith.constant 4 : index
    %159 = vector.load %arg10[%c0_144, %c4_145] : memref<32x324xf32, #tpu.memory_space<vmem>>, vector<32x256xf32>
    %c4_146 = arith.constant 4 : index
    %c0_147 = arith.constant 0 : index
    %160 = vector.load %arg2[%c4_146, %c0_147] : memref<5x256xf32, #tpu.memory_space<vmem>>, vector<1x256xf32>
    %161 = vector.broadcast %160 : vector<1x256xf32> to vector<32x256xf32>
    %162 = arith.mulf %159, %161 : vector<32x256xf32>
    %c128_148 = arith.constant 128 : index
    %c0_149 = arith.constant 0 : index
    %163 = vector.load %arg11[%c128_148, %c0_149] : memref<800x256xf32, #tpu.memory_space<vmem>>, vector<32x256xf32>
    tpu.vector_store %arg11[%c128_148, %c0_149], %162 {strides = array<i32>} : memref<800x256xf32, #tpu.memory_space<vmem>>, vector<32x256xf32>,
    %c0_150 = arith.constant 0 : index
    %c16_151 = arith.constant 16 : index
    %164 = vector.load %arg10[%c0_150, %c16_151] : memref<32x324xf32, #tpu.memory_space<vmem>>, vector<32x256xf32>
    %c0_152 = arith.constant 0 : index
    %c0_153 = arith.constant 0 : index
    %165 = vector.load %arg2[%c0_152, %c0_153] : memref<5x256xf32, #tpu.memory_space<vmem>>, vector<1x256xf32>
    %166 = vector.broadcast %165 : vector<1x256xf32> to vector<32x256xf32>
    %167 = arith.mulf %164, %166 : vector<32x256xf32>
    %c160_154 = arith.constant 160 : index
    %c0_155 = arith.constant 0 : index
    %168 = vector.load %arg11[%c160_154, %c0_155] : memref<800x256xf32, #tpu.memory_space<vmem>>, vector<32x256xf32>
    tpu.vector_store %arg11[%c160_154, %c0_155], %167 {strides = array<i32>} : memref<800x256xf32, #tpu.memory_space<vmem>>, vector<32x256xf32>,
    %c0_156 = arith.constant 0 : index
    %c17_157 = arith.constant 17 : index
    %169 = vector.load %arg10[%c0_156, %c17_157] : memref<32x324xf32, #tpu.memory_space<vmem>>, vector<32x256xf32>
    %c1_158 = arith.constant 1 : index
    %c0_159 = arith.constant 0 : index
    %170 = vector.load %arg2[%c1_158, %c0_159] : memref<5x256xf32, #tpu.memory_space<vmem>>, vector<1x256xf32>
    %171 = vector.broadcast %170 : vector<1x256xf32> to vector<32x256xf32>
    %172 = arith.mulf %169, %171 : vector<32x256xf32>
    %c192_160 = arith.constant 192 : index
    %c0_161 = arith.constant 0 : index
    %173 = vector.load %arg11[%c192_160, %c0_161] : memref<800x256xf32, #tpu.memory_space<vmem>>, vector<32x256xf32>
    tpu.vector_store %arg11[%c192_160, %c0_161], %172 {strides = array<i32>} : memref<800x256xf32, #tpu.memory_space<vmem>>, vector<32x256xf32>,
    %c0_162 = arith.constant 0 : index
    %c18_163 = arith.constant 18 : index
    %174 = vector.load %arg10[%c0_162, %c18_163] : memref<32x324xf32, #tpu.memory_space<vmem>>, vector<32x256xf32>
    %c2_164 = arith.constant 2 : index
    %c0_165 = arith.constant 0 : index
    %175 = vector.load %arg2[%c2_164, %c0_165] : memref<5x256xf32, #tpu.memory_space<vmem>>, vector<1x256xf32>
    %176 = vector.broadcast %175 : vector<1x256xf32> to vector<32x256xf32>
    %177 = arith.mulf %174, %176 : vector<32x256xf32>
    %c224_166 = arith.constant 224 : index
    %c0_167 = arith.constant 0 : index
    %178 = vector.load %arg11[%c224_166, %c0_167] : memref<800x256xf32, #tpu.memory_space<vmem>>, vector<32x256xf32>
    tpu.vector_store %arg11[%c224_166, %c0_167], %177 {strides = array<i32>} : memref<800x256xf32, #tpu.memory_space<vmem>>, vector<32x256xf32>,
    %c0_168 = arith.constant 0 : index
    %c19_169 = arith.constant 19 : index
    %179 = vector.load %arg10[%c0_168, %c19_169] : memref<32x324xf32, #tpu.memory_space<vmem>>, vector<32x256xf32>
    %c3_170 = arith.constant 3 : index
    %c0_171 = arith.constant 0 : index
    %180 = vector.load %arg2[%c3_170, %c0_171] : memref<5x256xf32, #tpu.memory_space<vmem>>, vector<1x256xf32>
    %181 = vector.broadcast %180 : vector<1x256xf32> to vector<32x256xf32>
    %182 = arith.mulf %179, %181 : vector<32x256xf32>
    %c256_172 = arith.constant 256 : index
    %c0_173 = arith.constant 0 : index
    %183 = vector.load %arg11[%c256_172, %c0_173] : memref<800x256xf32, #tpu.memory_space<vmem>>, vector<32x256xf32>
    tpu.vector_store %arg11[%c256_172, %c0_173], %182 {strides = array<i32>} : memref<800x256xf32, #tpu.memory_space<vmem>>, vector<32x256xf32>,
    %c0_174 = arith.constant 0 : index
    %c20_175 = arith.constant 20 : index
    %184 = vector.load %arg10[%c0_174, %c20_175] : memref<32x324xf32, #tpu.memory_space<vmem>>, vector<32x256xf32>
    %c4_176 = arith.constant 4 : index
    %c0_177 = arith.constant 0 : index
    %185 = vector.load %arg2[%c4_176, %c0_177] : memref<5x256xf32, #tpu.memory_space<vmem>>, vector<1x256xf32>
    %186 = vector.broadcast %185 : vector<1x256xf32> to vector<32x256xf32>
    %187 = arith.mulf %184, %186 : vector<32x256xf32>
    %c288_178 = arith.constant 288 : index
    %c0_179 = arith.constant 0 : index
    %188 = vector.load %arg11[%c288_178, %c0_179] : memref<800x256xf32, #tpu.memory_space<vmem>>, vector<32x256xf32>
    tpu.vector_store %arg11[%c288_178, %c0_179], %187 {strides = array<i32>} : memref<800x256xf32, #tpu.memory_space<vmem>>, vector<32x256xf32>,
    %c0_180 = arith.constant 0 : index
    %c32_181 = arith.constant 32 : index
    %189 = vector.load %arg10[%c0_180, %c32_181] : memref<32x324xf32, #tpu.memory_space<vmem>>, vector<32x256xf32>
    %c0_182 = arith.constant 0 : index
    %c0_183 = arith.constant 0 : index
    %190 = vector.load %arg2[%c0_182, %c0_183] : memref<5x256xf32, #tpu.memory_space<vmem>>, vector<1x256xf32>
    %191 = vector.broadcast %190 : vector<1x256xf32> to vector<32x256xf32>
    %192 = arith.mulf %189, %191 : vector<32x256xf32>
    %c320_184 = arith.constant 320 : index
    %c0_185 = arith.constant 0 : index
    %193 = vector.load %arg11[%c320_184, %c0_185] : memref<800x256xf32, #tpu.memory_space<vmem>>, vector<32x256xf32>
    tpu.vector_store %arg11[%c320_184, %c0_185], %192 {strides = array<i32>} : memref<800x256xf32, #tpu.memory_space<vmem>>, vector<32x256xf32>,
    %c0_186 = arith.constant 0 : index
    %c33_187 = arith.constant 33 : index
    %194 = vector.load %arg10[%c0_186, %c33_187] : memref<32x324xf32, #tpu.memory_space<vmem>>, vector<32x256xf32>
    %c1_188 = arith.constant 1 : index
    %c0_189 = arith.constant 0 : index
    %195 = vector.load %arg2[%c1_188, %c0_189] : memref<5x256xf32, #tpu.memory_space<vmem>>, vector<1x256xf32>
    %196 = vector.broadcast %195 : vector<1x256xf32> to vector<32x256xf32>
    %197 = arith.mulf %194, %196 : vector<32x256xf32>
    %c352_190 = arith.constant 352 : index
    %c0_191 = arith.constant 0 : index
    %198 = vector.load %arg11[%c352_190, %c0_191] : memref<800x256xf32, #tpu.memory_space<vmem>>, vector<32x256xf32>
    tpu.vector_store %arg11[%c352_190, %c0_191], %197 {strides = array<i32>} : memref<800x256xf32, #tpu.memory_space<vmem>>, vector<32x256xf32>,
    %c0_192 = arith.constant 0 : index
    %c34_193 = arith.constant 34 : index
    %199 = vector.load %arg10[%c0_192, %c34_193] : memref<32x324xf32, #tpu.memory_space<vmem>>, vector<32x256xf32>
    %c2_194 = arith.constant 2 : index
    %c0_195 = arith.constant 0 : index
    %200 = vector.load %arg2[%c2_194, %c0_195] : memref<5x256xf32, #tpu.memory_space<vmem>>, vector<1x256xf32>
    %201 = vector.broadcast %200 : vector<1x256xf32> to vector<32x256xf32>
    %202 = arith.mulf %199, %201 : vector<32x256xf32>
    %c384_196 = arith.constant 384 : index
    %c0_197 = arith.constant 0 : index
    %203 = vector.load %arg11[%c384_196, %c0_197] : memref<800x256xf32, #tpu.memory_space<vmem>>, vector<32x256xf32>
    tpu.vector_store %arg11[%c384_196, %c0_197], %202 {strides = array<i32>} : memref<800x256xf32, #tpu.memory_space<vmem>>, vector<32x256xf32>,
    %c0_198 = arith.constant 0 : index
    %c35_199 = arith.constant 35 : index
    %204 = vector.load %arg10[%c0_198, %c35_199] : memref<32x324xf32, #tpu.memory_space<vmem>>, vector<32x256xf32>
    %c3_200 = arith.constant 3 : index
    %c0_201 = arith.constant 0 : index
    %205 = vector.load %arg2[%c3_200, %c0_201] : memref<5x256xf32, #tpu.memory_space<vmem>>, vector<1x256xf32>
    %206 = vector.broadcast %205 : vector<1x256xf32> to vector<32x256xf32>
    %207 = arith.mulf %204, %206 : vector<32x256xf32>
    %c416_202 = arith.constant 416 : index
    %c0_203 = arith.constant 0 : index
    %208 = vector.load %arg11[%c416_202, %c0_203] : memref<800x256xf32, #tpu.memory_space<vmem>>, vector<32x256xf32>
    tpu.vector_store %arg11[%c416_202, %c0_203], %207 {strides = array<i32>} : memref<800x256xf32, #tpu.memory_space<vmem>>, vector<32x256xf32>,
    %c0_204 = arith.constant 0 : index
    %c36_205 = arith.constant 36 : index
    %209 = vector.load %arg10[%c0_204, %c36_205] : memref<32x324xf32, #tpu.memory_space<vmem>>, vector<32x256xf32>
    %c4_206 = arith.constant 4 : index
    %c0_207 = arith.constant 0 : index
    %210 = vector.load %arg2[%c4_206, %c0_207] : memref<5x256xf32, #tpu.memory_space<vmem>>, vector<1x256xf32>
    %211 = vector.broadcast %210 : vector<1x256xf32> to vector<32x256xf32>
    %212 = arith.mulf %209, %211 : vector<32x256xf32>
    %c448_208 = arith.constant 448 : index
    %c0_209 = arith.constant 0 : index
    %213 = vector.load %arg11[%c448_208, %c0_209] : memref<800x256xf32, #tpu.memory_space<vmem>>, vector<32x256xf32>
    tpu.vector_store %arg11[%c448_208, %c0_209], %212 {strides = array<i32>} : memref<800x256xf32, #tpu.memory_space<vmem>>, vector<32x256xf32>,
    %c0_210 = arith.constant 0 : index
    %c48_211 = arith.constant 48 : index
    %214 = vector.load %arg10[%c0_210, %c48_211] : memref<32x324xf32, #tpu.memory_space<vmem>>, vector<32x256xf32>
    %c0_212 = arith.constant 0 : index
    %c0_213 = arith.constant 0 : index
    %215 = vector.load %arg2[%c0_212, %c0_213] : memref<5x256xf32, #tpu.memory_space<vmem>>, vector<1x256xf32>
    %216 = vector.broadcast %215 : vector<1x256xf32> to vector<32x256xf32>
    %217 = arith.mulf %214, %216 : vector<32x256xf32>
    %c480_214 = arith.constant 480 : index
    %c0_215 = arith.constant 0 : index
    %218 = vector.load %arg11[%c480_214, %c0_215] : memref<800x256xf32, #tpu.memory_space<vmem>>, vector<32x256xf32>
    tpu.vector_store %arg11[%c480_214, %c0_215], %217 {strides = array<i32>} : memref<800x256xf32, #tpu.memory_space<vmem>>, vector<32x256xf32>,
    %c0_216 = arith.constant 0 : index
    %c49_217 = arith.constant 49 : index
    %219 = vector.load %arg10[%c0_216, %c49_217] : memref<32x324xf32, #tpu.memory_space<vmem>>, vector<32x256xf32>
    %c1_218 = arith.constant 1 : index
    %c0_219 = arith.constant 0 : index
    %220 = vector.load %arg2[%c1_218, %c0_219] : memref<5x256xf32, #tpu.memory_space<vmem>>, vector<1x256xf32>
    %221 = vector.broadcast %220 : vector<1x256xf32> to vector<32x256xf32>
    %222 = arith.mulf %219, %221 : vector<32x256xf32>
    %c512_220 = arith.constant 512 : index
    %c0_221 = arith.constant 0 : index
    %223 = vector.load %arg11[%c512_220, %c0_221] : memref<800x256xf32, #tpu.memory_space<vmem>>, vector<32x256xf32>
    tpu.vector_store %arg11[%c512_220, %c0_221], %222 {strides = array<i32>} : memref<800x256xf32, #tpu.memory_space<vmem>>, vector<32x256xf32>,
    %c0_222 = arith.constant 0 : index
    %c50_223 = arith.constant 50 : index
    %224 = vector.load %arg10[%c0_222, %c50_223] : memref<32x324xf32, #tpu.memory_space<vmem>>, vector<32x256xf32>
    %c2_224 = arith.constant 2 : index
    %c0_225 = arith.constant 0 : index
    %225 = vector.load %arg2[%c2_224, %c0_225] : memref<5x256xf32, #tpu.memory_space<vmem>>, vector<1x256xf32>
    %226 = vector.broadcast %225 : vector<1x256xf32> to vector<32x256xf32>
    %227 = arith.mulf %224, %226 : vector<32x256xf32>
    %c544_226 = arith.constant 544 : index
    %c0_227 = arith.constant 0 : index
    %228 = vector.load %arg11[%c544_226, %c0_227] : memref<800x256xf32, #tpu.memory_space<vmem>>, vector<32x256xf32>
    tpu.vector_store %arg11[%c544_226, %c0_227], %227 {strides = array<i32>} : memref<800x256xf32, #tpu.memory_space<vmem>>, vector<32x256xf32>,
    %c0_228 = arith.constant 0 : index
    %c51_229 = arith.constant 51 : index
    %229 = vector.load %arg10[%c0_228, %c51_229] : memref<32x324xf32, #tpu.memory_space<vmem>>, vector<32x256xf32>
    %c3_230 = arith.constant 3 : index
    %c0_231 = arith.constant 0 : index
    %230 = vector.load %arg2[%c3_230, %c0_231] : memref<5x256xf32, #tpu.memory_space<vmem>>, vector<1x256xf32>
    %231 = vector.broadcast %230 : vector<1x256xf32> to vector<32x256xf32>
    %232 = arith.mulf %229, %231 : vector<32x256xf32>
    %c576_232 = arith.constant 576 : index
    %c0_233 = arith.constant 0 : index
    %233 = vector.load %arg11[%c576_232, %c0_233] : memref<800x256xf32, #tpu.memory_space<vmem>>, vector<32x256xf32>
    tpu.vector_store %arg11[%c576_232, %c0_233], %232 {strides = array<i32>} : memref<800x256xf32, #tpu.memory_space<vmem>>, vector<32x256xf32>,
    %c0_234 = arith.constant 0 : index
    %c52_235 = arith.constant 52 : index
    %234 = vector.load %arg10[%c0_234, %c52_235] : memref<32x324xf32, #tpu.memory_space<vmem>>, vector<32x256xf32>
    %c4_236 = arith.constant 4 : index
    %c0_237 = arith.constant 0 : index
    %235 = vector.load %arg2[%c4_236, %c0_237] : memref<5x256xf32, #tpu.memory_space<vmem>>, vector<1x256xf32>
    %236 = vector.broadcast %235 : vector<1x256xf32> to vector<32x256xf32>
    %237 = arith.mulf %234, %236 : vector<32x256xf32>
    %c608_238 = arith.constant 608 : index
    %c0_239 = arith.constant 0 : index
    %238 = vector.load %arg11[%c608_238, %c0_239] : memref<800x256xf32, #tpu.memory_space<vmem>>, vector<32x256xf32>
    tpu.vector_store %arg11[%c608_238, %c0_239], %237 {strides = array<i32>} : memref<800x256xf32, #tpu.memory_space<vmem>>, vector<32x256xf32>,
    %c0_240 = arith.constant 0 : index
    %c64_241 = arith.constant 64 : index
    %239 = vector.load %arg10[%c0_240, %c64_241] : memref<32x324xf32, #tpu.memory_space<vmem>>, vector<32x256xf32>
    %c0_242 = arith.constant 0 : index
    %c0_243 = arith.constant 0 : index
    %240 = vector.load %arg2[%c0_242, %c0_243] : memref<5x256xf32, #tpu.memory_space<vmem>>, vector<1x256xf32>
    %241 = vector.broadcast %240 : vector<1x256xf32> to vector<32x256xf32>
    %242 = arith.mulf %239, %241 : vector<32x256xf32>
    %c640_244 = arith.constant 640 : index
    %c0_245 = arith.constant 0 : index
    %243 = vector.load %arg11[%c640_244, %c0_245] : memref<800x256xf32, #tpu.memory_space<vmem>>, vector<32x256xf32>
    tpu.vector_store %arg11[%c640_244, %c0_245], %242 {strides = array<i32>} : memref<800x256xf32, #tpu.memory_space<vmem>>, vector<32x256xf32>,
    %c0_246 = arith.constant 0 : index
    %c65_247 = arith.constant 65 : index
    %244 = vector.load %arg10[%c0_246, %c65_247] : memref<32x324xf32, #tpu.memory_space<vmem>>, vector<32x256xf32>
    %c1_248 = arith.constant 1 : index
    %c0_249 = arith.constant 0 : index
    %245 = vector.load %arg2[%c1_248, %c0_249] : memref<5x256xf32, #tpu.memory_space<vmem>>, vector<1x256xf32>
    %246 = vector.broadcast %245 : vector<1x256xf32> to vector<32x256xf32>
    %247 = arith.mulf %244, %246 : vector<32x256xf32>
    %c672_250 = arith.constant 672 : index
    %c0_251 = arith.constant 0 : index
    %248 = vector.load %arg11[%c672_250, %c0_251] : memref<800x256xf32, #tpu.memory_space<vmem>>, vector<32x256xf32>
    tpu.vector_store %arg11[%c672_250, %c0_251], %247 {strides = array<i32>} : memref<800x256xf32, #tpu.memory_space<vmem>>, vector<32x256xf32>,
    %c0_252 = arith.constant 0 : index
    %c66_253 = arith.constant 66 : index
    %249 = vector.load %arg10[%c0_252, %c66_253] : memref<32x324xf32, #tpu.memory_space<vmem>>, vector<32x256xf32>
    %c2_254 = arith.constant 2 : index
    %c0_255 = arith.constant 0 : index
    %250 = vector.load %arg2[%c2_254, %c0_255] : memref<5x256xf32, #tpu.memory_space<vmem>>, vector<1x256xf32>
    %251 = vector.broadcast %250 : vector<1x256xf32> to vector<32x256xf32>
    %252 = arith.mulf %249, %251 : vector<32x256xf32>
    %c704_256 = arith.constant 704 : index
    %c0_257 = arith.constant 0 : index
    %253 = vector.load %arg11[%c704_256, %c0_257] : memref<800x256xf32, #tpu.memory_space<vmem>>, vector<32x256xf32>
    tpu.vector_store %arg11[%c704_256, %c0_257], %252 {strides = array<i32>} : memref<800x256xf32, #tpu.memory_space<vmem>>, vector<32x256xf32>,
    %c0_258 = arith.constant 0 : index
    %c67_259 = arith.constant 67 : index
    %254 = vector.load %arg10[%c0_258, %c67_259] : memref<32x324xf32, #tpu.memory_space<vmem>>, vector<32x256xf32>
    %c3_260 = arith.constant 3 : index
    %c0_261 = arith.constant 0 : index
    %255 = vector.load %arg2[%c3_260, %c0_261] : memref<5x256xf32, #tpu.memory_space<vmem>>, vector<1x256xf32>
    %256 = vector.broadcast %255 : vector<1x256xf32> to vector<32x256xf32>
    %257 = arith.mulf %254, %256 : vector<32x256xf32>
    %c736_262 = arith.constant 736 : index
    %c0_263 = arith.constant 0 : index
    %258 = vector.load %arg11[%c736_262, %c0_263] : memref<800x256xf32, #tpu.memory_space<vmem>>, vector<32x256xf32>
    tpu.vector_store %arg11[%c736_262, %c0_263], %257 {strides = array<i32>} : memref<800x256xf32, #tpu.memory_space<vmem>>, vector<32x256xf32>,
    %c0_264 = arith.constant 0 : index
    %c68_265 = arith.constant 68 : index
    %259 = vector.load %arg10[%c0_264, %c68_265] : memref<32x324xf32, #tpu.memory_space<vmem>>, vector<32x256xf32>
    %c4_266 = arith.constant 4 : index
    %c0_267 = arith.constant 0 : index
    %260 = vector.load %arg2[%c4_266, %c0_267] : memref<5x256xf32, #tpu.memory_space<vmem>>, vector<1x256xf32>
    %261 = vector.broadcast %260 : vector<1x256xf32> to vector<32x256xf32>
    %262 = arith.mulf %259, %261 : vector<32x256xf32>
    %c768_268 = arith.constant 768 : index
    %c0_269 = arith.constant 0 : index
    %263 = vector.load %arg11[%c768_268, %c0_269] : memref<800x256xf32, #tpu.memory_space<vmem>>, vector<32x256xf32>
    tpu.vector_store %arg11[%c768_268, %c0_269], %262 {strides = array<i32>} : memref<800x256xf32, #tpu.memory_space<vmem>>, vector<32x256xf32>,
    %c0_270 = arith.constant 0 : index
    %c0_271 = arith.constant 0 : index
    %264 = vector.load %arg5[%c0_270, %c0_271] : memref<32x800xf32, #tpu.memory_space<vmem>>, vector<32x800xf32>
    %c0_272 = arith.constant 0 : index
    %c0_273 = arith.constant 0 : index
    %265 = vector.load %arg11[%c0_272, %c0_273] : memref<800x256xf32, #tpu.memory_space<vmem>>, vector<800x256xf32>
    %cst_274 = arith.constant dense<0.000000e+00> : vector<32x256xf32>
    %266 = tpu.matmul %264, %265, %cst_274 {dimension_numbers = #tpu.dot_dimension_numbers<[1], [0], [0], [1], [0, 0, 1, 1], [], []>} : vector<32x800xf32>, vector<800x256xf32>, vector<32x256xf32> -> vector<32x256xf32>
    %c0_275 = arith.constant 0 : index
    %c0_276 = arith.constant 0 : index
    %267 = vector.load %arg6[%c0_275, %c0_276] : memref<32x1xf32, #tpu.memory_space<vmem>>, vector<32x1xf32>
    %268 = vector.broadcast %267 : vector<32x1xf32> to vector<32x256xf32>
    %269 = arith.addf %266, %268 : vector<32x256xf32>
    %cst_277 = arith.constant 0.000000e+00 : f32
    %270 = vector.broadcast %cst_277 : f32 to vector<32x256xf32>
    %271 = arith.maximumf %269, %270 : vector<32x256xf32>
    %c0_278 = arith.constant 0 : index
    %c0_279 = arith.constant 0 : index
    %272 = vector.load %arg7[%c0_278, %c0_279] : memref<2x32xf32, #tpu.memory_space<vmem>>, vector<2x32xf32>
    %cst_280 = arith.constant dense<0.000000e+00> : vector<2x256xf32>
    %273 = tpu.matmul %272, %271, %cst_280 {dimension_numbers = #tpu.dot_dimension_numbers<[1], [0], [0], [1], [0, 0, 1, 1], [], []>} : vector<2x32xf32>, vector<32x256xf32>, vector<2x256xf32> -> vector<2x256xf32>
    %c0_281 = arith.constant 0 : index
    %c0_282 = arith.constant 0 : index
    %274 = vector.load %arg8[%c0_281, %c0_282] : memref<2x1xf32, #tpu.memory_space<vmem>>, vector<2x1xf32>
    %275 = vector.broadcast %274 : vector<2x1xf32> to vector<2x256xf32>
    %276 = arith.addf %273, %275 : vector<2x256xf32>
    %c0_283 = arith.constant 0 : index
    %c0_284 = arith.constant 0 : index
    %c0_285 = arith.constant 0 : index
    %277 = vector.load %arg9[%c0_283, %c0_284, %c0_285] : memref<1x2x256xf32, #tpu.memory_space<vmem>>, vector<1x2x256xf32>
    %278 = vector.shape_cast %277 : vector<1x2x256xf32> to vector<2x256xf32>
    %279 = vector.shape_cast %276 : vector<2x256xf32> to vector<1x2x256xf32>
    tpu.vector_store %arg9[%c0_283, %c0_284, %c0_285], %279 {strides = array<i32>} : memref<1x2x256xf32, #tpu.memory_space<vmem>>, vector<1x2x256xf32>,
    return
  }
  func.func @transform_0(%arg0: i32) -> (i32, i32, i32) {
    %c0_i32 = arith.constant 0 : i32
    %c0_i32_0 = arith.constant 0 : i32
    %c0_i32_1 = arith.constant 0 : i32
    return %arg0, %c0_i32, %c0_i32_0 : i32, i32, i32
  }
  func.func @transform_1(%arg0: i32) -> (i32, i32) {
    %c0_i32 = arith.constant 0 : i32
    %c0_i32_0 = arith.constant 0 : i32
    %c0_i32_1 = arith.constant 0 : i32
    return %c0_i32, %c0_i32_0 : i32, i32
  }
  func.func @transform_2(%arg0: i32) -> (i32, i32) {
    %c0_i32 = arith.constant 0 : i32
    %c0_i32_0 = arith.constant 0 : i32
    %c0_i32_1 = arith.constant 0 : i32
    return %c0_i32, %c0_i32_0 : i32, i32
  }
  func.func @transform_3(%arg0: i32) -> (i32, i32) {
    %c0_i32 = arith.constant 0 : i32
    %c0_i32_0 = arith.constant 0 : i32
    %c0_i32_1 = arith.constant 0 : i32
    return %c0_i32, %c0_i32_0 : i32, i32
  }
  func.func @transform_4(%arg0: i32) -> (i32, i32) {
    %c0_i32 = arith.constant 0 : i32
    %c0_i32_0 = arith.constant 0 : i32
    %c0_i32_1 = arith.constant 0 : i32
    return %c0_i32, %c0_i32_0 : i32, i32
  }
  func.func @transform_5(%arg0: i32) -> (i32, i32) {
    %c0_i32 = arith.constant 0 : i32
    %c0_i32_0 = arith.constant 0 : i32
    %c0_i32_1 = arith.constant 0 : i32
    return %c0_i32, %c0_i32_0 : i32, i32
  }
  func.func @transform_6(%arg0: i32) -> (i32, i32) {
    %c0_i32 = arith.constant 0 : i32
    %c0_i32_0 = arith.constant 0 : i32
    %c0_i32_1 = arith.constant 0 : i32
    return %c0_i32, %c0_i32_0 : i32, i32
  }
  func.func @transform_7(%arg0: i32) -> (i32, i32) {
    %c0_i32 = arith.constant 0 : i32
    %c0_i32_0 = arith.constant 0 : i32
    %c0_i32_1 = arith.constant 0 : i32
    return %c0_i32, %c0_i32_0 : i32, i32
  }
  func.func @transform_8(%arg0: i32) -> (i32, i32, i32) {
    %c0_i32 = arith.constant 0 : i32
    %c0_i32_0 = arith.constant 0 : i32
    %c0_i32_1 = arith.constant 0 : i32
    return %arg0, %c0_i32, %c0_i32_0 : i32, i32, i32
  }
}

</mosaic_0001>

<bundles_post_ra>
// kernel: tpu_custom_call.1
= control target key start
LH: loop header
LB: loop body
LE: loop exit
PB: predicated region body
PF: predicated region fallthrough
CT: control target
= control target key end

     0   :  { %s12732_s0 = inlined_call_operand.hbm [shape: f32[2,32,256], index: 0, kind: input, shape index: {}]   ;;  %s12733_s1 = inlined_call_operand.vmem [shape: f32[5,256], index: 1, kind: input, shape index: {}]   ;;  %s12734_s2 = inlined_call_operand.hbm [shape: f32[32,800], index: 2, kind: input, shape index: {}]   ;;  %s12735_s3 = inlined_call_operand.vmem [shape: f32[32,1], index: 3, kind: input, shape index: {}]   ;;  %s12736_s4 = inlined_call_operand.hbm [shape: f32[32,800], index: 4, kind: input, shape index: {}]   ;;  %s12737_s5 = inlined_call_operand.vmem [shape: f32[32,1], index: 5, kind: input, shape index: {}]   ;;  %s12738_s6 = inlined_call_operand.vmem [shape: f32[2,32], index: 6, kind: input, shape index: {}]   ;;  %s12739_s7 = inlined_call_operand.vmem [shape: f32[2,1], index: 7, kind: input, shape index: {}]   ;;  %s12740_s8 = inlined_call_operand.hbm [shape: f32[2,2,256], index: 8, kind: output, shape index: {}]  }
   0x1   :  { %13142 = sst [smem:[#allocation94_spill]] %s12734_s2 }
   0x2   :  { %13143 = sst [smem:[#allocation95_spill]] %s12736_s4 }
   0x3   :  { %13 = vsyncpa [#allocation5], 0 }
   0x4   :  { %15 = vsyncpa [#allocation5 + $0x1], 0 }
   0x5   :  { %16 = vsyncpa [#allocation8], 0 }
   0x6   :  { %17 = vsyncpa [#allocation6], 0 }
   0x7   :  { %19 = vsyncpa [#allocation6 + $0x1], 0  ;;  %s8637_s27 = smov 0   ;;  %s8639_s28 = smov 0  }
   0x8   :  { %s8641_s29 = smov 0   ;;  %s8643_s30 = smov 0  }
   0x9 LB: > { %s8658_s9 = sadd.s32 4294967295, %s8535_s30   ;;  %s6722_s10 = sadd.s32 4294967294, %s8535_s30   ;;  %s8535_s30 = sphi %s8643_s30, %s13803_s30   ;;  %s8531_s29 = sphi %s8641_s29, %s13802_s29   ;;  %s8527_s28 = sphi %s8639_s28, %s13801_s28   ;;  %s8523_s27 = sphi %s8637_s27, %s13800_s27  }
   0xa   : > { %p45_p0 = scmp.ne.s32.totalorder %s8527_s28, %s8523_s27  ;;  %p46_p1 = scmp.eq.s32.totalorder %s8658_s9, 0 }
   0xb   : > { %p216_p2 = scmp.eq.s32.totalorder %s8658_s9, 1  ;;  %p222_p3 = scmp.eq.s32.totalorder %s6722_s10, 1 }
   0xc   : > { %p8667_p4 = por %p46_p1, %p45_p0  ;;  %p6723_p5 = scmp.ge.s32.totalorder %s8535_s30, 1 }
   0xd   : > { %p8672_p6 = por %p222_p3, %p45_p0  ;;  %p229_p7 = scmp.lt.s32.totalorder %s8535_s30, 3 }
   0xe   : > { %s13146_s2 = sld [smem:[#allocation94_spill]]  ;;  %s8537_s17 = smov [#allocation7]  }
   0xf   : > { %p8680_p8 = pnand %p6723_p5, %p229_p7  ;;  %s245_s18 = sshll.u32 %s8537_s17, 4  ;;  %s246_s18 = int_to_ptr.vmem [resolvable:$true] %s245_s18 }
  0x10   : > { %s13148_s4 = sld [smem:[#allocation95_spill]]  ;;  %s8538_s22 = smov 896  }
  0x11   : > { %p6812_p9 = pneg %p8680_p8  ;;  %s8539_s23 = smov 56  }
  0x12   : > { %s8540_s24 = smov [#allocation9]   ;;  %s8693_s26 = sadd.s32 1, %s8535_s30  }
  0x13   : > { %p6813_p10 = pnand %p6812_p9, %p46_p1  ;;  %s262_s25 = sshll.u32 %s8540_s24, 4  ;;  %s263_s25 = int_to_ptr.vmem [resolvable:$true] %s262_s25 }
  0x14   : > { %s243_s15 = sshll.u32 %s13146_s2, 4  ;;  %s32_s10 = sadd.s32 1, %s8531_s29  ;;  %s244_s15 = int_to_ptr.hbm [resolvable:$true] %s243_s15 }
  0x15   : > { %6815 = dma.hbm_to_vmem [thread:$0]  (!%p6813_p10), %s244_s15, 3584, %s246_s18, [#allocation8], %s8538_s22, %s8538_s22, %s8539_s23  }
  0x16   : > { %s260_s21 = sshll.u32 %s13148_s4, 4  ;;  %s29_s13 = ssub.s32 %s8535_s30, %s8693_s26  ;;  %s261_s21 = int_to_ptr.hbm [resolvable:$true] %s260_s21 }
  0x17   : > { %6818 = dma.hbm_to_vmem [thread:$0]  (!%p6813_p10), %s261_s21, 3584, %s263_s25, [#allocation8], %s8538_s22, %s8538_s22, %s8539_s23  }
  0x18   : > { %p39_p12 = scmp.ne.s32.totalorder %s8531_s29, %s8527_s28  ;;  %p30_p13 = scmp.eq.s32.totalorder %s29_s13, 0 }
  0x19   : > { %p40_p0 = scmp.eq.s32.totalorder %s8535_s30, 0  ;;  %p6829_p5 = scmp.lt.s32.totalorder %s8535_s30, 2 }
  0x1a   : > { %p8703_p3 = por %p216_p2, %p39_p12  ;;  %s285_s17 = sand.u32 1, %s8531_s29  }
  0x1b   : > { %s8709_s15 = scalar_select %p30_p13, %s8531_s29, %s32_s10  }
  0x1c   : > { %p41_p7 = por %p40_p0, %p39_p12  ;;  %s6727_s18 = sshll.u32 %s285_s17, 6 }
  0x1d   : > { %s6798_s19 = sshll.u32 %s8535_s30, 6  ;;  %s289_s23 = scalar_lea.vmem [#allocation4], %s6727_s18 }
  0x1e   : > { %s294_s22 = scalar_lea.hbm %s12732_s0, %s6798_s19  ;;  %s297_s24 = sshll.u32 %s289_s23, 4  ;;  %s298_s24 = int_to_ptr.vmem [resolvable:$true] %s297_s24 }
  0x1f   : > { %s295_s25 = sshll.u32 %s294_s22, 4  ;;  %p8716_p2 = pnand %p6829_p5, %p41_p7  ;;  %s296_s25 = int_to_ptr.hbm [resolvable:$true] %s295_s25 }
  0x20   : > { %s286_s10 = scalar_lea.sflag [#allocation5], %s285_s17  ;;  %s8435_s2 = sshra.s32 %s296_s25, 4  ;;  %s8436_s2 = int_to_ptr.hbm [resolvable:$true] %s8435_s2 }
  0x21   : > { %s8437_s4 = scalar_lea.hbm %s8436_s2, 64  ;;  %p8439_p10 = pneg %p8716_p2 }
  0x22   : > { %p8438_p9 = scmp.ne.s32.totalorder %s8436_s2, %s8437_s4  ;;  %s8442_s20 = scalar_lea.hbm %s12732_s0, 128 }
  0x23   : > { %p8443_p0 = scmp.lt.s32.totalorder %s8436_s2, %s12732_s0  ;;  %p8444_p5 = scmp.lt.s32.totalorder %s8442_s20, %s8437_s4 }
  0x24   : > { %p8440_p12 = pnand %p8439_p10, %p8438_p9 }
  0x25   : > { %p8445_p7 = por %p8444_p5, %p8443_p0 }
  0x26   : > { %p8441_p13 = pneg %p8440_p12 }
  0x28   : > { %p8446_p11 = pnand %p8445_p7, %p8441_p13 }
  0x2a   : > { %8449 = shalt.err (!%p8446_p11)
}
  0x2b   : > { %s8541_s17 = smov 256   ;;  %s8542_s23 = smov 16  }
  0x2c   : > { %6822 = dma.hbm_to_vmem [thread:$0]  (!%p8716_p2), %s296_s25, 1024, %s298_s24, %s286_s10, %s8541_s17, %s8541_s17, %s8542_s23  }
  0x2d   : > { %309 = sbr.rel (%p8680_p8) target bundleno = 5272 (0x1498), region = 52 }
  0x32   : > { %s8733_s19 = sand.u32 1, %s8527_s28  }
  0x33   : > { %s6731_s18 = sshll.u32 %s8733_s19, 6  ;;  %s312_s2 = scalar_lea.sflag [#allocation5], %s8733_s19 }
  0x34   : > { %s315_s4 = scalar_lea.vmem [#allocation4], %s6731_s18 }
  0x35   : > { %8510 = dma.done.wait (%p8667_p4), %s312_s2, 1024  }
  0x36   : > { %8512 = vsyncadd (%p8667_p4), %s312_s2, 4294966272 }
  0x37   : > { %8514 = dma.done.wait (%p46_p1), [#allocation8], 7168  }
  0x38   : > { %8516 = vsyncadd (%p46_p1), [#allocation8], 4294960128  ;;  %v376_v0 = vld [vmem:[%s315_s4 + $0x20] sm:$0xff]  ;;  %v374_v1 = vld [vmem:[%s315_s4 + $0x10] sm:$0xff]  ;;  %s8543_s16 = smov 34   ;;  %s8544_s25 = smov 1  }
  0x39   : > { %v372_v2 = vld [vmem:[%s315_s4] sm:$0xff]  ;;  %396 = vrot.lane.b32.xlu2 %v376_v0, %s8543_s16  ;;  %392 = vrot.lane.b32.xlu1 %v374_v1, %s8543_s16  ;;  %v377_v3 = vld [vmem:[%s315_s4 + $0x28] sm:$0xff]  ;;  %v8545_v11 = vmov 0.0   ;;  %s8546_s20 = smov 2   ;;  %s8547_s18 = smov 4   ;;  %vm12972_vm0 = vcmask 556032  }
  0x3a   : > { %388 = vrot.lane.b32.xlu0 %v372_v2, %s8543_s16  ;;  %v375_v4 = vld [vmem:[%s315_s4 + $0x18] sm:$0xff]  ;;  %v373_v5 = vld [vmem:[%s315_s4 + $0x8] sm:$0xff]  ;;  %v378_v9 = vld [vmem:[%s315_s4 + $0x30] sm:$0xff]  ;;  %366 = vst [vmem:[#allocation2 + $0x30] sm:$0xff] %v8545_v11  ;;  %s8548_s2 = smov 3   ;;  %s8549_s24 = smov 16  }
  0x3b   : > { %v6735_v6 = vld [vmem:[%s12733_s1 + $0x1] ss:$8 sm:$0x3]  ;;  %v379_v8 = vld [vmem:[%s315_s4 + $0x38] sm:$0xff]  ;;  %359 = vst [vmem:[#allocation2] sm:$0xff] %v8545_v11  ;;  %s12741_s21 = smov 17  }
  0x3c   : > { %v479_v7 = vperm.slane %v6735_v6, 0  ;;  %v6736_v10 = vld [vmem:[%s12733_s1 + $0x2] ss:$8 sm:$0x3]  ;;  %363 = vst [vmem:[#allocation2 + $0x18] sm:$0xff] %v8545_v11  ;;  %v480_v14 = vperm.slane %v6735_v6, 1 }
  0x3d   : > { %v579_v12 = vperm.slane %v6736_v10, 1  ;;  %v578_v13 = vperm.slane %v6736_v10, 0  ;;  %369 = vst [vmem:[#allocation2 + $0x48] sm:$0xff] %v8545_v11  ;;  %v6738_v15 = vld [vmem:[%s12733_s1 + $0x4] ss:$8 sm:$0x3] }
  0x3e   : > { %v6737_v16 = vld [vmem:[%s12733_s1 + $0x3] ss:$8 sm:$0x3]  ;;  %v776_v17 = vperm.slane %v6738_v15, 0  ;;  %v777_v23 = vperm.slane %v6738_v15, 1  ;;  %368 = vst.msk [vmem:[#allocation2 + $0x40] sm:$0xff] %vm12972_vm0, %v8545_v11 }
  0x3f   : > { %v678_v18 = vperm.slane %v6737_v16, 1  ;;  %v677_v19 = vperm.slane %v6737_v16, 0  ;;  %v872_v20 = vld [vmem:[%s12733_s1] ss:$8 sm:$0x3]  ;;  %362 = vst.msk [vmem:[#allocation2 + $0x10] sm:$0xff] %vm12972_vm0, %v8545_v11 }
  0x40   : > { %v875_v21 = vperm.slane %v872_v20, 1  ;;  %v874_v22 = vperm.slane %v872_v20, 0  ;;  %v6739_v24 = vld [vmem:[%s12733_s1 + $0x1] ss:$8 sm:$0x3]  ;;  %365 = vst.msk [vmem:[#allocation2 + $0x28] sm:$0xff] %vm12972_vm0, %v8545_v11 }
  0x41   : > { %398 = vrot.lane.b32.xlu2 %v377_v3, %s8543_s16  ;;  %394 = vrot.lane.b32.xlu1 %v375_v4, %s8543_s16  ;;  %v973_v25 = vperm.slane %v6739_v24, 1  ;;  %v972_v26 = vperm.slane %v6739_v24, 0  ;;  %371 = vst.msk [vmem:[#allocation2 + $0x58] sm:$0xff] %vm12972_vm0, %v8545_v11  ;;  %vm12903_vm1 = vcmask 1047824   ;;  %vm12892_vm2 = vcmask 277504   ;;  %s8551_s22 = smov 126  }
  0x42   : > { %390 = vrot.lane.b32.xlu0 %v373_v5, %s8543_s16  ;;  %s8552_s17 = smov 127   ;;  %s12985_s23 = smov 125   ;;  %vm12829_vm3 = vcmask 7168   ;;  %vm12851_vm4 = vcmask 15360   ;;  %vm12850_vm5 = vcmask 23552   ;;  %vm12810_vm6 = vcmask 31744  }
  0x43   : > { %s12743_s4 = smov 112   ;;  %s12983_s11 = smov 124   ;;  %vm12846_vm7 = vcmask 130048   ;;  %vm12775_vm8 = vcmask 138240   ;;  %vm12947_vm9 = vcmask 1022976   ;;  %vm12946_vm10 = vcmask 1031168  }
  0x44   : > { %s12756_s13 = smov 111   ;;  %vm12910_vm11 = vcmask 1039360   ;;  %vm12774_vm12 = vcmask 146432   ;;  %vm1129_vm13 = vcmask 900096   ;;  %vm12770_vm14 = vcmask 154624   ;;  %s12808_s10 = smov 108  }
  0x45   : > { %vm1031_vm15 = vcmask 908288  }
  0x49   : > { %481 = vrot.lane.b32.xlu2 %v479_v7, %s8544_s25  ;;  %402 = vrot.lane.b32.xlu1 %v379_v8, %s8543_s16 }
  0x4a   : > { %400 = vrot.lane.b32.xlu0 %v378_v9, %s8543_s16 }
  0x51   : > { %582 = vrot.lane.b32.xlu2 %v579_v12, %s8546_s20  ;;  %580 = vrot.lane.b32.xlu1 %v578_v13, %s8546_s20 }
  0x52   : > { %483 = vrot.lane.b32.xlu0 %v480_v14, %s8544_s25 }
  0x59   : > { %778 = vrot.lane.b32.xlu2 %v776_v17, %s8547_s18  ;;  %681 = vrot.lane.b32.xlu1 %v678_v18, %s8548_s2 }
  0x5a   : > { %679 = vrot.lane.b32.xlu0 %v677_v19, %s8548_s2 }
  0x61   : > { %878 = vrot.lane.b32.xlu2 %v875_v21, %s8549_s24  ;;  %876 = vrot.lane.b32.xlu1 %v874_v22, %s8549_s24 }
  0x62   : > { %780 = vrot.lane.b32.xlu0 %v777_v23, %s8547_s18 }
  0x69   : > { %976 = vrot.lane.b32.xlu1 %v973_v25, %s12741_s21 }
  0x6a   : > { %974 = vrot.lane.b32.xlu0 %v972_v26, %s12741_s21  ;;  %s12792_s21 = smov 110  }
  0x93   : > { %v397_v27 = vpop.permute.xlu2 %396 }
  0x94   : > { %428 = vst.msk [vmem:[#allocation2 + $0x30] sm:$0xff] %vm12903_vm1, %v397_v27 }
  0x9b   : > { %v399_v28 = vpop.permute.xlu2 %398 }
  0x9c   : > { %v8789_v29 = vsel %vm12892_vm2, %v397_v27, %v399_v28  ;;  %430 = vst.msk [vmem:[#allocation2 + $0x40] sm:$0xff] %vm12892_vm2, %v399_v28 }
  0x9d   : > { %429 = vst [vmem:[#allocation2 + $0x38] sm:$0xff] %v8789_v29 }
  0xa3   : > { %v8795_v32 = vpop.permute.xlu2 %481  ;;  %v8833_v52 = vld [vmem:[#allocation2 + $0x40] sm:$0xff] }
  0xab   : > { %v393_v30 = vpop.permute.xlu1 %392  ;;  %v8808_v39 = vpop.permute.xlu2 %582 }
  0xac   : > { %425 = vst.msk [vmem:[#allocation2 + $0x18] sm:$0xff] %vm12903_vm1, %v393_v30  ;;  %v389_v31 = vpop.permute.xlu0 %388  ;;  %v597_v54 = vmul.f32 %v8808_v39, %v8833_v52 }
  0xad   : > { %422 = vst.msk [vmem:[#allocation2] sm:$0xff] %vm12903_vm1, %v389_v31 }
  0xb3   : > { %v395_v33 = vpop.permute.xlu1 %394  ;;  %v8817_v42 = vld [vmem:[#allocation2 + $0x18] sm:$0xff]  ;;  %v8831_v50 = vpop.permute.xlu2 %778 }
  0xb4   : > { %v8798_v34 = vsel %vm12892_vm2, %v393_v30, %v395_v33  ;;  %427 = vst.msk [vmem:[#allocation2 + $0x28] sm:$0xff] %vm12892_vm2, %v395_v33  ;;  %v391_v35 = vpop.permute.xlu0 %390  ;;  %v493_v48 = vmul.f32 %v8817_v42, %v8795_v32  ;;  %v790_v9 = vmul.f32 %v8831_v50, %v8817_v42  ;;  %v8903_v26 = vld [vmem:[#allocation2] sm:$0xff] }
  0xb5   : > { %426 = vst [vmem:[#allocation2 + $0x20] sm:$0xff] %v8798_v34  ;;  %v8803_v36 = vsel %vm12892_vm2, %v389_v31, %v391_v35  ;;  %v490_v33 = vmul.f32 %v8795_v32, %v8903_v26 }
  0xb6   : > { %423 = vst [vmem:[#allocation2 + $0x8] sm:$0xff] %v8803_v36 }
  0xb7   : > { %424 = vst.msk [vmem:[#allocation2 + $0x10] sm:$0xff] %vm12892_vm2, %v391_v35 }
  0xbb   : > { %v403_v37 = vpop.permute.xlu1 %402  ;;  %v8856_v1 = vpop.permute.xlu2 %878  ;;  %v8882_v14 = vld [vmem:[#allocation2 + $0x28] sm:$0xff] }
  0xbc   : > { %433 = vst.msk [vmem:[#allocation2 + $0x58] sm:$0xff] %vm12892_vm2, %v403_v37  ;;  %v401_v38 = vpop.permute.xlu0 %400  ;;  %v893_v15 = vmul.f32 %v8856_v1, %v8833_v52  ;;  %v594_v35 = vmul.f32 %v8808_v39, %v8882_v14 }
  0xbd   : > { %v8811_v40 = vsel %vm12892_vm2, %v401_v38, %v403_v37  ;;  %431 = vst.msk [vmem:[#allocation2 + $0x48] sm:$0xff] %vm12903_vm1, %v401_v38  ;;  %vm12907_vm1 = vcmask 752640  }
  0xbe   : > { %432 = vst [vmem:[#allocation2 + $0x50] sm:$0xff] %v8811_v40  ;;  %v8815_v41 = vld [vmem:[#allocation2 + $0x10] sm:$0xff] }
  0xbf   : > { %v591_v45 = vmul.f32 %v8808_v39, %v8815_v41  ;;  %v887_v6 = vmul.f32 %v8856_v1, %v8815_v41 }
  0xc3   : > { %v8819_v43 = vpop.permute.xlu1 %580  ;;  %v8896_v24 = vld [vmem:[#allocation2 + $0x58] sm:$0xff] }
  0xc4   : > { %v8821_v44 = vpop.permute.xlu0 %483  ;;  %v592_v46 = vmul.f32 %v8819_v43, %v8817_v42  ;;  %v8835_v53 = vld [vmem:[#allocation2 + $0x48] sm:$0xff]  ;;  %v585_v25 = vsel %vm12851_vm4, %v8819_v43, %v8808_v39  ;;  %vm12866_vm4 = vcmask 285696  }
  0xc5   : > { %v492_v47 = vmul.f32 %v8815_v41, %v8821_v44  ;;  %v598_v55 = vmul.f32 %v8819_v43, %v8835_v53  ;;  %v498_v57 = vmul.f32 %v8833_v52, %v8821_v44  ;;  %v499_v58 = vmul.f32 %v8835_v53, %v8795_v32 }
  0xc6   : > { %v6930_v49 = vpack.i.bf16 %v592_v46, %v591_v45  ;;  %v486_v13 = vsel %vm12829_vm3, %v8795_v32, %v8821_v44  ;;  %v495_v18 = vmul.f32 %v8821_v44, %v8882_v14  ;;  %v796_v20 = vmul.f32 %v8831_v50, %v8835_v53  ;;  %v8914_v46 = vld [vmem:[#allocation2 + $0x30] sm:$0xff] }
  0xc7   : > { %v6920_v51 = vpack.i.bf16 %v493_v48, %v492_v47  ;;  %v6935_v62 = vpack.i.bf16 %v598_v55, %v597_v54  ;;  %v6925_v0 = vpack.i.bf16 %v499_v58, %v498_v57  ;;  %v494_v17 = vmul.f32 %v486_v13, %v8798_v34 }
  0xc8   : > { %6931 = vrot.lane.b32.xlu1 %v6930_v49, %s8551_s22  ;;  %v491_v27 = vmul.f32 %v486_v13, %v8803_v36  ;;  %v500_v28 = vmul.f32 %v486_v13, %v8811_v40  ;;  %v501_v30 = vmul.f32 %v8821_v44, %v8896_v24  ;;  %v593_v31 = vmul.f32 %v585_v25, %v8798_v34 }
  0xc9   : > { %6921 = vrot.lane.b32.xlu2 %v6920_v51, %s8552_s17  ;;  %v6975_v22 = vpack.i.bf16 %v495_v18, %v494_v17  ;;  %v496_v44 = vmul.f32 %v8795_v32, %v8914_v46  ;;  %v497_v47 = vmul.f32 %v486_v13, %v8789_v29  ;;  %v599_v48 = vmul.f32 %v585_v25, %v8811_v40 }
  0xca   : > { %v6970_v37 = vpack.i.bf16 %v491_v27, %v490_v33  ;;  %v6985_v38 = vpack.i.bf16 %v501_v30, %v500_v28  ;;  %v6995_v45 = vpack.i.bf16 %v594_v35, %v593_v31  ;;  %v600_v49 = vmul.f32 %v8808_v39, %v8896_v24 }
  0xcb   : > { %v8843_v56 = vpop.permute.xlu1 %681  ;;  %v589_v51 = vmul.f32 %v8819_v43, %v8903_v26  ;;  %v590_v54 = vmul.f32 %v585_v25, %v8803_v36  ;;  %v6980_v55 = vpack.i.bf16 %v497_v47, %v496_v44  ;;  %v793_v35 = vmul.f32 %v8831_v50, %v8914_v46 }
  0xcc   : > { %v8849_v59 = vpop.permute.xlu0 %679  ;;  %v690_v60 = vmul.f32 %v8843_v56, %v8815_v41  ;;  %v696_v3 = vmul.f32 %v8843_v56, %v8833_v52  ;;  %v7005_v57 = vpack.i.bf16 %v600_v49, %v599_v48  ;;  %vm1423_vm3 = vcmask 785408  }
  0xcd   : > { %v691_v61 = vmul.f32 %v8849_v59, %v8817_v42  ;;  %v697_v4 = vmul.f32 %v8849_v59, %v8835_v53  ;;  %v6990_v58 = vpack.i.bf16 %v590_v54, %v589_v51  ;;  %v684_v32 = vsel %vm12850_vm5, %v8849_v59, %v8843_v56 }
  0xce   : > { %v692_v39 = vmul.f32 %v684_v32, %v8798_v34  ;;  %vm1227_vm5 = vcmask 891904  }
  0xcf   : > { %v6940_v63 = vpack.i.bf16 %v691_v61, %v690_v60  ;;  %v6945_v11 = vpack.i.bf16 %v697_v4, %v696_v3  ;;  %v693_v60 = vmul.f32 %v8843_v56, %v8882_v14  ;;  %v688_v61 = vmul.f32 %v8849_v59, %v8903_v26 }
  0xd0   : > { %6936 = vrot.lane.b32.xlu1 %v6935_v62, %s8551_s22  ;;  %v689_v62 = vmul.f32 %v684_v32, %v8803_v36 }
  0xd1   : > { %6941 = vrot.lane.b32.xlu0 %v6940_v63, %s12985_s23  ;;  %6926 = vrot.lane.b32.xlu2 %v6925_v0, %s8552_s17  ;;  %v595_v63 = vmul.f32 %v8819_v43, %v8914_v46  ;;  %v596_v0 = vmul.f32 %v585_v25, %v8789_v29  ;;  %v7015_v3 = vpack.i.bf16 %v693_v60, %v692_v39 }
  0xd2   : > { %v7010_v4 = vpack.i.bf16 %v689_v62, %v688_v61  ;;  %v699_v43 = vmul.f32 %v8843_v56, %v8896_v24 }
  0xd3   : > { %v8860_v2 = vpop.permute.xlu1 %876 }
  0xd4   : > { %v8866_v5 = vpop.permute.xlu0 %780  ;;  %v888_v7 = vmul.f32 %v8860_v2, %v8817_v42  ;;  %v894_v16 = vmul.f32 %v8860_v2, %v8835_v53  ;;  %v881_v56 = vsel %vm12846_vm7, %v8860_v2, %v8856_v1  ;;  %vm1325_vm7 = vcmask 883712  }
  0xd5   : > { %v789_v8 = vmul.f32 %v8866_v5, %v8815_v41  ;;  %v795_v19 = vmul.f32 %v8866_v5, %v8833_v52  ;;  %v889_v17 = vmul.f32 %v881_v56, %v8798_v34  ;;  %v895_v28 = vmul.f32 %v881_v56, %v8811_v40 }
  0xd6   : > { %v6960_v10 = vpack.i.bf16 %v888_v7, %v887_v6  ;;  %v6965_v21 = vpack.i.bf16 %v894_v16, %v893_v15  ;;  %v7000_v6 = vpack.i.bf16 %v596_v0, %v595_v63  ;;  %v783_v7 = vsel %vm12810_vm6, %v8831_v50, %v8866_v5 }
  0xd7   : > { %v6950_v12 = vpack.i.bf16 %v790_v9, %v789_v8  ;;  %v6955_v23 = vpack.i.bf16 %v796_v20, %v795_v19  ;;  %v698_v8 = vmul.f32 %v684_v32, %v8811_v40  ;;  %v694_v9 = vmul.f32 %v8849_v59, %v8914_v46 }
  0xd8   : > { %6961 = vrot.lane.b32.xlu1 %v6960_v10, %s12743_s4  ;;  %v695_v10 = vmul.f32 %v684_v32, %v8789_v29  ;;  %v788_v59 = vmul.f32 %v783_v7, %v8803_v36  ;;  %v797_v18 = vmul.f32 %v783_v7, %v8811_v40  ;;  %v798_v19 = vmul.f32 %v8866_v5, %v8896_v24 }
  0xd9   : > { %6946 = vrot.lane.b32.xlu0 %v6945_v11, %s12985_s23  ;;  %6951 = vrot.lane.b32.xlu2 %v6950_v12, %s12983_s11  ;;  %v791_v11 = vmul.f32 %v783_v7, %v8798_v34  ;;  %v792_v12 = vmul.f32 %v8866_v5, %v8882_v14  ;;  %v7025_v13 = vpack.i.bf16 %v699_v43, %v698_v8  ;;  %vm12824_vm6 = vcmask 269312  }
  0xda   : > { %v7020_v15 = vpack.i.bf16 %v695_v10, %v694_v9  ;;  %v787_v20 = vmul.f32 %v8831_v50, %v8903_v26  ;;  %v7045_v25 = vpack.i.bf16 %v798_v19, %v797_v18  ;;  %v794_v27 = vmul.f32 %v783_v7, %v8789_v29 }
  0xdb   : > { %v7035_v16 = vpack.i.bf16 %v792_v12, %v791_v11  ;;  %v885_v5 = vmul.f32 %v8860_v2, %v8903_v26  ;;  %v886_v30 = vmul.f32 %v881_v56, %v8803_v36  ;;  %v977_v31 = vpop.permute.xlu1 %976  ;;  %v892_v54 = vmul.f32 %v881_v56, %v8789_v29 }
  0xdc   : > { %v975_v33 = vpop.permute.xlu0 %974  ;;  %v988_v49 = vmul.f32 %v977_v31, %v8882_v14  ;;  %v994_v39 = vmul.f32 %v977_v31, %v8896_v24  ;;  %v985_v61 = vmul.f32 %v977_v31, %v8815_v41 }
  0xdd   : > { %v7050_v44 = vpack.i.bf16 %v886_v30, %v885_v5  ;;  %v979_v47 = vsel %vm12775_vm8, %v975_v33, %v977_v31  ;;  %v983_v50 = vmul.f32 %v975_v33, %v8903_v26  ;;  %v989_v60 = vmul.f32 %v975_v33, %v8914_v46 }
  0xde   : > { %v987_v48 = vmul.f32 %v979_v47, %v8798_v34  ;;  %v984_v51 = vmul.f32 %v979_v47, %v8803_v36  ;;  %v993_v32 = vmul.f32 %v979_v47, %v8811_v40  ;;  %v986_v62 = vmul.f32 %v975_v33, %v8817_v42 }
  0xdf   : > { %v992_v7 = vmul.f32 %v975_v33, %v8835_v53  ;;  %vm12794_vm8 = vcmask 162816  }
  0xe0   : > { %6966 = vrot.lane.b32.xlu1 %v6965_v21, %s12743_s4  ;;  %v890_v21 = vmul.f32 %v8856_v1, %v8882_v14  ;;  %v7095_v63 = vpack.i.bf16 %v994_v39, %v993_v32 }
  0xe1   : > { %6976 = vrot.lane.b32.xlu0 %v6975_v22, %s8552_s17  ;;  %6956 = vrot.lane.b32.xlu2 %v6955_v23, %s12983_s11  ;;  %v7030_v22 = vpack.i.bf16 %v788_v59, %v787_v20 }
  0xe2   : > { %v7055_v23 = vpack.i.bf16 %v890_v21, %v889_v17 }
  0xe8   : > { %6971 = vrot.lane.b32.xlu1 %v6970_v37, %s8552_s17  ;;  %v896_v37 = vmul.f32 %v8856_v1, %v8896_v24  ;;  %v891_v1 = vmul.f32 %v8860_v2, %v8914_v46  ;;  %v990_v2 = vmul.f32 %v979_v47, %v8789_v29 }
  0xe9   : > { %6986 = vrot.lane.b32.xlu0 %v6985_v38, %s8552_s17  ;;  %6996 = vrot.lane.b32.xlu2 %v6995_v45, %s8551_s22  ;;  %v7040_v38 = vpack.i.bf16 %v794_v27, %v793_v35 }
  0xea   : > { %v7070_v45 = vpack.i.bf16 %v896_v37, %v895_v28  ;;  %v7085_v0 = vpack.i.bf16 %v990_v2, %v989_v60 }
  0xf0   : > { %6981 = vrot.lane.b32.xlu1 %v6980_v55, %s8552_s17  ;;  %v7080_v55 = vpack.i.bf16 %v988_v49, %v987_v48 }
  0xf1   : > { %7006 = vrot.lane.b32.xlu2 %v7005_v57, %s8551_s22  ;;  %6991 = vrot.lane.b32.xlu0 %v6990_v58, %s8551_s22  ;;  %v7075_v57 = vpack.i.bf16 %v984_v51, %v983_v50  ;;  %v7060_v58 = vpack.i.bf16 %v892_v54, %v891_v1 }
  0xf8   : > { %7016 = vrot.lane.b32.xlu1 %v7015_v3, %s12985_s23  ;;  %v7065_v3 = vpack.i.bf16 %v986_v62, %v985_v61 }
  0xf9   : > { %7011 = vrot.lane.b32.xlu2 %v7010_v4, %s12985_s23  ;;  %7001 = vrot.lane.b32.xlu0 %v7000_v6, %s8551_s22  ;;  %v6740_v4 = vld [vmem:[%s12733_s1 + $0x2] ss:$8 sm:$0x3]  ;;  %v991_v6 = vmul.f32 %v977_v31, %v8833_v52 }
  0xfa   : > { %v1070_v8 = vperm.slane %v6740_v4, 0  ;;  %v1071_v10 = vperm.slane %v6740_v4, 1 }
  0xfb   : > { %v7090_v43 = vpack.i.bf16 %v992_v7, %v991_v6 }
 0x100   : > { %7026 = vrot.lane.b32.xlu1 %v7025_v13, %s12985_s23 }
 0x101   : > { %7021 = vrot.lane.b32.xlu2 %v7020_v15, %s12985_s23  ;;  %7036 = vrot.lane.b32.xlu0 %v7035_v16, %s12983_s11  ;;  %s13406_s23 = smov 110  }
 0x108   : > { %7031 = vrot.lane.b32.xlu1 %v7030_v22, %s12983_s11 }
 0x109   : > { %7056 = vrot.lane.b32.xlu2 %v7055_v23, %s12743_s4  ;;  %7046 = vrot.lane.b32.xlu0 %v7045_v25, %s12983_s11 }
 0x110   : > { %7041 = vrot.lane.b32.xlu1 %v7040_v38, %s12983_s11  ;;  %s13417_s11 = smov 20  }
 0x111   : > { %7071 = vrot.lane.b32.xlu2 %v7070_v45, %s12743_s4  ;;  %7051 = vrot.lane.b32.xlu0 %v7050_v44, %s12743_s4 }
 0x118   : > { %7081 = vrot.lane.b32.xlu1 %v7080_v55, %s12756_s13 }
 0x119   : > { %7076 = vrot.lane.b32.xlu2 %v7075_v57, %s12756_s13  ;;  %7061 = vrot.lane.b32.xlu0 %v7060_v58, %s12743_s4  ;;  %s12754_s4 = smov 18  }
 0x120   : > { %7096 = vrot.lane.b32.xlu1 %v7095_v63, %s12756_s13 }
 0x121   : > { %7086 = vrot.lane.b32.xlu2 %v7085_v0, %s12756_s13  ;;  %7066 = vrot.lane.b32.xlu0 %v7065_v3, %s12756_s13 }
 0x123   : > { %v9013_v9 = vpop.permute.xlu2 %6921 }
 0x124   : > { %13151 = vst [vmem:[#allocation14_spill] sm:$0xff] %v9013_v9 }
 0x129   : > { %1072 = vrot.lane.b32.xlu2 %v1070_v8, %s12754_s4  ;;  %7091 = vrot.lane.b32.xlu0 %v7090_v43, %s12756_s13  ;;  %s12772_s13 = smov 19  }
 0x12b   : > { %v9018_v11 = vpop.permute.xlu2 %6926 }
 0x12c   : > { %v6929_v8 = vunpack.i.h.bf16 %v9018_v11 }
 0x131   : > { %1074 = vrot.lane.b32.xlu0 %v1071_v10, %s12754_s4  ;;  %s12790_s4 = smov 109  }
 0x133   : > { %v9022_v13 = vpop.permute.xlu2 %6951 }
 0x134   : > { %13152 = vst [vmem:[#allocation15_spill] sm:$0xff] %v9022_v13 }
 0x13a   : > { %v9020_v12 = vpop.permute.xlu1 %6931 }
 0x13b   : > { %v9028_v56 = vpop.permute.xlu2 %6956  ;;  %v6934_v63 = vunpack.i.h.bf16 %v9020_v12 }
 0x13c   : > { %13153 = vst [vmem:[#allocation16_spill] sm:$0xff] %v9028_v56 }
 0x142   : > { %v9024_v15 = vpop.permute.xlu1 %6936 }
 0x143   : > { %v9026_v16 = vpop.permute.xlu0 %6941  ;;  %v9034_v18 = vpop.permute.xlu2 %6996  ;;  %v6939_v58 = vunpack.i.h.bf16 %v9024_v15 }
 0x144   : > { %v6944_v49 = vunpack.i.h.bf16 %v9026_v16  ;;  %v12750_v61 = vunpack.i.l.bf16 %v9034_v18 }
 0x146   : > { %v640_v7 = vsel %vm12946_vm10, %v6934_v63, %v12750_v61 }
 0x14a   : > { %v9030_v59 = vpop.permute.xlu1 %6961 }
 0x14b   : > { %13154 = vst [vmem:[#allocation17_spill] sm:$0xff] %v9030_v59  ;;  %v9032_v17 = vpop.permute.xlu0 %6946  ;;  %v9042_v22 = vpop.permute.xlu2 %7006 }
 0x14c   : > { %v6949_v35 = vunpack.i.h.bf16 %v9032_v17  ;;  %v12752_v54 = vunpack.i.l.bf16 %v9042_v22 }
 0x14e   : > { %v644_v62 = vsel %vm12946_vm10, %v6939_v58, %v12752_v54 }
 0x152   : > { %v9036_v19 = vpop.permute.xlu1 %6966 }
 0x153   : > { %13155 = vst [vmem:[#allocation18_spill] sm:$0xff] %v9036_v19  ;;  %v9038_v20 = vpop.permute.xlu0 %6976  ;;  %v9050_v28 = vpop.permute.xlu2 %7011 }
 0x154   : > { %v12753_v50 = vunpack.i.h.bf16 %v9050_v28  ;;  %v7013_v51 = vunpack.i.l.bf16 %v9050_v28 }
 0x156   : > { %v737_v2 = vsel %vm12947_vm9, %v7013_v51, %v12753_v50 }
 0x15a   : > { %v9040_v21 = vpop.permute.xlu1 %6971 }
 0x15b   : > { %13156 = vst [vmem:[#allocation19_spill] sm:$0xff] %v9040_v21  ;;  %v9044_v23 = vpop.permute.xlu0 %6986  ;;  %v9056_v31 = vpop.permute.xlu2 %7021  ;;  %v6973_v58 = vunpack.i.l.bf16 %v9040_v21 }
 0x15c   : > { %v12759_v37 = vunpack.i.h.bf16 %v9056_v31  ;;  %v7023_v38 = vunpack.i.l.bf16 %v9056_v31  ;;  %v12748_v6 = vunpack.i.l.bf16 %v9044_v23 }
 0x15e   : > { %v741_v1 = vsel %vm12947_vm9, %v7023_v38, %v12759_v37  ;;  %v545_v51 = vsel %vm12910_vm11, %v6929_v8, %v12748_v6 }
 0x162   : > { %v9046_v25 = vpop.permute.xlu1 %6981 }
 0x163   : > { %v9048_v27 = vpop.permute.xlu0 %6991  ;;  %v9077_v55 = vpop.permute.xlu2 %7056  ;;  %v12747_v43 = vunpack.i.h.bf16 %v9046_v25  ;;  %v6983_v10 = vunpack.i.l.bf16 %v9046_v25 }
 0x164   : > { %13158 = vst [vmem:[#allocation21_spill] sm:$0xff] %v9077_v55  ;;  %v12749_v0 = vunpack.i.h.bf16 %v9048_v27  ;;  %v6993_v3 = vunpack.i.l.bf16 %v9048_v27 }
 0x16a   : > { %v9052_v5 = vpop.permute.xlu1 %7016 }
 0x16b   : > { %v9054_v30 = vpop.permute.xlu0 %7001  ;;  %v12758_v47 = vunpack.i.l.bf16 %v9052_v5 }
 0x16c   : > { %v12751_v32 = vunpack.i.h.bf16 %v9054_v30  ;;  %v7003_v39 = vunpack.i.l.bf16 %v9054_v30 }
 0x16d   : > { %v739_v57 = vsel %vm12947_vm9, %v6944_v49, %v12758_v47  ;;  %v12746_v49 = vunpack.i.l.bf16 %v9038_v20 }
 0x16e   : > { %v642_v4 = vsel %vm12946_vm10, %v7003_v39, %v12751_v32  ;;  %v543_v39 = vsel %vm12910_vm11, %v6983_v10, %v12747_v43 }
 0x172   : > { %v9058_v33 = vpop.permute.xlu1 %7026 }
 0x173   : > { %v9063_v45 = vpop.permute.xlu0 %7036  ;;  %v12760_v44 = vunpack.i.l.bf16 %v9058_v33 }
 0x174   : > { %13157 = vst [vmem:[#allocation20_spill] sm:$0xff] %v9063_v45 }
 0x175   : > { %v743_v48 = vsel %vm12947_vm9, %v6949_v35, %v12760_v44  ;;  %v9107_v35 = vpop.permute.xlu2 %7071 }
 0x176   : > { %3081 = vmatpush.msra.mxu0 %v743_v48  ;;  %13160 = vst [vmem:[#allocation23_spill] sm:$0xff] %v9107_v35  ;;  %v638_v48 = vsel %vm12946_vm10, %v6993_v3, %v12749_v0 }
 0x178   : > { %3082 = vmatpush.msra.mxu0 %v741_v1  ;;  %v6924_v1 = vunpack.i.h.bf16 %v9013_v9 }
 0x17a   : > { %3083 = vmatpush.msra.mxu0 %v739_v57  ;;  %v12745_v57 = vunpack.i.h.bf16 %v9040_v21 }
 0x17b   : > { %v9085_v60 = vpop.permute.xlu0 %7046 }
 0x17c   : > { %13159 = vst [vmem:[#allocation22_spill] sm:$0xff] %v9085_v60  ;;  %3084 = vmatpush.msra.mxu0 %v737_v2  ;;  %v442_v2 = vld [vmem:[%s12733_s1] ss:$8 sm:$0x3] }
 0x17d   : > { %v444_v63 = vperm.slane %v442_v2, 0  ;;  %v9136_v8 = vpop.permute.xlu2 %7076 }
 0x17e   : > { %3085 = vmatpush.msra.mxu0 %v644_v62  ;;  %v541_v62 = vsel %vm12910_vm11, %v6924_v1, %v12746_v49  ;;  %13163 = vst [vmem:[#allocation26_spill] sm:$0xff] %v9136_v8 }
 0x17f   : > { %v452_v10 = vmul.f32 %v8914_v46, %v444_v63 }
 0x180   : > { %3086 = vmatpush.msra.mxu0 %v642_v4  ;;  %v539_v4 = vsel %vm12910_vm11, %v6973_v58, %v12745_v57 }
 0x182   : > { %3087 = vmatpush.msra.mxu0 %v640_v7  ;;  %v454_v7 = vmul.f32 %v8835_v53, %v444_v63 }
 0x183   : > { %v9109_v38 = vpop.permute.xlu0 %7051 }
 0x184   : > { %13161 = vst [vmem:[#allocation24_spill] sm:$0xff] %v9109_v38  ;;  %3088 = vmatpush.msra.mxu0 %v638_v48  ;;  %v450_v48 = vmul.f32 %v8817_v42, %v444_v63 }
 0x186   : > { %3089 = vmatpush.msra.mxu0 %v545_v51  ;;  %v448_v51 = vmul.f32 %v8903_v26, %v444_v63 }
 0x188   : > { %3090 = vmatpush.msra.mxu0 %v543_v39  ;;  %v9143_v39 = vpop.permute.xlu2 %7086 }
 0x189   : > { %13165 = vst [vmem:[#allocation28_spill] sm:$0xff] %v9143_v39 }
 0x18a   : > { %3091 = vmatpush.msra.mxu0 %v541_v62 }
 0x18b   : > { %v9130_v3 = vpop.permute.xlu0 %7061 }
 0x18c   : > { %13162 = vst [vmem:[#allocation25_spill] sm:$0xff] %v9130_v3  ;;  %3092 = vmatpush.msra.mxu0 %v539_v4 }
 0x18e   : > { %3093 = vmatpush.msra.mxu0 %v454_v7 }
 0x190   : > { %3094 = vmatpush.msra.mxu0 %v452_v10  ;;  %v1073_v2 = vpop.permute.xlu2 %1072 }
 0x191   : > { %v1084_v7 = vmul.f32 %v1073_v2, %v8817_v42  ;;  %v1081_v57 = vmul.f32 %v1073_v2, %v8903_v26  ;;  %v1090_v50 = vmul.f32 %v1073_v2, %v8835_v53 }
 0x192   : > { %3095 = vmatpush.msra.mxu0 %v450_v48 }
 0x193   : > { %v9141_v1 = vpop.permute.xlu0 %7066 }
 0x194   : > { %13164 = vst [vmem:[#allocation27_spill] sm:$0xff] %v9141_v1  ;;  %3096 = vmatpush.msra.mxu0 %v448_v51 }
 0x19b   : > { %v9145_v58 = vpop.permute.xlu0 %7091 }
 0x19c   : > { %13166 = vst [vmem:[#allocation29_spill] sm:$0xff] %v9145_v58  ;;  %v7094_v44 = vunpack.i.h.bf16 %v9145_v58 }
 0x1a3   : > { %v1075_v62 = vpop.permute.xlu0 %1074 }
 0x1a4   : > { %v1083_v4 = vmul.f32 %v1075_v62, %v8815_v41  ;;  %v1077_v10 = vsel %vm12774_vm12, %v1073_v2, %v1075_v62  ;;  %v1086_v48 = vmul.f32 %v1075_v62, %v8882_v14  ;;  %v1089_v0 = vmul.f32 %v1075_v62, %v8833_v52 }
 0x1a5   : > { %v1085_v63 = vmul.f32 %v1077_v10, %v8798_v34  ;;  %v1082_v51 = vmul.f32 %v1077_v10, %v8803_v36  ;;  %v1091_v61 = vmul.f32 %v1077_v10, %v8811_v40  ;;  %v1092_v32 = vmul.f32 %v1075_v62, %v8896_v24  ;;  %v6741_v40 = vld [vmem:[%s12733_s1 + $0x3] ss:$8 sm:$0x3] }
 0x1a6   : > { %v7105_v49 = vpack.i.bf16 %v1084_v7, %v1083_v4  ;;  %v1088_v54 = vmul.f32 %v1077_v10, %v8789_v29  ;;  %v1087_v4 = vmul.f32 %v1073_v2, %v8914_v46  ;;  %v9171_v29 = vpop.permute.xlu1 %7031  ;;  %vm835_vm12 = vcmask 1014784  }
 0x1a7   : > { %v7110_v43 = vpack.i.bf16 %v1086_v48, %v1085_v63  ;;  %v7100_v6 = vpack.i.bf16 %v1082_v51, %v1081_v57  ;;  %v7120_v57 = vpack.i.bf16 %v1090_v50, %v1089_v0  ;;  %v7125_v7 = vpack.i.bf16 %v1092_v32, %v1091_v61  ;;  %13167 = vst [vmem:[#allocation30_spill] sm:$0xff] %v9171_v29 }
 0x1a8   : > { %7106 = vrot.lane.b32.xlu2 %v7105_v49, %s12792_s21  ;;  %v7115_v48 = vpack.i.bf16 %v1088_v54, %v1087_v4 }
 0x1a9   : > { %7111 = vrot.lane.b32.xlu0 %v7110_v43, %s12792_s21  ;;  %7101 = vrot.lane.b32.xlu1 %v7100_v6, %s12792_s21  ;;  %v1169_v6 = vperm.slane %v6741_v40, 1  ;;  %v1168_v43 = vperm.slane %v6741_v40, 0 }
 0x1ae   : > { %v9173_v50 = vpop.permute.xlu1 %7041 }
 0x1af   : > { %13168 = vst [vmem:[#allocation31_spill] sm:$0xff] %v9173_v50 }
 0x1b0   : > { %7121 = vrot.lane.b32.xlu2 %v7120_v57, %s12792_s21 }
 0x1b1   : > { %7126 = vrot.lane.b32.xlu0 %v7125_v7, %s12792_s21  ;;  %7116 = vrot.lane.b32.xlu1 %v7115_v48, %s12792_s21  ;;  %s12806_s21 = smov 32  }
 0x1b6   : > { %v9175_v54 = vpop.permute.xlu1 %7081 }
 0x1b7   : > { %13169 = vst [vmem:[#allocation32_spill] sm:$0xff] %v9175_v54 }
 0x1b8   : > { %1172 = vrot.lane.b32.xlu2 %v1169_v6, %s12772_s13 }
 0x1b9   : > { %1170 = vrot.lane.b32.xlu1 %v1168_v43, %s12772_s13  ;;  %s12788_s13 = smov 20  }
 0x1be   : > { %v9177_v32 = vpop.permute.xlu1 %7096 }
 0x1bf   : > { %13170 = vst [vmem:[#allocation33_spill] sm:$0xff] %v9177_v32 }
 0x202   : > { %v9179_v61 = vpop.permute.xlu2 %7106 }
 0x203   : > { %13171 = vst [vmem:[#allocation34_spill] sm:$0xff] %v9179_v61  ;;  %v7109_v40 = vunpack.i.h.bf16 %v9179_v61 }
 0x20a   : > { %v9185_v2 = vpop.permute.xlu2 %7121 }
 0x20b   : > { %13174 = vst [vmem:[#allocation37_spill] sm:$0xff] %v9185_v2  ;;  %v7124_v63 = vunpack.i.h.bf16 %v9185_v2 }
 0x212   : > { %v1173_v6 = vpop.permute.xlu2 %1172 }
 0x213   : > { %v1181_v43 = vmul.f32 %v1173_v6, %v8815_v41 }
 0x21b   : > { %v9181_v0 = vpop.permute.xlu0 %7111  ;;  %v9183_v49 = vpop.permute.xlu1 %7101 }
 0x21c   : > { %13172 = vst [vmem:[#allocation35_spill] sm:$0xff] %v9181_v0  ;;  %v12766_v7 = vunpack.i.l.bf16 %v9181_v0  ;;  %v7103_v47 = vunpack.i.l.bf16 %v9183_v49  ;;  %v12771_v0 = vunpack.i.l.bf16 %v9175_v54 }
 0x21d   : > { %13173 = vst [vmem:[#allocation36_spill] sm:$0xff] %v9183_v49 }
 0x223   : > { %v9187_v62 = vpop.permute.xlu0 %7126  ;;  %v9189_v10 = vpop.permute.xlu1 %7116 }
 0x224   : > { %13175 = vst [vmem:[#allocation38_spill] sm:$0xff] %v9187_v62  ;;  %v12761_v51 = vunpack.i.l.bf16 %v9187_v62  ;;  %v12764_v4 = vunpack.i.h.bf16 %v9189_v10  ;;  %v7118_v57 = vunpack.i.l.bf16 %v9189_v10 }
 0x225   : > { %13176 = vst [vmem:[#allocation39_spill] sm:$0xff] %v9189_v10  ;;  %v13177_v10 = vunpack.i.h.bf16 %v9183_v49 }
 0x226   : > { %v1136_v48 = vsel %vm1129_vm13, %v7124_v63, %v12761_v51  ;;  %v1134_v37 = vsel %vm1129_vm13, %v7118_v57, %v12764_v4  ;;  %v1132_v63 = vsel %vm1129_vm13, %v7109_v40, %v12766_v7  ;;  %v12785_v51 = vunpack.i.l.bf16 %v9177_v32 }
 0x227   : > { %3110 = vmatpush.msra.mxu1 %v1136_v48  ;;  %v7088_v40 = vunpack.i.l.bf16 %v9143_v39 }
 0x228   : > { %v1038_v41 = vsel %vm1031_vm15, %v7094_v44, %v12785_v51  ;;  %v9325_v51 = vld [vmem:[#allocation2 + $0x40] sm:$0xff] }
 0x229   : > { %3111 = vmatpush.msra.mxu1 %v1134_v37  ;;  %v1130_v37 = vsel %vm1129_vm13, %v7103_v47, %v13177_v10 }
 0x22b   : > { %v1171_v61 = vpop.permute.xlu1 %1170  ;;  %3112 = vmatpush.msra.mxu1 %v1132_v63  ;;  %v1184_v63 = vmul.f32 %v1173_v6, %v8882_v14 }
 0x22c   : > { %v1182_v57 = vmul.f32 %v1171_v61, %v8817_v42  ;;  %v1175_v4 = vsel %vm12770_vm14, %v1171_v61, %v1173_v6  ;;  %v1179_v58 = vmul.f32 %v1171_v61, %v8903_v26  ;;  %v7069_v42 = vunpack.i.h.bf16 %v9141_v1 }
 0x22d   : > { %3113 = vmatpush.msra.mxu1 %v1130_v37  ;;  %v1183_v7 = vmul.f32 %v1175_v4, %v8798_v34  ;;  %v1180_v48 = vmul.f32 %v1175_v4, %v8803_v36  ;;  %v12784_v37 = vunpack.i.h.bf16 %v9136_v8  ;;  %v7078_v34 = vunpack.i.l.bf16 %v9136_v8 }
 0x22e   : > { %v7135_v47 = vpack.i.bf16 %v1182_v57, %v1181_v43  ;;  %v13178_v36 = vunpack.i.h.bf16 %v9143_v39  ;;  %v9237_v43 = vld [vmem:[#allocation2 + $0x50] sm:$0xff]  ;;  %v1034_v57 = vsel %vm1031_vm15, %v7069_v42, %v12771_v0  ;;  %v1190_v42 = vmul.f32 %v1173_v6, %v8896_v24 }
 0x22f   : > { %3114 = vmatpush.msra.mxu1 %v1038_v41  ;;  %v7140_v10 = vpack.i.bf16 %v1184_v63, %v1183_v7  ;;  %v7130_v49 = vpack.i.bf16 %v1180_v48, %v1179_v58  ;;  %v12783_v7 = vunpack.i.l.bf16 %v9107_v35  ;;  %v1188_v58 = vmul.f32 %v1171_v61, %v8835_v53  ;;  %v9239_v48 = vld [vmem:[#allocation2 + $0x38] sm:$0xff] }
 0x230   : > { %7136 = vrot.lane.b32.xlu1 %v7135_v47, %s12790_s4  ;;  %v1036_v44 = vsel %vm1031_vm15, %v7088_v40, %v13178_v36  ;;  %v1189_v63 = vmul.f32 %v1175_v4, %v9237_v43  ;;  %v1186_v41 = vmul.f32 %v1175_v4, %v9239_v48  ;;  %v6969_v40 = vunpack.i.h.bf16 %v9036_v19 }
 0x231   : > { %7141 = vrot.lane.b32.xlu2 %v7140_v10, %s12790_s4  ;;  %7131 = vrot.lane.b32.xlu0 %v7130_v49, %s12790_s4  ;;  %v1185_v49 = vmul.f32 %v1171_v61, %v8914_v46  ;;  %v1187_v47 = vmul.f32 %v1173_v6, %v8833_v52  ;;  %v12782_v53 = vunpack.i.h.bf16 %v9130_v3  ;;  %v7063_v10 = vunpack.i.l.bf16 %v9130_v3 }
 0x232   : > { %3115 = vmatpush.msra.mxu1 %v1036_v44  ;;  %v1032_v36 = vsel %vm1031_vm15, %v7078_v34, %v12784_v37  ;;  %vm933_vm14 = vcmask 916480   ;;  %v12781_v4 = vunpack.i.l.bf16 %v9077_v55  ;;  %v7155_v52 = vpack.i.bf16 %v1190_v42, %v1189_v63  ;;  %v6742_v63 = vld [vmem:[%s12733_s1 + $0x4] ss:$8 sm:$0x3] }
 0x233   : > { %v7150_v61 = vpack.i.bf16 %v1188_v58, %v1187_v47  ;;  %v940_v44 = vsel %vm933_vm14, %v6969_v40, %v12783_v7  ;;  %v6964_v0 = vunpack.i.h.bf16 %v9030_v59  ;;  %v12780_v34 = vunpack.i.h.bf16 %v9109_v38 }
 0x234   : > { %3116 = vmatpush.msra.mxu1 %v1034_v57  ;;  %v7145_v57 = vpack.i.bf16 %v1186_v41, %v1185_v49  ;;  %v7053_v6 = vunpack.i.l.bf16 %v9109_v38  ;;  %v938_v58 = vsel %vm933_vm14, %v7063_v10, %v12782_v53  ;;  %v12779_v49 = vunpack.i.l.bf16 %v9085_v60  ;;  %v9370_v60 = vld [vmem:[#allocation2 + $0x58] sm:$0xff] }
 0x235   : > { %v936_v41 = vsel %vm933_vm14, %v6964_v0, %v12781_v4  ;;  %v6959_v40 = vunpack.i.h.bf16 %v9028_v56  ;;  %v1267_v47 = vperm.slane %v6742_v63, 1  ;;  %v7043_v42 = vunpack.i.l.bf16 %v9173_v50 }
 0x236   : > { %3117 = vmatpush.msra.mxu1 %v1032_v36  ;;  %v12778_v36 = vunpack.i.h.bf16 %v9173_v50  ;;  %v934_v10 = vsel %vm933_vm14, %v7053_v6, %v12780_v34 }
 0x237   : > { %v842_v0 = vsel %vm835_vm12, %v6959_v40, %v12779_v49 }
 0x238   : > { %3118 = vmatpush.msra.mxu1 %v940_v44  ;;  %7151 = vrot.lane.b32.xlu1 %v7150_v61, %s12790_s4  ;;  %v1266_v61 = vperm.slane %v6742_v63, 0  ;;  %v12777_v44 = vunpack.i.l.bf16 %v9063_v45  ;;  %v840_v6 = vsel %vm835_vm12, %v7043_v42, %v12778_v36 }
 0x239   : > { %7156 = vrot.lane.b32.xlu2 %v7155_v52, %s12790_s4  ;;  %7146 = vrot.lane.b32.xlu0 %v7145_v57, %s12790_s4  ;;  %v6954_v52 = vunpack.i.h.bf16 %v9022_v13  ;;  %v12776_v57 = vunpack.i.h.bf16 %v9171_v29  ;;  %s12864_s4 = smov 96  }
 0x23a   : > { %3119 = vmatpush.msra.mxu1 %v938_v58  ;;  %v7033_v58 = vunpack.i.l.bf16 %v9171_v29  ;;  %v9327_v29 = vld [vmem:[#allocation2 + $0x48] sm:$0xff] }
 0x23b   : > { %v838_v63 = vsel %vm835_vm12, %v6954_v52, %v12777_v44  ;;  %v9309_v52 = vld [vmem:[#allocation2 + $0x18] sm:$0xff]  ;;  %v9316_v44 = vld [vmem:[#allocation2 + $0x8] sm:$0xff] }
 0x23c   : > { %3120 = vmatpush.msra.mxu1 %v936_v41  ;;  %v836_v41 = vsel %vm835_vm12, %v7033_v58, %v12776_v57 }
 0x23e   : > { %3121 = vmatpush.msra.mxu1 %v934_v10 }
 0x240   : > { %3122 = vmatpush.msra.mxu1 %v842_v0  ;;  %1270 = vrot.lane.b32.xlu1 %v1267_v47, %s12788_s13  ;;  %v9307_v0 = vld [vmem:[#allocation2 + $0x10] sm:$0xff] }
 0x241   : > { %1268 = vrot.lane.b32.xlu0 %v1266_v61, %s12788_s13  ;;  %s12876_s13 = smov 93  }
 0x242   : > { %3123 = vmatpush.msra.mxu1 %v840_v6 }
 0x244   : > { %3124 = vmatpush.msra.mxu1 %v838_v63 }
 0x246   : > { %3125 = vmatpush.msra.mxu1 %v836_v41  ;;  %v9313_v41 = vld [vmem:[#allocation2 + $0x20] sm:$0xff] }
 0x2a2   : > { %v9299_v40 = vpop.permute.xlu1 %7136 }
 0x2a3   : > { %13179 = vst [vmem:[#allocation40_spill] sm:$0xff] %v9299_v40  ;;  %v9301_v47 = vpop.permute.xlu0 %7131 }
 0x2a4   : > { %13180 = vst [vmem:[#allocation41_spill] sm:$0xff] %v9301_v47 }
 0x2aa   : > { %v9303_v10 = vpop.permute.xlu1 %7151 }
 0x2ab   : > { %13181 = vst [vmem:[#allocation42_spill] sm:$0xff] %v9303_v10  ;;  %v9305_v61 = vpop.permute.xlu0 %7146 }
 0x2ac   : > { %13182 = vst [vmem:[#allocation43_spill] sm:$0xff] %v9305_v61 }
 0x2b2   : > { %v1271_v42 = vpop.permute.xlu1 %1270 }
 0x2b3   : > { %v1269_v6 = vpop.permute.xlu0 %1268  ;;  %v1279_v63 = vmul.f32 %v1271_v42, %v9307_v0  ;;  %v1282_v34 = vmul.f32 %v1271_v42, %v8882_v14 }
 0x2b4   : > { %v1280_v58 = vmul.f32 %v1269_v6, %v9309_v52  ;;  %v1273_v57 = vsel %vm12794_vm8, %v1269_v6, %v1271_v42  ;;  %v1277_v36 = vmul.f32 %v1269_v6, %v8903_v26  ;;  %v1285_v26 = vmul.f32 %v1271_v42, %v9325_v51 }
 0x2b5   : > { %v1281_v49 = vmul.f32 %v1273_v57, %v9313_v41  ;;  %v1278_v4 = vmul.f32 %v1273_v57, %v9316_v44  ;;  %v1286_v14 = vmul.f32 %v1269_v6, %v9327_v29  ;;  %v1287_v13 = vmul.f32 %v1273_v57, %v9237_v43 }
 0x2b6   : > { %v7165_v53 = vpack.i.bf16 %v1280_v58, %v1279_v63  ;;  %vm1370_vm8 = vcmask 261120  }
 0x2b7   : > { %v7170_v7 = vpack.i.bf16 %v1282_v34, %v1281_v49  ;;  %v7160_v37 = vpack.i.bf16 %v1278_v4, %v1277_v36  ;;  %v1283_v34 = vmul.f32 %v1269_v6, %v8914_v46  ;;  %v1284_v4 = vmul.f32 %v1273_v57, %v9239_v48 }
 0x2b8   : > { %7166 = vrot.lane.b32.xlu0 %v7165_v53, %s12808_s10  ;;  %v1288_v53 = vmul.f32 %v1271_v42, %v8896_v24  ;;  %v7180_v49 = vpack.i.bf16 %v1286_v14, %v1285_v26  ;;  %v9343_v24 = vpop.permute.xlu2 %7141 }
 0x2b9   : > { %7171 = vrot.lane.b32.xlu1 %v7170_v7, %s12808_s10  ;;  %7161 = vrot.lane.b32.xlu2 %v7160_v37, %s12808_s10  ;;  %v7175_v36 = vpack.i.bf16 %v1284_v4, %v1283_v34  ;;  %v1362_v37 = vld [vmem:[%s12733_s1] ss:$8 sm:$0x3]  ;;  %13183 = vst [vmem:[#allocation44_spill] sm:$0xff] %v9343_v24 }
 0x2ba   : > { %v7185_v7 = vpack.i.bf16 %v1288_v53, %v1287_v13  ;;  %v1365_v63 = vperm.slane %v1362_v37, 1  ;;  %v1364_v58 = vperm.slane %v1362_v37, 0  ;;  %v9355_v34 = vld [vmem:[#allocation2 + $0x28] sm:$0xff] }
 0x2c0   : > { %7181 = vrot.lane.b32.xlu0 %v7180_v49, %s12808_s10  ;;  %v9345_v46 = vpop.permute.xlu2 %7156 }
 0x2c1   : > { %7186 = vrot.lane.b32.xlu1 %v7185_v7, %s12808_s10  ;;  %7176 = vrot.lane.b32.xlu2 %v7175_v36, %s12808_s10  ;;  %13184 = vst [vmem:[#allocation45_spill] sm:$0xff] %v9345_v46  ;;  %v9361_v36 = vld [vmem:[#allocation2] sm:$0xff]  ;;  %s12822_s10 = smov 33  }
 0x2c8   : > { %1368 = vrot.lane.b32.xlu0 %v1365_v63, %s12806_s21 }
 0x2c9   : > { %1366 = vrot.lane.b32.xlu2 %v1364_v58, %s12806_s21  ;;  %s12848_s21 = smov 95  }
 0x313   : > { %v9347_v13 = vpop.permute.xlu2 %7161 }
 0x314   : > { %13185 = vst [vmem:[#allocation46_spill] sm:$0xff] %v9347_v13 }
 0x31b   : > { %v9351_v42 = vpop.permute.xlu2 %7176 }
 0x31c   : > { %13187 = vst [vmem:[#allocation48_spill] sm:$0xff] %v9351_v42 }
 0x323   : > { %v1367_v26 = vpop.permute.xlu2 %1366 }
 0x324   : > { %v1378_v53 = vmul.f32 %v1367_v26, %v9309_v52  ;;  %v1375_v63 = vmul.f32 %v1367_v26, %v9361_v36 }
 0x32a   : > { %v9349_v57 = vpop.permute.xlu0 %7166 }
 0x32b   : > { %13186 = vst [vmem:[#allocation47_spill] sm:$0xff] %v9349_v57 }
 0x332   : > { %v9353_v6 = vpop.permute.xlu0 %7181 }
 0x333   : > { %13188 = vst [vmem:[#allocation49_spill] sm:$0xff] %v9353_v6 }
 0x33a   : > { %v1369_v14 = vpop.permute.xlu0 %1368 }
 0x33b   : > { %v1377_v4 = vmul.f32 %v1369_v14, %v9307_v0  ;;  %v1371_v49 = vsel %vm1370_vm8, %v1367_v26, %v1369_v14  ;;  %v1380_v7 = vmul.f32 %v1369_v14, %v9355_v34  ;;  %v1383_v38 = vmul.f32 %v1369_v14, %v9325_v51 }
 0x33c   : > { %v1379_v37 = vmul.f32 %v1371_v49, %v9313_v41  ;;  %v1376_v58 = vmul.f32 %v1371_v49, %v9316_v44  ;;  %v1385_v59 = vmul.f32 %v1371_v49, %v9237_v43  ;;  %v1386_v3 = vmul.f32 %v1369_v14, %v9370_v60 }
 0x33d   : > { %v7195_v50 = vpack.i.bf16 %v1378_v53, %v1377_v4  ;;  %v1382_v55 = vmul.f32 %v1371_v49, %v9239_v48  ;;  %v1384_v4 = vmul.f32 %v1367_v26, %v9327_v29  ;;  %v9376_v53 = vld [vmem:[#allocation2 + $0x30] sm:$0xff] }
 0x33e   : > { %v7200_v45 = vpack.i.bf16 %v1380_v7, %v1379_v37  ;;  %v7190_v56 = vpack.i.bf16 %v1376_v58, %v1375_v63 }
 0x33f   : > { %7196 = vrot.lane.b32.xlu2 %v7195_v50, %s12864_s4  ;;  %v1381_v50 = vmul.f32 %v1367_v26, %v9376_v53  ;;  %v7210_v7 = vpack.i.bf16 %v1384_v4, %v1383_v38  ;;  %v9387_v38 = vpop.permute.xlu1 %7171 }
 0x340   : > { %7201 = vrot.lane.b32.xlu0 %v7200_v45, %s12864_s4  ;;  %7191 = vrot.lane.b32.xlu1 %v7190_v56, %s12864_s4  ;;  %v7215_v45 = vpack.i.bf16 %v1386_v3, %v1385_v59  ;;  %v6743_v56 = vld [vmem:[%s12733_s1 + $0x1] ss:$8 sm:$0x3]  ;;  %13189 = vst [vmem:[#allocation50_spill] sm:$0xff] %v9387_v38 }
 0x341   : > { %v7205_v37 = vpack.i.bf16 %v1382_v55, %v1381_v50  ;;  %v1463_v14 = vperm.slane %v6743_v56, 1  ;;  %v1462_v49 = vperm.slane %v6743_v56, 0 }
 0x347   : > { %7211 = vrot.lane.b32.xlu2 %v7210_v7, %s12864_s4  ;;  %v9389_v59 = vpop.permute.xlu1 %7186 }
 0x348   : > { %7216 = vrot.lane.b32.xlu0 %v7215_v45, %s12864_s4  ;;  %7206 = vrot.lane.b32.xlu1 %v7205_v37, %s12864_s4  ;;  %s12874_s4 = smov 36  }
 0x34f   : > { %1466 = vrot.lane.b32.xlu2 %v1463_v14, %s12822_s10 }
 0x350   : > { %1464 = vrot.lane.b32.xlu1 %v1462_v49, %s12822_s10  ;;  %s12862_s10 = smov 94  }
 0x399   : > { %v9391_v55 = vpop.permute.xlu2 %7196 }
 0x39a   : > { %13190 = vst [vmem:[#allocation51_spill] sm:$0xff] %v9391_v55 }
 0x3a1   : > { %v9395_v26 = vpop.permute.xlu2 %7211 }
 0x3a2   : > { %13192 = vst [vmem:[#allocation53_spill] sm:$0xff] %v9395_v26 }
 0x3a9   : > { %v1467_v58 = vpop.permute.xlu2 %1466 }
 0x3aa   : > { %v1475_v50 = vmul.f32 %v1467_v58, %v9307_v0  ;;  %v1478_v14 = vmul.f32 %v1467_v58, %v9355_v34  ;;  %v1481_v2 = vmul.f32 %v1467_v58, %v9325_v51 }
 0x3b2   : > { %v9393_v3 = vpop.permute.xlu1 %7191 }
 0x3b3   : > { %13191 = vst [vmem:[#allocation52_spill] sm:$0xff] %v9393_v3 }
 0x3ba   : > { %v9397_v63 = vpop.permute.xlu1 %7206 }
 0x3bb   : > { %v13201_v21 = vunpack.i.h.bf16 %v9397_v63 }
 0x3c2   : > { %v1465_v4 = vpop.permute.xlu1 %1464 }
 0x3c3   : > { %v1476_v7 = vmul.f32 %v1465_v4, %v9309_v52  ;;  %v1469_v45 = vsel %vm12824_vm6, %v1465_v4, %v1467_v58  ;;  %v1473_v37 = vmul.f32 %v1465_v4, %v9361_v36  ;;  %v1482_v39 = vmul.f32 %v1465_v4, %v9327_v29 }
 0x3c4   : > { %v1477_v56 = vmul.f32 %v1469_v45, %v9313_v41  ;;  %v1474_v49 = vmul.f32 %v1469_v45, %v9316_v44  ;;  %v1483_v1 = vmul.f32 %v1469_v45, %v9237_v43  ;;  %v1479_v54 = vmul.f32 %v1465_v4, %v9376_v53 }
 0x3c5   : > { %v7225_v19 = vpack.i.bf16 %v1476_v7, %v1475_v50  ;;  %v1480_v32 = vmul.f32 %v1469_v45, %v9239_v48  ;;  %v1484_v50 = vmul.f32 %v1467_v58, %v9370_v60  ;;  %v7240_v7 = vpack.i.bf16 %v1482_v39, %v1481_v2  ;;  %v9423_v58 = vpop.permute.xlu0 %7201 }
 0x3c6   : > { %v7230_v8 = vpack.i.bf16 %v1478_v14, %v1477_v56  ;;  %v7220_v35 = vpack.i.bf16 %v1474_v49, %v1473_v37  ;;  %vm1521_vm6 = vcmask 777216  }
 0x3c7   : > { %7226 = vrot.lane.b32.xlu1 %v7225_v19, %s12848_s21  ;;  %v7245_v37 = vpack.i.bf16 %v1484_v50, %v1483_v1  ;;  %v7235_v56 = vpack.i.bf16 %v1480_v32, %v1479_v54  ;;  %v6744_v19 = vld [vmem:[%s12733_s1 + $0x2] ss:$8 sm:$0x3] }
 0x3c8   : > { %7231 = vrot.lane.b32.xlu2 %v7230_v8, %s12848_s21  ;;  %7221 = vrot.lane.b32.xlu0 %v7220_v35, %s12848_s21  ;;  %v1561_v35 = vperm.slane %v6744_v19, 1  ;;  %v1560_v8 = vperm.slane %v6744_v19, 0 }
 0x3cd   : > { %v9425_v1 = vpop.permute.xlu0 %7216 }
 0x3ce   : > { %13193 = vst [vmem:[#allocation54_spill] sm:$0xff] %v9425_v1 }
 0x3cf   : > { %7241 = vrot.lane.b32.xlu1 %v7240_v7, %s12848_s21 }
 0x3d0   : > { %7246 = vrot.lane.b32.xlu2 %v7245_v37, %s12848_s21  ;;  %7236 = vrot.lane.b32.xlu0 %v7235_v56, %s12848_s21  ;;  %s12860_s21 = smov 35  }
 0x3d7   : > { %1564 = vrot.lane.b32.xlu1 %v1561_v35, %s8543_s16 }
 0x3d8   : > { %1562 = vrot.lane.b32.xlu0 %v1560_v8, %s8543_s16 }
 0x422   : > { %v9427_v39 = vpop.permute.xlu2 %7231 }
 0x423   : > { %13194 = vst [vmem:[#allocation55_spill] sm:$0xff] %v9427_v39  ;;  %v12833_v35 = vunpack.i.l.bf16 %v9427_v39 }
 0x42a   : > { %v9433_v2 = vpop.permute.xlu2 %7246 }
 0x42b   : > { %13197 = vst [vmem:[#allocation58_spill] sm:$0xff] %v9433_v2  ;;  %v12831_v45 = vunpack.i.l.bf16 %v9433_v2  ;;  %v7193_v2 = vunpack.i.l.bf16 %v9393_v3 }
 0x439   : > { %v9429_v54 = vpop.permute.xlu1 %7226 }
 0x43a   : > { %13195 = vst [vmem:[#allocation56_spill] sm:$0xff] %v9429_v54  ;;  %v9431_v32 = vpop.permute.xlu0 %7221  ;;  %v7229_v37 = vunpack.i.h.bf16 %v9429_v54 }
 0x43b   : > { %13196 = vst [vmem:[#allocation57_spill] sm:$0xff] %v9431_v32  ;;  %v12838_v8 = vunpack.i.h.bf16 %v9431_v32 }
 0x43c   : > { %v1524_v54 = vsel %vm1521_vm6, %v7229_v37, %v12833_v35 }
 0x441   : > { %v9435_v4 = vpop.permute.xlu1 %7241 }
 0x442   : > { %13198 = vst [vmem:[#allocation59_spill] sm:$0xff] %v9435_v4  ;;  %v7244_v14 = vunpack.i.h.bf16 %v9435_v4  ;;  %v9439_v49 = vpop.permute.xlu0 %7236  ;;  %v7223_v4 = vunpack.i.l.bf16 %v9431_v32 }
 0x443   : > { %13199 = vst [vmem:[#allocation60_spill] sm:$0xff] %v9439_v49  ;;  %v12830_v50 = vunpack.i.h.bf16 %v9439_v49  ;;  %v7238_v7 = vunpack.i.l.bf16 %v9439_v49 }
 0x444   : > { %v1528_v56 = vsel %vm1521_vm6, %v7244_v14, %v12831_v45  ;;  %v7214_v14 = vunpack.i.h.bf16 %v9395_v26 }
 0x445   : > { %3139 = vmatpush.msra.mxu2 %v1528_v56  ;;  %v1526_v19 = vsel %vm1521_vm6, %v7238_v7, %v12830_v50  ;;  %v7208_v50 = vunpack.i.l.bf16 %v9397_v63  ;;  %v13200_v7 = vunpack.i.l.bf16 %v9425_v1 }
 0x447   : > { %3140 = vmatpush.msra.mxu2 %v1526_v19  ;;  %v1522_v19 = vsel %vm1521_vm6, %v7223_v4, %v12838_v8  ;;  %v1430_v26 = vsel %vm1423_vm3, %v7214_v14, %v13200_v7  ;;  %v7199_v8 = vunpack.i.h.bf16 %v9391_v55  ;;  %v1428_v1 = vsel %vm1423_vm3, %v7208_v50, %v13201_v21 }
 0x448   : > { %v7184_v7 = vunpack.i.h.bf16 %v9353_v6  ;;  %v12859_v55 = vunpack.i.l.bf16 %v9389_v59  ;;  %v12858_v21 = vunpack.i.h.bf16 %v9351_v42 }
 0x449   : > { %v1565_v56 = vpop.permute.xlu1 %1564  ;;  %3141 = vmatpush.msra.mxu2 %v1524_v54 }
 0x44a   : > { %v1563_v45 = vpop.permute.xlu0 %1562  ;;  %v1572_v62 = vmul.f32 %v1565_v56, %v9307_v0  ;;  %v1575_v32 = vmul.f32 %v1565_v56, %v9355_v34 }
 0x44b   : > { %3142 = vmatpush.msra.mxu2 %v1522_v19  ;;  %v1573_v37 = vmul.f32 %v1563_v45, %v9309_v52  ;;  %v1566_v35 = vsel %vm12892_vm2, %v1563_v45, %v1565_v56  ;;  %v1570_v54 = vmul.f32 %v1563_v45, %v9361_v36  ;;  %v12847_v19 = vunpack.i.h.bf16 %v9393_v3 }
 0x44c   : > { %v1574_v39 = vmul.f32 %v1566_v35, %v9313_v41  ;;  %v1571_v4 = vmul.f32 %v1566_v35, %v9316_v44  ;;  %v1576_v50 = vmul.f32 %v1563_v45, %v9376_v53  ;;  %vm12904_vm2 = vcmask 400384  }
 0x44d   : > { %3143 = vmatpush.msra.mxu2 %v1430_v26  ;;  %v7255_v49 = vpack.i.bf16 %v1573_v37, %v1572_v62  ;;  %v13202_v62 = vunpack.i.l.bf16 %v9423_v58  ;;  %v1577_v37 = vmul.f32 %v1566_v35, %v9239_v48 }
 0x44e   : > { %v7260_v9 = vpack.i.bf16 %v1575_v32, %v1574_v39  ;;  %v7250_v14 = vpack.i.bf16 %v1571_v4, %v1570_v54  ;;  %v7178_v39 = vunpack.i.l.bf16 %v9351_v42  ;;  %v1578_v32 = vmul.f32 %v1565_v56, %v9325_v51 }
 0x44f   : > { %7256 = vrot.lane.b32.xlu0 %v7255_v49, %s12862_s10  ;;  %3144 = vmatpush.msra.mxu2 %v1428_v1  ;;  %v1426_v26 = vsel %vm1423_vm3, %v7199_v8, %v13202_v62  ;;  %v1579_v1 = vmul.f32 %v1563_v45, %v9327_v29  ;;  %v1424_v49 = vsel %vm1423_vm3, %v7193_v2, %v12847_v19  ;;  %v7169_v8 = vunpack.i.h.bf16 %v9349_v57 }
 0x450   : > { %7261 = vrot.lane.b32.xlu1 %v7260_v9, %s12862_s10  ;;  %7251 = vrot.lane.b32.xlu2 %v7250_v14, %s12862_s10  ;;  %v1580_v9 = vmul.f32 %v1566_v35, %v9237_v43  ;;  %v12857_v54 = vunpack.i.l.bf16 %v9387_v38  ;;  %v1332_v4 = vsel %vm1325_vm7, %v7184_v7, %v12859_v55  ;;  %v1581_v14 = vmul.f32 %v1565_v56, %v9370_v60  ;;  %v6745_v7 = vld [vmem:[%s12733_s1 + $0x3] ss:$8 sm:$0x3] }
 0x451   : > { %3145 = vmatpush.msra.mxu2 %v1426_v26  ;;  %v12856_v2 = vunpack.i.h.bf16 %v9347_v13  ;;  %v7270_v62 = vpack.i.bf16 %v1579_v1, %v1578_v32  ;;  %v7163_v45 = vunpack.i.l.bf16 %v9347_v13  ;;  %v1330_v35 = vsel %vm1325_vm7, %v7178_v39, %v12858_v21 }
 0x452   : > { %v7275_v26 = vpack.i.bf16 %v1581_v14, %v1580_v9  ;;  %v7154_v19 = vunpack.i.h.bf16 %v9303_v10  ;;  %v1328_v56 = vsel %vm1325_vm7, %v7169_v8, %v12857_v54  ;;  %v12855_v39 = vunpack.i.l.bf16 %v9345_v46 }
 0x453   : > { %3146 = vmatpush.msra.mxu2 %v1424_v49  ;;  %v7265_v49 = vpack.i.bf16 %v1577_v37, %v1576_v50  ;;  %v12854_v32 = vunpack.i.h.bf16 %v9305_v61  ;;  %v7148_v1 = vunpack.i.l.bf16 %v9305_v61  ;;  %v1326_v9 = vsel %vm1325_vm7, %v7163_v45, %v12856_v2 }
 0x454   : > { %v1658_v50 = vperm.slane %v6745_v7, 1  ;;  %v7139_v37 = vunpack.i.h.bf16 %v9299_v40  ;;  %v1234_v8 = vsel %vm1227_vm5, %v7154_v19, %v12855_v39  ;;  %v12853_v14 = vunpack.i.l.bf16 %v9343_v24 }
 0x455   : > { %3147 = vmatpush.msra.mxu2 %v1332_v4  ;;  %v1657_v4 = vperm.slane %v6745_v7, 0  ;;  %v1232_v45 = vsel %vm1227_vm5, %v7148_v1, %v12854_v32 }
 0x456   : > { %v1230_v19 = vsel %vm1227_vm5, %v7139_v37, %v12853_v14 }
 0x457   : > { %7271 = vrot.lane.b32.xlu0 %v7270_v62, %s12862_s10  ;;  %3148 = vmatpush.msra.mxu2 %v1330_v35  ;;  %v12852_v62 = vunpack.i.h.bf16 %v9301_v47  ;;  %v7133_v35 = vunpack.i.l.bf16 %v9301_v47 }
 0x458   : > { %7276 = vrot.lane.b32.xlu1 %v7275_v26, %s12862_s10  ;;  %7266 = vrot.lane.b32.xlu2 %v7265_v49, %s12862_s10  ;;  %s12889_s10 = smov 92  }
 0x459   : > { %3149 = vmatpush.msra.mxu2 %v1328_v56  ;;  %v1228_v26 = vsel %vm1227_vm5, %v7133_v35, %v12852_v62 }
 0x45b   : > { %3150 = vmatpush.msra.mxu2 %v1326_v9 }
 0x45d   : > { %3151 = vmatpush.msra.mxu2 %v1234_v8 }
 0x45f   : > { %1661 = vrot.lane.b32.xlu0 %v1658_v50, %s12860_s21  ;;  %3152 = vmatpush.msra.mxu2 %v1232_v45 }
 0x460   : > { %1659 = vrot.lane.b32.xlu2 %v1657_v4, %s12860_s21  ;;  %s12961_s21 = smov 63  }
 0x461   : > { %3153 = vmatpush.msra.mxu2 %v1230_v19 }
 0x463   : > { %3154 = vmatpush.msra.mxu2 %v1228_v26 }
 0x4aa   : > { %v9543_v49 = vpop.permute.xlu2 %7251 }
 0x4ab   : > { %13203 = vst [vmem:[#allocation61_spill] sm:$0xff] %v9543_v49 }
 0x4b2   : > { %v9547_v7 = vpop.permute.xlu2 %7266 }
 0x4b3   : > { %13205 = vst [vmem:[#allocation63_spill] sm:$0xff] %v9547_v7 }
 0x4ba   : > { %v1660_v9 = vpop.permute.xlu2 %1659 }
 0x4bb   : > { %v1671_v37 = vmul.f32 %v1660_v9, %v9309_v52  ;;  %v1668_v19 = vmul.f32 %v1660_v9, %v9361_v36  ;;  %v1677_v55 = vmul.f32 %v1660_v9, %v9327_v29 }
 0x4c1   : > { %v9545_v56 = vpop.permute.xlu0 %7256 }
 0x4c2   : > { %13204 = vst [vmem:[#allocation62_spill] sm:$0xff] %v9545_v56 }
 0x4c9   : > { %v9549_v1 = vpop.permute.xlu0 %7271 }
 0x4ca   : > { %13206 = vst [vmem:[#allocation64_spill] sm:$0xff] %v9549_v1 }
 0x4d1   : > { %v1662_v50 = vpop.permute.xlu0 %1661 }
 0x4d2   : > { %v1670_v8 = vmul.f32 %v1662_v50, %v9307_v0  ;;  %v1664_v4 = vsel %vm12866_vm4, %v1660_v9, %v1662_v50  ;;  %v1673_v35 = vmul.f32 %v1662_v50, %v9355_v34  ;;  %v1676_v39 = vmul.f32 %v1662_v50, %v9325_v51 }
 0x4d3   : > { %v1672_v45 = vmul.f32 %v1664_v4, %v9313_v41  ;;  %v1669_v26 = vmul.f32 %v1664_v4, %v9316_v44  ;;  %v1678_v2 = vmul.f32 %v1664_v4, %v9237_v43  ;;  %v1679_v54 = vmul.f32 %v1662_v50, %v9370_v60 }
 0x4d4   : > { %v7285_v62 = vpack.i.bf16 %v1671_v37, %v1670_v8  ;;  %v1675_v21 = vmul.f32 %v1664_v4, %v9239_v48  ;;  %v1674_v8 = vmul.f32 %v1660_v9, %v9376_v53  ;;  %v7300_v37 = vpack.i.bf16 %v1677_v55, %v1676_v39  ;;  %v9575_v55 = vpop.permute.xlu1 %7261 }
 0x4d5   : > { %v7290_v14 = vpack.i.bf16 %v1673_v35, %v1672_v45  ;;  %v7280_v32 = vpack.i.bf16 %v1669_v26, %v1668_v19  ;;  %v7305_v35 = vpack.i.bf16 %v1679_v54, %v1678_v2  ;;  %13207 = vst [vmem:[#allocation65_spill] sm:$0xff] %v9575_v55  ;;  %vm12878_vm4 = vcmask 293888  }
 0x4d6   : > { %7286 = vrot.lane.b32.xlu2 %v7285_v62, %s12876_s13  ;;  %v7295_v45 = vpack.i.bf16 %v1675_v21, %v1674_v8 }
 0x4d7   : > { %7291 = vrot.lane.b32.xlu0 %v7290_v14, %s12876_s13  ;;  %7281 = vrot.lane.b32.xlu1 %v7280_v32, %s12876_s13  ;;  %v6746_v32 = vld [vmem:[%s12733_s1 + $0x4] ss:$8 sm:$0x3] }
 0x4d8   : > { %v1756_v14 = vperm.slane %v6746_v32, 1  ;;  %v1755_v62 = vperm.slane %v6746_v32, 0 }
 0x4dc   : > { %v9577_v21 = vpop.permute.xlu1 %7276 }
 0x4dd   : > { %13208 = vst [vmem:[#allocation66_spill] sm:$0xff] %v9577_v21 }
 0x4de   : > { %7301 = vrot.lane.b32.xlu2 %v7300_v37, %s12876_s13 }
 0x4df   : > { %7306 = vrot.lane.b32.xlu0 %v7305_v35, %s12876_s13  ;;  %7296 = vrot.lane.b32.xlu1 %v7295_v45, %s12876_s13  ;;  %s12887_s13 = smov 48  }
 0x4e6   : > { %1759 = vrot.lane.b32.xlu2 %v1756_v14, %s12874_s4 }
 0x4e7   : > { %1757 = vrot.lane.b32.xlu1 %v1755_v62, %s12874_s4  ;;  %s12905_s4 = smov 80  }
 0x530   : > { %v9579_v54 = vpop.permute.xlu2 %7286 }
 0x531   : > { %13209 = vst [vmem:[#allocation67_spill] sm:$0xff] %v9579_v54 }
 0x538   : > { %v9583_v39 = vpop.permute.xlu2 %7301 }
 0x540   : > { %v1760_v50 = vpop.permute.xlu2 %1759 }
 0x541   : > { %v1768_v19 = vmul.f32 %v1760_v50, %v9307_v0  ;;  %v1771_v45 = vmul.f32 %v1760_v50, %v9355_v34  ;;  %v1774_v10 = vmul.f32 %v1760_v50, %v9325_v51 }
 0x549   : > { %v9581_v2 = vpop.permute.xlu1 %7281 }
 0x54a   : > { %13210 = vst [vmem:[#allocation68_spill] sm:$0xff] %v9581_v2 }
 0x551   : > { %v9585_v9 = vpop.permute.xlu1 %7296 }
 0x552   : > { %13211 = vst [vmem:[#allocation69_spill] sm:$0xff] %v9585_v9 }
 0x559   : > { %v1758_v4 = vpop.permute.xlu1 %1757 }
 0x55a   : > { %v1769_v26 = vmul.f32 %v1758_v4, %v9309_v52  ;;  %v1762_v8 = vsel %vm12878_vm4, %v1758_v4, %v1760_v50  ;;  %v1766_v37 = vmul.f32 %v1758_v4, %v9361_v36  ;;  %v1775_v61 = vmul.f32 %v1758_v4, %v9327_v29 }
 0x55b   : > { %v1770_v35 = vmul.f32 %v1762_v8, %v9313_v41  ;;  %v1767_v32 = vmul.f32 %v1762_v8, %v9316_v44  ;;  %v1776_v40 = vmul.f32 %v1762_v8, %v9237_v43  ;;  %v1772_v24 = vmul.f32 %v1758_v4, %v9376_v53 }
 0x55c   : > { %v7315_v14 = vpack.i.bf16 %v1769_v26, %v1768_v19  ;;  %v1773_v13 = vmul.f32 %v1762_v8, %v9239_v48  ;;  %v1777_v19 = vmul.f32 %v1760_v50, %v9370_v60  ;;  %v7330_v26 = vpack.i.bf16 %v1775_v61, %v1774_v10  ;;  %v9611_v10 = vpop.permute.xlu0 %7291 }
 0x55d   : > { %v7320_v62 = vpack.i.bf16 %v1771_v45, %v1770_v35  ;;  %v7310_v47 = vpack.i.bf16 %v1767_v32, %v1766_v37  ;;  %13212 = vst [vmem:[#allocation70_spill] sm:$0xff] %v9611_v10  ;;  %vm12891_vm4 = vcmask 392192  }
 0x55e   : > { %7316 = vrot.lane.b32.xlu1 %v7315_v14, %s12889_s10  ;;  %v7335_v37 = vpack.i.bf16 %v1777_v19, %v1776_v40  ;;  %v7325_v35 = vpack.i.bf16 %v1773_v13, %v1772_v24 }
 0x55f   : > { %7321 = vrot.lane.b32.xlu2 %v7320_v62, %s12889_s10  ;;  %7311 = vrot.lane.b32.xlu0 %v7310_v47, %s12889_s10  ;;  %v1851_v47 = vld [vmem:[%s12733_s1] ss:$8 sm:$0x3] }
 0x560   : > { %v1854_v4 = vperm.slane %v1851_v47, 1  ;;  %v1853_v45 = vperm.slane %v1851_v47, 0 }
 0x564   : > { %v9613_v40 = vpop.permute.xlu0 %7306 }
 0x566   : > { %7331 = vrot.lane.b32.xlu1 %v7330_v26, %s12889_s10 }
 0x567   : > { %7336 = vrot.lane.b32.xlu2 %v7335_v37, %s12889_s10  ;;  %7326 = vrot.lane.b32.xlu0 %v7325_v35, %s12889_s10  ;;  %s12913_s10 = smov 49  }
 0x56e   : > { %1857 = vrot.lane.b32.xlu1 %v1854_v4, %s12887_s13 }
 0x56f   : > { %1855 = vrot.lane.b32.xlu0 %v1853_v45, %s12887_s13  ;;  %s12908_s13 = smov 79  }
 0x5d0   : > { %v9615_v61 = vpop.permute.xlu1 %7316 }
 0x5d1   : > { %v9617_v24 = vpop.permute.xlu0 %7311 }
 0x5d8   : > { %v9619_v13 = vpop.permute.xlu1 %7331 }
 0x5d9   : > { %13213 = vst [vmem:[#allocation71_spill] sm:$0xff] %v9619_v13  ;;  %v9621_v50 = vpop.permute.xlu0 %7326 }
 0x5e0   : > { %v1858_v8 = vpop.permute.xlu1 %1857 }
 0x5e1   : > { %v1856_v32 = vpop.permute.xlu0 %1855  ;;  %v1866_v14 = vmul.f32 %v1858_v8, %v9307_v0  ;;  %v1869_v35 = vmul.f32 %v1858_v8, %v9355_v34  ;;  %v1872_v42 = vmul.f32 %v1858_v8, %v9325_v51 }
 0x5e2   : > { %v1867_v62 = vmul.f32 %v1856_v32, %v9309_v52  ;;  %v1860_v19 = vsel %vm12891_vm4, %v1856_v32, %v1858_v8  ;;  %v1864_v26 = vmul.f32 %v1856_v32, %v9361_v36  ;;  %v1873_v57 = vmul.f32 %v1856_v32, %v9327_v29 }
 0x5e3   : > { %v1868_v37 = vmul.f32 %v1860_v19, %v9313_v41  ;;  %v1865_v47 = vmul.f32 %v1860_v19, %v9316_v44  ;;  %v1874_v38 = vmul.f32 %v1860_v19, %v9237_v43  ;;  %v1870_v3 = vmul.f32 %v1856_v32, %v9376_v53 }
 0x5e4   : > { %v7345_v4 = vpack.i.bf16 %v1867_v62, %v1866_v14  ;;  %v1871_v6 = vmul.f32 %v1860_v19, %v9239_v48  ;;  %v1875_v14 = vmul.f32 %v1858_v8, %v9370_v60  ;;  %v7360_v62 = vpack.i.bf16 %v1873_v57, %v1872_v42  ;;  %v9647_v48 = vpop.permute.xlu2 %7321 }
 0x5e5   : > { %v7350_v45 = vpack.i.bf16 %v1869_v35, %v1868_v37  ;;  %v7340_v46 = vpack.i.bf16 %v1865_v47, %v1864_v26  ;;  %vm12982_vm4 = vcmask 654336  }
 0x5e6   : > { %7346 = vrot.lane.b32.xlu0 %v7345_v4, %s12905_s4  ;;  %v7365_v26 = vpack.i.bf16 %v1875_v14, %v1874_v38  ;;  %v7355_v37 = vpack.i.bf16 %v1871_v6, %v1870_v3 }
 0x5e7   : > { %7351 = vrot.lane.b32.xlu1 %v7350_v45, %s12905_s4  ;;  %7341 = vrot.lane.b32.xlu2 %v7340_v46, %s12905_s4  ;;  %v6747_v46 = vld [vmem:[%s12733_s1 + $0x1] ss:$8 sm:$0x3] }
 0x5e8   : > { %v1952_v43 = vperm.slane %v6747_v46, 1  ;;  %v1951_v35 = vperm.slane %v6747_v46, 0 }
 0x5ec   : > { %v9649_v57 = vpop.permute.xlu2 %7336 }
 0x5ee   : > { %7361 = vrot.lane.b32.xlu0 %v7360_v62, %s12905_s4  ;;  %v7334_v62 = vunpack.i.h.bf16 %v9619_v13 }
 0x5ef   : > { %7366 = vrot.lane.b32.xlu1 %v7365_v26, %s12905_s4  ;;  %7356 = vrot.lane.b32.xlu2 %v7355_v37, %s12905_s4  ;;  %s12911_s4 = smov 50  }
 0x5f6   : > { %1955 = vrot.lane.b32.xlu0 %v1952_v43, %s12913_s10 }
 0x5f7   : > { %1953 = vrot.lane.b32.xlu2 %v1951_v35, %s12913_s10  ;;  %s12924_s10 = smov 51  }
 0x641   : > { %v9651_v42 = vpop.permute.xlu2 %7341 }
 0x642   : > { %v7343_v46 = vunpack.i.l.bf16 %v9651_v42 }
 0x649   : > { %v9657_v3 = vpop.permute.xlu2 %7356 }
 0x64a   : > { %13216 = vst [vmem:[#allocation74_spill] sm:$0xff] %v9657_v3  ;;  %v12897_v47 = vunpack.i.h.bf16 %v9657_v3  ;;  %v7358_v4 = vunpack.i.l.bf16 %v9657_v3 }
 0x64c   : > { %v1917_v35 = vsel %vm12982_vm4, %v7358_v4, %v12897_v47 }
 0x651   : > { %v1954_v43 = vpop.permute.xlu2 %1953 }
 0x652   : > { %v1965_v4 = vmul.f32 %v1954_v43, %v9309_v52  ;;  %v13221_v52 = vunpack.i.l.bf16 %v9649_v57 }
 0x658   : > { %v9653_v6 = vpop.permute.xlu0 %7346 }
 0x659   : > { %13214 = vst [vmem:[#allocation72_spill] sm:$0xff] %v9653_v6  ;;  %v9655_v38 = vpop.permute.xlu1 %7351  ;;  %v7349_v14 = vunpack.i.h.bf16 %v9653_v6 }
 0x65a   : > { %13215 = vst [vmem:[#allocation73_spill] sm:$0xff] %v9655_v38 }
 0x660   : > { %v9659_v8 = vpop.permute.xlu0 %7361 }
 0x661   : > { %13217 = vst [vmem:[#allocation75_spill] sm:$0xff] %v9659_v8  ;;  %v7364_v32 = vunpack.i.h.bf16 %v9659_v8  ;;  %v9662_v19 = vpop.permute.xlu1 %7366  ;;  %v13220_v8 = vunpack.i.h.bf16 %v9651_v42 }
 0x662   : > { %13218 = vst [vmem:[#allocation76_spill] sm:$0xff] %v9662_v19  ;;  %v12895_v45 = vunpack.i.l.bf16 %v9662_v19  ;;  %v1962_v19 = vmul.f32 %v1954_v43, %v9361_v36  ;;  %v12929_v36 = vunpack.i.h.bf16 %v9617_v24 }
 0x663   : > { %v1913_v6 = vsel %vm12982_vm4, %v7343_v46, %v13220_v8  ;;  %v9709_v8 = vld [vmem:[#allocation2 + $0x50] sm:$0xff] }
 0x664   : > { %v1919_v26 = vsel %vm12982_vm4, %v7364_v32, %v12895_v45  ;;  %v7328_v32 = vunpack.i.l.bf16 %v9621_v50  ;;  %v13219_v45 = vunpack.i.l.bf16 %v9655_v38 }
 0x665   : > { %3168 = vmatpush.msra.mxu3 %v1919_v26 }
 0x666   : > { %v1915_v37 = vsel %vm12982_vm4, %v7349_v14, %v13219_v45  ;;  %v1821_v14 = vsel %vm12907_vm1, %v7334_v62, %v13221_v52  ;;  %v7298_v52 = vunpack.i.l.bf16 %v9585_v9 }
 0x667   : > { %3169 = vmatpush.msra.mxu3 %v1917_v35 }
 0x668   : > { %v1956_v26 = vpop.permute.xlu0 %1955 }
 0x669   : > { %3170 = vmatpush.msra.mxu3 %v1915_v37  ;;  %v1964_v3 = vmul.f32 %v1956_v26, %v9307_v0  ;;  %v1958_v47 = vsel %vm12904_vm2, %v1954_v43, %v1956_v26  ;;  %v1967_v35 = vmul.f32 %v1956_v26, %v9355_v34  ;;  %v7319_v0 = vunpack.i.h.bf16 %v9615_v61 }
 0x66a   : > { %v1966_v13 = vmul.f32 %v1958_v47, %v9313_v41  ;;  %v1963_v38 = vmul.f32 %v1958_v47, %v9316_v44  ;;  %v12930_v41 = vunpack.i.l.bf16 %v9647_v48  ;;  %v7313_v44 = vunpack.i.l.bf16 %v9617_v24 }
 0x66b   : > { %3171 = vmatpush.msra.mxu3 %v1913_v6  ;;  %v7375_v45 = vpack.i.bf16 %v1965_v4, %v1964_v3  ;;  %v13222_v6 = vunpack.i.h.bf16 %v9621_v50  ;;  %v1972_v46 = vmul.f32 %v1958_v47, %v9709_v8  ;;  %v1973_v4 = vmul.f32 %v1956_v26, %v9370_v60 }
 0x66c   : > { %v7380_v34 = vpack.i.bf16 %v1967_v35, %v1966_v13  ;;  %v7370_v37 = vpack.i.bf16 %v1963_v38, %v1962_v19  ;;  %v12928_v13 = vunpack.i.l.bf16 %v9613_v40  ;;  %v1970_v38 = vmul.f32 %v1956_v26, %v9325_v51  ;;  %v9711_v19 = vld [vmem:[#allocation2 + $0x38] sm:$0xff] }
 0x66d   : > { %7376 = vrot.lane.b32.xlu2 %v7375_v45, %s12908_s13  ;;  %3172 = vmatpush.msra.mxu3 %v1821_v14  ;;  %v1819_v3 = vsel %vm12907_vm1, %v7328_v32, %v13222_v6  ;;  %v1817_v62 = vsel %vm12907_vm1, %v7319_v0, %v12930_v41  ;;  %v1969_v35 = vmul.f32 %v1958_v47, %v9711_v19  ;;  %v7304_v32 = vunpack.i.h.bf16 %v9583_v39  ;;  %v6748_v6 = vld [vmem:[%s12733_s1 + $0x2] ss:$8 sm:$0x3] }
 0x66e   : > { %7381 = vrot.lane.b32.xlu0 %v7380_v34, %s12908_s13  ;;  %7371 = vrot.lane.b32.xlu1 %v7370_v37, %s12908_s13  ;;  %v1971_v45 = vmul.f32 %v1954_v43, %v9327_v29  ;;  %v12927_v51 = vunpack.i.h.bf16 %v9585_v9  ;;  %v1815_v14 = vsel %vm12907_vm1, %v7313_v44, %v12929_v36  ;;  %v1968_v0 = vmul.f32 %v1954_v43, %v9376_v53 }
 0x66f   : > { %3173 = vmatpush.msra.mxu3 %v1819_v3  ;;  %vm12989_vm2 = vcmask 760832   ;;  %v12921_v60 = vunpack.i.l.bf16 %v9611_v10  ;;  %v7395_v29 = vpack.i.bf16 %v1973_v4, %v1972_v46  ;;  %v7289_v37 = vunpack.i.h.bf16 %v9579_v54 }
 0x670   : > { %v7390_v34 = vpack.i.bf16 %v1971_v45, %v1970_v38  ;;  %v1723_v47 = vsel %vm12989_vm2, %v7304_v32, %v12928_v13  ;;  %v7385_v26 = vpack.i.bf16 %v1969_v35, %v1968_v0  ;;  %v12920_v44 = vunpack.i.h.bf16 %v9581_v2 }
 0x671   : > { %3174 = vmatpush.msra.mxu3 %v1817_v62  ;;  %v7283_v53 = vunpack.i.l.bf16 %v9581_v2  ;;  %v1721_v43 = vsel %vm12989_vm2, %v7298_v52, %v12927_v51  ;;  %v7274_v3 = vunpack.i.h.bf16 %v9549_v1  ;;  %v12919_v38 = vunpack.i.l.bf16 %v9577_v21  ;;  %v2817_v1 = vld [vmem:[#allocation7] sm:$0xff] }
 0x672   : > { %v1719_v62 = vsel %vm12989_vm2, %v7289_v37, %v12921_v60  ;;  %v2050_v46 = vperm.slane %v6748_v6, 1  ;;  %v12918_v4 = vunpack.i.h.bf16 %v9547_v7  ;;  %v7268_v35 = vunpack.i.l.bf16 %v9547_v7  ;;  %3097 = vmatmul.f32.vlgmr.msra.gmra.mxu0 %v2817_v1 }
 0x673   : > { %3175 = vmatpush.msra.mxu3 %v1815_v14  ;;  %v1717_v32 = vsel %vm12989_vm2, %v7283_v53, %v12920_v44  ;;  %v2049_v45 = vperm.slane %v6748_v6, 0  ;;  %vm12990_vm1 = vcmask 769024   ;;  %v7259_v52 = vunpack.i.h.bf16 %v9545_v56 }
 0x674   : > { %v12917_v14 = vunpack.i.l.bf16 %v9575_v55  ;;  %v1625_v0 = vsel %vm12990_vm1, %v7274_v3, %v12919_v38  ;;  %v7019_v6 = vunpack.i.h.bf16 %v9052_v5  ;;  %v13223_v3 = vunpack.i.l.bf16 %v9058_v33 }
 0x675   : > { %7391 = vrot.lane.b32.xlu2 %v7390_v34, %s12908_s13  ;;  %3176 = vmatpush.msra.mxu3 %v1723_v47  ;;  %v12916_v34 = vunpack.i.h.bf16 %v9543_v49  ;;  %v7253_v47 = vunpack.i.l.bf16 %v9543_v49 }
 0x676   : > { %7396 = vrot.lane.b32.xlu0 %v7395_v29, %s12908_s13  ;;  %7386 = vrot.lane.b32.xlu1 %v7385_v26, %s12908_s13  ;;  %v1623_v29 = vsel %vm12990_vm1, %v7268_v35, %v12918_v4  ;;  %v7029_v26 = vunpack.i.h.bf16 %v9058_v33  ;;  %v1621_v37 = vsel %vm12990_vm1, %v7259_v52, %v12917_v14  ;;  %v13225_v52 = vunpack.i.l.bf16 %v9052_v5  ;;  %s12922_s13 = smov 78  }
 0x677   : > { %3177 = vmatpush.msra.mxu3 %v1721_v43  ;;  %v1619_v53 = vsel %vm12990_vm1, %v7253_v47, %v12916_v34  ;;  %v6948_v43 = vunpack.i.l.bf16 %v9032_v17  ;;  %v6938_v47 = vunpack.i.l.bf16 %v9024_v15 }
 0x678   : > { %v740_v17 = vsel %vm12947_vm9, %v13225_v52, %v7019_v6  ;;  %v6928_v6 = vunpack.i.l.bf16 %v9018_v11  ;;  %v8363_v11 = vld [vmem:[%s12733_s1] ss:$8 sm:$0x3] }
 0x679   : > { %3178 = vmatpush.msra.mxu3 %v1719_v62  ;;  %v744_v62 = vsel %vm12947_vm9, %v13223_v3, %v7029_v26  ;;  %v13228_v26 = vunpack.i.h.bf16 %v9054_v30  ;;  %v6979_v30 = vunpack.i.h.bf16 %v9038_v20  ;;  %v13231_v3 = vunpack.i.l.bf16 %v9044_v23 }
 0x67b   : > { %3179 = vmatpush.msra.mxu3 %v1717_v32  ;;  %v6943_v32 = vunpack.i.l.bf16 %v9026_v16  ;;  %v643_v5 = vsel %vm12946_vm10, %v13228_v26, %v6938_v47 }
 0x67d   : > { %2053 = vrot.lane.b32.xlu2 %v2050_v46, %s12911_s4  ;;  %3180 = vmatpush.msra.mxu3 %v1625_v0  ;;  %v13224_v46 = vunpack.i.h.bf16 %v9056_v31  ;;  %v13226_v0 = vunpack.i.h.bf16 %v9050_v28  ;;  %v6999_v31 = vunpack.i.h.bf16 %v9034_v18  ;;  %v6989_v28 = vunpack.i.h.bf16 %v9044_v23 }
 0x67e   : > { %2051 = vrot.lane.b32.xlu1 %v2049_v45, %s12911_s4  ;;  %v7009_v45 = vunpack.i.h.bf16 %v9042_v22  ;;  %v445_v23 = vperm.slane %v8363_v11, 1  ;;  %v9856_v11 = vld [vmem:[#allocation2 + $0x48] sm:$0xff]  ;;  %s12933_s4 = smov 77  }
 0x67f   : > { %3181 = vmatpush.msra.mxu3 %v1623_v29  ;;  %v742_v35 = vsel %vm12947_vm9, %v13224_v46, %v6948_v43  ;;  %v738_v33 = vsel %vm12947_vm9, %v13226_v0, %v6943_v32  ;;  %v13227_v29 = vunpack.i.l.bf16 %v9042_v22  ;;  %v13230_v43 = vunpack.i.h.bf16 %v9048_v27  ;;  %v13233_v46 = vld [vmem:[#allocation14_spill] sm:$0xff]  ;;  %v9823_v0 = vld [vmem:[#allocation2 + $0x20] sm:$0xff] }
 0x680   : > { %v13234_v27 = vunpack.i.l.bf16 %v9038_v20  ;;  %v453_v20 = vmul.f32 %v9711_v19, %v445_v23  ;;  %v451_v47 = vmul.f32 %v445_v23, %v9823_v0  ;;  %vm12952_vm9 = vcmask 629760  }
 0x681   : > { %3182 = vmatpush.msra.mxu3 %v1621_v37  ;;  %v645_v16 = vsel %vm12946_vm10, %v13227_v29, %v7009_v45  ;;  %v6933_v37 = vunpack.i.l.bf16 %v9020_v12  ;;  %v546_v12 = vsel %vm12910_vm11, %v13231_v3, %v6989_v28  ;;  %v13235_v45 = vld [vmem:[#allocation19_spill] sm:$0xff] }
 0x682   : > { %v542_v32 = vsel %vm12910_vm11, %v13234_v27, %v6979_v30  ;;  %v13236_v52 = vunpack.i.h.bf16 %v13235_v45  ;;  %v9846_v30 = vld [vmem:[#allocation2 + $0x28] sm:$0xff]  ;;  %v9859_v45 = vld [vmem:[#allocation2 + $0x30] sm:$0xff] }
 0x683   : > { %3183 = vmatpush.msra.mxu3 %v1619_v53  ;;  %v13229_v53 = vunpack.i.l.bf16 %v9034_v18  ;;  %v639_v22 = vsel %vm12946_vm10, %v13230_v43, %v6933_v37  ;;  %v9842_v43 = vld [vmem:[#allocation2] sm:$0xff] }
 0x685   : > { %3284 = vmatpush.msrb.mxu3 %v744_v62  ;;  %v641_v15 = vsel %vm12946_vm10, %v13229_v53, %v6999_v31  ;;  %v13232_v62 = vunpack.i.h.bf16 %v9046_v25  ;;  %v455_v25 = vmul.f32 %v9709_v8, %v445_v23  ;;  %v9838_v53 = vld [vmem:[#allocation2 + $0x10] sm:$0xff]  ;;  %vm12988_vm10 = vcmask 523264  }
 0x687   : > { %3285 = vmatpush.msrb.mxu3 %v742_v35  ;;  %v544_v18 = vsel %vm12910_vm11, %v13232_v62, %v6928_v6  ;;  %v6923_v35 = vunpack.i.l.bf16 %v13233_v46 }
 0x689   : > { %3286 = vmatpush.msrb.mxu3 %v740_v17  ;;  %v540_v17 = vsel %vm12910_vm11, %v13236_v52, %v6923_v35  ;;  %vm12915_vm11 = vcmask 408576   ;;  %v9861_v52 = vld [vmem:[#allocation2 + $0x40] sm:$0xff] }
 0x68b   : > { %3287 = vmatpush.msrb.mxu3 %v738_v33  ;;  %v9826_v33 = vld [vmem:[#allocation2 + $0x8] sm:$0xff] }
 0x68c   : > { %v449_v31 = vmul.f32 %v445_v23, %v9826_v33 }
 0x68d   : > { %3288 = vmatpush.msrb.mxu3 %v645_v16 }
 0x68f   : > { %3289 = vmatpush.msrb.mxu3 %v643_v5 }
 0x691   : > { %3290 = vmatpush.msrb.mxu3 %v641_v15  ;;  %v9840_v15 = vld [vmem:[#allocation2 + $0x18] sm:$0xff] }
 0x693   : > { %3291 = vmatpush.msrb.mxu3 %v639_v22 }
 0x695   : > { %3292 = vmatpush.msrb.mxu3 %v546_v12 }
 0x697   : > { %3293 = vmatpush.msrb.mxu3 %v544_v18 }
 0x699   : > { %3294 = vmatpush.msrb.mxu3 %v542_v32 }
 0x69b   : > { %3295 = vmatpush.msrb.mxu3 %v540_v17 }
 0x69d   : > { %3296 = vmatpush.msrb.mxu3 %v455_v25 }
 0x69f   : > { %3297 = vmatpush.msrb.mxu3 %v453_v20 }
 0x6a1   : > { %3298 = vmatpush.msrb.mxu3 %v451_v47 }
 0x6a3   : > { %3299 = vmatpush.msrb.mxu3 %v449_v31  ;;  %v9867_v31 = vld [vmem:[#allocation2 + $0x58] sm:$0xff] }
 0x6c7   : > { %v9830_v29 = vpop.permute.xlu2 %7376 }
 0x6cf   : > { %v9834_v26 = vpop.permute.xlu2 %7391 }
 0x6d7   : > { %v2054_v37 = vpop.permute.xlu2 %2053 }
 0x6d8   : > { %v2062_v22 = vmul.f32 %v2054_v37, %v9838_v53  ;;  %v2065_v18 = vmul.f32 %v2054_v37, %v9846_v30  ;;  %v2068_v47 = vmul.f32 %v2054_v37, %v9861_v52 }
 0x6e0   : > { %v9832_v16 = vpop.permute.xlu1 %7371 }
 0x6e8   : > { %v9836_v5 = vpop.permute.xlu1 %7386 }
 0x6f0   : > { %v2052_v28 = vpop.permute.xlu1 %2051 }
 0x6f1   : > { %v2063_v6 = vmul.f32 %v2052_v28, %v9840_v15  ;;  %v2056_v3 = vsel %vm12915_vm11, %v2052_v28, %v2054_v37  ;;  %v2060_v12 = vmul.f32 %v2052_v28, %v9842_v43  ;;  %v2069_v23 = vmul.f32 %v2052_v28, %v9856_v11 }
 0x6f2   : > { %v2064_v62 = vmul.f32 %v2056_v3, %v9823_v0  ;;  %v2061_v46 = vmul.f32 %v2056_v3, %v9826_v33  ;;  %v2070_v17 = vmul.f32 %v2056_v3, %v9709_v8  ;;  %v2066_v25 = vmul.f32 %v2052_v28, %v9859_v45  ;;  %v6749_v28 = vld [vmem:[%s12733_s1 + $0x3] ss:$8 sm:$0x3] }
 0x6f3   : > { %v7405_v35 = vpack.i.bf16 %v2063_v6, %v2062_v22  ;;  %v2067_v20 = vmul.f32 %v2056_v3, %v9711_v19  ;;  %v2071_v22 = vmul.f32 %v2054_v37, %v9867_v31  ;;  %v7420_v6 = vpack.i.bf16 %v2069_v23, %v2068_v47  ;;  %v9878_v37 = vpop.permute.xlu0 %7381 }
 0x6f4   : > { %v7410_v27 = vpack.i.bf16 %v2065_v18, %v2064_v62  ;;  %v7400_v32 = vpack.i.bf16 %v2061_v46, %v2060_v12  ;;  %v2148_v3 = vperm.slane %v6749_v28, 1  ;;  %v2147_v18 = vperm.slane %v6749_v28, 0 }
 0x6f5   : > { %7406 = vrot.lane.b32.xlu1 %v7405_v35, %s12922_s13  ;;  %v7425_v12 = vpack.i.bf16 %v2071_v22, %v2070_v17  ;;  %v7415_v62 = vpack.i.bf16 %v2067_v20, %v2066_v25  ;;  %vm12926_vm11 = vcmask 416768  }
 0x6f6   : > { %7411 = vrot.lane.b32.xlu2 %v7410_v27, %s12922_s13  ;;  %7401 = vrot.lane.b32.xlu0 %v7400_v32, %s12922_s13 }
 0x6fb   : > { %v9880_v46 = vpop.permute.xlu0 %7396 }
 0x6fd   : > { %7421 = vrot.lane.b32.xlu1 %v7420_v6, %s12922_s13 }
 0x6fe   : > { %7426 = vrot.lane.b32.xlu2 %v7425_v12, %s12922_s13  ;;  %7416 = vrot.lane.b32.xlu0 %v7415_v62, %s12922_s13  ;;  %s12954_s13 = smov 76  }
 0x705   : > { %2151 = vrot.lane.b32.xlu1 %v2148_v3, %s12924_s10 }
 0x706   : > { %2149 = vrot.lane.b32.xlu0 %v2147_v18, %s12924_s10  ;;  %s12935_s10 = smov 52  }
 0x767   : > { %v9882_v35 = vpop.permute.xlu1 %7406 }
 0x768   : > { %v9884_v27 = vpop.permute.xlu0 %7401 }
 0x76f   : > { %v9886_v32 = vpop.permute.xlu1 %7421 }
 0x770   : > { %v9888_v23 = vpop.permute.xlu0 %7416 }
 0x777   : > { %v2152_v17 = vpop.permute.xlu1 %2151 }
 0x778   : > { %v2150_v25 = vpop.permute.xlu0 %2149  ;;  %v2160_v20 = vmul.f32 %v2152_v17, %v9838_v53  ;;  %v2163_v62 = vmul.f32 %v2152_v17, %v9846_v30  ;;  %v2166_v14 = vmul.f32 %v2152_v17, %v9861_v52 }
 0x779   : > { %v2154_v47 = vsel %vm12926_vm11, %v2150_v25, %v2152_v17  ;;  %v2161_v22 = vmul.f32 %v2150_v25, %v9840_v15  ;;  %v2158_v6 = vmul.f32 %v2150_v25, %v9842_v43  ;;  %v2167_v4 = vmul.f32 %v2150_v25, %v9856_v11 }
 0x77a   : > { %v2162_v12 = vmul.f32 %v2154_v47, %v9823_v0  ;;  %v2159_v28 = vmul.f32 %v2154_v47, %v9826_v33  ;;  %v2168_v38 = vmul.f32 %v2154_v47, %v9709_v8  ;;  %v2164_v44 = vmul.f32 %v2150_v25, %v9859_v45 }
 0x77b   : > { %v7435_v3 = vpack.i.bf16 %v2161_v22, %v2160_v20  ;;  %v2165_v60 = vmul.f32 %v2154_v47, %v9711_v19  ;;  %v2169_v20 = vmul.f32 %v2152_v17, %v9867_v31  ;;  %v7450_v22 = vpack.i.bf16 %v2167_v4, %v2166_v14  ;;  %v9914_v4 = vpop.permute.xlu2 %7411 }
 0x77c   : > { %v7440_v18 = vpack.i.bf16 %v2163_v62, %v2162_v12  ;;  %v7430_v34 = vpack.i.bf16 %v2159_v28, %v2158_v6  ;;  %vm12937_vm11 = vcmask 424960  }
 0x77d   : > { %7436 = vrot.lane.b32.xlu0 %v7435_v3, %s12933_s4  ;;  %v7455_v6 = vpack.i.bf16 %v2169_v20, %v2168_v38  ;;  %v7445_v12 = vpack.i.bf16 %v2165_v60, %v2164_v44 }
 0x77e   : > { %7441 = vrot.lane.b32.xlu1 %v7440_v18, %s12933_s4  ;;  %7431 = vrot.lane.b32.xlu2 %v7430_v34, %s12933_s4  ;;  %v6750_v34 = vld [vmem:[%s12733_s1 + $0x4] ss:$8 sm:$0x3] }
 0x77f   : > { %v2246_v62 = vperm.slane %v6750_v34, 1  ;;  %v2245_v28 = vperm.slane %v6750_v34, 0 }
 0x783   : > { %v9916_v60 = vpop.permute.xlu2 %7426 }
 0x785   : > { %7451 = vrot.lane.b32.xlu0 %v7450_v22, %s12933_s4 }
 0x786   : > { %7456 = vrot.lane.b32.xlu1 %v7455_v6, %s12933_s4  ;;  %7446 = vrot.lane.b32.xlu2 %v7445_v12, %s12933_s4  ;;  %s12958_s4 = smov 65  }
 0x78d   : > { %2249 = vrot.lane.b32.xlu0 %v2246_v62, %s12935_s10 }
 0x78e   : > { %2247 = vrot.lane.b32.xlu2 %v2245_v28, %s12935_s10  ;;  %s12956_s10 = smov 64  }
 0x7d8   : > { %v9918_v44 = vpop.permute.xlu2 %7431 }
 0x7d9   : > { %v7433_v9 = vunpack.i.l.bf16 %v9918_v44 }
 0x7e0   : > { %v9922_v14 = vpop.permute.xlu2 %7446 }
 0x7e8   : > { %v2248_v25 = vpop.permute.xlu2 %2247 }
 0x7e9   : > { %v2259_v20 = vmul.f32 %v2248_v25, %v9840_v15  ;;  %v2256_v12 = vmul.f32 %v2248_v25, %v9842_v43  ;;  %v2265_v7 = vmul.f32 %v2248_v25, %v9856_v11 }
 0x7ef   : > { %v9920_v38 = vpop.permute.xlu0 %7436 }
 0x7f0   : > { %v7438_v10 = vunpack.i.l.bf16 %v9920_v38 }
 0x7f7   : > { %v9924_v17 = vpop.permute.xlu0 %7451 }
 0x7ff   : > { %v2250_v47 = vpop.permute.xlu0 %2249 }
 0x800   : > { %v2252_v3 = vsel %vm12937_vm11, %v2248_v25, %v2250_v47  ;;  %v2258_v18 = vmul.f32 %v2250_v47, %v9838_v53  ;;  %v2261_v22 = vmul.f32 %v2250_v47, %v9846_v30  ;;  %v2264_v13 = vmul.f32 %v2250_v47, %v9861_v52 }
 0x801   : > { %v2260_v6 = vmul.f32 %v2252_v3, %v9823_v0  ;;  %v2257_v34 = vmul.f32 %v2252_v3, %v9826_v33  ;;  %v2266_v36 = vmul.f32 %v2252_v3, %v9709_v8  ;;  %v2267_v41 = vmul.f32 %v2250_v47, %v9867_v31 }
 0x802   : > { %v7465_v62 = vpack.i.bf16 %v2259_v20, %v2258_v18  ;;  %v2263_v49 = vmul.f32 %v2252_v3, %v9711_v19  ;;  %v2262_v18 = vmul.f32 %v2248_v25, %v9859_v45  ;;  %v7480_v20 = vpack.i.bf16 %v2265_v7, %v2264_v13  ;;  %v2820_v7 = vld [vmem:[#allocation7 + $0x18] sm:$0xff] }
 0x803   : > { %v7470_v28 = vpack.i.bf16 %v2261_v22, %v2260_v6  ;;  %v7460_v51 = vpack.i.bf16 %v2257_v34, %v2256_v12  ;;  %v7485_v22 = vpack.i.bf16 %v2267_v41, %v2266_v36  ;;  %3184 = vmatmul.f32.vlgmr.msra.gmra.mxu3 %v2820_v7  ;;  %vm12951_vm11 = vcmask 621568  }
 0x804   : > { %7466 = vrot.lane.b32.xlu2 %v7465_v62, %s12954_s13  ;;  %v7475_v6 = vpack.i.bf16 %v2263_v49, %v2262_v18  ;;  %v9950_v49 = vpop.permute.xlu1 %7441 }
 0x805   : > { %7471 = vrot.lane.b32.xlu0 %v7470_v28, %s12954_s13  ;;  %7461 = vrot.lane.b32.xlu1 %v7460_v51, %s12954_s13  ;;  %v2341_v51 = vld [vmem:[%s12733_s1] ss:$8 sm:$0x3] }
 0x806   : > { %v2344_v47 = vperm.slane %v2341_v51, 1  ;;  %v2343_v12 = vperm.slane %v2341_v51, 0 }
 0x80c   : > { %7481 = vrot.lane.b32.xlu2 %v7480_v20, %s12954_s13  ;;  %v7457_v41 = vpop.permute.xlu1 %7456 }
 0x80d   : > { %7486 = vrot.lane.b32.xlu0 %v7485_v22, %s12954_s13  ;;  %7476 = vrot.lane.b32.xlu1 %v7475_v6, %s12954_s13  ;;  %s13423_s13 = smov 32  }
 0x814   : > { %2347 = vrot.lane.b32.xlu2 %v2344_v47, %s12956_s10 }
 0x815   : > { %2345 = vrot.lane.b32.xlu1 %v2343_v12, %s12956_s10 }
 0x85e   : > { %v7467_v36 = vpop.permute.xlu2 %7466 }
 0x85f   : > { %v7469_v54 = vunpack.i.h.bf16 %v7467_v36 }
 0x866   : > { %v7482_v3 = vpop.permute.xlu2 %7481 }
 0x867   : > { %v7484_v34 = vunpack.i.h.bf16 %v7482_v3  ;;  %v7483_v51 = vunpack.i.l.bf16 %v7482_v3  ;;  %v7454_v3 = vunpack.i.h.bf16 %v9924_v17 }
 0x86e   : > { %v9954_v21 = vpop.permute.xlu2 %2347 }
 0x877   : > { %v7472_v13 = vpop.permute.xlu0 %7471  ;;  %v7462_v25 = vpop.permute.xlu1 %7461 }
 0x878   : > { %v7474_v47 = vunpack.i.h.bf16 %v7472_v13  ;;  %v7473_v12 = vunpack.i.l.bf16 %v7472_v13  ;;  %v7464_v55 = vunpack.i.h.bf16 %v7462_v25  ;;  %v7463_v2 = vunpack.i.l.bf16 %v7462_v25 }
 0x879   : > { %v7459_v13 = vunpack.i.h.bf16 %v7457_v41  ;;  %v7468_v25 = vunpack.i.l.bf16 %v7467_v36 }
 0x87a   : > { %v2305_v1 = vsel %vm12951_vm11, %v7463_v2, %v7464_v55  ;;  %v2359_v2 = vmul.f32 %v9954_v21, %v9846_v30 }
 0x87b   : > { %v2306_v36 = vsel %vm12951_vm11, %v7464_v55, %v7468_v25 }
 0x87f   : > { %v7487_v62 = vpop.permute.xlu0 %7486  ;;  %v7477_v28 = vpop.permute.xlu1 %7476 }
 0x880   : > { %v7489_v18 = vunpack.i.h.bf16 %v7487_v62  ;;  %v7488_v20 = vunpack.i.l.bf16 %v7487_v62  ;;  %v7479_v22 = vunpack.i.h.bf16 %v7477_v28  ;;  %v7478_v6 = vunpack.i.l.bf16 %v7477_v28 }
 0x882   : > { %v2311_v7 = vsel %vm12951_vm11, %v7484_v34, %v7488_v20  ;;  %v2312_v56 = vsel %vm12951_vm11, %v7488_v20, %v7489_v18  ;;  %v2309_v62 = vsel %vm12951_vm11, %v7478_v6, %v7479_v22  ;;  %v2310_v28 = vsel %vm12951_vm11, %v7479_v22, %v7483_v51 }
 0x883   : > { %3197 = vmatpush.msrb.mxu0 %v2311_v7  ;;  %3400 = vmatpush.msra.mxu3 %v2312_v56  ;;  %v7458_v34 = vunpack.i.l.bf16 %v7457_v41  ;;  %v2307_v56 = vsel %vm12951_vm11, %v7469_v54, %v7473_v12  ;;  %v2308_v18 = vsel %vm12951_vm11, %v7473_v12, %v7474_v47  ;;  %v7449_v20 = vunpack.i.h.bf16 %v9922_v14 }
 0x884   : > { %v7448_v6 = vunpack.i.l.bf16 %v9922_v14  ;;  %v2356_v22 = vmul.f32 %v9954_v21, %v9838_v53  ;;  %v7453_v47 = vunpack.i.l.bf16 %v9924_v17  ;;  %v7443_v17 = vunpack.i.l.bf16 %v9950_v49 }
 0x885   : > { %3198 = vmatpush.msrb.mxu0 %v2309_v62  ;;  %3401 = vmatpush.msra.mxu3 %v2310_v28  ;;  %v7439_v62 = vunpack.i.h.bf16 %v9920_v38  ;;  %v2213_v28 = vsel %vm12952_vm9, %v7454_v3, %v7458_v34  ;;  %v2214_v55 = vsel %vm12952_vm9, %v7458_v34, %v7459_v13  ;;  %v7429_v13 = vunpack.i.h.bf16 %v9916_v60 }
 0x886   : > { %v2211_v3 = vsel %vm12952_vm9, %v7448_v6, %v7449_v20  ;;  %v7428_v34 = vunpack.i.l.bf16 %v9916_v60  ;;  %vm12960_vm11 = vcmask 637952   ;;  %v7419_v6 = vunpack.i.h.bf16 %v9888_v23 }
 0x887   : > { %v2346_v7 = vpop.permute.xlu1 %2345  ;;  %3199 = vmatpush.msrb.mxu0 %v2307_v56  ;;  %3402 = vmatpush.msra.mxu3 %v2308_v18  ;;  %v7444_v56 = vunpack.i.h.bf16 %v9950_v49  ;;  %v2212_v49 = vsel %vm12952_vm9, %v7449_v20, %v7453_v47  ;;  %v7418_v20 = vunpack.i.l.bf16 %v9888_v23 }
 0x888   : > { %v2350_v41 = vsel %vm12988_vm10, %v2346_v7, %v9954_v21  ;;  %v2357_v54 = vmul.f32 %v2346_v7, %v9840_v15  ;;  %v2354_v51 = vmul.f32 %v2346_v7, %v9842_v43  ;;  %v2360_v60 = vmul.f32 %v2346_v7, %v9859_v45 }
 0x889   : > { %3200 = vmatpush.msrb.mxu0 %v2305_v1  ;;  %3403 = vmatpush.msra.mxu3 %v2306_v36  ;;  %v2358_v14 = vmul.f32 %v2350_v41, %v9823_v0  ;;  %v2355_v12 = vmul.f32 %v2350_v41, %v9826_v33  ;;  %v7434_v36 = vunpack.i.h.bf16 %v9918_v44  ;;  %v2209_v44 = vsel %vm12952_vm9, %v7439_v62, %v7443_v17 }
 0x88a   : > { %v7495_v25 = vpack.i.bf16 %v2357_v54, %v2356_v22  ;;  %v7424_v22 = vunpack.i.h.bf16 %v9886_v32  ;;  %v2210_v38 = vsel %vm12952_vm9, %v7443_v17, %v7444_v56  ;;  %v2363_v54 = vmul.f32 %v2346_v7, %v9856_v11 }
 0x88b   : > { %3201 = vmatpush.msrb.mxu0 %v2213_v28  ;;  %3404 = vmatpush.msra.mxu3 %v2214_v55  ;;  %v7500_v18 = vpack.i.bf16 %v2359_v2, %v2358_v14  ;;  %v7490_v1 = vpack.i.bf16 %v2355_v12, %v2354_v51  ;;  %v2364_v51 = vmul.f32 %v2350_v41, %v9709_v8  ;;  %v7423_v28 = vunpack.i.l.bf16 %v9886_v32 }
 0x88c   : > { %7496 = vrot.lane.b32.xlu1 %v7495_v25, %s12956_s10  ;;  %v2361_v47 = vmul.f32 %v2350_v41, %v9711_v19  ;;  %v2207_v14 = vsel %vm12952_vm9, %v7433_v9, %v7434_v36  ;;  %v2208_v2 = vsel %vm12952_vm9, %v7434_v36, %v7438_v10  ;;  %v2362_v12 = vmul.f32 %v9954_v21, %v9861_v52 }
 0x88d   : > { %7501 = vrot.lane.b32.xlu2 %v7500_v18, %s12956_s10  ;;  %7491 = vrot.lane.b32.xlu0 %v7490_v1, %s12956_s10  ;;  %v2365_v62 = vmul.f32 %v9954_v21, %v9867_v31  ;;  %v2116_v23 = vsel %vm12960_vm11, %v7428_v34, %v7429_v13  ;;  %v7409_v7 = vunpack.i.h.bf16 %v9882_v35  ;;  %v2115_v41 = vsel %vm12960_vm11, %v7424_v22, %v7428_v34  ;;  %v6751_v1 = vld [vmem:[%s12733_s1 + $0x1] ss:$8 sm:$0x3] }
 0x88e   : > { %3202 = vmatpush.msrb.mxu0 %v2211_v3  ;;  %3405 = vmatpush.msra.mxu3 %v2212_v49  ;;  %v7510_v55 = vpack.i.bf16 %v2363_v54, %v2362_v12  ;;  %v7414_v10 = vunpack.i.h.bf16 %v9914_v4  ;;  %v7413_v25 = vunpack.i.l.bf16 %v9914_v4  ;;  %v7505_v56 = vpack.i.bf16 %v2361_v47, %v2360_v60  ;;  %v13237_v12 = vld [vmem:[#allocation38_spill] sm:$0xff] }
 0x88f   : > { %v7515_v9 = vpack.i.bf16 %v2365_v62, %v2364_v51  ;;  %v7404_v21 = vunpack.i.h.bf16 %v9884_v27  ;;  %v7403_v32 = vunpack.i.l.bf16 %v9884_v27  ;;  %v2113_v17 = vsel %vm12960_vm11, %v7418_v20, %v7419_v6 }
 0x890   : > { %3203 = vmatpush.msrb.mxu0 %v2209_v44  ;;  %3406 = vmatpush.msra.mxu3 %v2210_v38  ;;  %v7408_v18 = vunpack.i.l.bf16 %v9882_v35  ;;  %v2114_v4 = vsel %vm12960_vm11, %v7419_v6, %v7423_v28  ;;  %v7398_v36 = vunpack.i.l.bf16 %v9880_v46  ;;  %v2111_v27 = vsel %vm12960_vm11, %v7409_v7, %v7413_v25  ;;  %v13238_v7 = vld [vmem:[#allocation37_spill] sm:$0xff] }
 0x891   : > { %v7394_v3 = vunpack.i.h.bf16 %v9834_v26  ;;  %v7399_v49 = vunpack.i.h.bf16 %v9880_v46  ;;  %v2112_v35 = vsel %vm12960_vm11, %v7413_v25, %v7414_v10  ;;  %v7389_v13 = vunpack.i.h.bf16 %v9836_v5 }
 0x892   : > { %3204 = vmatpush.msrb.mxu0 %v2207_v14  ;;  %3407 = vmatpush.msra.mxu3 %v2208_v2  ;;  %v7388_v34 = vunpack.i.l.bf16 %v9836_v5  ;;  %v2109_v22 = vsel %vm12960_vm11, %v7403_v32, %v7404_v21  ;;  %v2441_v44 = vperm.slane %v6751_v1, 1  ;;  %v2110_v38 = vsel %vm12960_vm11, %v7404_v21, %v7408_v18 }
 0x893   : > { %vm12953_vm9 = vcmask 646144   ;;  %v2440_v54 = vperm.slane %v6751_v1, 0  ;;  %v7383_v51 = vunpack.i.l.bf16 %v9878_v37  ;;  %v7393_v6 = vunpack.i.l.bf16 %v9834_v26 }
 0x894   : > { %3205 = vmatpush.msrb.mxu0 %v2115_v41  ;;  %3408 = vmatpush.msra.mxu3 %v2116_v23  ;;  %v2017_v46 = vsel %vm12953_vm9, %v7394_v3, %v7398_v36  ;;  %v7384_v20 = vunpack.i.h.bf16 %v9878_v37  ;;  %v2018_v5 = vsel %vm12953_vm9, %v7398_v36, %v7399_v49  ;;  %v7379_v60 = vunpack.i.h.bf16 %v9830_v29  ;;  %v13246_v3 = vld [vmem:[#allocation29_spill] sm:$0xff] }
 0x895   : > { %7511 = vrot.lane.b32.xlu1 %v7510_v55, %s12956_s10  ;;  %7516 = vrot.lane.b32.xlu2 %v7515_v9, %s12956_s10  ;;  %v7374_v47 = vunpack.i.h.bf16 %v9832_v16  ;;  %v7373_v14 = vunpack.i.l.bf16 %v9832_v16  ;;  %v2015_v2 = vsel %vm12953_vm9, %v7388_v34, %v7389_v13  ;;  %v7129_v62 = vunpack.i.h.bf16 %v13237_v12  ;;  %v13239_v55 = vld [vmem:[#allocation35_spill] sm:$0xff] }
 0x896   : > { %7506 = vrot.lane.b32.xlu0 %v7505_v56, %s12956_s10  ;;  %3206 = vmatpush.msrb.mxu0 %v2113_v17  ;;  %v2016_v26 = vsel %vm12953_vm9, %v7389_v13, %v7393_v6  ;;  %v2013_v37 = vsel %vm12953_vm9, %v7379_v60, %v7383_v51  ;;  %v7378_v28 = vunpack.i.l.bf16 %v9830_v29  ;;  %v2014_v16 = vsel %vm12953_vm9, %v7383_v51, %v7384_v20  ;;  %v13241_v29 = vld [vmem:[#allocation39_spill] sm:$0xff]  ;;  %v13243_v17 = vld [vmem:[#allocation33_spill] sm:$0xff]  ;;  %v13252_v6 = vld [vmem:[#allocation28_spill] sm:$0xff]  ;;  %s12966_s10 = smov 62  }
 0x897   : > { %3409 = vmatpush.msra.mxu3 %v2114_v4  ;;  %v2011_v23 = vsel %vm12953_vm9, %v7373_v14, %v7374_v47  ;;  %v7123_v41 = vunpack.i.l.bf16 %v13238_v7  ;;  %v7114_v9 = vunpack.i.h.bf16 %v13239_v55  ;;  %v13240_v25 = vunpack.i.l.bf16 %v13237_v12  ;;  %v13244_v4 = vld [vmem:[#allocation34_spill] sm:$0xff]  ;;  %v13251_v51 = vld [vmem:[#allocation27_spill] sm:$0xff] }
 0x898   : > { %3207 = vmatpush.msrb.mxu0 %v2111_v27  ;;  %v2012_v10 = vsel %vm12953_vm9, %v7374_v47, %v7378_v28  ;;  %v13242_v21 = vunpack.i.h.bf16 %v13241_v29  ;;  %v7099_v18 = vunpack.i.h.bf16 %v13243_v17  ;;  %v7108_v1 = vunpack.i.l.bf16 %v13244_v4  ;;  %v13254_v60 = vld [vmem:[#allocation23_spill] sm:$0xff]  ;;  %v13256_v12 = vld [vmem:[#allocation26_spill] sm:$0xff] }
 0x899   : > { %3410 = vmatpush.msra.mxu3 %v2112_v35  ;;  %v1137_v56 = vsel %vm1129_vm13, %v13240_v25, %v7129_v62  ;;  %v13245_v36 = vunpack.i.l.bf16 %v13239_v55  ;;  %v7093_v49 = vunpack.i.l.bf16 %v13246_v3  ;;  %v13247_v35 = vld [vmem:[#allocation36_spill] sm:$0xff]  ;;  %v13253_v20 = vunpack.i.h.bf16 %v13252_v6  ;;  %v13261_v55 = vld [vmem:[#allocation25_spill] sm:$0xff]  ;;  %v13264_v29 = vld [vmem:[#allocation22_spill] sm:$0xff] }
 0x89a   : > { %3208 = vmatpush.msrb.mxu0 %v2109_v22  ;;  %v1135_v32 = vsel %vm1129_vm13, %v13242_v21, %v7123_v41  ;;  %v13248_v13 = vunpack.i.h.bf16 %v13247_v35  ;;  %v13249_v22 = vld [vmem:[#allocation32_spill] sm:$0xff]  ;;  %v7074_v47 = vunpack.i.h.bf16 %v13254_v60  ;;  %v13257_v62 = vunpack.i.h.bf16 %v13256_v12  ;;  %v13263_v25 = vld [vmem:[#allocation17_spill] sm:$0xff]  ;;  %v13275_v6 = vld [vmem:[#allocation30_spill] sm:$0xff] }
 0x89b   : > { %3411 = vmatpush.msra.mxu3 %v2110_v38  ;;  %v1133_v27 = vsel %vm1129_vm13, %v13245_v36, %v7114_v9  ;;  %v13250_v38 = vunpack.i.l.bf16 %v13243_v17  ;;  %v13255_v14 = vunpack.i.l.bf16 %v13249_v22  ;;  %v13260_v7 = vunpack.i.l.bf16 %v13254_v60  ;;  %v13268_v36 = vld [vmem:[#allocation16_spill] sm:$0xff] }
 0x89c   : > { %3209 = vmatpush.msrb.mxu0 %v2017_v46  ;;  %v1131_v34 = vsel %vm1129_vm13, %v13248_v13, %v7108_v1  ;;  %v7068_v46 = vunpack.i.l.bf16 %v13251_v51  ;;  %v13262_v9 = vunpack.i.h.bf16 %v13261_v55  ;;  %v7049_v21 = vunpack.i.h.bf16 %v13264_v29  ;;  %v13269_v3 = vld [vmem:[#allocation20_spill] sm:$0xff] }
 0x89d   : > { %3412 = vmatpush.msra.mxu3 %v2018_v5  ;;  %2444 = vrot.lane.b32.xlu1 %v2441_v44, %s12958_s4  ;;  %v7084_v44 = vunpack.i.h.bf16 %v13249_v22  ;;  %v1037_v5 = vsel %vm1031_vm15, %v13253_v20, %v7093_v49  ;;  %v941_v41 = vsel %vm933_vm14, %v13260_v7, %v7074_v47  ;;  %v7039_v49 = vunpack.i.h.bf16 %v13269_v3 }
 0x89e   : > { %2442 = vrot.lane.b32.xlu0 %v2440_v54, %s12958_s4  ;;  %3210 = vmatpush.msrb.mxu0 %v2015_v2  ;;  %v1039_v54 = vsel %vm1031_vm15, %v13250_v38, %v7099_v18  ;;  %v13266_v18 = vld [vmem:[#allocation24_spill] sm:$0xff]  ;;  %v13270_v35 = vunpack.i.l.bf16 %v13264_v29  ;;  %v13273_v38 = vld [vmem:[#allocation15_spill] sm:$0xff]  ;;  %v13274_v51 = vunpack.i.l.bf16 %v13269_v3  ;;  %v13276_v20 = vunpack.i.h.bf16 %v13275_v6  ;;  %s12963_s4 = smov 66  }
 0x89f   : > { %3413 = vmatpush.msra.mxu3 %v2016_v26  ;;  %v1035_v2 = vsel %vm1031_vm15, %v13255_v14, %v7084_v44  ;;  %v1033_v26 = vsel %vm1031_vm15, %v13257_v62, %v7068_v46  ;;  %v13267_v4 = vunpack.i.h.bf16 %v13266_v18  ;;  %vm12965_vm9 = vcmask 531456  }
 0x8a0   : > { %3211 = vmatpush.msrb.mxu0 %v2013_v37  ;;  %v13258_v37 = vld [vmem:[#allocation18_spill] sm:$0xff]  ;;  %v843_v13 = vsel %vm835_vm12, %v13270_v35, %v7049_v21  ;;  %v839_v46 = vsel %vm835_vm12, %v13274_v51, %v7039_v49  ;;  %vm12970_vm11 = vcmask 539648  }
 0x8a1   : > { %3414 = vmatpush.msra.mxu3 %v2014_v16  ;;  %v6968_v28 = vunpack.i.l.bf16 %v13258_v37  ;;  %v13259_v16 = vld [vmem:[#allocation21_spill] sm:$0xff] }
 0x8a2   : > { %3212 = vmatpush.msrb.mxu0 %v2011_v23  ;;  %v7059_v23 = vunpack.i.h.bf16 %v13259_v16 }
 0x8a3   : > { %3415 = vmatpush.msra.mxu3 %v2012_v10  ;;  %v939_v10 = vsel %vm933_vm14, %v13262_v9, %v6968_v28 }
 0x8a4   : > { %3313 = vmatpush.msra.mxu0 %v1137_v56  ;;  %v6963_v56 = vunpack.i.l.bf16 %v13263_v25 }
 0x8a6   : > { %3314 = vmatpush.msra.mxu0 %v1135_v32  ;;  %v13265_v32 = vunpack.i.l.bf16 %v13259_v16  ;;  %v935_v1 = vsel %vm933_vm14, %v13267_v4, %v6963_v56 }
 0x8a8   : > { %3315 = vmatpush.msra.mxu0 %v1133_v27  ;;  %v937_v17 = vsel %vm933_vm14, %v13265_v32, %v7059_v23  ;;  %v6958_v27 = vunpack.i.l.bf16 %v13268_v36  ;;  %v6752_v36 = vld [vmem:[%s12733_s1 + $0x2] ss:$8 sm:$0x3] }
 0x8aa   : > { %3316 = vmatpush.msra.mxu0 %v1131_v34  ;;  %v13271_v34 = vld [vmem:[#allocation31_spill] sm:$0xff] }
 0x8ab   : > { %v13272_v22 = vunpack.i.h.bf16 %v13271_v34 }
 0x8ac   : > { %3317 = vmatpush.msra.mxu0 %v1039_v54  ;;  %v6953_v54 = vunpack.i.l.bf16 %v13273_v38 }
 0x8ad   : > { %v841_v44 = vsel %vm835_vm12, %v13272_v22, %v6958_v27  ;;  %v2538_v27 = vperm.slane %v6752_v36, 0 }
 0x8ae   : > { %3318 = vmatpush.msra.mxu0 %v1037_v5  ;;  %v837_v5 = vsel %vm835_vm12, %v13276_v20, %v6953_v54 }
 0x8b0   : > { %3319 = vmatpush.msra.mxu0 %v1035_v2 }
 0x8b2   : > { %3320 = vmatpush.msra.mxu0 %v1033_v26 }
 0x8b4   : > { %3321 = vmatpush.msra.mxu0 %v941_v41 }
 0x8b6   : > { %3322 = vmatpush.msra.mxu0 %v939_v10 }
 0x8b8   : > { %3323 = vmatpush.msra.mxu0 %v937_v17 }
 0x8ba   : > { %3324 = vmatpush.msra.mxu0 %v935_v1 }
 0x8bc   : > { %3325 = vmatpush.msra.mxu0 %v843_v13 }
 0x8be   : > { %3326 = vmatpush.msra.mxu0 %v841_v44 }
 0x8c0   : > { %3327 = vmatpush.msra.mxu0 %v839_v46 }
 0x8c2   : > { %3328 = vmatpush.msra.mxu0 %v837_v5 }
 0x8fe   : > { %v10113_v60 = vpop.permute.xlu1 %7496 }
 0x8ff   : > { %v10115_v47 = vpop.permute.xlu0 %7491 }
 0x907   : > { %v10117_v14 = vpop.permute.xlu1 %7511 }
 0x908   : > { %v10119_v2 = vpop.permute.xlu0 %7506 }
 0x90f   : > { %v2445_v12 = vpop.permute.xlu1 %2444 }
 0x910   : > { %v2443_v62 = vpop.permute.xlu0 %2442  ;;  %v2453_v26 = vmul.f32 %v2445_v12, %v9838_v53  ;;  %v2456_v7 = vmul.f32 %v2445_v12, %v9846_v30  ;;  %v2459_v25 = vmul.f32 %v2445_v12, %v9861_v52  ;;  %v2462_v17 = vmul.f32 %v2445_v12, %v9867_v31 }
 0x911   : > { %v2447_v37 = vsel %vm12965_vm9, %v2443_v62, %v2445_v12  ;;  %v2454_v28 = vmul.f32 %v2443_v62, %v9840_v15  ;;  %v2451_v16 = vmul.f32 %v2443_v62, %v9842_v43  ;;  %v2460_v56 = vmul.f32 %v2443_v62, %v9856_v11 }
 0x912   : > { %v2455_v23 = vmul.f32 %v2447_v37, %v9823_v0  ;;  %v2452_v41 = vmul.f32 %v2447_v37, %v9826_v33  ;;  %v2461_v29 = vmul.f32 %v2447_v37, %v9709_v8  ;;  %v2457_v21 = vmul.f32 %v2443_v62, %v9859_v45 }
 0x913   : > { %v7525_v55 = vpack.i.bf16 %v2454_v28, %v2453_v26  ;;  %v2458_v32 = vmul.f32 %v2447_v37, %v9711_v19  ;;  %v7540_v18 = vpack.i.bf16 %v2460_v56, %v2459_v25  ;;  %v2539_v8 = vperm.slane %v6752_v36, 1  ;;  %v10145_v19 = vpop.permute.xlu2 %7501  ;;  %v10168_v28 = vld [vmem:[#allocation2 + $0x50] sm:$0xff]  ;;  %v6753_v25 = vld [vmem:[%s12733_s1 + $0x3] ss:$8 sm:$0x3] }
 0x914   : > { %v7530_v9 = vpack.i.bf16 %v2456_v7, %v2455_v23  ;;  %v7520_v10 = vpack.i.bf16 %v2452_v41, %v2451_v16  ;;  %v7545_v4 = vpack.i.bf16 %v2462_v17, %v2461_v29  ;;  %v10170_v16 = vld [vmem:[#allocation2 + $0x38] sm:$0xff]  ;;  %v2637_v56 = vperm.slane %v6753_v25, 1 }
 0x915   : > { %7526 = vrot.lane.b32.xlu0 %v7525_v55, %s12961_s21  ;;  %v7535_v1 = vpack.i.bf16 %v2458_v32, %v2457_v21  ;;  %v2636_v29 = vperm.slane %v6753_v25, 0  ;;  %vm12971_vm9 = vcmask 547840  }
 0x916   : > { %7531 = vrot.lane.b32.xlu1 %v7530_v9, %s12961_s21  ;;  %7521 = vrot.lane.b32.xlu2 %v7520_v10, %s12961_s21 }
 0x91b   : > { %v10147_v3 = vpop.permute.xlu2 %7516 }
 0x91d   : > { %7541 = vrot.lane.b32.xlu0 %v7540_v18, %s12961_s21 }
 0x91e   : > { %7546 = vrot.lane.b32.xlu1 %v7545_v4, %s12961_s21  ;;  %7536 = vrot.lane.b32.xlu2 %v7535_v1, %s12961_s21  ;;  %v10195_v1 = vld [vmem:[#allocation7 + $0x38] sm:$0xff]  ;;  %s12977_s21 = smov 61  }
 0x91f   : > { %3100 = vmatmul.f32.gmra.mxu0 %v10195_v1 }
 0x925   : > { %2542 = vrot.lane.b32.xlu0 %v2539_v8, %s12963_s4  ;;  %v10200_v8 = vld [vmem:[#allocation7 + $0x70] sm:$0xff] }
 0x926   : > { %2540 = vrot.lane.b32.xlu2 %v2538_v27, %s12963_s4  ;;  %s12968_s4 = smov 67  }
 0x927   : > { %3103 = vmatmul.f32.gmra.mxu0 %v10200_v8 }
 0x970   : > { %v10149_v49 = vpop.permute.xlu2 %7521 }
 0x978   : > { %v10153_v13 = vpop.permute.xlu2 %7536 }
 0x980   : > { %v2541_v22 = vpop.permute.xlu2 %2540 }
 0x981   : > { %v2552_v51 = vmul.f32 %v2541_v22, %v9840_v15  ;;  %v2549_v20 = vmul.f32 %v2541_v22, %v9842_v43  ;;  %v2558_v7 = vmul.f32 %v2541_v22, %v9856_v11  ;;  %v2555_v41 = vmul.f32 %v2541_v22, %v9859_v45 }
 0x987   : > { %v10151_v35 = vpop.permute.xlu0 %7526 }
 0x988   : > { %v10185_v21 = vpop.permute.xlu1 %7531 }
 0x98f   : > { %v10155_v34 = vpop.permute.xlu0 %7541 }
 0x990   : > { %v10187_v32 = vpop.permute.xlu1 %7546 }
 0x997   : > { %v2543_v44 = vpop.permute.xlu0 %2542 }
 0x998   : > { %v2545_v38 = vsel %vm12970_vm11, %v2541_v22, %v2543_v44  ;;  %v2551_v54 = vmul.f32 %v2543_v44, %v9838_v53  ;;  %v2554_v46 = vmul.f32 %v2543_v44, %v9846_v30  ;;  %v2557_v37 = vmul.f32 %v2543_v44, %v9861_v52 }
 0x999   : > { %v2553_v6 = vmul.f32 %v2545_v38, %v9823_v0  ;;  %v2550_v5 = vmul.f32 %v2545_v38, %v9826_v33  ;;  %v2559_v0 = vmul.f32 %v2545_v38, %v10168_v28  ;;  %v2560_v33 = vmul.f32 %v2543_v44, %v9867_v31 }
 0x99a   : > { %v7555_v12 = vpack.i.bf16 %v2552_v51, %v2551_v54  ;;  %v2556_v23 = vmul.f32 %v2545_v38, %v10170_v16  ;;  %v7570_v55 = vpack.i.bf16 %v2558_v7, %v2557_v37  ;;  %v10206_v51 = vld [vmem:[#allocation2 + $0x20] sm:$0xff]  ;;  %vm12987_vm11 = vcmask 498688  }
 0x99b   : > { %v7560_v62 = vpack.i.bf16 %v2554_v46, %v2553_v6  ;;  %v7550_v26 = vpack.i.bf16 %v2550_v5, %v2549_v20  ;;  %v7575_v9 = vpack.i.bf16 %v2560_v33, %v2559_v0  ;;  %v10208_v46 = vld [vmem:[#allocation2 + $0x8] sm:$0xff] }
 0x99c   : > { %7556 = vrot.lane.b32.xlu2 %v7555_v12, %s12966_s10  ;;  %v7565_v10 = vpack.i.bf16 %v2556_v23, %v2555_v41 }
 0x99d   : > { %7561 = vrot.lane.b32.xlu0 %v7560_v62, %s12966_s10  ;;  %7551 = vrot.lane.b32.xlu1 %v7550_v26, %s12966_s10 }
 0x9a4   : > { %7571 = vrot.lane.b32.xlu2 %v7570_v55, %s12966_s10 }
 0x9a5   : > { %7576 = vrot.lane.b32.xlu0 %v7575_v9, %s12966_s10  ;;  %7566 = vrot.lane.b32.xlu1 %v7565_v10, %s12966_s10  ;;  %s12973_s10 = smov 60  }
 0x9ac   : > { %2640 = vrot.lane.b32.xlu2 %v2637_v56, %s12968_s4 }
 0x9ad   : > { %2638 = vrot.lane.b32.xlu1 %v2636_v29, %s12968_s4  ;;  %s12975_s4 = smov 68  }
 0x9f6   : > { %v10189_v17 = vpop.permute.xlu2 %7556 }
 0x9fe   : > { %v10193_v4 = vpop.permute.xlu2 %7571 }
 0xa06   : > { %v2641_v27 = vpop.permute.xlu2 %2640 }
 0xa07   : > { %v2649_v38 = vmul.f32 %v2641_v27, %v9838_v53  ;;  %v2652_v5 = vmul.f32 %v2641_v27, %v9846_v30  ;;  %v2655_v0 = vmul.f32 %v2641_v27, %v9861_v52  ;;  %v2658_v33 = vmul.f32 %v2641_v27, %v9867_v31  ;;  %v10231_v52 = vld [vmem:[#allocation7 + $0xa8] sm:$0xff]  ;;  %v10234_v31 = vld [vmem:[#allocation7 + $0x20] sm:$0xff] }
 0xa08   : > { %3106 = vmatmul.f32.gmra.mxu0 %v10231_v52 }
 0xa0f   : > { %v10191_v18 = vpop.permute.xlu1 %7551  ;;  %v10237_v10 = vpop.permute.xlu0 %7561 }
 0xa10   : > { %3213 = vmatmul.f32.vlgmr.msrb.gmra.mxu0 %v10234_v31 }
 0xa17   : > { %v10198_v36 = vpop.permute.xlu1 %7566 }
 0xa1f   : > { %v2639_v22 = vpop.permute.xlu1 %2638 }
 0xa20   : > { %v2643_v44 = vsel %vm12971_vm9, %v2639_v22, %v2641_v27  ;;  %v2650_v54 = vmul.f32 %v2639_v22, %v9840_v15  ;;  %v2647_v6 = vmul.f32 %v2639_v22, %v9842_v43  ;;  %v2656_v53 = vmul.f32 %v2639_v22, %v9856_v11  ;;  %v6754_v11 = vld [vmem:[%s12733_s1 + $0x4] ss:$8 sm:$0x3] }
 0xa21   : > { %v2651_v20 = vmul.f32 %v2643_v44, %v10206_v51  ;;  %v2648_v12 = vmul.f32 %v2643_v44, %v10208_v46  ;;  %v2657_v15 = vmul.f32 %v2643_v44, %v10168_v28  ;;  %v2653_v43 = vmul.f32 %v2639_v22, %v9859_v45  ;;  %v7577_v22 = vpop.permute.xlu0 %7576 }
 0xa22   : > { %v7585_v62 = vpack.i.bf16 %v2650_v54, %v2649_v38  ;;  %v2654_v30 = vmul.f32 %v2643_v44, %v10170_v16  ;;  %v7600_v23 = vpack.i.bf16 %v2656_v53, %v2655_v0  ;;  %v2735_v45 = vperm.slane %v6754_v11, 1 }
 0xa23   : > { %v7590_v26 = vpack.i.bf16 %v2652_v5, %v2651_v20  ;;  %v7580_v37 = vpack.i.bf16 %v2648_v12, %v2647_v6  ;;  %v7605_v7 = vpack.i.bf16 %v2658_v33, %v2657_v15  ;;  %v2734_v55 = vperm.slane %v6754_v11, 0 }
 0xa24   : > { %7586 = vrot.lane.b32.xlu1 %v7585_v62, %s12977_s21  ;;  %v7595_v41 = vpack.i.bf16 %v2654_v30, %v2653_v43  ;;  %v10241_v43 = vld [vmem:[#allocation7 + $0x8] sm:$0xff]  ;;  %v7578_v11 = vunpack.i.l.bf16 %v7577_v22  ;;  %vm12981_vm9 = vcmask 506880  }
 0xa25   : > { %7591 = vrot.lane.b32.xlu2 %v7590_v26, %s12977_s21  ;;  %7581 = vrot.lane.b32.xlu0 %v7580_v37, %s12977_s21 }
 0xa26   : > { %3126 = vmatmul.f32.vlgmr.msra.gmra.mxu1 %v10241_v43 }
 0xa2c   : > { %7601 = vrot.lane.b32.xlu1 %v7600_v23, %s12977_s21 }
 0xa2d   : > { %7606 = vrot.lane.b32.xlu2 %v7605_v7, %s12977_s21  ;;  %7596 = vrot.lane.b32.xlu0 %v7595_v41, %s12977_s21  ;;  %v7579_v41 = vunpack.i.h.bf16 %v7577_v22  ;;  %s13397_s21 = smov 111  }
 0xa34   : > { %2738 = vrot.lane.b32.xlu1 %v2735_v45, %s12975_s4 }
 0xa35   : > { %2736 = vrot.lane.b32.xlu0 %v2734_v55, %s12975_s4  ;;  %v7574_v55 = vunpack.i.h.bf16 %v10193_v4  ;;  %s13422_s4 = smov 108  }
 0xa7f   : > { %v7592_v9 = vpop.permute.xlu2 %7591 }
 0xa80   : > { %v7594_v12 = vunpack.i.h.bf16 %v7592_v9  ;;  %v7593_v62 = vunpack.i.l.bf16 %v7592_v9 }
 0xa82   : > { %v2699_v45 = vsel %vm12987_vm11, %v7593_v62, %v7594_v12  ;;  %v2720_v12 = vld [vmem:[#allocation2] sm:$0xff] }
 0xa87   : > { %v7607_v25 = vpop.permute.xlu2 %7606 }
 0xa88   : > { %v7609_v56 = vunpack.i.h.bf16 %v7607_v25  ;;  %v7608_v29 = vunpack.i.l.bf16 %v7607_v25  ;;  %v7573_v25 = vunpack.i.l.bf16 %v10193_v4 }
 0xa8a   : > { %v2703_v27 = vsel %vm12987_vm11, %v7608_v29, %v7609_v56  ;;  %v7564_v56 = vunpack.i.h.bf16 %v10237_v10 }
 0xa8b   : > { %3429 = vmatpush.msrb.mxu0 %v2703_v27 }
 0xa96   : > { %v7587_v44 = vpop.permute.xlu1 %7586 }
 0xa97   : > { %v7582_v38 = vpop.permute.xlu0 %7581  ;;  %v7589_v53 = vunpack.i.h.bf16 %v7587_v44  ;;  %v7588_v30 = vunpack.i.l.bf16 %v7587_v44  ;;  %v2722_v44 = vld [vmem:[#allocation2 + $0x10] sm:$0xff] }
 0xa98   : > { %v7584_v0 = vunpack.i.h.bf16 %v7582_v38  ;;  %v7583_v7 = vunpack.i.l.bf16 %v7582_v38  ;;  %v7563_v38 = vunpack.i.l.bf16 %v10237_v10 }
 0xa99   : > { %v2698_v9 = vsel %vm12987_vm11, %v7589_v53, %v7593_v62  ;;  %v2725_v53 = vld [vmem:[#allocation2 + $0x28] sm:$0xff] }
 0xa9a   : > { %v2697_v22 = vsel %vm12987_vm11, %v7584_v0, %v7588_v30 }
 0xa9e   : > { %v7602_v54 = vpop.permute.xlu1 %7601 }
 0xa9f   : > { %v7604_v6 = vunpack.i.h.bf16 %v7602_v54  ;;  %v7603_v20 = vunpack.i.l.bf16 %v7602_v54  ;;  %v7597_v5 = vpop.permute.xlu0 %7596  ;;  %v7568_v54 = vunpack.i.l.bf16 %v10198_v36 }
 0xaa0   : > { %v7599_v26 = vunpack.i.h.bf16 %v7597_v5  ;;  %v7598_v37 = vunpack.i.l.bf16 %v7597_v5  ;;  %v2723_v5 = vld [vmem:[#allocation2 + $0x18] sm:$0xff] }
 0xaa1   : > { %v2702_v15 = vsel %vm12987_vm11, %v7604_v6, %v7608_v29  ;;  %v7569_v29 = vunpack.i.h.bf16 %v10198_v36  ;;  %v2604_v36 = vsel %vm12981_vm9, %v7574_v55, %v7578_v11 }
 0xaa2   : > { %3226 = vmatpush.msrb.mxu1 %v2702_v15  ;;  %v2701_v33 = vsel %vm12987_vm11, %v7599_v26, %v7603_v20  ;;  %v2700_v23 = vsel %vm12987_vm11, %v7598_v37, %v7599_v26  ;;  %v2696_v20 = vsel %vm12987_vm11, %v7583_v7, %v7584_v0  ;;  %v2605_v26 = vsel %vm12981_vm9, %v7578_v11, %v7579_v41 }
 0xaa3   : > { %3430 = vmatpush.msrb.mxu0 %v2701_v33  ;;  %v7559_v33 = vunpack.i.h.bf16 %v10189_v17  ;;  %v2603_v7 = vsel %vm12981_vm9, %v7569_v29, %v7573_v25  ;;  %v7558_v25 = vunpack.i.l.bf16 %v10189_v17  ;;  %v7543_v17 = vunpack.i.l.bf16 %v10155_v34 }
 0xaa4   : > { %3227 = vmatpush.msrb.mxu1 %v2700_v23  ;;  %v7554_v23 = vunpack.i.h.bf16 %v10191_v18 }
 0xaa5   : > { %3431 = vmatpush.msrb.mxu0 %v2699_v45  ;;  %v7553_v45 = vunpack.i.l.bf16 %v10191_v18  ;;  %v2601_v18 = vsel %vm12981_vm9, %v7563_v38, %v7564_v56 }
 0xaa6   : > { %v10252_v27 = vpop.permute.xlu1 %2738  ;;  %3228 = vmatpush.msrb.mxu1 %v2698_v9  ;;  %v2602_v9 = vsel %vm12981_vm9, %v7568_v54, %v7569_v29  ;;  %v2600_v29 = vsel %vm12981_vm9, %v7559_v33, %v7563_v38  ;;  %v2729_v54 = vld [vmem:[#allocation2 + $0x48] sm:$0xff]  ;;  %v7538_v38 = vunpack.i.l.bf16 %v10153_v13  ;;  %v7528_v33 = vunpack.i.l.bf16 %v10151_v35 }
 0xaa7   : > { %v2737_v6 = vpop.permute.xlu0 %2736  ;;  %3432 = vmatpush.msrb.mxu0 %v2697_v22  ;;  %v2746_v4 = vmul.f32 %v10252_v27, %v2722_v44  ;;  %v2749_v30 = vmul.f32 %v10252_v27, %v2725_v53  ;;  %v7549_v22 = vunpack.i.h.bf16 %v10187_v32  ;;  %v2728_v44 = vld [vmem:[#allocation2 + $0x40] sm:$0xff]  ;;  %v2731_v53 = vld [vmem:[#allocation2 + $0x58] sm:$0xff] }
 0xaa8   : > { %v2740_v62 = vsel %vm12972_vm0, %v2737_v6, %v10252_v27  ;;  %3229 = vmatpush.msrb.mxu1 %v2696_v20  ;;  %v2747_v37 = vmul.f32 %v2737_v6, %v2723_v5  ;;  %v2744_v15 = vmul.f32 %v2737_v6, %v2720_v12  ;;  %v7539_v20 = vunpack.i.h.bf16 %v10153_v13 }
 0xaa9   : > { %3433 = vmatpush.msrb.mxu0 %v2605_v26  ;;  %v2748_v10 = vmul.f32 %v2740_v62, %v10206_v51  ;;  %v2745_v0 = vmul.f32 %v2740_v62, %v10208_v46  ;;  %v7544_v51 = vunpack.i.h.bf16 %v10155_v34  ;;  %v7548_v46 = vunpack.i.l.bf16 %v10187_v32  ;;  %v2726_v26 = vld [vmem:[#allocation2 + $0x30] sm:$0xff] }
 0xaaa   : > { %3230 = vmatpush.msrb.mxu1 %v2604_v36  ;;  %v7615_v41 = vpack.i.bf16 %v2747_v37, %v2746_v4  ;;  %vm12979_vm0 = vcmask 515072   ;;  %v2752_v5 = vmul.f32 %v10252_v27, %v2728_v44  ;;  %v2753_v32 = vmul.f32 %v2737_v6, %v2729_v54 }
 0xaab   : > { %3434 = vmatpush.msrb.mxu0 %v2603_v7  ;;  %v7620_v11 = vpack.i.bf16 %v2749_v30, %v2748_v10  ;;  %v7610_v55 = vpack.i.bf16 %v2745_v0, %v2744_v15  ;;  %v2599_v4 = vsel %vm12981_vm9, %v7554_v23, %v7558_v25  ;;  %v2598_v12 = vsel %vm12981_vm9, %v7553_v45, %v7554_v23 }
 0xaac   : > { %7616 = vrot.lane.b32.xlu0 %v7615_v41, %s12973_s10  ;;  %3231 = vmatpush.msrb.mxu1 %v2602_v9  ;;  %v2754_v56 = vmul.f32 %v2740_v62, %v10168_v28  ;;  %v7534_v37 = vunpack.i.h.bf16 %v10185_v21  ;;  %v2750_v15 = vmul.f32 %v2737_v6, %v2726_v26  ;;  %v2751_v36 = vmul.f32 %v2740_v62, %v10170_v16  ;;  %v10330_v26 = vld [vmem:[#allocation7 + $0x10] sm:$0xff] }
 0xaad   : > { %7621 = vrot.lane.b32.xlu1 %v7620_v11, %s12973_s10  ;;  %7611 = vrot.lane.b32.xlu2 %v7610_v55, %s12973_s10  ;;  %v7533_v10 = vunpack.i.l.bf16 %v10185_v21  ;;  %v2507_v34 = vsel %vm12979_vm0, %v7548_v46, %v7549_v22  ;;  %v2506_v30 = vsel %vm12979_vm0, %v7544_v51, %v7548_v46  ;;  %v2755_v0 = vmul.f32 %v10252_v27, %v2731_v53 }
 0xaae   : > { %3435 = vmatpush.msrb.mxu0 %v2601_v18  ;;  %3232 = vmatpush.msrb.mxu1 %v2600_v29  ;;  %v7529_v28 = vunpack.i.h.bf16 %v10151_v35  ;;  %v7630_v13 = vpack.i.bf16 %v2753_v32, %v2752_v5  ;;  %v2505_v23 = vsel %vm12979_vm0, %v7539_v20, %v7543_v17  ;;  %v7524_v16 = vunpack.i.h.bf16 %v10149_v49 }
 0xaaf   : > { %v7635_v6 = vpack.i.bf16 %v2755_v0, %v2754_v56  ;;  %v7523_v21 = vunpack.i.l.bf16 %v10149_v49  ;;  %v2504_v62 = vsel %vm12979_vm0, %v7538_v38, %v7539_v20  ;;  %v7625_v27 = vpack.i.bf16 %v2751_v36, %v2750_v15  ;;  %v13277_v20 = vld [vmem:[#allocation58_spill] sm:$0xff]  ;;  %v13279_v38 = vld [vmem:[#allocation55_spill] sm:$0xff]  ;;  %3155 = vmatmul.f32.vlgmr.msra.gmra.mxu2 %v10330_v26 }
 0xab0   : > { %3436 = vmatpush.msrb.mxu0 %v2599_v4  ;;  %3233 = vmatpush.msrb.mxu1 %v2598_v12  ;;  %v7519_v7 = vunpack.i.h.bf16 %v10147_v3  ;;  %v7518_v41 = vunpack.i.l.bf16 %v10147_v3  ;;  %v2503_v35 = vsel %vm12979_vm0, %v7533_v10, %v7534_v37  ;;  %v7514_v45 = vunpack.i.h.bf16 %v10117_v14  ;;  %v13278_v4 = vld [vmem:[#allocation59_spill] sm:$0xff] }
 0xab1   : > { %v2502_v49 = vsel %vm12979_vm0, %v7529_v28, %v7533_v10  ;;  %v7513_v9 = vunpack.i.l.bf16 %v10117_v14  ;;  %v7509_v11 = vunpack.i.h.bf16 %v10119_v2  ;;  %v2501_v55 = vsel %vm12979_vm0, %v7524_v16, %v7528_v33  ;;  %v10337_v36 = vld [vmem:[#allocation7 + $0x50] sm:$0xff]  ;;  %v13281_v10 = vld [vmem:[#allocation56_spill] sm:$0xff] }
 0xab2   : > { %3437 = vmatpush.msrb.mxu0 %v2507_v34  ;;  %3234 = vmatpush.msrb.mxu1 %v2506_v30  ;;  %v7508_v3 = vunpack.i.l.bf16 %v10119_v2  ;;  %v2500_v51 = vsel %vm12979_vm0, %v7523_v21, %v7524_v16  ;;  %v7504_v22 = vunpack.i.h.bf16 %v10145_v19  ;;  %v7503_v46 = vunpack.i.l.bf16 %v10145_v19  ;;  %v13282_v30 = vld [vmem:[#allocation60_spill] sm:$0xff]  ;;  %v10349_v16 = vld [vmem:[#allocation7 + $0x48] sm:$0xff]  ;;  %v13286_v21 = vld [vmem:[#allocation57_spill] sm:$0xff] }
 0xab3   : > { %v2409_v25 = vsel %vm12988_vm10, %v7518_v41, %v7519_v7  ;;  %v7499_v18 = vunpack.i.h.bf16 %v10113_v60  ;;  %v2408_v14 = vsel %vm12988_vm10, %v7514_v45, %v7518_v41  ;;  %v7498_v29 = vunpack.i.l.bf16 %v10113_v60  ;;  %3187 = vmatmul.f32.gmra.mxu3 %v10337_v36  ;;  %v10354_v7 = vld [vmem:[#allocation7 + $0x78] sm:$0xff]  ;;  %v13288_v41 = vld [vmem:[#allocation53_spill] sm:$0xff] }
 0xab4   : > { %3438 = vmatpush.msrb.mxu0 %v2505_v23  ;;  %7631 = vrot.lane.b32.xlu0 %v7630_v13, %s12973_s10  ;;  %v7494_v44 = vunpack.i.h.bf16 %v10115_v47  ;;  %v2407_v2 = vsel %vm12988_vm10, %v7509_v11, %v7513_v9  ;;  %v7493_v54 = vunpack.i.l.bf16 %v10115_v47  ;;  %v2406_v19 = vsel %vm12988_vm10, %v7508_v3, %v7509_v11  ;;  %v10328_v47 = vld [vmem:[#allocation7 + $0x40] sm:$0xff]  ;;  %v13284_v13 = vld [vmem:[#allocation54_spill] sm:$0xff] }
 0xab5   : > { %3235 = vmatpush.msrb.mxu1 %v2504_v62  ;;  %7636 = vrot.lane.b32.xlu1 %v7635_v6, %s12973_s10  ;;  %v7249_v5 = vunpack.i.h.bf16 %v13277_v20  ;;  %v2405_v32 = vsel %vm12988_vm10, %v7503_v46, %v7504_v22  ;;  %v2404_v17 = vsel %vm12988_vm10, %v7499_v18, %v7503_v46  ;;  %v7243_v60 = vunpack.i.l.bf16 %v13278_v4  ;;  %v13293_v18 = vld [vmem:[#allocation49_spill] sm:$0xff] }
 0xab6   : > { %7626 = vrot.lane.b32.xlu2 %v7625_v27, %s12973_s10  ;;  %3439 = vmatpush.msrb.mxu0 %v2503_v35  ;;  %v2403_v12 = vsel %vm12988_vm10, %v7494_v44, %v7498_v29  ;;  %v2402_v56 = vsel %vm12988_vm10, %v7493_v54, %v7494_v44  ;;  %v7234_v37 = vunpack.i.h.bf16 %v13279_v38  ;;  %v13280_v53 = vunpack.i.l.bf16 %v13277_v20  ;;  %v13294_v29 = vld [vmem:[#allocation52_spill] sm:$0xff]  ;;  %v13296_v54 = vld [vmem:[#allocation50_spill] sm:$0xff]  ;;  %s13464_s10 = smov 66  }
 0xab7   : > { %3236 = vmatpush.msrb.mxu1 %v2502_v49  ;;  %v7228_v34 = vunpack.i.l.bf16 %v13281_v10  ;;  %v13283_v0 = vunpack.i.h.bf16 %v13282_v30  ;;  %v7219_v33 = vunpack.i.h.bf16 %v13284_v13  ;;  %v13285_v23 = vunpack.i.l.bf16 %v13279_v38  ;;  %3158 = vmatmul.f32.gmra.mxu2 %v10349_v16  ;;  %v2822_v30 = vld [vmem:[#allocation7 + $0x28] sm:$0xff] }
 0xab8   : > { %3440 = vmatpush.msrb.mxu0 %v2501_v55  ;;  %v1529_v15 = vsel %vm1521_vm6, %v13280_v53, %v7249_v5  ;;  %3129 = vmatmul.f32.gmra.mxu1 %v10328_v47  ;;  %v13287_v62 = vunpack.i.h.bf16 %v13286_v21  ;;  %v7213_v35 = vunpack.i.l.bf16 %v13288_v41  ;;  %v7204_v45 = vunpack.i.h.bf16 %v9423_v58  ;;  %v13309_v21 = vld [vmem:[#allocation43_spill] sm:$0xff] }
 0xab9   : > { %3237 = vmatpush.msrb.mxu1 %v2500_v51  ;;  %v1527_v28 = vsel %vm1521_vm6, %v13283_v0, %v7243_v60  ;;  %v1525_v6 = vsel %vm1521_vm6, %v13285_v23, %v7234_v37  ;;  %v13289_v49 = vunpack.i.l.bf16 %v13284_v13  ;;  %v13290_v11 = vunpack.i.h.bf16 %v9397_v63  ;;  %v13291_v51 = vld [vmem:[#allocation51_spill] sm:$0xff]  ;;  %v13306_v0 = vld [vmem:[#allocation44_spill] sm:$0xff] }
 0xaba   : > { %3441 = vmatpush.msrb.mxu0 %v2409_v25  ;;  %v1523_v27 = vsel %vm1521_vm6, %v13287_v62, %v7228_v34  ;;  %v7189_v3 = vunpack.i.h.bf16 %v9389_v59  ;;  %v7198_v22 = vunpack.i.l.bf16 %v13291_v51  ;;  %v13292_v46 = vunpack.i.l.bf16 %v9423_v58  ;;  %v13298_v58 = vld [vmem:[#allocation47_spill] sm:$0xff]  ;;  %v13308_v23 = vld [vmem:[#allocation40_spill] sm:$0xff]  ;;  %v10411_v51 = vld [vmem:[#allocation7 + $0x60] sm:$0xff] }
 0xabb   : > { %3238 = vmatpush.msrb.mxu1 %v2408_v14  ;;  %v1431_v9 = vsel %vm1423_vm3, %v13289_v49, %v7219_v33  ;;  %v1429_v55 = vsel %vm1423_vm3, %v13290_v11, %v7213_v35  ;;  %v7183_v14 = vunpack.i.l.bf16 %v13293_v18  ;;  %v13295_v44 = vunpack.i.h.bf16 %v13294_v29  ;;  %v2833_v11 = vld [vmem:[#allocation7 + $0x80] sm:$0xff]  ;;  %v10420_v29 = vld [vmem:[#allocation7 + $0x98] sm:$0xff] }
 0xabc   : > { %3442 = vmatpush.msrb.mxu0 %v2407_v2  ;;  %v1427_v25 = vsel %vm1423_vm3, %v13292_v46, %v7204_v45  ;;  %v10375_v2 = vld [vmem:[#allocation7 + $0xb0] sm:$0xff]  ;;  %v13297_v20 = vunpack.i.l.bf16 %v9389_v59  ;;  %v13302_v38 = vunpack.i.l.bf16 %v13296_v54  ;;  %v13303_v59 = vld [vmem:[#allocation42_spill] sm:$0xff]  ;;  %v13310_v62 = vunpack.i.h.bf16 %v13309_v21  ;;  %v13312_v45 = vld [vmem:[#allocation41_spill] sm:$0xff] }
 0xabd   : > { %3239 = vmatpush.msrb.mxu1 %v2406_v19  ;;  %v1425_v63 = vsel %vm1423_vm3, %v13295_v44, %v7198_v22  ;;  %v7174_v19 = vunpack.i.h.bf16 %v13296_v54  ;;  %v7153_v53 = vunpack.i.l.bf16 %v13303_v59  ;;  %v13311_v41 = vunpack.i.l.bf16 %v13306_v0  ;;  %v3046_v22 = vld [vmem:[%s12735_s3 + $0x8] sm:$0xff]  ;;  %v10417_v18 = vld [vmem:[#allocation7 + $0xc0] sm:$0xff]  ;;  %v3047_v44 = vld [vmem:[%s12735_s3 + $0x10] sm:$0xff] }
 0xabe   : > { %3443 = vmatpush.msrb.mxu0 %v2405_v32  ;;  %v1333_v5 = vsel %vm1325_vm7, %v13297_v20, %v7189_v3  ;;  %v7168_v32 = vunpack.i.l.bf16 %v13298_v58  ;;  %v13313_v49 = vunpack.i.h.bf16 %v13312_v45  ;;  %v2828_v3 = vld [vmem:[#allocation7 + $0x58] sm:$0xff]  ;;  %v8591_v46 = vmov 0   ;;  %v8364_v54 = vld [vmem:[#allocation7] sm:$0xff] }
 0xabf   : > { %3240 = vmatpush.msrb.mxu1 %v2404_v17  ;;  %v13299_v17 = vld [vmem:[#allocation48_spill] sm:$0xff]  ;;  %v1329_v37 = vsel %vm1325_vm7, %v13302_v38, %v7174_v19  ;;  %3161 = vmatmul.f32.gmra.mxu2 %v2833_v11  ;;  %v10429_v19 = vld [vmem:[#allocation7 + $0xd0] sm:$0xff]  ;;  %v3045_v20 = vld [vmem:[%s12735_s3] sm:$0xff]  ;;  %vm12980_vm0 = vcmask 490496  }
 0xac0   : > { %3444 = vmatpush.msrb.mxu0 %v2403_v12  ;;  %3132 = vmatmul.f32.gmra.mxu1 %v10354_v7  ;;  %v13300_v4 = vunpack.i.h.bf16 %v13299_v17  ;;  %v13301_v12 = vld [vmem:[#allocation45_spill] sm:$0xff] }
 0xac1   : > { %3241 = vmatpush.msrb.mxu1 %v2402_v56  ;;  %v7159_v56 = vunpack.i.h.bf16 %v13301_v12  ;;  %v13307_v13 = vunpack.i.l.bf16 %v13301_v12  ;;  %3216 = vmatmul.f32.gmra.mxu0 %v2828_v3  ;;  %v13316_v21 = vld [vmem:[#allocation73_spill] sm:$0xff] }
 0xac2   : > { %v1331_v60 = vsel %vm1325_vm7, %v13300_v4, %v7183_v14  ;;  %7641 = vset.pattern.permute.xlu0 %v8591_v46  ;;  %7642 = vset.pattern.permute.xlu1 %v8591_v46  ;;  %v2835_v14 = vld [vmem:[#allocation7 + $0x90] sm:$0xff] }
 0xac3   : > { %3342 = vmatpush.msra.mxu1 %v1529_v15  ;;  %v13304_v15 = vld [vmem:[#allocation46_spill] sm:$0xff]  ;;  %v1235_v33 = vsel %vm1227_vm5, %v13307_v13, %v7159_v56  ;;  %3056 = vperm.xlu0 %7641, %v3046_v22   ;;  %v13315_v13 = vld [vmem:[#allocation75_spill] sm:$0xff] }
 0xac4   : > { %v13305_v10 = vunpack.i.h.bf16 %v13304_v15  ;;  %7640 = vset.pattern.permute.xlu2 %v8591_v46  ;;  %3061 = vperm.xlu1 %7642, %v3047_v44   ;;  %v2830_v46 = vld [vmem:[#allocation7 + $0x68] sm:$0xff]  ;;  %v13323_v44 = vunpack.i.h.bf16 %v9651_v42 }
 0xac5   : > { %3343 = vmatpush.msra.mxu1 %v1527_v28  ;;  %v7144_v28 = vunpack.i.h.bf16 %v13306_v0  ;;  %3051 = vperm.xlu2 %7640, %v3045_v20  }
 0xac6   : > { %v1327_v34 = vsel %vm1325_vm7, %v13305_v10, %v7168_v32  ;;  %v13314_v10 = vld [vmem:[#allocation76_spill] sm:$0xff] }
 0xac7   : > { %3344 = vmatpush.msra.mxu1 %v1525_v6  ;;  %v7138_v6 = vunpack.i.l.bf16 %v13308_v23  ;;  %v1231_v35 = vsel %vm1227_vm5, %v13311_v41, %v7144_v28  ;;  %v2823_v28 = vld [vmem:[#allocation7 + $0x30] sm:$0xff] }
 0xac8   : > { %3135 = vmatmul.f32.gmra.mxu1 %v10375_v2 }
 0xac9   : > { %3345 = vmatpush.msra.mxu1 %v1523_v27  ;;  %v1233_v27 = vsel %vm1227_vm5, %v13310_v62, %v7153_v53  ;;  %3219 = vmatmul.f32.gmra.mxu0 %v2835_v14  ;;  %v7354_v62 = vunpack.i.h.bf16 %v13316_v21 }
 0xacb   : > { %3346 = vmatpush.msra.mxu1 %v1431_v9  ;;  %v1229_v9 = vsel %vm1227_vm5, %v13313_v49, %v7138_v6  ;;  %v13319_v49 = vld [vmem:[#allocation74_spill] sm:$0xff] }
 0xacd   : > { %3347 = vmatpush.msra.mxu1 %v1429_v55  ;;  %v10408_v55 = vld [vmem:[#allocation7 + $0x88] sm:$0xff] }
 0xace   : > { %3190 = vmatmul.f32.gmra.mxu3 %v10408_v55 }
 0xacf   : > { %3348 = vmatpush.msra.mxu1 %v1427_v25  ;;  %v2840_v25 = vld [vmem:[#allocation7 + $0xb8] sm:$0xff] }
 0xad0   : > { %3242 = vmatmul.f32.vlgmr.msrb.gmra.mxu1 %v2822_v30  ;;  %3164 = vmatmul.f32.gmra.mxu2 %v2840_v25 }
 0xad1   : > { %3349 = vmatpush.msra.mxu1 %v1425_v63  ;;  %v10426_v63 = vld [vmem:[#allocation7 + $0xc8] sm:$0xff] }
 0xad2   : > { %3222 = vmatmul.f32.gmra.mxu0 %v10426_v63 }
 0xad3   : > { %3350 = vmatpush.msra.mxu1 %v1333_v5  ;;  %v3048_v5 = vld [vmem:[%s12735_s3 + $0x18] sm:$0xff] }
 0xad4   : > { %3066 = vperm.xlu2 %7640, %v3048_v5   ;;  %v7318_v5 = vunpack.i.l.bf16 %v9615_v61  ;;  %v7303_v61 = vunpack.i.l.bf16 %v9583_v39 }
 0xad5   : > { %3351 = vmatpush.msra.mxu1 %v1331_v60 }
 0xad6   : > { %3193 = vmatmul.f32.gmra.mxu3 %v10417_v18 }
 0xad7   : > { %3352 = vmatpush.msra.mxu1 %v1329_v37 }
 0xad8   : > { %3245 = vmatmul.f32.gmra.mxu1 %v10411_v51 }
 0xad9   : > { %3353 = vmatpush.msra.mxu1 %v1327_v34  ;;  %v7369_v34 = vunpack.i.h.bf16 %v13314_v10 }
 0xada   : > { %3329 = vmatmul.f32.vlgmr.msra.gmra.mxu0 %v10241_v43 }
 0xadb   : > { %3354 = vmatpush.msra.mxu1 %v1235_v33  ;;  %v7363_v33 = vunpack.i.l.bf16 %v13315_v13 }
 0xadd   : > { %3355 = vmatpush.msra.mxu1 %v1233_v27  ;;  %v13317_v27 = vunpack.i.l.bf16 %v13314_v10 }
 0xade   : > { %3300 = vmatmul.f32.vlgmr.msrb.gmra.mxu3 %v8364_v54  ;;  %v7324_v54 = vunpack.i.h.bf16 %v9647_v48 }
 0xadf   : > { %3356 = vmatpush.msra.mxu1 %v1231_v35  ;;  %v1920_v41 = vsel %vm12982_vm4, %v13317_v27, %v7369_v34  ;;  %v13318_v35 = vld [vmem:[#allocation72_spill] sm:$0xff]  ;;  %v13343_v34 = vld [vmem:[#allocation62_spill] sm:$0xff] }
 0xae0   : > { %3248 = vmatmul.f32.gmra.mxu1 %v10420_v29  ;;  %v7348_v45 = vunpack.i.l.bf16 %v13318_v35  ;;  %v8365_v27 = vld [vmem:[#allocation7 + $0x18] sm:$0xff]  ;;  %v3127_v35 = vpop.f32.mrf.mxu1 }
 0xae1   : > { %3357 = vmatpush.msra.mxu1 %v1229_v9  ;;  %v13320_v9 = vunpack.i.h.bf16 %v13319_v49 }
 0xae2   : > { %3332 = vmatmul.f32.gmra.mxu0 %v10328_v47 }
 0xae6   : > { %3303 = vmatmul.f32.gmra.mxu3 %v10195_v1 }
 0xae8   : > { %3251 = vmatmul.f32.gmra.mxu1 %v10429_v19 }
 0xaea   : > { %3335 = vmatmul.f32.gmra.mxu0 %v10354_v7 }
 0xaee   : > { %3306 = vmatmul.f32.gmra.mxu3 %v10200_v8 }
 0xaf0   : > { %3358 = vmatmul.f32.vlgmr.msra.gmra.mxu1 %v10330_v26 }
 0xaf2   : > { %3338 = vmatmul.f32.gmra.mxu0 %v10375_v2 }
 0xaf6   : > { %3309 = vmatmul.f32.gmra.mxu3 %v10231_v52 }
 0xaf8   : > { %3361 = vmatmul.f32.gmra.mxu1 %v10349_v16 }
 0xafa   : > { %3445 = vmatmul.f32.vlgmr.msrb.gmra.mxu0 %v2822_v30 }
 0xafe   : > { %3416 = vmatmul.f32.vlgmr.msra.gmra.mxu3 %v10234_v31 }
 0xb00   : > { %3364 = vmatmul.f32.gmra.mxu1 %v2833_v11  ;;  %v1918_v11 = vsel %vm12982_vm4, %v13320_v9, %v7363_v33 }
 0xb02   : > { %3448 = vmatmul.f32.gmra.mxu0 %v10411_v51  ;;  %v13321_v51 = vunpack.i.l.bf16 %v13316_v21 }
 0xb04   : > { %v1916_v22 = vsel %vm12982_vm4, %v13321_v51, %v7354_v62 }
 0xb06   : > { %3419 = vmatmul.f32.gmra.mxu3 %v2828_v3  ;;  %v7339_v3 = vunpack.i.h.bf16 %v9649_v57 }
 0xb07   : > { %v7612_v1 = vpop.permute.xlu2 %7611 }
 0xb08   : > { %3367 = vmatmul.f32.gmra.mxu1 %v2840_v25  ;;  %v7614_v38 = vunpack.i.h.bf16 %v7612_v1  ;;  %v7613_v37 = vunpack.i.l.bf16 %v7612_v1  ;;  %v13322_v25 = vld [vmem:[#allocation71_spill] sm:$0xff]  ;;  %v13326_v1 = vunpack.i.h.bf16 %v9621_v50  ;;  %v13331_v50 = vld [vmem:[#allocation70_spill] sm:$0xff] }
 0xb0a   : > { %v2793_v23 = vsel %vm12980_vm0, %v7613_v37, %v7614_v38  ;;  %3451 = vmatmul.f32.gmra.mxu0 %v10420_v29  ;;  %v13324_v29 = vunpack.i.l.bf16 %v9649_v57 }
 0xb0e   : > { %3422 = vmatmul.f32.gmra.mxu3 %v2835_v14  ;;  %v7333_v14 = vunpack.i.l.bf16 %v13322_v25 }
 0xb10   : > { %v7627_v47 = vpop.permute.xlu2 %7626 }
 0xb11   : > { %v7629_v26 = vunpack.i.h.bf16 %v7627_v47  ;;  %v7628_v58 = vunpack.i.l.bf16 %v7627_v47  ;;  %v2837_v47 = vld [vmem:[#allocation7 + $0xa0] sm:$0xff] }
 0xb12   : > { %3454 = vmatmul.f32.gmra.mxu0 %v10429_v19  ;;  %v13332_v19 = vunpack.i.l.bf16 %v9613_v40 }
 0xb13   : > { %v2797_v53 = vsel %vm12980_vm0, %v7628_v58, %v7629_v26 }
 0xb16   : > { %3425 = vmatmul.f32.gmra.mxu3 %v10426_v63  ;;  %v1914_v63 = vsel %vm12982_vm4, %v13323_v44, %v7348_v45 }
 0xb1e   : > { %v7617_v8 = vpop.permute.xlu0 %7616 }
 0xb1f   : > { %v7622_v43 = vpop.permute.xlu1 %7621  ;;  %v7619_v60 = vunpack.i.h.bf16 %v7617_v8  ;;  %v7618_v59 = vunpack.i.l.bf16 %v7617_v8  ;;  %v7309_v8 = vunpack.i.h.bf16 %v9613_v40  ;;  %v2844_v40 = vld [vmem:[#allocation7 + $0xd8] sm:$0xff] }
 0xb20   : > { %v7624_v12 = vunpack.i.h.bf16 %v7622_v43  ;;  %v7623_v31 = vunpack.i.l.bf16 %v7622_v43  ;;  %v13328_v43 = vunpack.i.l.bf16 %v9647_v48  ;;  %v13333_v48 = vld [vmem:[#allocation69_spill] sm:$0xff] }
 0xb21   : > { %v2794_v6 = vsel %vm12980_vm0, %v7614_v38, %v7618_v59  ;;  %v13334_v58 = vunpack.i.h.bf16 %v13333_v48  ;;  %v13341_v59 = vld [vmem:[#allocation65_spill] sm:$0xff] }
 0xb22   : > { %v2795_v30 = vsel %vm12980_vm0, %v7619_v60, %v7623_v31  ;;  %v2796_v0 = vsel %vm12980_vm0, %v7623_v31, %v7624_v12  ;;  %v13337_v60 = vunpack.i.l.bf16 %v13331_v50  ;;  %v13338_v31 = vld [vmem:[#allocation64_spill] sm:$0xff]  ;;  %v13346_v33 = vunpack.i.l.bf16 %v13341_v59 }
 0xb26   : > { %v7632_v52 = vpop.permute.xlu0 %7631 }
 0xb27   : > { %v7634_v16 = vunpack.i.h.bf16 %v7632_v52  ;;  %v7637_v7 = vpop.permute.xlu1 %7636  ;;  %v7633_v32 = vunpack.i.l.bf16 %v7632_v52  ;;  %v13330_v52 = vunpack.i.h.bf16 %v9617_v24  ;;  %v1722_v24 = vsel %vm12989_vm2, %v13334_v58, %v7303_v61 }
 0xb28   : > { %v7639_v17 = vunpack.i.h.bf16 %v7637_v7  ;;  %v7638_v4 = vunpack.i.l.bf16 %v7637_v7  ;;  %v1724_v7 = vsel %vm12989_vm2, %v13332_v19, %v7309_v8 }
 0xb29   : > { %v2798_v15 = vsel %vm12980_vm0, %v7629_v26, %v7633_v32  ;;  %v13335_v32 = vld [vmem:[#allocation66_spill] sm:$0xff] }
 0xb2a   : > { %v2799_v2 = vsel %vm12980_vm0, %v7634_v16, %v7638_v4  ;;  %v2800_v56 = vsel %vm12980_vm0, %v7638_v4, %v7639_v17  ;;  %vm13325_vm0 = vcmask 752640   ;;  %v7294_v16 = vunpack.i.h.bf16 %v13331_v50  ;;  %v13336_v4 = vld [vmem:[#allocation67_spill] sm:$0xff] }
 0xb2b   : > { %3267 = vmatpush.msrb.mxu2 %v2799_v2  ;;  %3470 = vmatpush.msrb.mxu1 %v2800_v56  ;;  %v1822_v20 = vsel %vm13325_vm0, %v13324_v29, %v7339_v3  ;;  %vm13327_vm9 = vmmov %vm13325_vm0  ;;  %v1816_v26 = vsel %vm13325_vm0, %v13330_v52, %v7318_v5  ;;  %v7279_v17 = vunpack.i.h.bf16 %v13335_v32  ;;  %v7288_v39 = vunpack.i.l.bf16 %v13336_v4  ;;  %v13339_v56 = vld [vmem:[#allocation68_spill] sm:$0xff] }
 0xb2c   : > { %v1820_v42 = vsel %vm13327_vm9, %v13326_v1, %v7333_v14  ;;  %vm13329_vm4 = vmmov %vm13325_vm0  ;;  %v1720_v12 = vsel %vm12989_vm2, %v13337_v60, %v7294_v16  ;;  %v7273_v2 = vunpack.i.l.bf16 %v13338_v31  ;;  %v13340_v38 = vunpack.i.h.bf16 %v13339_v56 }
 0xb2d   : > { %3268 = vmatpush.msrb.mxu2 %v2797_v53  ;;  %3471 = vmatpush.msrb.mxu1 %v2798_v15  ;;  %v1818_v57 = vsel %vm13329_vm4, %v13328_v43, %v7324_v54  ;;  %v7264_v53 = vunpack.i.h.bf16 %v13341_v59  ;;  %v13342_v15 = vunpack.i.l.bf16 %v13335_v32  ;;  %vm13349_vm4 = vcmask 1047824  }
 0xb2e   : > { %v1718_v37 = vsel %vm12989_vm2, %v13340_v38, %v7288_v39  ;;  %vm13350_vm9 = vmmov %vm13349_vm4  ;;  %vm13351_vm0 = vcmask 277504  }
 0xb2f   : > { %3269 = vmatpush.msrb.mxu2 %v2795_v30  ;;  %3472 = vmatpush.msrb.mxu1 %v2796_v0  ;;  %v1626_v10 = vsel %vm12990_vm1, %v13342_v15, %v7279_v17  ;;  %v7258_v30 = vunpack.i.l.bf16 %v13343_v34  ;;  %v13344_v0 = vld [vmem:[#allocation63_spill] sm:$0xff]  ;;  %vm13352_vm11 = vmmov %vm13351_vm0 }
 0xb30   : > { %vm13353_vm10 = vmmov %vm13349_vm4 }
 0xb31   : > { %3270 = vmatpush.msrb.mxu2 %v2793_v23  ;;  %3473 = vmatpush.msrb.mxu1 %v2794_v6  ;;  %v1622_v23 = vsel %vm12990_vm1, %v13346_v33, %v7264_v53  ;;  %v13347_v6 = vld [vmem:[#allocation61_spill] sm:$0xff]  ;;  %vm13354_vm2 = vmmov %vm13351_vm0 }
 0xb32   : > { %6755 = vmatmul.msk.f32.vlgmr.msrb.gmra.mxu2 %vm1370_vm8, %v2823_v28  ;;  %6759 = vmatmul.msk.f32.vlgmr.msrb.gmra.mxu1 %vm1370_vm8, %v2823_v28  ;;  %v13345_v28 = vunpack.i.h.bf16 %v13344_v0  ;;  %v13348_v21 = vunpack.i.h.bf16 %v13347_v6 }
 0xb33   : > { %3371 = vmatpush.msra.mxu2 %v1920_v41  ;;  %v3098_v41 = vpop.f32.mrf.mxu0 }
 0xb34   : > { %v1624_v13 = vsel %vm12990_vm1, %v13345_v28, %v7273_v2  ;;  %v1620_v62 = vsel %vm12990_vm1, %v13348_v21, %v7258_v30  ;;  %vm13355_vm1 = vmmov %vm13351_vm0 }
 0xb35   : > { %3372 = vmatpush.msra.mxu2 %v1918_v11  ;;  %v3130_v49 = vpop.f32.mrf.mxu1 }
 0xb36   : > { %v3062_v28 = vpop.permute.xlu1 %3061 }
 0xb37   : > { %3373 = vmatpush.msra.mxu2 %v1916_v22  ;;  %v3185_v22 = vpop.f32.mrf.mxu3 }
 0xb39   : > { %3374 = vmatpush.msra.mxu2 %v1914_v63 }
 0xb3a   : > { %6756 = vmatmul.msk.f32.gmra.mxu2 %vm1370_vm8, %v2830_v46  ;;  %6760 = vmatmul.msk.f32.gmra.mxu1 %vm1370_vm8, %v2830_v46 }
 0xb3b   : > { %3375 = vmatpush.msra.mxu2 %v1822_v20  ;;  %v3101_v45 = vpop.f32.mrf.mxu0 }
 0xb3d   : > { %3376 = vmatpush.msra.mxu2 %v1820_v42  ;;  %v3133_v11 = vpop.f32.mrf.mxu1 }
 0xb3f   : > { %3377 = vmatpush.msra.mxu2 %v1818_v57  ;;  %v3188_v14 = vpop.f32.mrf.mxu3 }
 0xb41   : > { %3378 = vmatpush.msra.mxu2 %v1816_v26 }
 0xb42   : > { %6757 = vmatmul.msk.f32.gmra.mxu2 %vm1370_vm8, %v2837_v47  ;;  %6761 = vmatmul.msk.f32.gmra.mxu1 %vm1370_vm8, %v2837_v47  ;;  %v3057_v47 = vpop.permute.xlu0 %3056 }
 0xb43   : > { %3379 = vmatpush.msra.mxu2 %v1724_v7  ;;  %v3104_v9 = vpop.f32.mrf.mxu0  ;;  %v3102_v61 = vadd.f32 %v3101_v45, %v3057_v47 }
 0xb44   : > { %v3105_v33 = vadd.f32 %v3104_v9, %v3062_v28 }
 0xb45   : > { %3380 = vmatpush.msra.mxu2 %v1722_v24  ;;  %v10537_v51 = vpop.f32.mrf.mxu1  ;;  %v3131_v7 = vadd.f32 %v3130_v49, %v3102_v61 }
 0xb46   : > { %v3134_v21 = vadd.f32 %v3133_v11, %v3105_v33 }
 0xb47   : > { %3381 = vmatpush.msra.mxu2 %v1720_v12 }
 0xb49   : > { %3382 = vmatpush.msra.mxu2 %v1718_v37 }
 0xb4a   : > { %6758 = vmatmul.msk.f32.gmra.mxu2 %vm1370_vm8, %v2844_v40  ;;  %6762 = vmatmul.msk.f32.gmra.mxu1 %vm1370_vm8, %v2844_v40 }
 0xb4b   : > { %3383 = vmatpush.msra.mxu2 %v1626_v10  ;;  %v10535_v3 = vpop.f32.mrf.mxu0 }
 0xb4d   : > { %3384 = vmatpush.msra.mxu2 %v1624_v13  ;;  %v3243_v25 = vpop.f32.mrf.mxu1 }
 0xb4f   : > { %3385 = vmatpush.msra.mxu2 %v1622_v23 }
 0xb51   : > { %3386 = vmatpush.msra.mxu2 %v1620_v62  ;;  %v3191_v54 = vpop.f32.mrf.mxu3 }
 0xb52   : > { %3387 = vmatmul.f32.vlgmr.msra.gmra.mxu2 %v8365_v27 }
 0xb53   : > { %v3214_v46 = vpop.f32.mrf.mxu0 }
 0xb55   : > { %v3246_v63 = vpop.f32.mrf.mxu1 }
 0xb59   : > { %v10543_v5 = vpop.f32.mrf.mxu3 }
 0xb5a   : > { %3390 = vmatmul.f32.gmra.mxu2 %v10337_v36  ;;  %v3156_v36 = vpop.f32.mrf.mxu2 }
 0xb5b   : > { %v3217_v44 = vpop.f32.mrf.mxu0 }
 0xb5d   : > { %v10541_v20 = vpop.f32.mrf.mxu1 }
 0xb61   : > { %v3301_v52 = vpop.f32.mrf.mxu3 }
 0xb62   : > { %3393 = vmatmul.f32.gmra.mxu2 %v10408_v55  ;;  %v3159_v55 = vpop.f32.mrf.mxu2 }
 0xb63   : > { %v10539_v29 = vpop.f32.mrf.mxu0  ;;  %v3160_v24 = vadd.f32 %v3159_v55, %v3131_v7 }
 0xb65   : > { %v10547_v43 = vpop.f32.mrf.mxu1  ;;  %v3189_v39 = vadd.f32 %v3188_v14, %v3160_v24 }
 0xb67   : > { %v3218_v31 = vadd.f32 %v3217_v44, %v3189_v39 }
 0xb69   : > { %v3304_v32 = vpop.f32.mrf.mxu3  ;;  %v3247_v38 = vadd.f32 %v3246_v63, %v3218_v31 }
 0xb6a   : > { %3396 = vmatmul.f32.gmra.mxu2 %v10417_v18  ;;  %v3052_v18 = vpop.permute.xlu2 %3051  ;;  %v3162_v8 = vpop.f32.mrf.mxu2 }
 0xb6b   : > { %v3099_v1 = vadd.f32 %v3098_v41, %v3052_v18  ;;  %v10545_v42 = vpop.f32.mrf.mxu0  ;;  %v3302_v23 = vadd.f32 %v3301_v52, %v3052_v18  ;;  %v3163_v45 = vadd.f32 %v3162_v8, %v3134_v21 }
 0xb6d   : > { %v3128_v57 = vadd.f32 %v3127_v35, %v3099_v1  ;;  %v3359_v16 = vpop.f32.mrf.mxu1 }
 0xb6f   : > { %v3157_v26 = vadd.f32 %v3156_v36, %v3128_v57  ;;  %v3192_v36 = vadd.f32 %v3191_v54, %v3163_v45 }
 0xb71   : > { %v3186_v19 = vadd.f32 %v3185_v22, %v3157_v26  ;;  %v3307_v56 = vpop.f32.mrf.mxu3  ;;  %v3221_v11 = vadd.f32 %v10539_v29, %v3192_v36 }
 0xb72   : > { %v3165_v48 = vpop.f32.mrf.mxu2  ;;  %v3067_v41 = vpop.permute.xlu2 %3066  ;;  %v3308_v8 = vadd.f32 %v3307_v56, %v3062_v28 }
 0xb73   : > { %v3330_v50 = vpop.f32.mrf.mxu0  ;;  %v3215_v58 = vadd.f32 %v3214_v46, %v3186_v19  ;;  %v3108_v22 = vadd.f32 %v10535_v3, %v3067_v41  ;;  %v3250_v19 = vadd.f32 %v10541_v20, %v3221_v11 }
 0xb74   : > { %v3331_v27 = vadd.f32 %v3330_v50, %v3302_v23 }
 0xb75   : > { %v3244_v4 = vadd.f32 %v3243_v25, %v3215_v58  ;;  %v3362_v12 = vpop.f32.mrf.mxu1  ;;  %v3305_v25 = vadd.f32 %v3304_v32, %v3057_v47  ;;  %v3137_v63 = vadd.f32 %v10537_v51, %v3108_v22  ;;  %v6766_v22 = vld [vmem:[%s12733_s1 + $0x4] ss:$8 sm:$0x3] }
 0xb76   : > { %v3360_v46 = vadd.f32 %v3359_v16, %v3331_v27  ;;  %v6764_v27 = vld [vmem:[%s12733_s1 + $0x2] ss:$8 sm:$0x3] }
 0xb77   : > { %v3166_v52 = vadd.f32 %v3165_v48, %v3137_v63  ;;  %v3688_v45 = vperm.slane %v6764_v27, 1 }
 0xb79   : > { %v3310_v30 = vpop.f32.mrf.mxu3  ;;  %v3195_v54 = vadd.f32 %v10543_v5, %v3166_v52 }
 0xb7b   : > { %v3333_v17 = vpop.f32.mrf.mxu0  ;;  %v3224_v48 = vadd.f32 %v10545_v42, %v3195_v54 }
 0xb7c   : > { %v3334_v55 = vadd.f32 %v3333_v17, %v3305_v25  ;;  %v3311_v17 = vadd.f32 %v3310_v30, %v3067_v41  ;;  %v6765_v41 = vld [vmem:[%s12733_s1 + $0x3] ss:$8 sm:$0x3]  ;;  %v3879_v25 = vperm.slane %v6766_v22, 0 }
 0xb7d   : > { %v3365_v15 = vpop.f32.mrf.mxu1  ;;  %v3253_v5 = vadd.f32 %v10547_v43, %v3224_v48 }
 0xb7e   : > { %v3363_v26 = vadd.f32 %v3362_v12, %v3334_v55 }
 0xb81   : > { %v3417_v62 = vpop.f32.mrf.mxu3 }
 0xb83   : > { %v3336_v59 = vpop.f32.mrf.mxu0 }
 0xb84   : > { %v3337_v51 = vadd.f32 %v3336_v59, %v3308_v8 }
 0xb85   : > { %v3368_v13 = vpop.f32.mrf.mxu1 }
 0xb86   : > { %v3366_v32 = vadd.f32 %v3365_v15, %v3337_v51 }
 0xb89   : > { %v3420_v18 = vpop.f32.mrf.mxu3 }
 0xb8b   : > { %v3339_v0 = vpop.f32.mrf.mxu0 }
 0xb91   : > { %v3423_v29 = vpop.f32.mrf.mxu3 }
 0xb93   : > { %v3446_v35 = vpop.f32.mrf.mxu0 }
 0xb99   : > { %v3426_v15 = vpop.f32.mrf.mxu3 }
 0xb9b   : > { %v3449_v57 = vpop.f32.mrf.mxu0 }
 0xbaf   : > { %v3475_v49 = vpop.f32.mrf.mxu1 }
 0xbb5   : > { %v3272_v60 = vpop.f32.mrf.mxu2 }
 0xbb6   : > { %v3273_v40 = vadd.f32 %v3272_v60, %v3244_v4  ;;  %v3452_v60 = vpop.f32.mrf.mxu0 }
 0xbb7   : > { %v3478_v3 = vpop.f32.mrf.mxu1 }
 0xbb8   : > { %v3487_v2 = vmax.f32 %v3273_v40, 0.0 }
 0xbba   : > { %3503 = vrot.lane.b32.xlu1 %v3487_v2, %s8543_s16  ;;  %v3340_v2 = vadd.f32 %v3339_v0, %v3311_v17  ;;  %v6763_v0 = vld [vmem:[%s12733_s1 + $0x1] ss:$8 sm:$0x3] }
 0xbbb   : > { %v3592_v21 = vperm.slane %v6763_v0, 1 }
 0xbbc   : > { %v3369_v42 = vadd.f32 %v3368_v13, %v3340_v2  ;;  %v3591_v13 = vperm.slane %v6763_v0, 0 }
 0xbbd   : > { %v3275_v37 = vpop.f32.mrf.mxu2 }
 0xbbe   : > { %v3276_v53 = vadd.f32 %v3275_v37, %v3247_v38  ;;  %v3455_v28 = vpop.f32.mrf.mxu0 }
 0xbbf   : > { %v3481_v20 = vpop.f32.mrf.mxu1 }
 0xbc0   : > { %v3489_v10 = vmax.f32 %v3276_v53, 0.0 }
 0xbc2   : > { %3507 = vrot.lane.b32.xlu0 %v3489_v10, %s8543_s16 }
 0xbc5   : > { %v3278_v34 = vpop.f32.mrf.mxu2 }
 0xbc6   : > { %v3279_v58 = vadd.f32 %v3278_v34, %v3250_v19 }
 0xbc7   : > { %v3484_v43 = vpop.f32.mrf.mxu1 }
 0xbc8   : > { %v3491_v12 = vmax.f32 %v3279_v58, 0.0 }
 0xbcd   : > { %v3281_v6 = vpop.f32.mrf.mxu2 }
 0xbce   : > { %v3282_v38 = vadd.f32 %v3281_v6, %v3253_v5 }
 0xbd0   : > { %v3493_v10 = vmax.f32 %v3282_v38, 0.0 }
 0xbd5   : > { %v3388_v14 = vpop.f32.mrf.mxu2 }
 0xbd6   : > { %v3389_v44 = vadd.f32 %v3388_v14, %v3360_v46  ;;  %v3784_v46 = vperm.slane %v6765_v41, 1  ;;  %v3880_v14 = vperm.slane %v6766_v22, 1 }
 0xbd8   : > { %v3418_v9 = vadd.f32 %v3417_v62, %v3389_v44  ;;  %v3973_v44 = vld [vmem:[%s12733_s1] ss:$8 sm:$0x3] }
 0xbd9   : > { %v3975_v36 = vperm.slane %v3973_v44, 0  ;;  %v3976_v63 = vperm.slane %v3973_v44, 1 }
 0xbda   : > { %v3447_v1 = vadd.f32 %v3446_v35, %v3418_v9  ;;  %v3687_v35 = vperm.slane %v6764_v27, 0 }
 0xbdc   : > { %v3476_v61 = vadd.f32 %v3475_v49, %v3447_v1  ;;  %v3783_v49 = vperm.slane %v6765_v41, 0 }
 0xbdd   : > { %v3391_v50 = vpop.f32.mrf.mxu2 }
 0xbde   : > { %v3488_v16 = vmax.f32 %v3476_v61, 0.0  ;;  %v3392_v47 = vadd.f32 %v3391_v50, %v3363_v26 }
 0xbe0   : > { %v3421_v7 = vadd.f32 %v3420_v18, %v3392_v47  ;;  %3505 = vrot.lane.b32.xlu2 %v3488_v16, %s8543_s16 }
 0xbe2   : > { %v3450_v24 = vadd.f32 %v3449_v57, %v3421_v7 }
 0xbe4   : > { %v3479_v4 = vadd.f32 %v3478_v3, %v3450_v24 }
 0xbe5   : > { %v3394_v39 = vpop.f32.mrf.mxu2 }
 0xbe6   : > { %v3490_v40 = vmax.f32 %v3479_v4, 0.0  ;;  %v3395_v31 = vadd.f32 %v3394_v39, %v3366_v32 }
 0xbe8   : > { %v3424_v56 = vadd.f32 %v3423_v29, %v3395_v31  ;;  %3511 = vrot.lane.b32.xlu2 %v3491_v12, %s8543_s16  ;;  %3509 = vrot.lane.b32.xlu1 %v3490_v40, %s8543_s16 }
 0xbea   : > { %v3453_v37 = vadd.f32 %v3452_v60, %v3424_v56 }
 0xbec   : > { %v3482_v59 = vadd.f32 %v3481_v20, %v3453_v37 }
 0xbed   : > { %v3397_v53 = vpop.f32.mrf.mxu2 }
 0xbee   : > { %v3492_v34 = vmax.f32 %v3482_v59, 0.0  ;;  %v3398_v30 = vadd.f32 %v3397_v53, %v3369_v42 }
 0xbf0   : > { %v3427_v33 = vadd.f32 %v3426_v15, %v3398_v30  ;;  %3513 = vrot.lane.b32.xlu0 %v3492_v34, %s8543_s16  ;;  %3515 = vrot.lane.b32.xlu1 %v3493_v10, %s8543_s16 }
 0xbf2   : > { %v3456_v23 = vadd.f32 %v3455_v28, %v3427_v33 }
 0xbf4   : > { %v3485_v6 = vadd.f32 %v3484_v43, %v3456_v23 }
 0xbf6   : > { %v3494_v62 = vmax.f32 %v3485_v6, 0.0 }
 0xbf8   : > { %3517 = vrot.lane.b32.xlu2 %v3494_v62, %s8543_s16  ;;  %3593 = vrot.lane.b32.xlu0 %v3591_v13, %s8544_s25 }
 0xbf9   : > { %3595 = vrot.lane.b32.xlu1 %v3592_v21, %s8544_s25  ;;  %s13398_s25 = smov 18  }
 0xc00   : > { %3689 = vrot.lane.b32.xlu2 %v3687_v35, %s8546_s20  ;;  %3691 = vrot.lane.b32.xlu0 %v3688_v45, %s8546_s20  ;;  %s13362_s20 = smov 125  }
 0xc01   : > { %3785 = vrot.lane.b32.xlu1 %v3783_v49, %s8548_s2 }
 0xc08   : > { %3787 = vrot.lane.b32.xlu2 %v3784_v46, %s8548_s2  ;;  %3881 = vrot.lane.b32.xlu0 %v3879_v25, %s8547_s18  ;;  %s13367_s2 = smov 112  }
 0xc09   : > { %3883 = vrot.lane.b32.xlu1 %v3880_v14, %s8547_s18  ;;  %s13364_s18 = smov 124  }
 0xc10   : > { %3977 = vrot.lane.b32.xlu2 %v3975_v36, %s8549_s24  ;;  %3979 = vrot.lane.b32.xlu0 %v3976_v63, %s8549_s24  ;;  %s13415_s24 = smov 109  }
 0xc2c   : > { %v3504_v55 = vpop.permute.xlu1 %3503 }
 0xc2d   : > { %3535 = vst.msk [vmem:[#allocation2] sm:$0xff] %vm13349_vm4, %v3504_v55  ;;  %vm13356_vm4 = vmmov %vm13351_vm0 }
 0xc34   : > { %v3508_v9 = vpop.permute.xlu0 %3507  ;;  %v10655_v56 = vld [vmem:[#allocation2] sm:$0xff] }
 0xc35   : > { %3538 = vst.msk [vmem:[#allocation2 + $0x18] sm:$0xff] %vm13350_vm9, %v3508_v9  ;;  %vm13357_vm9 = vmmov %vm13351_vm0 }
 0xc3a   : > { %v3506_v18 = vpop.permute.xlu2 %3505 }
 0xc3b   : > { %v10592_v1 = vsel %vm13351_vm0, %v3504_v55, %v3506_v18  ;;  %3537 = vst.msk [vmem:[#allocation2 + $0x10] sm:$0xff] %vm13352_vm11, %v3506_v18  ;;  %vm13358_vm11 = vmmov %vm13351_vm0 }
 0xc3c   : > { %3536 = vst [vmem:[#allocation2 + $0x8] sm:$0xff] %v10592_v1  ;;  %v10617_v19 = vld [vmem:[#allocation2 + $0x18] sm:$0xff] }
 0xc42   : > { %v3512_v11 = vpop.permute.xlu2 %3511  ;;  %v10621_v51 = vld [vmem:[#allocation2 + $0x10] sm:$0xff] }
 0xc43   : > { %3541 = vst.msk [vmem:[#allocation2 + $0x30] sm:$0xff] %vm13353_vm10, %v3512_v11  ;;  %vm13359_vm10 = vmmov %vm13351_vm0  ;;  %vm13363_vm0 = vcmask 23552  }
 0xc52   : > { %v3518_v57 = vpop.permute.xlu2 %3517 }
 0xc53   : > { %3546 = vst.msk [vmem:[#allocation2 + $0x58] sm:$0xff] %vm13354_vm2, %v3518_v57  ;;  %vm13360_vm2 = vcmask 1047824  }
 0xc5a   : > { %v3510_v52 = vpop.permute.xlu1 %3509  ;;  %v10613_v16 = vpop.permute.xlu2 %3689 }
 0xc5b   : > { %v10599_v26 = vsel %vm13355_vm1, %v3508_v9, %v3510_v52  ;;  %3540 = vst.msk [vmem:[#allocation2 + $0x28] sm:$0xff] %vm13356_vm4, %v3510_v52  ;;  %v3700_v4 = vmul.f32 %v10613_v16, %v10617_v19  ;;  %vm13361_vm1 = vcmask 15360   ;;  %v3697_v37 = vmul.f32 %v10613_v16, %v10655_v56 }
 0xc5c   : > { %3539 = vst [vmem:[#allocation2 + $0x20] sm:$0xff] %v10599_v26  ;;  %vm13365_vm4 = vcmask 130048  }
 0xc62   : > { %v3514_v8 = vpop.permute.xlu0 %3513  ;;  %v3516_v50 = vpop.permute.xlu1 %3515  ;;  %v10703_v45 = vld [vmem:[#allocation2 + $0x28] sm:$0xff] }
 0xc63   : > { %v10604_v61 = vsel %vm13357_vm9, %v3512_v11, %v3514_v8  ;;  %3543 = vst.msk [vmem:[#allocation2 + $0x40] sm:$0xff] %vm13358_vm11, %v3514_v8  ;;  %v10609_v3 = vsel %vm13359_vm10, %v3516_v50, %v3518_v57  ;;  %v10628_v29 = vpop.permute.xlu2 %3787  ;;  %vm13366_vm9 = vcmask 7168   ;;  %vm13368_vm11 = vcmask 31744  }
 0xc64   : > { %3542 = vst [vmem:[#allocation2 + $0x38] sm:$0xff] %v10604_v61  ;;  %v3795_v39 = vmul.f32 %v10628_v29, %v10621_v51  ;;  %vm13381_vm10 = vcmask 1022976  }
 0xc65   : > { %3544 = vst.msk [vmem:[#allocation2 + $0x48] sm:$0xff] %vm13360_vm2, %v3516_v50  ;;  %vm13382_vm2 = vmmov %vm13381_vm10 }
 0xc66   : > { %3545 = vst [vmem:[#allocation2 + $0x50] sm:$0xff] %v10609_v3 }
 0xc6a   : > { %v10615_v47 = vpop.permute.xlu0 %3593  ;;  %v10717_v55 = vld [vmem:[#allocation2 + $0x40] sm:$0xff] }
 0xc6b   : > { %v10619_v54 = vpop.permute.xlu1 %3595  ;;  %v3604_v7 = vmul.f32 %v10615_v47, %v10617_v19  ;;  %v10668_v10 = vpop.permute.xlu2 %3977  ;;  %v3601_v41 = vmul.f32 %v10655_v56, %v10615_v47 }
 0xc6c   : > { %v3603_v58 = vmul.f32 %v10619_v54, %v10621_v51  ;;  %v3988_v0 = vmul.f32 %v10668_v10, %v10617_v19  ;;  %v3985_v23 = vmul.f32 %v10668_v10, %v10655_v56  ;;  %v10694_v21 = vsel %vm13366_vm9, %v10615_v47, %v10619_v54  ;;  %v10719_v9 = vld [vmem:[#allocation2 + $0x48] sm:$0xff] }
 0xc6d   : > { %v3602_v35 = vmul.f32 %v10694_v21, %v10592_v1  ;;  %v3605_v46 = vmul.f32 %v10694_v21, %v10599_v26  ;;  %v3606_v25 = vmul.f32 %v10703_v45, %v10619_v54  ;;  %v3609_v57 = vmul.f32 %v10619_v54, %v10717_v55 }
 0xc6e   : > { %v7643_v24 = vpack.i.bf16 %v3604_v7, %v3603_v58  ;;  %v3610_v52 = vmul.f32 %v10615_v47, %v10719_v9 }
 0xc6f   : > { %v7668_v14 = vpack.i.bf16 %v3602_v35, %v3601_v41  ;;  %v7693_v63 = vpack.i.bf16 %v3606_v25, %v3605_v46  ;;  %v3611_v35 = vmul.f32 %v10694_v21, %v10609_v3 }
 0xc70   : > { %7644 = vrot.lane.b32.xlu0 %v7643_v24, %s8552_s17  ;;  %v7713_v58 = vpack.i.bf16 %v3610_v52, %v3609_v57 }
 0xc72   : > { %v10630_v48 = vpop.permute.xlu0 %3691 }
 0xc73   : > { %v10632_v32 = vpop.permute.xlu1 %3785  ;;  %v3699_v17 = vmul.f32 %v10630_v48, %v10621_v51  ;;  %v10645_v31 = vsel %vm13361_vm1, %v10613_v16, %v10630_v48  ;;  %v3702_v22 = vmul.f32 %v10630_v48, %v10703_v45  ;;  %vm13383_vm1 = vmmov %vm13382_vm2 }
 0xc74   : > { %v3796_v60 = vmul.f32 %v10632_v32, %v10617_v19  ;;  %v3698_v5 = vmul.f32 %v10645_v31, %v10592_v1  ;;  %v10666_v15 = vsel %vm13363_vm0, %v10632_v32, %v10628_v29  ;;  %v3793_v30 = vmul.f32 %v10632_v32, %v10655_v56  ;;  %vm13384_vm0 = vmmov %vm13383_vm1 }
 0xc75   : > { %v7648_v12 = vpack.i.bf16 %v3700_v4, %v3699_v17  ;;  %v3794_v28 = vmul.f32 %v10666_v15, %v10592_v1  ;;  %v3701_v49 = vmul.f32 %v10645_v31, %v10599_v26  ;;  %v3797_v17 = vmul.f32 %v10666_v15, %v10599_v26 }
 0xc76   : > { %v7653_v40 = vpack.i.bf16 %v3796_v60, %v3795_v39  ;;  %v7673_v59 = vpack.i.bf16 %v3698_v5, %v3697_v37  ;;  %v3802_v60 = vmul.f32 %v10632_v32, %v10719_v9 }
 0xc77   : > { %7649 = vrot.lane.b32.xlu2 %v7648_v12, %s8551_s22  ;;  %v7678_v62 = vpack.i.bf16 %v3794_v28, %v3793_v30  ;;  %v7698_v36 = vpack.i.bf16 %v3702_v22, %v3701_v49  ;;  %v3798_v12 = vmul.f32 %v10628_v29, %v10703_v45  ;;  %v3800_v30 = vmul.f32 %v10666_v15, %v10604_v61 }
 0xc78   : > { %7654 = vrot.lane.b32.xlu1 %v7653_v40, %s13362_s20  ;;  %v3801_v40 = vmul.f32 %v10628_v29, %v10717_v55  ;;  %v3704_v28 = vmul.f32 %v10645_v31, %v10604_v61 }
 0xc79   : > { %v7703_v5 = vpack.i.bf16 %v3798_v12, %v3797_v17 }
 0xc7a   : > { %v10649_v20 = vpop.permute.xlu0 %3881  ;;  %v7723_v37 = vpack.i.bf16 %v3802_v60, %v3801_v40 }
 0xc7b   : > { %v10653_v2 = vpop.permute.xlu1 %3883  ;;  %v3892_v38 = vmul.f32 %v10649_v20, %v10617_v19  ;;  %v3889_v18 = vmul.f32 %v10649_v20, %v10655_v56  ;;  %v3898_v39 = vmul.f32 %v10649_v20, %v10719_v9 }
 0xc7c   : > { %v3891_v42 = vmul.f32 %v10653_v2, %v10621_v51  ;;  %v3885_v44 = vsel %vm13368_vm11, %v10649_v20, %v10653_v2  ;;  %v3894_v50 = vmul.f32 %v10653_v2, %v10703_v45  ;;  %v3897_v4 = vmul.f32 %v10653_v2, %v10717_v55 }
 0xc7d   : > { %v3890_v11 = vmul.f32 %v3885_v44, %v10592_v1  ;;  %v3893_v8 = vmul.f32 %v3885_v44, %v10599_v26 }
 0xc7e   : > { %v7658_v53 = vpack.i.bf16 %v3892_v38, %v3891_v42  ;;  %v7728_v38 = vpack.i.bf16 %v3898_v39, %v3897_v4  ;;  %v10751_v42 = vld [vmem:[#allocation2 + $0x30] sm:$0xff] }
 0xc7f   : > { %v7683_v7 = vpack.i.bf16 %v3890_v11, %v3889_v18  ;;  %v7708_v24 = vpack.i.bf16 %v3894_v50, %v3893_v8  ;;  %v3991_v52 = vmul.f32 %v10668_v10, %v10751_v42 }
 0xc80   : > { %7674 = vrot.lane.b32.xlu1 %v7673_v59, %s8551_s22  ;;  %7659 = vrot.lane.b32.xlu0 %v7658_v53, %s13364_s18  ;;  %v3705_v59 = vmul.f32 %v10630_v48, %v10717_v55  ;;  %v3799_v53 = vmul.f32 %v10632_v32, %v10751_v42  ;;  %v10768_v32 = vld [vmem:[#allocation2 + $0x58] sm:$0xff] }
 0xc81   : > { %v3708_v41 = vmul.f32 %v10630_v48, %v10768_v32  ;;  %v3612_v49 = vmul.f32 %v10768_v32, %v10619_v54  ;;  %v3896_v48 = vmul.f32 %v3885_v44, %v10604_v61  ;;  %v3804_v57 = vmul.f32 %v10628_v29, %v10768_v32 }
 0xc82   : > { %v10672_v34 = vpop.permute.xlu0 %3979  ;;  %v3994_v29 = vmul.f32 %v10668_v10, %v10719_v9 }
 0xc83   : > { %v10681_v33 = vsel %vm13365_vm4, %v10668_v10, %v10672_v34  ;;  %v3987_v43 = vmul.f32 %v10672_v34, %v10621_v51  ;;  %v7753_v25 = vpack.i.bf16 %v3612_v49, %v3611_v35  ;;  %v3990_v54 = vmul.f32 %v10672_v34, %v10703_v45 }
 0xc84   : > { %v3986_v6 = vmul.f32 %v10681_v33, %v10592_v1  ;;  %v3995_v11 = vmul.f32 %v10681_v33, %v10609_v3  ;;  %vm13385_vm4 = vcmask 1031168  }
 0xc85   : > { %v7663_v13 = vpack.i.bf16 %v3988_v0, %v3987_v43  ;;  %v3706_v43 = vmul.f32 %v10613_v16, %v10719_v9  ;;  %v3703_v0 = vmul.f32 %v10751_v42, %v10613_v16  ;;  %v3707_v16 = vmul.f32 %v10645_v31, %v10609_v3  ;;  %vm13386_vm9 = vmmov %vm13385_vm4 }
 0xc86   : > { %v7688_v27 = vpack.i.bf16 %v3986_v6, %v3985_v23  ;;  %v7743_v6 = vpack.i.bf16 %v3800_v30, %v3799_v53  ;;  %v3989_v31 = vmul.f32 %v10681_v33, %v10599_v26  ;;  %vm13387_vm11 = vmmov %vm13385_vm4 }
 0xc87   : > { %7664 = vrot.lane.b32.xlu2 %v7663_v13, %s13367_s2  ;;  %v7718_v23 = vpack.i.bf16 %v3706_v43, %v3705_v59  ;;  %v7738_v13 = vpack.i.bf16 %v3704_v28, %v3703_v0  ;;  %v7758_v46 = vpack.i.bf16 %v3708_v41, %v3707_v16 }
 0xc88   : > { %7679 = vrot.lane.b32.xlu0 %v7678_v62, %s13362_s20  ;;  %7689 = vrot.lane.b32.xlu1 %v7688_v27, %s13367_s2  ;;  %v3607_v62 = vmul.f32 %v10751_v42, %v10615_v47  ;;  %v3608_v27 = vmul.f32 %v10694_v21, %v10604_v61  ;;  %v3895_v47 = vmul.f32 %v10649_v20, %v10751_v42 }
 0xc89   : > { %v3899_v21 = vmul.f32 %v3885_v44, %v10609_v3  ;;  %v3803_v20 = vmul.f32 %v10666_v15, %v10609_v3  ;;  %v3996_v44 = vmul.f32 %v10672_v34, %v10768_v32  ;;  %v3993_v15 = vmul.f32 %v10672_v34, %v10717_v55 }
 0xc8a   : > { %v7733_v22 = vpack.i.bf16 %v3608_v27, %v3607_v62 }
 0xc8b   : > { %v7768_v8 = vpack.i.bf16 %v3804_v57, %v3803_v20  ;;  %v7788_v50 = vpack.i.bf16 %v3996_v44, %v3995_v11 }
 0xc8f   : > { %7669 = vrot.lane.b32.xlu2 %v7668_v14, %s8552_s17  ;;  %v3900_v14 = vmul.f32 %v10653_v2, %v10768_v32  ;;  %v3992_v2 = vmul.f32 %v10681_v33, %v10604_v61  ;;  %v6767_v33 = vld [vmem:[%s12733_s1 + $0x1] ss:$8 sm:$0x3] }
 0xc90   : > { %7699 = vrot.lane.b32.xlu0 %v7698_v36, %s8551_s22  ;;  %7694 = vrot.lane.b32.xlu1 %v7693_v63, %s8552_s17  ;;  %v7748_v36 = vpack.i.bf16 %v3896_v48, %v3895_v47  ;;  %v7763_v63 = vpack.i.bf16 %v3990_v54, %v3989_v31  ;;  %v4072_v17 = vperm.slane %v6767_v33, 1 }
 0xc91   : > { %v7773_v18 = vpack.i.bf16 %v3900_v14, %v3899_v21 }
 0xc97   : > { %7684 = vrot.lane.b32.xlu2 %v7683_v7, %s13364_s18  ;;  %v7778_v7 = vpack.i.bf16 %v3992_v2, %v3991_v52 }
 0xc98   : > { %7714 = vrot.lane.b32.xlu0 %v7713_v58, %s8552_s17  ;;  %7709 = vrot.lane.b32.xlu1 %v7708_v24, %s13364_s18  ;;  %v4071_v58 = vperm.slane %v6767_v33, 0  ;;  %v7783_v24 = vpack.i.bf16 %v3994_v29, %v3993_v15 }
 0xc9f   : > { %7704 = vrot.lane.b32.xlu2 %v7703_v5, %s13362_s20 }
 0xca0   : > { %7729 = vrot.lane.b32.xlu0 %v7728_v38, %s13364_s18  ;;  %7724 = vrot.lane.b32.xlu1 %v7723_v37, %s13362_s20 }
 0xca7   : > { %7719 = vrot.lane.b32.xlu2 %v7718_v23, %s8551_s22 }
 0xca8   : > { %7744 = vrot.lane.b32.xlu0 %v7743_v6, %s13362_s20  ;;  %7739 = vrot.lane.b32.xlu1 %v7738_v13, %s8551_s22 }
 0xcaf   : > { %7734 = vrot.lane.b32.xlu2 %v7733_v22, %s8552_s17 }
 0xcb0   : > { %7759 = vrot.lane.b32.xlu0 %v7758_v46, %s8551_s22  ;;  %7754 = vrot.lane.b32.xlu1 %v7753_v25, %s8552_s17  ;;  %s13369_s17 = smov 17   ;;  %s13462_s22 = smov 67  }
 0xcb7   : > { %7749 = vrot.lane.b32.xlu2 %v7748_v36, %s13364_s18 }
 0xcb8   : > { %7764 = vrot.lane.b32.xlu0 %v7763_v63, %s13367_s2  ;;  %7774 = vrot.lane.b32.xlu1 %v7773_v18, %s13364_s18  ;;  %s13429_s18 = smov 33  }
 0xcbf   : > { %7769 = vrot.lane.b32.xlu2 %v7768_v8, %s13362_s20  ;;  %s13486_s20 = smov 76  }
 0xcc0   : > { %7789 = vrot.lane.b32.xlu0 %v7788_v50, %s13367_s2  ;;  %7779 = vrot.lane.b32.xlu1 %v7778_v7, %s13367_s2 }
 0xcc7   : > { %7784 = vrot.lane.b32.xlu2 %v7783_v24, %s13367_s2  ;;  %s13407_s2 = smov 19  }
 0xcc8   : > { %4073 = vrot.lane.b32.xlu1 %v4071_v58, %s13369_s17 }
 0xccf   : > { %4075 = vrot.lane.b32.xlu2 %v4072_v17, %s13369_s17  ;;  %s13492_s17 = smov 77  }
 0xcd1   : > { %v10823_v4 = vpop.permute.xlu2 %7649 }
 0xcd2   : > { %v7652_v8 = vunpack.i.h.bf16 %v10823_v4 }
 0xce1   : > { %v10825_v39 = vpop.permute.xlu2 %7664 }
 0xce2   : > { %13370 = vst [vmem:[#allocation14_spill] sm:$0xff] %v10825_v39  ;;  %v10829_v60 = vpop.permute.xlu0 %7644 }
 0xce3   : > { %13372 = vst [vmem:[#allocation38_spill] sm:$0xff] %v10829_v60 }
 0xce9   : > { %v10827_v34 = vpop.permute.xlu2 %7669 }
 0xcea   : > { %13371 = vst [vmem:[#allocation19_spill] sm:$0xff] %v10827_v34  ;;  %v10831_v12 = vpop.permute.xlu1 %7654 }
 0xceb   : > { %v7657_v48 = vunpack.i.h.bf16 %v10831_v12 }
 0xcf1   : > { %v10833_v10 = vpop.permute.xlu2 %7684 }
 0xcf2   : > { %13373 = vst [vmem:[#allocation37_spill] sm:$0xff] %v10833_v10  ;;  %v10835_v40 = vpop.permute.xlu0 %7659  ;;  %v10837_v5 = vpop.permute.xlu1 %7674 }
 0xcf3   : > { %13374 = vst [vmem:[#allocation35_spill] sm:$0xff] %v10835_v40  ;;  %v12995_v50 = vunpack.i.h.bf16 %v10837_v5  ;;  %v7676_v7 = vunpack.i.l.bf16 %v10837_v5 }
 0xcf9   : > { %v10839_v38 = vpop.permute.xlu2 %7704 }
 0xcfa   : > { %v10841_v37 = vpop.permute.xlu0 %7679  ;;  %v10843_v59 = vpop.permute.xlu1 %7689  ;;  %v13000_v25 = vunpack.i.l.bf16 %v10839_v38 }
 0xcfb   : > { %13375 = vst [vmem:[#allocation39_spill] sm:$0xff] %v10843_v59  ;;  %v12999_v31 = vunpack.i.h.bf16 %v10841_v37  ;;  %v7681_v54 = vunpack.i.l.bf16 %v10841_v37 }
 0xcfc   : > { %v3843_v14 = vsel %vm13383_vm1, %v7657_v48, %v13000_v25 }
 0xcfd   : > { %v3841_v18 = vsel %vm13384_vm0, %v7681_v54, %v12999_v31 }
 0xd01   : > { %v10845_v53 = vpop.permute.xlu2 %7719 }
 0xd02   : > { %v10847_v30 = vpop.permute.xlu0 %7699  ;;  %v10849_v28 = vpop.permute.xlu1 %7694  ;;  %v7722_v20 = vunpack.i.h.bf16 %v10845_v53 }
 0xd03   : > { %v12996_v57 = vunpack.i.l.bf16 %v10847_v30 }
 0xd05   : > { %v3747_v29 = vsel %vm13387_vm11, %v7652_v8, %v12996_v57  ;;  %vm13405_vm11 = vcmask 146432  }
 0xd09   : > { %v10851_v43 = vpop.permute.xlu2 %7734 }
 0xd0a   : > { %13376 = vst [vmem:[#allocation33_spill] sm:$0xff] %v10851_v43  ;;  %v10853_v0 = vpop.permute.xlu0 %7714  ;;  %v10855_v23 = vpop.permute.xlu1 %7709  ;;  %v12993_v17 = vunpack.i.h.bf16 %v10851_v43 }
 0xd0b   : > { %13377 = vst [vmem:[#allocation34_spill] sm:$0xff] %v10853_v0  ;;  %v7717_v24 = vunpack.i.h.bf16 %v10853_v0 }
 0xd0c   : > { %13378 = vst [vmem:[#allocation29_spill] sm:$0xff] %v10855_v23 }
 0xd11   : > { %v10857_v6 = vpop.permute.xlu2 %7749 }
 0xd12   : > { %13379 = vst [vmem:[#allocation36_spill] sm:$0xff] %v10857_v6  ;;  %v10859_v13 = vpop.permute.xlu0 %7729  ;;  %v10861_v62 = vpop.permute.xlu1 %7724 }
 0xd13   : > { %13380 = vst [vmem:[#allocation32_spill] sm:$0xff] %v10859_v13  ;;  %v7727_v16 = vunpack.i.h.bf16 %v10861_v62 }
 0xd19   : > { %v10863_v27 = vpop.permute.xlu2 %7769 }
 0xd1a   : > { %v10866_v41 = vpop.permute.xlu0 %7744  ;;  %v13002_v35 = vunpack.i.l.bf16 %v10863_v27  ;;  %v10869_v49 = vpop.permute.xlu1 %7739 }
 0xd1b   : > { %v13001_v22 = vunpack.i.h.bf16 %v10866_v41  ;;  %v7746_v46 = vunpack.i.l.bf16 %v10866_v41  ;;  %v12997_v11 = vunpack.i.h.bf16 %v10869_v49  ;;  %v7741_v44 = vunpack.i.l.bf16 %v10869_v49 }
 0xd1c   : > { %v3847_v47 = vsel %vm13381_vm10, %v7727_v16, %v13002_v35  ;;  %v7736_v16 = vunpack.i.l.bf16 %v10851_v43  ;;  %vm13389_vm10 = vmmov %vm13385_vm4 }
 0xd1d   : > { %6145 = vmatpush.msrb.mxu2 %v3847_v47  ;;  %v3845_v21 = vsel %vm13382_vm2, %v7746_v46, %v13001_v22  ;;  %v3749_v15 = vsel %vm13386_vm9, %v7741_v44, %v12997_v11  ;;  %v3745_v46 = vsel %vm13389_vm10, %v7676_v7, %v12995_v50  ;;  %v12992_v47 = vunpack.i.l.bf16 %v10849_v28  ;;  %v3555_v44 = vld [vmem:[%s12733_s1] ss:$8 sm:$0x3] }
 0xd1e   : > { %vm13390_vm2 = vcmask 1039360   ;;  %v3557_v7 = vperm.slane %v3555_v44, 0  ;;  %vm13396_vm9 = vcmask 138240   ;;  %vm13414_vm10 = vcmask 154624  }
 0xd1f   : > { %6146 = vmatpush.msrb.mxu2 %v3845_v21  ;;  %v7647_v21 = vunpack.i.h.bf16 %v10829_v60  ;;  %vm13392_vm1 = vmmov %vm13390_vm2 }
 0xd20   : > { %vm13393_vm0 = vmmov %vm13392_vm1 }
 0xd21   : > { %6147 = vmatpush.msrb.mxu2 %v3843_v14  ;;  %v10923_v54 = vpop.permute.xlu2 %7784  ;;  %v12991_v14 = vunpack.i.h.bf16 %v10827_v34 }
 0xd22   : > { %v10886_v36 = vpop.permute.xlu0 %7759  ;;  %v10888_v63 = vpop.permute.xlu1 %7754  ;;  %13391 = vst [vmem:[#allocation28_spill] sm:$0xff] %v10923_v54 }
 0xd23   : > { %v12998_v2 = vunpack.i.l.bf16 %v10886_v36  ;;  %6148 = vmatpush.msrb.mxu2 %v3841_v18  ;;  %v12994_v33 = vunpack.i.l.bf16 %v10888_v63  ;;  %v7671_v18 = vunpack.i.l.bf16 %v10827_v34 }
 0xd25   : > { %v3751_v52 = vsel %vm13385_vm4, %v7722_v20, %v12998_v2  ;;  %v3655_v48 = vsel %vm13390_vm2, %v7717_v24, %v12994_v33  ;;  %v3653_v20 = vsel %vm13392_vm1, %v7736_v16, %v12993_v17  ;;  %vm13395_vm4 = vmmov %vm13393_vm0  ;;  %v3565_v24 = vmul.f32 %v10751_v42, %v3557_v7 }
 0xd26   : > { %6149 = vmatpush.msrb.mxu2 %v3751_v52  ;;  %v3651_v52 = vsel %vm13393_vm0, %v7647_v21, %v12992_v47  ;;  %v3561_v21 = vmul.f32 %v10655_v56, %v3557_v7  ;;  %vm13421_vm2 = vcmask 162816   ;;  %vm13434_vm1 = vcmask 269312  }
 0xd27   : > { %vm13441_vm0 = vcmask 277504  }
 0xd28   : > { %6150 = vmatpush.msrb.mxu2 %v3749_v15  ;;  %v3649_v15 = vsel %vm13395_vm4, %v7671_v18, %v12991_v14  ;;  %vm13451_vm4 = vcmask 769024  }
 0xd29   : > { %v4076_v16 = vpop.permute.xlu2 %4075 }
 0xd2a   : > { %6151 = vmatpush.msrb.mxu2 %v3747_v29  ;;  %v10911_v58 = vpop.permute.xlu1 %7774  ;;  %v3567_v29 = vmul.f32 %v10719_v9, %v3557_v7  ;;  %v4083_v44 = vmul.f32 %v4076_v16, %v10621_v51  ;;  %v4089_v50 = vmul.f32 %v4076_v16, %v10717_v55 }
 0xd2b   : > { %13388 = vst [vmem:[#allocation27_spill] sm:$0xff] %v10911_v58 }
 0xd2c   : > { %6152 = vmatpush.msrb.mxu2 %v3745_v46  ;;  %v3563_v46 = vmul.f32 %v10617_v19, %v3557_v7 }
 0xd2e   : > { %6153 = vmatpush.msrb.mxu2 %v3655_v48 }
 0xd30   : > { %6154 = vmatpush.msrb.mxu2 %v3653_v20 }
 0xd32   : > { %6155 = vmatpush.msrb.mxu2 %v3651_v52  ;;  %v10937_v8 = vpop.permute.xlu1 %7779 }
 0xd33   : > { %13394 = vst [vmem:[#allocation23_spill] sm:$0xff] %v10937_v8 }
 0xd34   : > { %6156 = vmatpush.msrb.mxu2 %v3649_v15 }
 0xd36   : > { %6157 = vmatpush.msrb.mxu2 %v3567_v29  ;;  %v4086_v29 = vmul.f32 %v4076_v16, %v10703_v45 }
 0xd38   : > { %6158 = vmatpush.msrb.mxu2 %v3565_v24 }
 0xd3a   : > { %6159 = vmatpush.msrb.mxu2 %v3563_v46  ;;  %v4074_v48 = vpop.permute.xlu1 %4073 }
 0xd3b   : > { %v4077_v20 = vsel %vm13396_vm9, %v4074_v48, %v4076_v16  ;;  %v4084_v18 = vmul.f32 %v4074_v48, %v10617_v19  ;;  %v4081_v52 = vmul.f32 %v4074_v48, %v10655_v56  ;;  %v4090_v7 = vmul.f32 %v4074_v48, %v10719_v9  ;;  %vm13453_vm9 = vmmov %vm13451_vm4 }
 0xd3c   : > { %6160 = vmatpush.msrb.mxu2 %v3561_v21  ;;  %v4085_v15 = vmul.f32 %v4077_v20, %v10599_v26  ;;  %v4082_v24 = vmul.f32 %v4077_v20, %v10592_v1  ;;  %v4091_v17 = vmul.f32 %v4077_v20, %v10609_v3  ;;  %v4087_v21 = vmul.f32 %v4074_v48, %v10751_v42 }
 0xd3d   : > { %v7798_v14 = vpack.i.bf16 %v4084_v18, %v4083_v44  ;;  %v4088_v33 = vmul.f32 %v4077_v20, %v10604_v61  ;;  %v4092_v44 = vmul.f32 %v4076_v16, %v10768_v32  ;;  %v7813_v18 = vpack.i.bf16 %v4090_v7, %v4089_v50  ;;  %v10970_v16 = vpop.permute.xlu0 %7764 }
 0xd3e   : > { %v7803_v46 = vpack.i.bf16 %v4086_v29, %v4085_v15  ;;  %v7793_v47 = vpack.i.bf16 %v4082_v24, %v4081_v52  ;;  %13399 = vst [vmem:[#allocation26_spill] sm:$0xff] %v10970_v16 }
 0xd3f   : > { %7799 = vrot.lane.b32.xlu1 %v7798_v14, %s13397_s21  ;;  %v7818_v52 = vpack.i.bf16 %v4092_v44, %v4091_v17  ;;  %v7808_v15 = vpack.i.bf16 %v4088_v33, %v4087_v21 }
 0xd40   : > { %7804 = vrot.lane.b32.xlu2 %v7803_v46, %s13397_s21  ;;  %7794 = vrot.lane.b32.xlu0 %v7793_v47, %s13397_s21  ;;  %v6768_v47 = vld [vmem:[%s12733_s1 + $0x2] ss:$8 sm:$0x3] }
 0xd41   : > { %v4168_v14 = vperm.slane %v6768_v47, 1  ;;  %v4167_v48 = vperm.slane %v6768_v47, 0 }
 0xd45   : > { %v10972_v50 = vpop.permute.xlu0 %7789 }
 0xd46   : > { %13400 = vst [vmem:[#allocation18_spill] sm:$0xff] %v10972_v50 }
 0xd47   : > { %7814 = vrot.lane.b32.xlu1 %v7813_v18, %s13397_s21 }
 0xd48   : > { %7819 = vrot.lane.b32.xlu2 %v7818_v52, %s13397_s21  ;;  %7809 = vrot.lane.b32.xlu0 %v7808_v15, %s13397_s21  ;;  %s13459_s21 = smov 93  }
 0xd4f   : > { %4171 = vrot.lane.b32.xlu1 %v4168_v14, %s13398_s25 }
 0xd50   : > { %4169 = vrot.lane.b32.xlu0 %v4167_v48, %s13398_s25  ;;  %s13428_s25 = smov 96  }
 0xdb1   : > { %v10974_v33 = vpop.permute.xlu1 %7799 }
 0xdb2   : > { %13401 = vst [vmem:[#allocation21_spill] sm:$0xff] %v10974_v33  ;;  %v10976_v17 = vpop.permute.xlu0 %7794 }
 0xdb3   : > { %13402 = vst [vmem:[#allocation25_spill] sm:$0xff] %v10976_v17 }
 0xdb9   : > { %v10978_v20 = vpop.permute.xlu1 %7814 }
 0xdba   : > { %13403 = vst [vmem:[#allocation17_spill] sm:$0xff] %v10978_v20  ;;  %v10980_v29 = vpop.permute.xlu0 %7809 }
 0xdbb   : > { %13404 = vst [vmem:[#allocation22_spill] sm:$0xff] %v10980_v29 }
 0xdc1   : > { %v4172_v24 = vpop.permute.xlu1 %4171 }
 0xdc2   : > { %v4170_v46 = vpop.permute.xlu0 %4169  ;;  %v4179_v7 = vmul.f32 %v4172_v24, %v10621_v51  ;;  %v4182_v15 = vmul.f32 %v4172_v24, %v10703_v45  ;;  %v4185_v11 = vmul.f32 %v4172_v24, %v10717_v55 }
 0xdc3   : > { %v4173_v21 = vsel %vm13405_vm11, %v4170_v46, %v4172_v24  ;;  %v4180_v44 = vmul.f32 %v4170_v46, %v10617_v19  ;;  %v4177_v18 = vmul.f32 %v4170_v46, %v10655_v56  ;;  %v4186_v2 = vmul.f32 %v4170_v46, %v10719_v9  ;;  %vm13454_vm11 = vmmov %vm13451_vm4 }
 0xdc4   : > { %v4181_v52 = vmul.f32 %v4173_v21, %v10599_v26  ;;  %v4178_v47 = vmul.f32 %v4173_v21, %v10592_v1  ;;  %v4187_v31 = vmul.f32 %v4173_v21, %v10609_v3  ;;  %v4183_v25 = vmul.f32 %v4170_v46, %v10751_v42 }
 0xdc5   : > { %v7828_v14 = vpack.i.bf16 %v4180_v44, %v4179_v7  ;;  %v4184_v22 = vmul.f32 %v4173_v21, %v10604_v61  ;;  %v4188_v7 = vmul.f32 %v4172_v24, %v10768_v32  ;;  %v7843_v44 = vpack.i.bf16 %v4186_v2, %v4185_v11  ;;  %v11006_v24 = vpop.permute.xlu2 %7804 }
 0xdc6   : > { %v7833_v48 = vpack.i.bf16 %v4182_v15, %v4181_v52  ;;  %v7823_v57 = vpack.i.bf16 %v4178_v47, %v4177_v18  ;;  %13408 = vst [vmem:[#allocation24_spill] sm:$0xff] %v11006_v24 }
 0xdc7   : > { %7829 = vrot.lane.b32.xlu0 %v7828_v14, %s13406_s23  ;;  %v7848_v18 = vpack.i.bf16 %v4188_v7, %v4187_v31  ;;  %v7838_v52 = vpack.i.bf16 %v4184_v22, %v4183_v25 }
 0xdc8   : > { %7834 = vrot.lane.b32.xlu1 %v7833_v48, %s13406_s23  ;;  %7824 = vrot.lane.b32.xlu2 %v7823_v57, %s13406_s23  ;;  %v6769_v57 = vld [vmem:[%s12733_s1 + $0x3] ss:$8 sm:$0x3] }
 0xdc9   : > { %v4264_v15 = vperm.slane %v6769_v57, 1  ;;  %v4263_v47 = vperm.slane %v6769_v57, 0 }
 0xdcd   : > { %v11008_v31 = vpop.permute.xlu2 %7819 }
 0xdce   : > { %13409 = vst [vmem:[#allocation16_spill] sm:$0xff] %v11008_v31 }
 0xdcf   : > { %7844 = vrot.lane.b32.xlu0 %v7843_v44, %s13406_s23 }
 0xdd0   : > { %7849 = vrot.lane.b32.xlu1 %v7848_v18, %s13406_s23  ;;  %7839 = vrot.lane.b32.xlu2 %v7838_v52, %s13406_s23  ;;  %s13465_s23 = smov 65  }
 0xdd7   : > { %4267 = vrot.lane.b32.xlu0 %v4264_v15, %s13407_s2 }
 0xdd8   : > { %4265 = vrot.lane.b32.xlu2 %v4263_v47, %s13407_s2  ;;  %s13435_s2 = smov 95  }
 0xe22   : > { %v7825_v22 = vpop.permute.xlu2 %7824 }
 0xe23   : > { %v7827_v11 = vunpack.i.h.bf16 %v7825_v22 }
 0xe2a   : > { %v7840_v7 = vpop.permute.xlu2 %7839 }
 0xe2b   : > { %v7842_v52 = vunpack.i.h.bf16 %v7840_v7  ;;  %v7841_v35 = vunpack.i.l.bf16 %v7840_v7  ;;  %v7817_v7 = vunpack.i.h.bf16 %v10978_v20 }
 0xe39   : > { %v7830_v25 = vpop.permute.xlu0 %7829 }
 0xe3a   : > { %v7831_v2 = vunpack.i.l.bf16 %v7830_v25  ;;  %v7835_v46 = vpop.permute.xlu1 %7834 }
 0xe3b   : > { %v7837_v21 = vunpack.i.h.bf16 %v7835_v46  ;;  %v7836_v14 = vunpack.i.l.bf16 %v7835_v46  ;;  %v7832_v46 = vunpack.i.h.bf16 %v7830_v25 }
 0xe3c   : > { %v11011_v48 = vsel %vm1129_vm13, %v7827_v11, %v7831_v2 }
 0xe3d   : > { %13410 = vst [vmem:[#allocation20_spill] sm:$0xff] %v11011_v48  ;;  %v11014_v44 = vsel %vm1129_vm13, %v7836_v14, %v7837_v21  ;;  %v7826_v21 = vunpack.i.l.bf16 %v7825_v22  ;;  %v4266_v48 = vpop.permute.xlu2 %4265  ;;  %v4227_v25 = vsel %vm1129_vm13, %v7832_v46, %v7836_v14  ;;  %v7802_v14 = vunpack.i.h.bf16 %v10974_v33 }
 0xe3e   : > { %13411 = vst [vmem:[#allocation31_spill] sm:$0xff] %v11014_v44  ;;  %v4229_v44 = vsel %vm1129_vm13, %v7841_v35, %v7842_v52 }
 0xe41   : > { %v7845_v18 = vpop.permute.xlu0 %7844 }
 0xe42   : > { %v7847_v57 = vunpack.i.h.bf16 %v7845_v18  ;;  %v7846_v15 = vunpack.i.l.bf16 %v7845_v18  ;;  %v11016_v47 = vpop.permute.xlu1 %7849  ;;  %v13019_v18 = vunpack.i.l.bf16 %v11008_v31 }
 0xe43   : > { %13412 = vst [vmem:[#allocation15_spill] sm:$0xff] %v11016_v47  ;;  %v13008_v34 = vunpack.i.l.bf16 %v11016_v47  ;;  %v4276_v47 = vmul.f32 %v4266_v48, %v10617_v19 }
 0xe44   : > { %v11020_v60 = vsel %vm1129_vm13, %v7842_v52, %v7846_v15  ;;  %v7811_v15 = vunpack.i.l.bf16 %v10980_v29  ;;  %v4225_v52 = vsel %vm1129_vm13, %v7826_v21, %v7827_v11  ;;  %v4135_v19 = vsel %vm1031_vm15, %v7817_v7, %v13019_v18 }
 0xe45   : > { %13413 = vst [vmem:[#allocation30_spill] sm:$0xff] %v11020_v60  ;;  %v4231_v2 = vsel %vm1129_vm13, %v7847_v57, %v13008_v34  ;;  %v13017_v11 = vunpack.i.h.bf16 %v10976_v17  ;;  %v13016_v21 = vunpack.i.l.bf16 %v10972_v50 }
 0xe46   : > { %6174 = vmatpush.msrb.mxu3 %v4231_v2 }
 0xe48   : > { %6175 = vmatpush.msrb.mxu3 %v4229_v44  ;;  %v4273_v44 = vmul.f32 %v4266_v48, %v10655_v56  ;;  %v13018_v56 = vunpack.i.l.bf16 %v11006_v24 }
 0xe49   : > { %v4268_v60 = vpop.permute.xlu0 %4267 }
 0xe4a   : > { %v4269_v57 = vsel %vm13414_vm10, %v4266_v48, %v4268_v60  ;;  %v4275_v22 = vmul.f32 %v4268_v60, %v10621_v51  ;;  %v4278_v35 = vmul.f32 %v4268_v60, %v10703_v45  ;;  %6176 = vmatpush.msrb.mxu3 %v4227_v25  ;;  %v4131_v7 = vsel %vm1031_vm15, %v7802_v14, %v13018_v56  ;;  %vm13456_vm10 = vmmov %vm13451_vm4 }
 0xe4b   : > { %v4277_v2 = vmul.f32 %v4269_v57, %v10599_v26  ;;  %v4274_v34 = vmul.f32 %v4269_v57, %v10592_v1  ;;  %v7796_v26 = vunpack.i.l.bf16 %v10976_v17  ;;  %v13416_v1 = vunpack.i.h.bf16 %v10980_v29  ;;  %v11281_v17 = vld [vmem:[#allocation2 + $0x30] sm:$0xff] }
 0xe4c   : > { %6177 = vmatpush.msrb.mxu3 %v4225_v52  ;;  %v7858_v43 = vpack.i.bf16 %v4276_v47, %v4275_v22  ;;  %v4283_v25 = vmul.f32 %v4269_v57, %v10609_v3  ;;  %v4280_v22 = vmul.f32 %v4269_v57, %v10604_v61  ;;  %v7781_v52 = vunpack.i.l.bf16 %v10937_v8 }
 0xe4d   : > { %v7863_v51 = vpack.i.bf16 %v4278_v35, %v4277_v2  ;;  %v7853_v46 = vpack.i.bf16 %v4274_v34, %v4273_v44  ;;  %v4133_v47 = vsel %vm1031_vm15, %v7811_v15, %v13416_v1  ;;  %v4281_v34 = vmul.f32 %v4268_v60, %v10717_v55  ;;  %v6770_v1 = vld [vmem:[%s12733_s1 + $0x4] ss:$8 sm:$0x3] }
 0xe4e   : > { %7859 = vrot.lane.b32.xlu2 %v7858_v43, %s13415_s24  ;;  %6178 = vmatpush.msrb.mxu3 %v4135_v19  ;;  %v4284_v43 = vmul.f32 %v4268_v60, %v10768_v32  ;;  %v7787_v35 = vunpack.i.h.bf16 %v10923_v54  ;;  %v4282_v44 = vmul.f32 %v4266_v48, %v10719_v9  ;;  %v13015_v15 = vunpack.i.h.bf16 %v10937_v8 }
 0xe4f   : > { %7864 = vrot.lane.b32.xlu0 %v7863_v51, %s13415_s24  ;;  %7854 = vrot.lane.b32.xlu1 %v7853_v46, %s13415_s24  ;;  %v4279_v2 = vmul.f32 %v4266_v48, %v10751_v42  ;;  %v4129_v60 = vsel %vm1031_vm15, %v7796_v26, %v13017_v11  ;;  %v13014_v3 = vunpack.i.l.bf16 %v10970_v16  ;;  %v13013_v51 = vunpack.i.h.bf16 %v10843_v59 }
 0xe50   : > { %6179 = vmatpush.msrb.mxu3 %v4133_v47  ;;  %v7873_v14 = vpack.i.bf16 %v4282_v44, %v4281_v34  ;;  %v4039_v61 = vsel %vm933_vm14, %v7787_v35, %v13016_v21  ;;  %v7878_v57 = vpack.i.bf16 %v4284_v43, %v4283_v25  ;;  %v7691_v46 = vunpack.i.l.bf16 %v10843_v59 }
 0xe51   : > { %v7868_v19 = vpack.i.bf16 %v4280_v22, %v4279_v2  ;;  %v7667_v48 = vunpack.i.h.bf16 %v10825_v39  ;;  %v4037_v26 = vsel %vm933_vm14, %v7781_v52, %v13015_v15  ;;  %v13012_v47 = vunpack.i.l.bf16 %v10911_v58 }
 0xe52   : > { %6180 = vmatpush.msrb.mxu3 %v4131_v7  ;;  %v4033_v43 = vsel %vm933_vm14, %v7691_v46, %v13013_v51  ;;  %v4360_v7 = vperm.slane %v6770_v1, 1  ;;  %v7732_v25 = vunpack.i.h.bf16 %v10859_v13  ;;  %v13011_v22 = vunpack.i.h.bf16 %v10857_v6  ;;  %v11147_v51 = vld [vmem:[#allocation2 + $0x20] sm:$0xff] }
 0xe53   : > { %v4035_v34 = vsel %vm933_vm14, %v7667_v48, %v13014_v3  ;;  %v7751_v35 = vunpack.i.l.bf16 %v10857_v6  ;;  %v4359_v44 = vperm.slane %v6770_v1, 0  ;;  %v13010_v52 = vunpack.i.l.bf16 %v10855_v23  ;;  %v11214_v6 = vld [vmem:[#allocation2 + $0x48] sm:$0xff] }
 0xe54   : > { %6181 = vmatpush.msrb.mxu3 %v4129_v60  ;;  %v3943_v2 = vsel %vm835_vm12, %v7732_v25, %v13012_v47  ;;  %v7662_v60 = vunpack.i.h.bf16 %v10835_v40 }
 0xe56   : > { %7874 = vrot.lane.b32.xlu2 %v7873_v14, %s13415_s24  ;;  %6182 = vmatpush.msrb.mxu3 %v4039_v61  ;;  %v13009_v14 = vunpack.i.h.bf16 %v10833_v10  ;;  %v7686_v61 = vunpack.i.l.bf16 %v10833_v10 }
 0xe57   : > { %7879 = vrot.lane.b32.xlu0 %v7878_v57, %s13415_s24  ;;  %7869 = vrot.lane.b32.xlu1 %v7868_v19, %s13415_s24  ;;  %v3941_v57 = vsel %vm835_vm12, %v7751_v35, %v13011_v22  ;;  %v3939_v19 = vsel %vm835_vm12, %v7662_v60, %v13010_v52  ;;  %s13466_s24 = smov 49  }
 0xe58   : > { %6183 = vmatpush.msrb.mxu3 %v4037_v26  ;;  %v3937_v46 = vsel %vm835_vm12, %v7686_v61, %v13009_v14 }
 0xe5a   : > { %6184 = vmatpush.msrb.mxu3 %v4035_v34 }
 0xe5c   : > { %6185 = vmatpush.msrb.mxu3 %v4033_v43 }
 0xe5e   : > { %4363 = vrot.lane.b32.xlu2 %v4360_v7, %s13417_s11  ;;  %6186 = vmatpush.msrb.mxu3 %v3943_v2 }
 0xe5f   : > { %4361 = vrot.lane.b32.xlu1 %v4359_v44, %s13417_s11  ;;  %s13463_s11 = smov 51  }
 0xe60   : > { %6187 = vmatpush.msrb.mxu3 %v3941_v57 }
 0xe62   : > { %6188 = vmatpush.msrb.mxu3 %v3939_v19 }
 0xe64   : > { %6189 = vmatpush.msrb.mxu3 %v3937_v46 }
 0xea8   : > { %v7860_v48 = vpop.permute.xlu2 %7859 }
 0xea9   : > { %v7862_v26 = vunpack.i.h.bf16 %v7860_v48  ;;  %v7861_v43 = vunpack.i.l.bf16 %v7860_v48 }
 0xeb0   : > { %v11126_v61 = vpop.permute.xlu2 %7874 }
 0xeb1   : > { %v7876_v19 = vunpack.i.l.bf16 %v11126_v61 }
 0xec1   : > { %v7865_v1 = vpop.permute.xlu0 %7864  ;;  %v11112_v34 = vpop.permute.xlu1 %7854 }
 0xec2   : > { %v7867_v7 = vunpack.i.h.bf16 %v7865_v1  ;;  %v7866_v25 = vunpack.i.l.bf16 %v7865_v1  ;;  %v13020_v35 = vunpack.i.h.bf16 %v11112_v34  ;;  %v11137_v1 = vld [vmem:[#allocation2 + $0x10] sm:$0xff] }
 0xec4   : > { %v11116_v44 = vsel %vm1227_vm5, %v7862_v26, %v7866_v25  ;;  %v11119_v2 = vsel %vm1227_vm5, %v7866_v25, %v7867_v7  ;;  %v11124_v60 = vsel %vm1227_vm5, %v13020_v35, %v7861_v43  ;;  %v4364_v26 = vpop.permute.xlu2 %4363  ;;  %v11139_v7 = vld [vmem:[#allocation2] sm:$0xff]  ;;  %v11141_v43 = vld [vmem:[#allocation2 + $0x18] sm:$0xff] }
 0xec5   : > { %13418 = vst [vmem:[#allocation58_spill] sm:$0xff] %v11119_v2  ;;  %v4371_v14 = vmul.f32 %v4364_v26, %v11137_v1  ;;  %v4374_v3 = vmul.f32 %v4364_v26, %v10703_v45 }
 0xec6   : > { %13419 = vst [vmem:[#allocation59_spill] sm:$0xff] %v11124_v60  ;;  %v11160_v60 = vld [vmem:[#allocation2 + $0x38] sm:$0xff] }
 0xec9   : > { %v11128_v57 = vpop.permute.xlu1 %7869 }
 0xeca   : > { %v13021_v46 = vunpack.i.h.bf16 %v11128_v57 }
 0xecc   : > { %v11135_v48 = vsel %vm1227_vm5, %v13021_v46, %v7876_v19  ;;  %v11149_v19 = vld [vmem:[#allocation2 + $0x8] sm:$0xff]  ;;  %v11158_v46 = vld [vmem:[#allocation2 + $0x50] sm:$0xff] }
 0xecd   : > { %13420 = vst [vmem:[#allocation55_spill] sm:$0xff] %v11135_v48 }
 0xed1   : > { %v4362_v25 = vpop.permute.xlu1 %4361 }
 0xed2   : > { %v4365_v52 = vsel %vm13421_vm2, %v4362_v25, %v4364_v26  ;;  %v4369_v22 = vmul.f32 %v4362_v25, %v11139_v7  ;;  %v4372_v47 = vmul.f32 %v4362_v25, %v11141_v43  ;;  %v4378_v35 = vmul.f32 %v4362_v25, %v10719_v9  ;;  %v4453_v9 = vld [vmem:[%s12733_s1] ss:$8 sm:$0x3] }
 0xed3   : > { %v4373_v15 = vmul.f32 %v4365_v52, %v11147_v51  ;;  %v4370_v21 = vmul.f32 %v4365_v52, %v11149_v19  ;;  %v4375_v45 = vmul.f32 %v4362_v25, %v10751_v42  ;;  %v4379_v2 = vmul.f32 %v4365_v52, %v11158_v46 }
 0xed4   : > { %v7888_v11 = vpack.i.bf16 %v4372_v47, %v4371_v14  ;;  %v4376_v47 = vmul.f32 %v4365_v52, %v11160_v60  ;;  %vm13458_vm2 = vcmask 285696  }
 0xed5   : > { %v7893_v56 = vpack.i.bf16 %v4374_v3, %v4373_v15  ;;  %v7883_v18 = vpack.i.bf16 %v4370_v21, %v4369_v22  ;;  %v4377_v21 = vmul.f32 %v4364_v26, %v10717_v55  ;;  %v4455_v22 = vperm.slane %v4453_v9, 0 }
 0xed6   : > { %7889 = vrot.lane.b32.xlu1 %v7888_v11, %s13422_s4  ;;  %v4380_v11 = vmul.f32 %v4364_v26, %v10768_v32  ;;  %v7898_v3 = vpack.i.bf16 %v4376_v47, %v4375_v45 }
 0xed7   : > { %7894 = vrot.lane.b32.xlu2 %v7893_v56, %s13422_s4  ;;  %7884 = vrot.lane.b32.xlu0 %v7883_v18, %s13422_s4  ;;  %v7903_v15 = vpack.i.bf16 %v4378_v35, %v4377_v21  ;;  %v4456_v18 = vperm.slane %v4453_v9, 1 }
 0xed8   : > { %v7908_v56 = vpack.i.bf16 %v4380_v11, %v4379_v2  ;;  %v11178_v2 = vpop.permute.xlu0 %7879 }
 0xed9   : > { %13425 = vst [vmem:[#allocation60_spill] sm:$0xff] %v11178_v2 }
 0xede   : > { %7904 = vrot.lane.b32.xlu1 %v7903_v15, %s13422_s4 }
 0xedf   : > { %7909 = vrot.lane.b32.xlu2 %v7908_v56, %s13422_s4  ;;  %7899 = vrot.lane.b32.xlu0 %v7898_v3, %s13422_s4  ;;  %s13448_s4 = smov 35  }
 0xee6   : > { %4459 = vrot.lane.b32.xlu1 %v4456_v18, %s13423_s13 }
 0xee7   : > { %4457 = vrot.lane.b32.xlu0 %v4455_v22, %s13423_s13  ;;  %s13502_s13 = smov 79  }
 0xf31   : > { %v7895_v55 = vpop.permute.xlu2 %7894 }
 0xf32   : > { %v7897_v52 = vunpack.i.h.bf16 %v7895_v55  ;;  %v7896_v14 = vunpack.i.l.bf16 %v7895_v55 }
 0xf34   : > { %v11176_v35 = vsel %vm1325_vm7, %v7896_v14, %v7897_v52 }
 0xf35   : > { %13424 = vst [vmem:[#allocation56_spill] sm:$0xff] %v11176_v35 }
 0xf48   : > { %v7890_v26 = vpop.permute.xlu1 %7889 }
 0xf49   : > { %v7892_v25 = vunpack.i.h.bf16 %v7890_v26  ;;  %v7891_v45 = vunpack.i.l.bf16 %v7890_v26  ;;  %v11180_v47 = vpop.permute.xlu0 %7884  ;;  %v11203_v26 = vld [vmem:[#allocation2 + $0x28] sm:$0xff] }
 0xf4a   : > { %v13022_v21 = vunpack.i.h.bf16 %v11180_v47 }
 0xf4b   : > { %v11184_v11 = vsel %vm1325_vm7, %v7892_v25, %v7896_v14 }
 0xf4c   : > { %v11189_v15 = vsel %vm1325_vm7, %v13022_v21, %v7891_v45 }
 0xf4d   : > { %13426 = vst [vmem:[#allocation54_spill] sm:$0xff] %v11189_v15 }
 0xf50   : > { %v11191_v56 = vpop.permute.xlu1 %7904 }
 0xf51   : > { %v7906_v3 = vunpack.i.l.bf16 %v11191_v56  ;;  %v11194_v9 = vpop.permute.xlu0 %7899 }
 0xf52   : > { %v13024_v18 = vunpack.i.h.bf16 %v11194_v9 }
 0xf54   : > { %v11200_v22 = vsel %vm1325_vm7, %v13024_v18, %v7906_v3 }
 0xf55   : > { %13427 = vst [vmem:[#allocation57_spill] sm:$0xff] %v11200_v22  ;;  %v11212_v22 = vld [vmem:[#allocation2 + $0x40] sm:$0xff] }
 0xf58   : > { %v4460_v55 = vpop.permute.xlu1 %4459 }
 0xf59   : > { %v4467_v52 = vmul.f32 %v4460_v55, %v11137_v1  ;;  %v4458_v14 = vpop.permute.xlu0 %4457  ;;  %v4470_v48 = vmul.f32 %v4460_v55, %v11203_v26  ;;  %v4473_v40 = vmul.f32 %v4460_v55, %v11212_v22 }
 0xf5a   : > { %v4461_v25 = vsel %vm1370_vm8, %v4458_v14, %v4460_v55  ;;  %v4465_v45 = vmul.f32 %v4458_v14, %v11139_v7  ;;  %v4468_v21 = vmul.f32 %v4458_v14, %v11141_v43  ;;  %v4474_v23 = vmul.f32 %v4458_v14, %v11214_v6 }
 0xf5b   : > { %v4469_v15 = vmul.f32 %v4461_v25, %v11147_v51  ;;  %v4466_v10 = vmul.f32 %v4461_v25, %v11149_v19  ;;  %v4471_v59 = vmul.f32 %v4458_v14, %v10751_v42 }
 0xf5c   : > { %v7918_v3 = vpack.i.bf16 %v4468_v21, %v4467_v52  ;;  %v4475_v21 = vmul.f32 %v4461_v25, %v11158_v46 }
 0xf5d   : > { %v7923_v18 = vpack.i.bf16 %v4470_v48, %v4469_v15  ;;  %v7913_v35 = vpack.i.bf16 %v4466_v10, %v4465_v45  ;;  %v4472_v10 = vmul.f32 %v4461_v25, %v11160_v60  ;;  %v4476_v48 = vmul.f32 %v4460_v55, %v10768_v32  ;;  %v11232_v32 = vpop.permute.xlu2 %7909 }
 0xf5e   : > { %7919 = vrot.lane.b32.xlu0 %v7918_v3, %s13428_s25  ;;  %v7933_v15 = vpack.i.bf16 %v4474_v23, %v4473_v40  ;;  %13430 = vst [vmem:[#allocation53_spill] sm:$0xff] %v11232_v32 }
 0xf5f   : > { %7924 = vrot.lane.b32.xlu1 %v7923_v18, %s13428_s25  ;;  %7914 = vrot.lane.b32.xlu2 %v7913_v35, %s13428_s25  ;;  %v7938_v52 = vpack.i.bf16 %v4476_v48, %v4475_v21  ;;  %v7928_v45 = vpack.i.bf16 %v4472_v10, %v4471_v59  ;;  %v6771_v35 = vld [vmem:[%s12733_s1 + $0x1] ss:$8 sm:$0x3] }
 0xf60   : > { %v4552_v42 = vperm.slane %v6771_v35, 1  ;;  %v4551_v18 = vperm.slane %v6771_v35, 0 }
 0xf66   : > { %7934 = vrot.lane.b32.xlu0 %v7933_v15, %s13428_s25 }
 0xf67   : > { %7939 = vrot.lane.b32.xlu1 %v7938_v52, %s13428_s25  ;;  %7929 = vrot.lane.b32.xlu2 %v7928_v45, %s13428_s25  ;;  %s13460_s25 = smov 36  }
 0xf6e   : > { %4555 = vrot.lane.b32.xlu0 %v4552_v42, %s13429_s18 }
 0xf6f   : > { %4553 = vrot.lane.b32.xlu2 %v4551_v18, %s13429_s18  ;;  %s13461_s18 = smov 52  }
 0xfb9   : > { %v11234_v40 = vpop.permute.xlu2 %7914 }
 0xfba   : > { %v13030_v23 = vunpack.i.h.bf16 %v11234_v40 }
 0xfc1   : > { %v11249_v10 = vpop.permute.xlu2 %7929 }
 0xfc2   : > { %v13036_v52 = vunpack.i.h.bf16 %v11249_v10 }
 0xfc9   : > { %v4554_v42 = vpop.permute.xlu2 %4553 }
 0xfd0   : > { %v11236_v59 = vpop.permute.xlu0 %7919 }
 0xfd1   : > { %v7921_v55 = vunpack.i.l.bf16 %v11236_v59  ;;  %v11240_v14 = vpop.permute.xlu1 %7924 }
 0xfd2   : > { %v7927_v25 = vunpack.i.h.bf16 %v11240_v14  ;;  %v13031_v3 = vunpack.i.l.bf16 %v11240_v14 }
 0xfd3   : > { %v11247_v21 = vsel %vm1423_vm3, %v13030_v23, %v7921_v55  ;;  %v4564_v55 = vmul.f32 %v4554_v42, %v11141_v43 }
 0xfd4   : > { %13431 = vst [vmem:[#allocation51_spill] sm:$0xff] %v11247_v21  ;;  %v11254_v48 = vsel %vm1423_vm3, %v13031_v3, %v7927_v25  ;;  %v4561_v21 = vmul.f32 %v4554_v42, %v11139_v7 }
 0xfd5   : > { %13432 = vst [vmem:[#allocation49_spill] sm:$0xff] %v11254_v48 }
 0xfd8   : > { %v11256_v15 = vpop.permute.xlu0 %7934 }
 0xfd9   : > { %v7936_v45 = vunpack.i.l.bf16 %v11256_v15 }
 0xfdb   : > { %v11263_v35 = vsel %vm1423_vm3, %v13036_v52, %v7936_v45  ;;  %v11275_v52 = vld [vmem:[#allocation2 + $0x58] sm:$0xff] }
 0xfdc   : > { %13433 = vst [vmem:[#allocation52_spill] sm:$0xff] %v11263_v35 }
 0xfe0   : > { %v4556_v18 = vpop.permute.xlu0 %4555 }
 0xfe1   : > { %v4557_v23 = vsel %vm13434_vm1, %v4554_v42, %v4556_v18  ;;  %v4563_v25 = vmul.f32 %v4556_v18, %v11137_v1  ;;  %v4566_v3 = vmul.f32 %v4556_v18, %v11203_v26  ;;  %v4569_v35 = vmul.f32 %v4556_v18, %v11212_v22 }
 0xfe2   : > { %v4565_v13 = vmul.f32 %v4557_v23, %v11147_v51  ;;  %v4562_v48 = vmul.f32 %v4557_v23, %v11149_v19  ;;  %v4572_v8 = vmul.f32 %v4556_v18, %v11275_v52  ;;  %v4571_v16 = vmul.f32 %v4557_v23, %v11158_v46 }
 0xfe3   : > { %v7948_v58 = vpack.i.bf16 %v4564_v55, %v4563_v25  ;;  %v4568_v54 = vmul.f32 %v4557_v23, %v11160_v60  ;;  %vm13468_vm1 = vcmask 760832  }
 0xfe4   : > { %v7953_v39 = vpack.i.bf16 %v4566_v3, %v4565_v13  ;;  %v7943_v45 = vpack.i.bf16 %v4562_v48, %v4561_v21  ;;  %v4570_v13 = vmul.f32 %v4554_v42, %v11214_v6  ;;  %v6772_v48 = vld [vmem:[%s12733_s1 + $0x2] ss:$8 sm:$0x3] }
 0xfe5   : > { %7949 = vrot.lane.b32.xlu2 %v7948_v58, %s13435_s2  ;;  %v4567_v58 = vmul.f32 %v4554_v42, %v11281_v17  ;;  %v4648_v23 = vperm.slane %v6772_v48, 1  ;;  %v4647_v18 = vperm.slane %v6772_v48, 0  ;;  %v11293_v42 = vpop.permute.xlu1 %7939 }
 0xfe6   : > { %7954 = vrot.lane.b32.xlu0 %v7953_v39, %s13435_s2  ;;  %7944 = vrot.lane.b32.xlu1 %v7943_v45, %s13435_s2  ;;  %v7963_v3 = vpack.i.bf16 %v4570_v13, %v4569_v35  ;;  %v7968_v39 = vpack.i.bf16 %v4572_v8, %v4571_v16  ;;  %13436 = vst [vmem:[#allocation50_spill] sm:$0xff] %v11293_v42  ;;  %v13054_v24 = vunpack.i.l.bf16 %v11293_v42 }
 0xfe7   : > { %v7958_v21 = vpack.i.bf16 %v4568_v54, %v4567_v58 }
 0xfed   : > { %7964 = vrot.lane.b32.xlu2 %v7963_v3, %s13435_s2 }
 0xfee   : > { %7969 = vrot.lane.b32.xlu0 %v7968_v39, %s13435_s2  ;;  %7959 = vrot.lane.b32.xlu1 %v7958_v21, %s13435_s2  ;;  %s13488_s2 = smov 62  }
 0xff5   : > { %4651 = vrot.lane.b32.xlu2 %v4648_v23, %s8543_s16 }
 0xff6   : > { %4649 = vrot.lane.b32.xlu1 %v4647_v18, %s8543_s16  ;;  %s13442_s16 = smov 94  }
0x103f   : > { %v7950_v8 = vpop.permute.xlu2 %7949 }
0x1040   : > { %v7951_v35 = vunpack.i.l.bf16 %v7950_v8 }
0x1047   : > { %v7965_v13 = vpop.permute.xlu2 %7964 }
0x1048   : > { %v7967_v39 = vunpack.i.h.bf16 %v7965_v13  ;;  %v7966_v23 = vunpack.i.l.bf16 %v7965_v13  ;;  %v7937_v13 = vunpack.i.h.bf16 %v11256_v15 }
0x1058   : > { %v7955_v54 = vpop.permute.xlu0 %7954  ;;  %v7945_v16 = vpop.permute.xlu1 %7944 }
0x1059   : > { %v7957_v55 = vunpack.i.h.bf16 %v7955_v54  ;;  %v7956_v25 = vunpack.i.l.bf16 %v7955_v54  ;;  %v7947_v45 = vunpack.i.h.bf16 %v7945_v16 }
0x105b   : > { %v11296_v58 = vsel %vm1521_vm6, %v7956_v25, %v7957_v55  ;;  %v11299_v3 = vsel %vm1521_vm6, %v7947_v45, %v7951_v35  ;;  %v7952_v55 = vunpack.i.h.bf16 %v7950_v8  ;;  %v4652_v35 = vpop.permute.xlu2 %4651 }
0x105c   : > { %13437 = vst [vmem:[#allocation47_spill] sm:$0xff] %v11296_v58  ;;  %v4659_v20 = vmul.f32 %v4652_v35, %v11137_v1 }
0x105d   : > { %13438 = vst [vmem:[#allocation48_spill] sm:$0xff] %v11299_v3  ;;  %v7946_v3 = vunpack.i.l.bf16 %v7945_v16 }
0x105f   : > { %v4609_v16 = vsel %vm1521_vm6, %v7946_v3, %v7947_v45  ;;  %v7916_v45 = vunpack.i.l.bf16 %v11234_v40  ;;  %v13443_v3 = vunpack.i.h.bf16 %v11249_v10 }
0x1060   : > { %v11301_v21 = vpop.permute.xlu0 %7969  ;;  %v7960_v48 = vpop.permute.xlu1 %7959 }
0x1061   : > { %13439 = vst [vmem:[#allocation45_spill] sm:$0xff] %v11301_v21  ;;  %v13051_v18 = vunpack.i.l.bf16 %v11301_v21  ;;  %v7962_v50 = vunpack.i.h.bf16 %v7960_v48  ;;  %v7961_v29 = vunpack.i.l.bf16 %v7960_v48  ;;  %v4611_v48 = vsel %vm1521_vm6, %v7952_v55, %v7956_v25 }
0x1062   : > { %v7922_v55 = vunpack.i.h.bf16 %v11236_v59 }
0x1063   : > { %v4615_v54 = vsel %vm1521_vm6, %v7967_v39, %v13051_v18  ;;  %v11308_v33 = vsel %vm1521_vm6, %v7962_v50, %v7966_v23  ;;  %v4613_v58 = vsel %vm1521_vm6, %v7961_v29, %v7962_v50  ;;  %v7931_v50 = vunpack.i.l.bf16 %v11249_v10 }
0x1064   : > { %13440 = vst [vmem:[#allocation42_spill] sm:$0xff] %v11308_v33  ;;  %6203 = vmatpush.msra.mxu0 %v4615_v54  ;;  %v4662_v29 = vmul.f32 %v4652_v35, %v11203_v26  ;;  %v13053_v10 = vunpack.i.l.bf16 %v11232_v32  ;;  %v11604_v33 = vld [vmem:[#allocation2 + $0x8] sm:$0xff] }
0x1066   : > { %6204 = vmatpush.msra.mxu0 %v4613_v58  ;;  %v4519_v58 = vsel %vm1423_vm3, %v7937_v13, %v13054_v24  ;;  %v7907_v13 = vunpack.i.h.bf16 %v11191_v56  ;;  %v7901_v56 = vunpack.i.l.bf16 %v11194_v9  ;;  %v11503_v24 = vld [vmem:[#allocation2 + $0x20] sm:$0xff] }
0x1068   : > { %v4650_v21 = vpop.permute.xlu1 %4649  ;;  %6205 = vmatpush.msra.mxu0 %v4611_v48 }
0x1069   : > { %v4653_v39 = vsel %vm13441_vm0, %v4650_v21, %v4652_v35  ;;  %v4657_v23 = vmul.f32 %v4650_v21, %v11139_v7  ;;  %v4660_v8 = vmul.f32 %v4650_v21, %v11141_v43  ;;  %v4663_v59 = vmul.f32 %v4650_v21, %v11281_v17  ;;  %vm13470_vm0 = vmmov %vm13468_vm1 }
0x106a   : > { %6206 = vmatpush.msra.mxu0 %v4609_v16  ;;  %v4661_v15 = vmul.f32 %v4653_v39, %v11147_v51  ;;  %v4658_v25 = vmul.f32 %v4653_v39, %v11149_v19  ;;  %v4517_v16 = vsel %vm1423_vm3, %v7931_v50, %v13443_v3  ;;  %v4668_v50 = vmul.f32 %v4652_v35, %v11275_v52 }
0x106b   : > { %v7978_v54 = vpack.i.bf16 %v4660_v8, %v4659_v20  ;;  %v4666_v20 = vmul.f32 %v4650_v21, %v11214_v6 }
0x106c   : > { %6207 = vmatpush.msra.mxu0 %v4519_v58  ;;  %v7983_v48 = vpack.i.bf16 %v4662_v29, %v4661_v15  ;;  %v7973_v18 = vpack.i.bf16 %v4658_v25, %v4657_v23  ;;  %v13444_v23 = vunpack.i.l.bf16 %v11240_v14  ;;  %v4667_v29 = vmul.f32 %v4653_v39, %v11158_v46 }
0x106d   : > { %7979 = vrot.lane.b32.xlu1 %v7978_v54, %s13442_s16  ;;  %v4664_v15 = vmul.f32 %v4653_v39, %v11160_v60  ;;  %v13445_v25 = vunpack.i.h.bf16 %v11234_v40  ;;  %v4423_v58 = vsel %vm1325_vm7, %v7907_v13, %v13053_v10  ;;  %v13446_v40 = vunpack.i.h.bf16 %v11194_v9 }
0x106e   : > { %7984 = vrot.lane.b32.xlu2 %v7983_v48, %s13442_s16  ;;  %7974 = vrot.lane.b32.xlu0 %v7973_v18, %s13442_s16  ;;  %v4515_v8 = vsel %vm1423_vm3, %v7922_v55, %v13444_v23  ;;  %v4665_v18 = vmul.f32 %v4652_v35, %v11212_v22  ;;  %v7998_v39 = vpack.i.bf16 %v4668_v50, %v4667_v29  ;;  %v7886_v55 = vunpack.i.l.bf16 %v11180_v47  ;;  %v6773_v48 = vld [vmem:[%s12733_s1 + $0x3] ss:$8 sm:$0x3] }
0x106f   : > { %6208 = vmatpush.msra.mxu0 %v4517_v16  ;;  %v4513_v21 = vsel %vm1423_vm3, %v7916_v45, %v13445_v25  ;;  %v7988_v54 = vpack.i.bf16 %v4664_v15, %v4663_v59  ;;  %v4421_v35 = vsel %vm1325_vm7, %v7901_v56, %v13446_v40  ;;  %v13052_v45 = vunpack.i.l.bf16 %v11178_v2 }
0x1070   : > { %v7993_v14 = vpack.i.bf16 %v4666_v20, %v4665_v18  ;;  %v4744_v3 = vperm.slane %v6773_v48, 1  ;;  %v7877_v16 = vunpack.i.h.bf16 %v11126_v61  ;;  %v7871_v13 = vunpack.i.l.bf16 %v11128_v57 }
0x1071   : > { %6209 = vmatpush.msra.mxu0 %v4515_v8  ;;  %v13447_v20 = vunpack.i.h.bf16 %v11180_v47  ;;  %v4743_v59 = vperm.slane %v6773_v48, 0  ;;  %v13449_v61 = vunpack.i.h.bf16 %v11128_v57  ;;  %v13450_v47 = vunpack.i.h.bf16 %v11112_v34 }
0x1072   : > { %v4327_v23 = vsel %vm1227_vm5, %v7877_v16, %v13052_v45 }
0x1073   : > { %6210 = vmatpush.msra.mxu0 %v4513_v21  ;;  %v4417_v9 = vsel %vm1325_vm7, %v7886_v55, %v13447_v20  ;;  %v4325_v8 = vsel %vm1227_vm5, %v7871_v13, %v13449_v61 }
0x1075   : > { %6211 = vmatpush.msra.mxu0 %v4423_v58  ;;  %7994 = vrot.lane.b32.xlu1 %v7993_v14, %s13442_s16 }
0x1076   : > { %7999 = vrot.lane.b32.xlu2 %v7998_v39, %s13442_s16  ;;  %7989 = vrot.lane.b32.xlu0 %v7988_v54, %s13442_s16  ;;  %s13476_s16 = smov 92  }
0x1077   : > { %6212 = vmatpush.msra.mxu0 %v4421_v35 }
0x1079   : > { %6213 = vmatpush.msra.mxu0 %v11184_v11  ;;  %v7856_v11 = vunpack.i.l.bf16 %v11112_v34 }
0x107b   : > { %6214 = vmatpush.msra.mxu0 %v4417_v9  ;;  %v4321_v29 = vsel %vm1227_vm5, %v7856_v11, %v13450_v47 }
0x107d   : > { %6215 = vmatpush.msra.mxu0 %v4327_v23  ;;  %4747 = vrot.lane.b32.xlu1 %v4744_v3, %s13448_s4 }
0x107e   : > { %4745 = vrot.lane.b32.xlu0 %v4743_v59, %s13448_s4  ;;  %s13496_s4 = smov 78  }
0x107f   : > { %6216 = vmatpush.msra.mxu0 %v4325_v8 }
0x1081   : > { %6217 = vmatpush.msra.mxu0 %v11116_v44 }
0x1083   : > { %6218 = vmatpush.msra.mxu0 %v4321_v29 }
0x10c8   : > { %v7985_v15 = vpop.permute.xlu2 %7984 }
0x10c9   : > { %v7987_v18 = vunpack.i.h.bf16 %v7985_v15  ;;  %v7986_v56 = vunpack.i.l.bf16 %v7985_v15 }
0x10cb   : > { %v11383_v50 = vsel %vm13451_vm4, %v7986_v56, %v7987_v18  ;;  %vm13471_vm4 = vmmov %vm13470_vm0 }
0x10cc   : > { %13452 = vst [vmem:[#allocation46_spill] sm:$0xff] %v11383_v50 }
0x10df   : > { %v7980_v25 = vpop.permute.xlu1 %7979 }
0x10e0   : > { %v7982_v21 = vunpack.i.h.bf16 %v7980_v25  ;;  %v7981_v14 = vunpack.i.l.bf16 %v7980_v25  ;;  %v11385_v57 = vpop.permute.xlu0 %7974 }
0x10e1   : > { %v13055_v58 = vunpack.i.h.bf16 %v11385_v57 }
0x10e2   : > { %v11389_v44 = vsel %vm13453_vm9, %v7982_v21, %v7986_v56  ;;  %vm13473_vm9 = vmmov %vm13470_vm0 }
0x10e3   : > { %v11394_v34 = vsel %vm13454_vm11, %v13055_v58, %v7981_v14  ;;  %vm13475_vm11 = vcmask 293888  }
0x10e4   : > { %13455 = vst [vmem:[#allocation44_spill] sm:$0xff] %v11394_v34 }
0x10e7   : > { %v11396_v39 = vpop.permute.xlu1 %7994 }
0x10e8   : > { %v7996_v54 = vunpack.i.l.bf16 %v11396_v39  ;;  %v11399_v55 = vpop.permute.xlu0 %7989 }
0x10e9   : > { %v13056_v40 = vunpack.i.h.bf16 %v11399_v55 }
0x10eb   : > { %v11405_v35 = vsel %vm13456_vm10, %v13056_v40, %v7996_v54  ;;  %vm13480_vm10 = vcmask 547840  }
0x10ec   : > { %13457 = vst [vmem:[#allocation40_spill] sm:$0xff] %v11405_v35 }
0x10ef   : > { %v4748_v48 = vpop.permute.xlu1 %4747 }
0x10f0   : > { %v4755_v3 = vmul.f32 %v4748_v48, %v11137_v1  ;;  %v4746_v16 = vpop.permute.xlu0 %4745  ;;  %v4758_v59 = vmul.f32 %v4748_v48, %v11203_v26  ;;  %v4761_v29 = vmul.f32 %v4748_v48, %v11212_v22  ;;  %v4764_v25 = vmul.f32 %v4748_v48, %v11275_v52  ;;  %v6774_v22 = vld [vmem:[%s12733_s1 + $0x4] ss:$8 sm:$0x3] }
0x10f1   : > { %v4749_v13 = vsel %vm13458_vm2, %v4746_v16, %v4748_v48  ;;  %v4753_v20 = vmul.f32 %v4746_v16, %v11139_v7  ;;  %v4756_v9 = vmul.f32 %v4746_v16, %v11141_v43  ;;  %v4762_v15 = vmul.f32 %v4746_v16, %v11214_v6  ;;  %v6778_v48 = vld [vmem:[%s12733_s1 + $0x4] ss:$8 sm:$0x3] }
0x10f2   : > { %v4757_v23 = vmul.f32 %v4749_v13, %v11147_v51  ;;  %v4754_v11 = vmul.f32 %v4749_v13, %v11149_v19  ;;  %v4759_v18 = vmul.f32 %v4746_v16, %v11281_v17  ;;  %v4763_v26 = vmul.f32 %v4749_v13, %v11158_v46 }
0x10f3   : > { %v8008_v61 = vpack.i.bf16 %v4756_v9, %v4755_v3  ;;  %v4760_v56 = vmul.f32 %v4749_v13, %v11160_v60  ;;  %v8023_v21 = vpack.i.bf16 %v4762_v15, %v4761_v29  ;;  %v4840_v3 = vperm.slane %v6774_v22, 1  ;;  %v6775_v29 = vld [vmem:[%s12733_s1 + $0x1] ss:$8 sm:$0x3] }
0x10f4   : > { %v8013_v8 = vpack.i.bf16 %v4758_v59, %v4757_v23  ;;  %v8003_v47 = vpack.i.bf16 %v4754_v11, %v4753_v20  ;;  %v8028_v14 = vpack.i.bf16 %v4764_v25, %v4763_v26  ;;  %v4839_v16 = vperm.slane %v6774_v22, 0  ;;  %v6781_v20 = vld [vmem:[%s12733_s1 + $0x3] ss:$8 sm:$0x3] }
0x10f5   : > { %8009 = vrot.lane.b32.xlu0 %v8008_v61, %s13459_s21  ;;  %v8018_v54 = vpack.i.bf16 %v4760_v56, %v4759_v18  ;;  %v5319_v13 = vperm.slane %v6778_v48, 0  ;;  %v5704_v9 = vperm.slane %v6781_v20, 1  ;;  %v6777_v59 = vld [vmem:[%s12733_s1 + $0x3] ss:$8 sm:$0x3]  ;;  %v5032_v15 = vperm.slane %v6775_v29, 1  ;;  %v11455_v18 = vpop.permute.xlu2 %7999 }
0x10f6   : > { %8014 = vrot.lane.b32.xlu1 %v8013_v8, %s13459_s21  ;;  %8004 = vrot.lane.b32.xlu2 %v8003_v47, %s13459_s21  ;;  %v5223_v23 = vperm.slane %v6777_v59, 0  ;;  %v6780_v11 = vld [vmem:[%s12733_s1 + $0x2] ss:$8 sm:$0x3]  ;;  %13467 = vst [vmem:[#allocation43_spill] sm:$0xff] %v11455_v18  ;;  %vm13482_vm2 = vcmask 752640  }
0x10f7   : > { %v5608_v61 = vperm.slane %v6780_v11, 1  ;;  %v6779_v8 = vld [vmem:[%s12733_s1 + $0x1] ss:$8 sm:$0x3] }
0x10f8   : > { %v5511_v47 = vperm.slane %v6779_v8, 0 }
0x10fd   : > { %8024 = vrot.lane.b32.xlu0 %v8023_v21, %s13459_s21 }
0x10fe   : > { %8029 = vrot.lane.b32.xlu1 %v8028_v14, %s13459_s21  ;;  %8019 = vrot.lane.b32.xlu2 %v8018_v54, %s13459_s21  ;;  %s13477_s21 = smov 48  }
0x1105   : > { %4843 = vrot.lane.b32.xlu0 %v4840_v3, %s13460_s25 }
0x1106   : > { %4841 = vrot.lane.b32.xlu2 %v4839_v16, %s13460_s25  ;;  %s13504_s25 = smov 68  }
0x110d   : > { %5321 = vrot.lane.b32.xlu0 %v5319_v13, %s13461_s18 }
0x1115   : > { %5707 = vrot.lane.b32.xlu0 %v5704_v9, %s13462_s22 }
0x111d   : > { %5225 = vrot.lane.b32.xlu0 %v5223_v23, %s13463_s11 }
0x1125   : > { %5611 = vrot.lane.b32.xlu0 %v5608_v61, %s13464_s10 }
0x112d   : > { %5513 = vrot.lane.b32.xlu0 %v5511_v47, %s13465_s23 }
0x1135   : > { %5035 = vrot.lane.b32.xlu0 %v5032_v15, %s13466_s24 }
0x1150   : > { %v11457_v26 = vpop.permute.xlu2 %8004 }
0x1151   : > { %v13057_v25 = vunpack.i.h.bf16 %v11457_v26 }
0x1158   : > { %v11465_v13 = vpop.permute.xlu2 %8019 }
0x1159   : > { %v13058_v47 = vunpack.i.h.bf16 %v11465_v13 }
0x1167   : > { %v8010_v56 = vpop.permute.xlu0 %8009 }
0x1168   : > { %v8012_v21 = vunpack.i.h.bf16 %v8010_v56  ;;  %v8011_v14 = vunpack.i.l.bf16 %v8010_v56  ;;  %v8015_v54 = vpop.permute.xlu1 %8014 }
0x1169   : > { %v8017_v22 = vunpack.i.h.bf16 %v8015_v54  ;;  %v8016_v3 = vunpack.i.l.bf16 %v8015_v54 }
0x116a   : > { %v11463_v16 = vsel %vm13468_vm1, %v13057_v25, %v8011_v14  ;;  %v11482_v14 = vpop.permute.xlu2 %4841  ;;  %vm13484_vm1 = vcmask 424960  }
0x116b   : > { %13469 = vst [vmem:[#allocation41_spill] sm:$0xff] %v11463_v16  ;;  %v11468_v9 = vsel %vm13470_vm0, %v8012_v21, %v8016_v3  ;;  %v11471_v23 = vsel %vm13471_vm4, %v8016_v3, %v8017_v22  ;;  %v4858_v21 = vmul.f32 %v11482_v14, %v11214_v6  ;;  %v4849_v45 = vmul.f32 %v11482_v14, %v11139_v7 }
0x116c   : > { %13472 = vst [vmem:[#allocation76_spill] sm:$0xff] %v11471_v23  ;;  %vm13485_vm0 = vcmask 539648   ;;  %vm13487_vm4 = vcmask 392192  }
0x116f   : > { %v11473_v61 = vpop.permute.xlu0 %8024 }
0x1170   : > { %v8026_v15 = vunpack.i.l.bf16 %v11473_v61 }
0x1172   : > { %v11480_v56 = vsel %vm13473_vm9, %v13058_v47, %v8026_v15  ;;  %v5320_v47 = vperm.slane %v6778_v48, 1  ;;  %vm13491_vm9 = vcmask 416768  }
0x1173   : > { %13474 = vst [vmem:[#allocation75_spill] sm:$0xff] %v11480_v56  ;;  %v11586_v56 = vld [vmem:[#allocation2 + $0x50] sm:$0xff] }
0x1177   : > { %v11484_v54 = vpop.permute.xlu0 %4843 }
0x1178   : > { %v11491_v22 = vsel %vm13475_vm11, %v11482_v14, %v11484_v54  ;;  %v4851_v3 = vmul.f32 %v11484_v54, %v11137_v1  ;;  %v11499_v15 = vmul.f32 %v11484_v54, %v11275_v52  ;;  %v5703_v52 = vperm.slane %v6781_v20, 0 }
0x1179   : > { %v4850_v10 = vmul.f32 %v11491_v22, %v11149_v19  ;;  %v11507_v40 = vmul.f32 %v11503_v24, %v11491_v22  ;;  %vm13493_vm11 = vcmask 408576  }
0x117a   : > { %v8038_v58 = vpack.i.bf16 %v4858_v21, %v4851_v3  ;;  %v4933_v21 = vld [vmem:[%s12733_s1] ss:$8 sm:$0x3] }
0x117b   : > { %v8033_v25 = vpack.i.bf16 %v4850_v10, %v4849_v45  ;;  %v4936_v3 = vperm.slane %v4933_v21, 1  ;;  %v4935_v34 = vperm.slane %v4933_v21, 0  ;;  %v5607_v10 = vperm.slane %v6780_v11, 0 }
0x117c   : > { %8039 = vrot.lane.b32.xlu2 %v8038_v58, %s13476_s16  ;;  %v5224_v45 = vperm.slane %v6777_v59, 1  ;;  %v6776_v58 = vld [vmem:[%s12733_s1 + $0x2] ss:$8 sm:$0x3] }
0x117d   : > { %8034 = vrot.lane.b32.xlu1 %v8033_v25, %s13476_s16  ;;  %v5128_v48 = vperm.slane %v6776_v58, 1  ;;  %v5127_v20 = vperm.slane %v6776_v58, 0  ;;  %v5031_v25 = vperm.slane %v6775_v29, 0 }
0x1184   : > { %5705 = vrot.lane.b32.xlu2 %v5703_v52, %s13462_s22  ;;  %v11534_v52 = vpop.permute.xlu0 %5321 }
0x1185   : > { %5323 = vrot.lane.b32.xlu1 %v5320_v47, %s13461_s18  ;;  %s13478_s18 = smov 50   ;;  %v5512_v47 = vperm.slane %v6779_v8, 1 }
0x118c   : > { %4939 = vrot.lane.b32.xlu2 %v4936_v3, %s13477_s21  ;;  %v11538_v29 = vpop.permute.xlu0 %5707 }
0x118d   : > { %4937 = vrot.lane.b32.xlu1 %v4935_v34, %s13477_s21  ;;  %v5413_v34 = vld [vmem:[%s12733_s1] ss:$8 sm:$0x3]  ;;  %s13499_s21 = smov 63  }
0x118e   : > { %v5416_v59 = vperm.slane %v5413_v34, 1  ;;  %v5415_v11 = vperm.slane %v5413_v34, 0 }
0x1194   : > { %5609 = vrot.lane.b32.xlu2 %v5607_v10, %s13464_s10  ;;  %s13564_s10 = smov 60  }
0x1195   : > { %5227 = vrot.lane.b32.xlu1 %v5224_v45, %s13463_s11  ;;  %s13479_s11 = smov 64  }
0x119c   : > { %5131 = vrot.lane.b32.xlu2 %v5128_v48, %s13478_s18 }
0x119d   : > { %5129 = vrot.lane.b32.xlu1 %v5127_v20, %s13478_s18 }
0x11a4   : > { %5033 = vrot.lane.b32.xlu2 %v5031_v25, %s13466_s24  ;;  %v11547_v25 = vpop.permute.xlu1 %8029  ;;  %s13489_s24 = smov 80  }
0x11a5   : > { %5515 = vrot.lane.b32.xlu1 %v5512_v47, %s13465_s23  ;;  %s13481_s23 = smov 61  }
0x11ac   : > { %5419 = vrot.lane.b32.xlu2 %v5416_v59, %s13479_s11 }
0x11ad   : > { %5417 = vrot.lane.b32.xlu1 %v5415_v11, %s13479_s11 }
0x11d6   : > { %v11536_v21 = vpop.permute.xlu2 %8039 }
0x11de   : > { %v5706_v8 = vpop.permute.xlu2 %5705 }
0x11df   : > { %v5709_v3 = vsel %vm13480_vm10, %v5706_v8, %v11538_v29  ;;  %v5722_v10 = vmul.f32 %v5706_v8, %v11214_v6  ;;  %v5719_v48 = vmul.f32 %v5706_v8, %v11281_v17  ;;  %v5716_v34 = vmul.f32 %v5706_v8, %v11141_v43 }
0x11e0   : > { %v5723_v45 = vmul.f32 %v5709_v3, %v11158_v46  ;;  %v5720_v20 = vmul.f32 %v5709_v3, %v11160_v60  ;;  %v5717_v11 = vmul.f32 %v5709_v3, %v11147_v51  ;;  %v5714_v51 = vmul.f32 %v5709_v3, %v11149_v19 }
0x11e1   : > { %vm13495_vm10 = vcmask 531456  }
0x11e2   : > { %v8053_v58 = vpack.i.bf16 %v5723_v45, %v5722_v10  ;;  %v8068_v47 = vpack.i.bf16 %v5720_v20, %v5719_v48  ;;  %v11556_v10 = vpop.permute.xlu0 %5225  ;;  %v8041_v45 = vunpack.i.l.bf16 %v11536_v21  ;;  %v8083_v50 = vpack.i.bf16 %v5717_v11, %v5716_v34 }
0x11e3   : > { %v5713_v20 = vmul.f32 %v5706_v8, %v11139_v7  ;;  %v5335_v34 = vmul.f32 %v11534_v52, %v11281_v17  ;;  %v5338_v11 = vmul.f32 %v11534_v52, %v11214_v6 }
0x11e4   : > { %8054 = vrot.lane.b32.xlu2 %v8053_v58, %s13481_s23 }
0x11e5   : > { %v8098_v19 = vpack.i.bf16 %v5714_v51, %v5713_v20 }
0x11e6   : > { %v11551_v59 = vpop.permute.xlu2 %4939 }
0x11ea   : > { %v11579_v8 = vpop.permute.xlu0 %5611 }
0x11ec   : > { %8069 = vrot.lane.b32.xlu2 %v8068_v47, %s13481_s23 }
0x11ee   : > { %v5610_v35 = vpop.permute.xlu2 %5609 }
0x11ef   : > { %v11554_v1 = vpop.permute.xlu1 %8034  ;;  %v5613_v3 = vsel %vm13485_vm0, %v5610_v35, %v11579_v8  ;;  %v5623_v2 = vmul.f32 %v5610_v35, %v11281_v17  ;;  %vm13506_vm0 = vcmask 498688  }
0x11f0   : > { %v13059_v58 = vunpack.i.h.bf16 %v11554_v1 }
0x11f2   : > { %v11563_v48 = vsel %vm13482_vm2, %v13059_v58, %v8041_v45  ;;  %vm13498_vm2 = vcmask 400384  }
0x11f3   : > { %13483 = vst [vmem:[#allocation73_spill] sm:$0xff] %v11563_v48 }
0x11f4   : > { %8084 = vrot.lane.b32.xlu2 %v8083_v50, %s13481_s23 }
0x11f7   : > { %v11568_v47 = vpop.permute.xlu1 %5323 }
0x11f8   : > { %v5325_v16 = vsel %vm13484_vm1, %v11534_v52, %v11568_v47  ;;  %vm13501_vm1 = vcmask 523264  }
0x11f9   : > { %v5339_v45 = vmul.f32 %v5325_v16, %v11158_v46  ;;  %v5336_v50 = vmul.f32 %v5325_v16, %v11160_v60  ;;  %v5626_v46 = vmul.f32 %v5610_v35, %v11214_v6  ;;  %v5627_v60 = vmul.f32 %v5613_v3, %v11586_v56 }
0x11fa   : > { %v5333_v20 = vmul.f32 %v5325_v16, %v11503_v24 }
0x11fb   : > { %v8043_v58 = vpack.i.bf16 %v5339_v45, %v5338_v11  ;;  %v8048_v23 = vpack.i.bf16 %v5336_v50, %v5335_v34  ;;  %v5332_v34 = vmul.f32 %v11534_v52, %v11141_v43 }
0x11fc   : > { %8099 = vrot.lane.b32.xlu2 %v8098_v19, %s13481_s23  ;;  %v11600_v19 = vld [vmem:[#allocation2 + $0x38] sm:$0xff] }
0x11fd   : > { %8044 = vrot.lane.b32.xlu0 %v8043_v58, %s13486_s20  ;;  %8049 = vrot.lane.b32.xlu1 %v8048_v23, %s13486_s20  ;;  %v8113_v23 = vpack.i.bf16 %v5627_v60, %v5626_v46  ;;  %v8063_v45 = vpack.i.bf16 %v5333_v20, %v5332_v34  ;;  %v5624_v32 = vmul.f32 %v5613_v3, %v11600_v19 }
0x11fe   : > { %v5330_v46 = vmul.f32 %v5325_v16, %v11604_v33  ;;  %v5329_v20 = vmul.f32 %v11534_v52, %v11139_v7  ;;  %v5620_v16 = vmul.f32 %v5610_v35, %v11141_v43  ;;  %v5621_v52 = vmul.f32 %v5613_v3, %v11503_v24 }
0x11ff   : > { %v4938_v48 = vpop.permute.xlu1 %4937 }
0x1200   : > { %v4941_v51 = vsel %vm13487_vm4, %v4938_v48, %v11551_v59  ;;  %v4954_v11 = vmul.f32 %v4938_v48, %v11214_v6  ;;  %v4951_v42 = vmul.f32 %v4938_v48, %v11281_v17  ;;  %vm13507_vm4 = vmmov %vm13506_vm0 }
0x1201   : > { %v4955_v58 = vmul.f32 %v11586_v56, %v4941_v51  ;;  %v4952_v60 = vmul.f32 %v11600_v19, %v4941_v51 }
0x1203   : > { %v8058_v50 = vpack.i.bf16 %v4955_v58, %v4954_v11  ;;  %v8128_v11 = vpack.i.bf16 %v5624_v32, %v5623_v2  ;;  %v8078_v58 = vpack.i.bf16 %v5330_v46, %v5329_v20  ;;  %v4949_v32 = vmul.f32 %v11503_v24, %v4941_v51 }
0x1204   : > { %8114 = vrot.lane.b32.xlu2 %v8113_v23, %s13488_s2  ;;  %v8073_v23 = vpack.i.bf16 %v4952_v60, %v4951_v42  ;;  %v5242_v46 = vmul.f32 %v11556_v10, %v11214_v6  ;;  %v8143_v60 = vpack.i.bf16 %v5621_v52, %v5620_v16  ;;  %v4946_v16 = vmul.f32 %v11604_v33, %v4941_v51 }
0x1205   : > { %8064 = vrot.lane.b32.xlu1 %v8063_v45, %s13486_s20  ;;  %8059 = vrot.lane.b32.xlu0 %v8058_v50, %s13489_s24  ;;  %v11620_v50 = vld [vmem:[#allocation2 + $0x18] sm:$0xff]  ;;  %v4859_v51 = vmul.f32 %v11586_v56, %v11491_v22 }
0x1206   : > { %v4948_v2 = vmul.f32 %v11620_v50, %v4938_v48 }
0x1207   : > { %v11611_v34 = vpop.permute.xlu1 %5227 }
0x1208   : > { %13490 = vst [vmem:[#allocation72_spill] sm:$0xff] %v11611_v34  ;;  %v5229_v45 = vsel %vm13491_vm9, %v11556_v10, %v11611_v34  ;;  %v8088_v20 = vpack.i.bf16 %v4949_v32, %v4948_v2  ;;  %v5618_v34 = vmul.f32 %v5613_v3, %v11604_v33  ;;  %v5239_v2 = vmul.f32 %v11556_v10, %v11281_v17  ;;  %v11642_v32 = vpop.permute.xlu2 %5131  ;;  %vm13509_vm9 = vmmov %vm13506_vm0 }
0x1209   : > { %v5243_v42 = vmul.f32 %v11586_v56, %v5229_v45  ;;  %v5240_v52 = vmul.f32 %v11600_v19, %v5229_v45 }
0x120c   : > { %8129 = vrot.lane.b32.xlu2 %v8128_v11, %s13488_s2  ;;  %v8093_v11 = vpack.i.bf16 %v5243_v42, %v5242_v46 }
0x120d   : > { %8079 = vrot.lane.b32.xlu1 %v8078_v58, %s13486_s20  ;;  %8074 = vrot.lane.b32.xlu0 %v8073_v23, %s13489_s24  ;;  %v5617_v58 = vmul.f32 %v5610_v35, %v11139_v7  ;;  %v11632_v23 = vld [vmem:[#allocation2] sm:$0xff] }
0x120e   : > { %v4945_v0 = vmul.f32 %v11632_v23, %v4938_v48 }
0x120f   : > { %v11634_v31 = vpop.permute.xlu1 %5129  ;;  %v8158_v42 = vpack.i.bf16 %v5618_v34, %v5617_v58  ;;  %v5237_v34 = vmul.f32 %v11503_v24, %v5229_v45  ;;  %v5236_v58 = vmul.f32 %v11556_v10, %v11141_v43 }
0x1210   : > { %v11647_v35 = vsel %vm13493_vm11, %v11634_v31, %v11642_v32  ;;  %v8103_v46 = vpack.i.bf16 %v4946_v16, %v4945_v0  ;;  %v5143_v48 = vmul.f32 %v11634_v31, %v11281_v17  ;;  %vm13511_vm11 = vmmov %vm13506_vm0 }
0x1211   : > { %v5144_v3 = vmul.f32 %v11600_v19, %v11647_v35 }
0x1213   : > { %v8163_v16 = vpack.i.bf16 %v5144_v3, %v5143_v48  ;;  %v5234_v48 = vmul.f32 %v11604_v33, %v5229_v45 }
0x1214   : > { %8144 = vrot.lane.b32.xlu2 %v8143_v60, %s13488_s2  ;;  %v8108_v60 = vpack.i.bf16 %v5240_v52, %v5239_v2 }
0x1215   : > { %8089 = vrot.lane.b32.xlu0 %v8088_v20, %s13489_s24  ;;  %8094 = vrot.lane.b32.xlu1 %v8093_v11, %s13492_s17  ;;  %v11659_v20 = vpop.permute.xlu0 %5513  ;;  %v4855_v11 = vmul.f32 %v11482_v14, %v11281_v17 }
0x1216   : > { %v5527_v3 = vmul.f32 %v11659_v20, %v11281_v17 }
0x1217   : > { %v11661_v0 = vpop.permute.xlu1 %5515  ;;  %v8118_v2 = vpack.i.bf16 %v4855_v11, %v4859_v51  ;;  %v4852_v51 = vmul.f32 %v11482_v14, %v11141_v43 }
0x1218   : > { %13494 = vst [vmem:[#allocation74_spill] sm:$0xff] %v11661_v0  ;;  %v11670_v52 = vsel %vm13495_vm10, %v11659_v20, %v11661_v0  ;;  %v11682_v0 = vpop.permute.xlu2 %5033  ;;  %vm13513_vm10 = vcmask 506880  }
0x1219   : > { %v5050_v43 = vmul.f32 %v11682_v0, %v11214_v6 }
0x121c   : > { %8159 = vrot.lane.b32.xlu2 %v8158_v42, %s13488_s2  ;;  %v8123_v42 = vpack.i.bf16 %v5237_v34, %v5236_v58  ;;  %v5233_v34 = vmul.f32 %v11556_v10, %v11139_v7  ;;  %v11700_v7 = vld [vmem:[#allocation2 + $0x48] sm:$0xff] }
0x121d   : > { %8104 = vrot.lane.b32.xlu0 %v8103_v46, %s13489_s24  ;;  %8109 = vrot.lane.b32.xlu1 %v8108_v60, %s13492_s17  ;;  %v5528_v46 = vmul.f32 %v11600_v19, %v11670_v52  ;;  %v4856_v60 = vmul.f32 %v11600_v19, %v11491_v22  ;;  %v11688_v11 = vpop.permute.xlu0 %5035  ;;  %v5146_v10 = vmul.f32 %v11634_v31, %v11700_v7 }
0x121e   : > { %13497 = vst [vmem:[#allocation71_spill] sm:$0xff] %v11688_v11  ;;  %v11693_v22 = vsel %vm13498_vm2, %v11682_v0, %v11688_v11  ;;  %v5137_v11 = vmul.f32 %v11634_v31, %v11632_v23  ;;  %vm13515_vm2 = vmmov %vm13513_vm10 }
0x121f   : > { %v8178_v58 = vpack.i.bf16 %v5528_v46, %v5527_v3  ;;  %v8133_v45 = vpack.i.bf16 %v4852_v51, %v4856_v60  ;;  %v5051_v14 = vmul.f32 %v11586_v56, %v11693_v22  ;;  %v13503_v51 = vpack.i.bf16 %v11499_v15, %v11507_v40 }
0x1220   : > { %v11710_v46 = vpop.permute.xlu2 %5419  ;;  %v5041_v40 = vmul.f32 %v11682_v0, %v11632_v23  ;;  %v5140_v15 = vmul.f32 %v11634_v31, %v11620_v50 }
0x1221   : > { %13500 = vst [vmem:[#allocation70_spill] sm:$0xff] %v11710_v46  ;;  %v8193_v60 = vpack.i.bf16 %v5051_v14, %v5050_v43 }
0x1224   : > { %8164 = vrot.lane.b32.xlu2 %v8163_v16, %s13496_s4  ;;  %v8138_v16 = vpack.i.bf16 %v5234_v48, %v5233_v34 }
0x1225   : > { %8119 = vrot.lane.b32.xlu0 %v8118_v2, %s13476_s16  ;;  %8124 = vrot.lane.b32.xlu1 %v8123_v42, %s13492_s17  ;;  %v5147_v2 = vmul.f32 %v11586_v56, %v11647_v35  ;;  %v11708_v42 = vpop.permute.xlu1 %5417 }
0x1226   : > { %v11715_v48 = vsel %vm13501_vm1, %v11708_v42, %v11710_v46  ;;  %v5434_v34 = vmul.f32 %v11708_v42, %v11700_v7  ;;  %vm13518_vm1 = vmmov %vm13515_vm2 }
0x1227   : > { %v8153_v3 = vpack.i.bf16 %v5147_v2, %v5146_v10  ;;  %v5042_v2 = vmul.f32 %v11604_v33, %v11693_v22 }
0x122c   : > { %8179 = vrot.lane.b32.xlu2 %v8178_v58, %s13499_s21  ;;  %v5435_v58 = vmul.f32 %v11586_v56, %v11715_v48 }
0x122d   : > { %8134 = vrot.lane.b32.xlu0 %v8133_v45, %s13476_s16  ;;  %8139 = vrot.lane.b32.xlu1 %v8138_v16, %s13492_s17  ;;  %v6782_v45 = vld [vmem:[%s12733_s1 + $0x4] ss:$8 sm:$0x3] }
0x122e   : > { %v5799_v16 = vperm.slane %v6782_v45, 0  ;;  %v5800_v43 = vperm.slane %v6782_v45, 1  ;;  %v8208_v14 = vpack.i.bf16 %v5435_v58, %v5434_v34  ;;  %v5531_v34 = vmul.f32 %v11586_v56, %v11670_v52 }
0x122f   : > { %v5530_v58 = vmul.f32 %v11659_v20, %v11214_v6 }
0x1234   : > { %8194 = vrot.lane.b32.xlu2 %v8193_v60, %s13502_s13 }
0x1235   : > { %8149 = vrot.lane.b32.xlu0 %v13503_v51, %s13476_s16  ;;  %8154 = vrot.lane.b32.xlu1 %v8153_v3, %s13496_s4  ;;  %v5141_v51 = vmul.f32 %v11503_v24, %v11647_v35 }
0x123c   : > { %8209 = vrot.lane.b32.xlu2 %v8208_v14, %s13479_s11  ;;  %v8168_v14 = vpack.i.bf16 %v5531_v34, %v5530_v58 }
0x123d   : > { %5801 = vrot.lane.b32.xlu0 %v5799_v16, %s13504_s25  ;;  %5803 = vrot.lane.b32.xlu1 %v5800_v43, %s13504_s25  ;;  %v8223_v16 = vpack.i.bf16 %v5042_v2, %v5041_v40  ;;  %v8173_v43 = vpack.i.bf16 %v5141_v51, %v5140_v15  ;;  %v5138_v40 = vmul.f32 %v11604_v33, %v11647_v35  ;;  %v8366_v2 = vld [vmem:[#allocation2 + $0x18] sm:$0xff]  ;;  %s8485_s25 = scalar_lea.hbm %s12740_s8, 8 }
0x123e   : > { %v11737_v10 = vpop.permute.xlu2 %8054  ;;  %v5525_v15 = vmul.f32 %v11670_v52, %v11503_v24  ;;  %v5047_v35 = vmul.f32 %v11682_v0, %v11281_v17 }
0x123f   : > { %13505 = vst [vmem:[#allocation69_spill] sm:$0xff] %v11737_v10  ;;  %v13086_v60 = vunpack.i.h.bf16 %v11737_v10  ;;  %v8056_v3 = vunpack.i.l.bf16 %v11737_v10  ;;  %v8183_v31 = vpack.i.bf16 %v5138_v40, %v5137_v11  ;;  %v5522_v11 = vmul.f32 %v11670_v52, %v11604_v33 }
0x1241   : > { %v5767_v45 = vsel %vm13506_vm0, %v8056_v3, %v13086_v60  ;;  %v5524_v3 = vmul.f32 %v8366_v2, %v11659_v20  ;;  %v5044_v2 = vmul.f32 %v11682_v0, %v11620_v50  ;;  %vm13519_vm0 = vcmask 621568  }
0x1242   : > { %6290 = vmatpush.msra.mxu3 %v5767_v45 }
0x1243   : > { %v8188_v34 = vpack.i.bf16 %v5525_v15, %v5524_v3  ;;  %v11789_v3 = vld [vmem:[#allocation2 + $0x30] sm:$0xff] }
0x1244   : > { %8224 = vrot.lane.b32.xlu2 %v8223_v16, %s13502_s13 }
0x1245   : > { %8174 = vrot.lane.b32.xlu1 %v8173_v43, %s13496_s4  ;;  %8169 = vrot.lane.b32.xlu0 %v8168_v14, %s13499_s21  ;;  %v5048_v43 = vmul.f32 %v11600_v19, %v11693_v22 }
0x1246   : > { %v11757_v46 = vpop.permute.xlu2 %8069 }
0x1247   : > { %v13085_v6 = vunpack.i.h.bf16 %v11757_v46  ;;  %v8071_v10 = vunpack.i.l.bf16 %v11757_v46  ;;  %v8203_v17 = vpack.i.bf16 %v5048_v43, %v5047_v35  ;;  %v5432_v35 = vmul.f32 %v11600_v19, %v11715_v48 }
0x1249   : > { %v5765_v51 = vsel %vm13507_vm4, %v8071_v10, %v13085_v6  ;;  %v8367_v10 = vld [vmem:[#allocation2] sm:$0xff]  ;;  %vm13520_vm4 = vmmov %vm13519_vm0 }
0x124a   : > { %6291 = vmatpush.msra.mxu3 %v5765_v51  ;;  %v5521_v14 = vmul.f32 %v8367_v10, %v11659_v20  ;;  %v5045_v20 = vmul.f32 %v11503_v24, %v11693_v22  ;;  %v5431_v51 = vmul.f32 %v11708_v42, %v11789_v3  ;;  %v5425_v22 = vmul.f32 %v11708_v42, %v11632_v23 }
0x124c   : > { %v8198_v15 = vpack.i.bf16 %v5522_v11, %v5521_v14  ;;  %v8218_v43 = vpack.i.bf16 %v5432_v35, %v5431_v51  ;;  %v5428_v11 = vmul.f32 %v11708_v42, %v11620_v50 }
0x124d   : > { %8184 = vrot.lane.b32.xlu0 %v8183_v31, %s13496_s4  ;;  %8189 = vrot.lane.b32.xlu1 %v8188_v34, %s13499_s21 }
0x124e   : > { %v11773_v58 = vpop.permute.xlu2 %8084 }
0x124f   : > { %13508 = vst [vmem:[#allocation66_spill] sm:$0xff] %v11773_v58  ;;  %v13082_v45 = vunpack.i.h.bf16 %v11773_v58  ;;  %v8086_v16 = vunpack.i.l.bf16 %v11773_v58 }
0x1251   : > { %v5763_v40 = vsel %vm13509_vm9, %v8086_v16, %v13082_v45  ;;  %v8213_v16 = vpack.i.bf16 %v5045_v20, %v5044_v2  ;;  %vm13524_vm9 = vmmov %vm13518_vm1 }
0x1252   : > { %6292 = vmatpush.msra.mxu3 %v5763_v40 }
0x1255   : > { %8204 = vrot.lane.b32.xlu1 %v8203_v17, %s13502_s13  ;;  %8199 = vrot.lane.b32.xlu0 %v8198_v15, %s13499_s21  ;;  %v5429_v17 = vmul.f32 %v11715_v48, %v11503_v24  ;;  %v5426_v15 = vmul.f32 %v11715_v48, %v11604_v33 }
0x1256   : > { %v11791_v52 = vpop.permute.xlu2 %8099 }
0x1257   : > { %13510 = vst [vmem:[#allocation67_spill] sm:$0xff] %v11791_v52  ;;  %v13080_v31 = vunpack.i.h.bf16 %v11791_v52  ;;  %v8101_v34 = vunpack.i.l.bf16 %v11791_v52  ;;  %v8228_v20 = vpack.i.bf16 %v5429_v17, %v5428_v11  ;;  %v8233_v51 = vpack.i.bf16 %v5426_v15, %v5425_v22 }
0x1259   : > { %v5761_v0 = vsel %vm13511_vm11, %v8101_v34, %v13080_v31  ;;  %vm13525_vm11 = vcmask 654336  }
0x125a   : > { %6293 = vmatpush.msra.mxu3 %v5761_v0 }
0x125d   : > { %8214 = vrot.lane.b32.xlu0 %v8213_v16, %s13502_s13  ;;  %8219 = vrot.lane.b32.xlu1 %v8218_v43, %s13479_s11 }
0x125e   : > { %v11810_v10 = vpop.permute.xlu2 %8114 }
0x125f   : > { %13512 = vst [vmem:[#allocation64_spill] sm:$0xff] %v11810_v10  ;;  %v13079_v14 = vunpack.i.h.bf16 %v11810_v10  ;;  %v8116_v40 = vunpack.i.l.bf16 %v11810_v10 }
0x1261   : > { %v5671_v2 = vsel %vm13513_vm10, %v8116_v40, %v13079_v14  ;;  %vm13526_vm10 = vmmov %vm13519_vm0 }
0x1262   : > { %6294 = vmatpush.msra.mxu3 %v5671_v2 }
0x1265   : > { %8229 = vrot.lane.b32.xlu0 %v8228_v20, %s13479_s11  ;;  %8234 = vrot.lane.b32.xlu1 %v8233_v51, %s13479_s11 }
0x1266   : > { %v11823_v42 = vpop.permute.xlu2 %8129 }
0x1267   : > { %13514 = vst [vmem:[#allocation68_spill] sm:$0xff] %v11823_v42  ;;  %v13078_v34 = vunpack.i.h.bf16 %v11823_v42  ;;  %v8131_v35 = vunpack.i.l.bf16 %v11823_v42 }
0x1269   : > { %v5669_v48 = vsel %vm13515_vm2, %v8131_v35, %v13078_v34  ;;  %vm13529_vm2 = vmmov %vm13525_vm11 }
0x126a   : > { %6295 = vmatpush.msra.mxu3 %v5669_v48 }
0x126e   : > { %v11830_v0 = vpop.permute.xlu2 %8144 }
0x126f   : > { %13516 = vst [vmem:[#allocation65_spill] sm:$0xff] %v11830_v0  ;;  %v13081_v16 = vunpack.i.h.bf16 %v11830_v0  ;;  %v8146_v43 = vunpack.i.l.bf16 %v11830_v0  ;;  %v11834_v22 = vpop.permute.xlu0 %8044  ;;  %v11836_v11 = vpop.permute.xlu1 %8049 }
0x1270   : > { %13517 = vst [vmem:[#allocation62_spill] sm:$0xff] %v11836_v11  ;;  %v13084_v40 = vunpack.i.h.bf16 %v11834_v22  ;;  %v8046_v17 = vunpack.i.l.bf16 %v11834_v22  ;;  %v13083_v15 = vunpack.i.h.bf16 %v11836_v11  ;;  %v8051_v2 = vunpack.i.l.bf16 %v11836_v11 }
0x1271   : > { %v5667_v20 = vsel %vm13518_vm1, %v8146_v43, %v13081_v16  ;;  %vm13530_vm1 = vmmov %vm13519_vm0  ;;  %v13552_v11 = vunpack.i.h.bf16 %v11554_v1 }
0x1272   : > { %6296 = vmatpush.msra.mxu3 %v5667_v20  ;;  %v5383_v51 = vsel %vm13519_vm0, %v8046_v17, %v13084_v40  ;;  %v5381_v35 = vsel %vm13520_vm4, %v8051_v2, %v13083_v15  ;;  %vm13533_vm0 = vmmov %vm13529_vm2  ;;  %vm13534_vm4 = vcmask 629760  }
0x1273   : > { %6261 = vmatpush.msra.mxu2 %v5383_v51 }
0x1275   : > { %6262 = vmatpush.msra.mxu2 %v5381_v35 }
0x1276   : > { %v11851_v48 = vpop.permute.xlu2 %8159 }
0x1277   : > { %13521 = vst [vmem:[#allocation63_spill] sm:$0xff] %v11851_v48  ;;  %v13087_v34 = vunpack.i.h.bf16 %v11851_v48  ;;  %v8161_v14 = vunpack.i.l.bf16 %v11851_v48  ;;  %v11855_v31 = vpop.permute.xlu0 %8059  ;;  %v11857_v43 = vpop.permute.xlu1 %8064 }
0x1278   : > { %13522 = vst [vmem:[#allocation61_spill] sm:$0xff] %v11855_v31  ;;  %v13088_v20 = vunpack.i.h.bf16 %v11855_v31  ;;  %v8061_v17 = vunpack.i.l.bf16 %v11855_v31  ;;  %v13089_v51 = vunpack.i.h.bf16 %v11857_v43  ;;  %v8066_v16 = vunpack.i.l.bf16 %v11857_v43 }
0x1279   : > { %13523 = vst [vmem:[#allocation77_spill] sm:$0xff] %v11857_v43  ;;  %v5665_v2 = vsel %vm13524_vm9, %v8161_v14, %v13087_v34  ;;  %vm13537_vm9 = vmmov %vm13533_vm0  ;;  %v8021_v43 = vunpack.i.l.bf16 %v11465_v13 }
0x127a   : > { %6297 = vmatpush.msra.mxu3 %v5665_v2  ;;  %v4999_v35 = vsel %vm13525_vm11, %v8061_v17, %v13088_v20  ;;  %v5379_v45 = vsel %vm13526_vm10, %v8066_v16, %v13089_v51  ;;  %vm13538_vm11 = vmmov %vm13534_vm4  ;;  %vm13540_vm10 = vcmask 752640  }
0x127b   : > { %6232 = vmatpush.msra.mxu1 %v4999_v35  ;;  %6263 = vmatpush.msra.mxu2 %v5379_v45 }
0x127f   : > { %v11872_v15 = vpop.permute.xlu0 %8074  ;;  %v11874_v40 = vpop.permute.xlu1 %8079 }
0x1280   : > { %13527 = vst [vmem:[#allocation78_spill] sm:$0xff] %v11872_v15  ;;  %v13091_v6 = vunpack.i.h.bf16 %v11872_v15  ;;  %v8076_v60 = vunpack.i.l.bf16 %v11872_v15  ;;  %v13092_v14 = vunpack.i.h.bf16 %v11874_v40  ;;  %v8081_v2 = vunpack.i.l.bf16 %v11874_v40 }
0x1281   : > { %13528 = vst [vmem:[#allocation79_spill] sm:$0xff] %v11874_v40 }
0x1282   : > { %v4997_v17 = vsel %vm13529_vm2, %v8076_v60, %v13091_v6  ;;  %v5377_v45 = vsel %vm13530_vm1, %v8081_v2, %v13092_v14  ;;  %vm13541_vm2 = vmmov %vm13534_vm4 }
0x1283   : > { %6233 = vmatpush.msra.mxu1 %v4997_v17  ;;  %6264 = vmatpush.msra.mxu2 %v5377_v45  ;;  %vm13544_vm1 = vmmov %vm13540_vm10 }
0x1287   : > { %v11886_v16 = vpop.permute.xlu0 %8089  ;;  %v11888_v35 = vpop.permute.xlu1 %8094 }
0x1288   : > { %13531 = vst [vmem:[#allocation80_spill] sm:$0xff] %v11886_v16  ;;  %v13095_v34 = vunpack.i.h.bf16 %v11886_v16  ;;  %v8091_v20 = vunpack.i.l.bf16 %v11886_v16  ;;  %v13096_v51 = vunpack.i.h.bf16 %v11888_v35  ;;  %v8096_v48 = vunpack.i.l.bf16 %v11888_v35 }
0x1289   : > { %13532 = vst [vmem:[#allocation81_spill] sm:$0xff] %v11888_v35 }
0x128a   : > { %v4995_v60 = vsel %vm13533_vm0, %v8091_v20, %v13095_v34  ;;  %v5287_v2 = vsel %vm13534_vm4, %v8096_v48, %v13096_v51  ;;  %v11916_v34 = vld [vmem:[#allocation9] sm:$0xff]  ;;  %v8042_v51 = vunpack.i.h.bf16 %v11536_v21  ;;  %v11930_v21 = vld [vmem:[#allocation9 + $0x38] sm:$0xff]  ;;  %vm13545_vm0 = vmmov %vm13541_vm2 }
0x128b   : > { %6234 = vmatpush.msra.mxu1 %v4995_v60  ;;  %6265 = vmatpush.msra.mxu2 %v5287_v2  ;;  %vm13549_vm4 = vmmov %vm13544_vm1 }
0x128c   : > { %6161 = vmatmul.f32.vlgmr.msrb.gmra.mxu2 %v11916_v34 }
0x128f   : > { %v11900_v17 = vpop.permute.xlu0 %8104  ;;  %v11902_v45 = vpop.permute.xlu1 %8109 }
0x1290   : > { %13535 = vst [vmem:[#allocation82_spill] sm:$0xff] %v11900_v17  ;;  %v13100_v6 = vunpack.i.h.bf16 %v11900_v17  ;;  %v8106_v14 = vunpack.i.l.bf16 %v11900_v17  ;;  %v13101_v0 = vunpack.i.h.bf16 %v11902_v45  ;;  %v8111_v42 = vunpack.i.l.bf16 %v11902_v45 }
0x1291   : > { %13536 = vst [vmem:[#allocation83_spill] sm:$0xff] %v11902_v45 }
0x1292   : > { %v4993_v20 = vsel %vm13537_vm9, %v8106_v14, %v13100_v6  ;;  %v5285_v48 = vsel %vm13538_vm11, %v8111_v42, %v13101_v0  ;;  %v11932_v6 = vld [vmem:[#allocation9 + $0x8] sm:$0xff]  ;;  %vm13550_vm9 = vcmask 637952   ;;  %vm13551_vm11 = vmmov %vm13544_vm1 }
0x1293   : > { %6235 = vmatpush.msra.mxu1 %v4993_v20  ;;  %6266 = vmatpush.msra.mxu2 %v5285_v48 }
0x1294   : > { %6164 = vmatmul.f32.gmra.mxu2 %v11930_v21  ;;  %6190 = vmatmul.f32.vlgmr.msrb.gmra.mxu3 %v11932_v6 }
0x1297   : > { %v8120_v60 = vpop.permute.xlu0 %8119  ;;  %v11914_v2 = vpop.permute.xlu1 %8124 }
0x1298   : > { %13539 = vst [vmem:[#allocation84_spill] sm:$0xff] %v11914_v2  ;;  %v8121_v10 = vunpack.i.l.bf16 %v8120_v60  ;;  %v13104_v52 = vunpack.i.h.bf16 %v11914_v2  ;;  %v8126_v17 = vunpack.i.l.bf16 %v11914_v2  ;;  %v8122_v0 = vunpack.i.h.bf16 %v8120_v60  ;;  %v11945_v60 = vpop.permute.xlu2 %8164 }
0x1299   : > { %13546 = vst [vmem:[#allocation87_spill] sm:$0xff] %v11945_v60  ;;  %v8166_v2 = vunpack.i.l.bf16 %v11945_v60 }
0x129a   : > { %v4903_v14 = vsel %vm13540_vm10, %v8042_v51, %v8121_v10  ;;  %v5283_v42 = vsel %vm13541_vm2, %v8126_v17, %v13104_v52  ;;  %v8027_v52 = vunpack.i.h.bf16 %v11473_v61  ;;  %vm13553_vm10 = vmmov %vm13544_vm1 }
0x129b   : > { %6236 = vmatpush.msra.mxu1 %v4903_v14  ;;  %6267 = vmatpush.msra.mxu2 %v5283_v42  ;;  %v8036_v42 = vunpack.i.l.bf16 %v11554_v1  ;;  %vm13555_vm2 = vmmov %vm13550_vm9 }
0x129d   : > { %v4897_v61 = vsel %vm13553_vm10, %v8036_v42, %v13552_v11  ;;  %v11997_v42 = vld [vmem:[#allocation9 + $0xa8] sm:$0xff] }
0x129f   : > { %v11926_v20 = vpop.permute.xlu0 %8134  ;;  %v11928_v48 = vpop.permute.xlu1 %8139 }
0x12a0   : > { %13542 = vst [vmem:[#allocation85_spill] sm:$0xff] %v11926_v20  ;;  %v13109_v16 = vunpack.i.l.bf16 %v11926_v20  ;;  %v13110_v58 = vunpack.i.h.bf16 %v11928_v48  ;;  %v8141_v51 = vunpack.i.l.bf16 %v11928_v48  ;;  %v8137_v15 = vunpack.i.h.bf16 %v11926_v20 }
0x12a1   : > { %13543 = vst [vmem:[#allocation86_spill] sm:$0xff] %v11928_v48  ;;  %v13554_v48 = vunpack.i.h.bf16 %v11945_v60 }
0x12a2   : > { %v4901_v17 = vsel %vm13544_vm1, %v8122_v0, %v13109_v16  ;;  %v5281_v14 = vsel %vm13545_vm0, %v8141_v51, %v13110_v58  ;;  %v11955_v0 = vld [vmem:[#allocation9 + $0x70] sm:$0xff]  ;;  %v11957_v16 = vld [vmem:[#allocation9 + $0x40] sm:$0xff]  ;;  %vm13558_vm1 = vcmask 760832  }
0x12a3   : > { %6237 = vmatpush.msra.mxu1 %v4901_v17  ;;  %6268 = vmatpush.msra.mxu2 %v5281_v14  ;;  %vm13560_vm0 = vmmov %vm13558_vm1 }
0x12a4   : > { %6167 = vmatmul.f32.gmra.mxu2 %v11955_v0  ;;  %6193 = vmatmul.f32.gmra.mxu3 %v11957_v16 }
0x12a7   : > { %v11951_v45 = vpop.permute.xlu0 %8149  ;;  %v11953_v31 = vpop.permute.xlu1 %8154 }
0x12a8   : > { %13547 = vst [vmem:[#allocation88_spill] sm:$0xff] %v11951_v45  ;;  %v8152_v51 = vunpack.i.h.bf16 %v11951_v45  ;;  %v13119_v17 = vunpack.i.l.bf16 %v11951_v45  ;;  %v13118_v14 = vunpack.i.h.bf16 %v11953_v31  ;;  %v8156_v58 = vunpack.i.l.bf16 %v11953_v31 }
0x12a9   : > { %13548 = vst [vmem:[#allocation89_spill] sm:$0xff] %v11953_v31  ;;  %v5189_v45 = vsel %vm13555_vm2, %v8166_v2, %v13554_v48 }
0x12aa   : > { %v4899_v20 = vsel %vm13549_vm4, %v8137_v15, %v13119_v17  ;;  %v5191_v35 = vsel %vm13550_vm9, %v8156_v58, %v13118_v14  ;;  %v11974_v40 = vsel %vm13551_vm11, %v8121_v10, %v8152_v51  ;;  %v11983_v15 = vpop.permute.xlu2 %8179  ;;  %v13557_v58 = vunpack.i.l.bf16 %v11547_v25  ;;  %vm13563_vm9 = vmmov %vm13560_vm0  ;;  %v12015_v17 = vld [vmem:[#allocation2 + $0x40] sm:$0xff] }
0x12ab   : > { %6238 = vmatpush.msra.mxu1 %v4899_v20  ;;  %6269 = vmatpush.msra.mxu2 %v5191_v35  ;;  %13556 = vst [vmem:[#allocation90_spill] sm:$0xff] %v11983_v15  ;;  %v8006_v35 = vunpack.i.l.bf16 %v11457_v26  ;;  %vm13561_vm4 = vcmask 556032   ;;  %vm13565_vm11 = vcmask 769024  }
0x12ac   : > { %v4807_v10 = vsel %vm13558_vm1, %v8027_v52, %v13557_v58  ;;  %v7997_v52 = vunpack.i.h.bf16 %v11396_v39  ;;  %6170 = vmatmul.f32.gmra.mxu2 %v11997_v42  ;;  %vm13567_vm10 = vmmov %vm13565_vm11  ;;  %vm13569_vm1 = vcmask 515072  }
0x12ad   : > { %6239 = vmatpush.msra.mxu1 %v4897_v61  ;;  %6270 = vmatpush.msra.mxu2 %v5189_v45  ;;  %v13559_v45 = vunpack.i.h.bf16 %v11465_v13  ;;  %v11999_v61 = vld [vmem:[#allocation9 + $0x78] sm:$0xff] }
0x12ae   : > { %6196 = vmatmul.f32.gmra.mxu3 %v11999_v61 }
0x12af   : > { %v5802_v20 = vpop.permute.xlu0 %5801  ;;  %v11989_v51 = vpop.permute.xlu1 %5803  ;;  %6240 = vmatpush.msra.mxu1 %v4807_v10  ;;  %v4805_v48 = vsel %vm13560_vm0, %v8021_v43, %v13559_v45  ;;  %v13120_v43 = vunpack.i.l.bf16 %v11455_v18  ;;  %vm13571_vm0 = vmmov %vm13567_vm10 }
0x12b0   : > { %v5812_v1 = vmul.f32 %v5802_v20, %v11620_v50  ;;  %v5815_v11 = vmul.f32 %v5802_v20, %v11789_v3  ;;  %v5818_v2 = vmul.f32 %v5802_v20, %v11700_v7  ;;  %v5805_v58 = vsel %vm13561_vm4, %v5802_v20, %v11989_v51 }
0x12b1   : > { %6241 = vmatpush.msra.mxu1 %v4805_v48  ;;  %v7991_v50 = vunpack.i.l.bf16 %v11399_v55  ;;  %v5819_v3 = vmul.f32 %v5805_v58, %v11586_v56  ;;  %v5816_v7 = vmul.f32 %v5805_v58, %v11600_v19  ;;  %v5813_v13 = vmul.f32 %v5805_v58, %v11503_v24 }
0x12b2   : > { %v13562_v48 = vunpack.i.h.bf16 %v11457_v26  ;;  %v5721_v24 = vmul.f32 %v12015_v17, %v11538_v29  ;;  %vm13574_vm4 = vcmask 1022976  }
0x12b3   : > { %6242 = vmatpush.msra.mxu1 %v11468_v9  ;;  %v8238_v39 = vpack.i.bf16 %v5819_v3, %v5818_v2  ;;  %v8243_v10 = vpack.i.bf16 %v5816_v7, %v5815_v11  ;;  %v8248_v45 = vpack.i.bf16 %v5813_v13, %v5812_v1  ;;  %v4711_v9 = vsel %vm13565_vm11, %v7997_v52, %v13120_v43  ;;  %v12039_v52 = vld [vmem:[#allocation9 + $0x10] sm:$0xff]  ;;  %vm13578_vm11 = vmmov %vm13574_vm4 }
0x12b4   : > { %v4801_v14 = vsel %vm13563_vm9, %v8006_v35, %v13562_v48  ;;  %v13566_v1 = vunpack.i.h.bf16 %v11399_v55  ;;  %v7976_v35 = vunpack.i.l.bf16 %v11385_v57  ;;  %v5809_v2 = vmul.f32 %v5802_v20, %v11632_v23  ;;  %6219 = vmatmul.f32.vlgmr.msra.gmra.mxu0 %v12039_v52  ;;  %v12061_v43 = vld [vmem:[#allocation9 + $0xb0] sm:$0xff]  ;;  %vm13576_vm9 = vmmov %vm13569_vm1 }
0x12b5   : > { %6243 = vmatpush.msra.mxu1 %v4801_v14  ;;  %8239 = vrot.lane.b32.xlu2 %v8238_v39, %s13564_s10  ;;  %v12028_v14 = vld [vmem:[#allocation2 + $0x58] sm:$0xff]  ;;  %v5810_v55 = vmul.f32 %v5805_v58, %v11604_v33  ;;  %v7772_v20 = vunpack.i.h.bf16 %v10863_v27  ;;  %v8181_v48 = vunpack.i.l.bf16 %v11983_v15  ;;  %v13570_v58 = vunpack.i.h.bf16 %v11385_v57 }
0x12b6   : > { %8244 = vrot.lane.b32.xlu0 %v8243_v10, %s13564_s10  ;;  %v4709_v26 = vsel %vm13567_vm10, %v7991_v50, %v13566_v1  ;;  %v5724_v11 = vmul.f32 %v12028_v14, %v11538_v29  ;;  %8249 = vrot.lane.b32.xlu1 %v8248_v45, %s13564_s10  ;;  %v12041_v50 = vpop.permute.xlu2 %8194  ;;  %v4953_v45 = vmul.f32 %v12015_v17, %v11551_v59  ;;  %vm13579_vm10 = vmmov %vm13555_vm2 }
0x12b7   : > { %v12034_v3 = vpop.permute.xlu0 %8169  ;;  %v12036_v7 = vpop.permute.xlu1 %8174  ;;  %6244 = vmatpush.msra.mxu1 %v4711_v9  ;;  %v4956_v33 = vmul.f32 %v12028_v14, %v11551_v59  ;;  %v4705_v31 = vsel %vm13571_vm0, %v7976_v35, %v13570_v58  ;;  %6199 = vmatmul.f32.gmra.mxu3 %v12061_v43  ;;  %v12079_v35 = vld [vmem:[#allocation2 + $0x28] sm:$0xff]  ;;  %vm13584_vm0 = vcmask 646144  }
0x12b8   : > { %13568 = vst [vmem:[#allocation91_spill] sm:$0xff] %v12036_v7  ;;  %v13127_v13 = vunpack.i.h.bf16 %v12034_v3  ;;  %v8171_v39 = vunpack.i.l.bf16 %v12034_v3  ;;  %v13126_v10 = vunpack.i.h.bf16 %v12036_v7  ;;  %v8176_v23 = vunpack.i.l.bf16 %v12036_v7 }
0x12b9   : > { %6245 = vmatpush.msra.mxu1 %v4709_v26  ;;  %v8253_v60 = vpack.i.bf16 %v5721_v24, %v5724_v11  ;;  %v8258_v26 = vpack.i.bf16 %v5810_v55, %v5809_v2  ;;  %v7707_v7 = vunpack.i.h.bf16 %v10839_v38  ;;  %v8263_v18 = vpack.i.bf16 %v4953_v45, %v4956_v33  ;;  %v12075_v24 = vld [vmem:[#allocation2 + $0x10] sm:$0xff] }
0x12ba   : > { %v5187_v9 = vsel %vm13555_vm2, %v8176_v23, %v13126_v10  ;;  %v5575_v1 = vsel %vm13569_vm1, %v8171_v39, %v13127_v13  ;;  %v12068_v23 = vld [vmem:[#allocation9 + $0x18] sm:$0xff]  ;;  %v13573_v39 = vunpack.i.l.bf16 %v10863_v27  ;;  %v5715_v57 = vmul.f32 %v12075_v24, %v11538_v29  ;;  %vm13580_vm2 = vmmov %vm13569_vm1 }
0x12bb   : > { %6246 = vmatpush.msra.mxu1 %v11389_v44  ;;  %6271 = vmatpush.msra.mxu2 %v5187_v9  ;;  %13572 = vst [vmem:[#allocation92_spill] sm:$0xff] %v12068_v23  ;;  %v7726_v44 = vunpack.i.l.bf16 %v10861_v62  ;;  %v13575_v27 = vunpack.i.h.bf16 %v11983_v15  ;;  %v5337_v62 = vmul.f32 %v12015_v17, %v11568_v47  ;;  %v5340_v2 = vmul.f32 %v12028_v14, %v11568_v47  ;;  %v12104_v9 = vld [vmem:[#allocation9 + $0x48] sm:$0xff]  ;;  %vm13582_vm1 = vmmov %vm13574_vm4 }
0x12bc   : > { %6298 = vmatpush.msra.mxu3 %v5575_v1  ;;  %v3848_v10 = vsel %vm13574_vm4, %v13573_v39, %v7772_v20  ;;  %v8196_v20 = vunpack.i.l.bf16 %v12041_v50  ;;  %v4950_v1 = vmul.f32 %v12079_v35, %v11551_v59  ;;  %6222 = vmatmul.f32.gmra.mxu0 %v12104_v9  ;;  %vm13586_vm4 = vmmov %vm13582_vm1 }
0x12bd   : > { %6247 = vmatpush.msra.mxu1 %v4705_v31  ;;  %v5718_v31 = vmul.f32 %v12079_v35, %v11538_v29  ;;  %8254 = vrot.lane.b32.xlu2 %v8253_v60, %s13481_s23  ;;  %v5573_v11 = vsel %vm13576_vm9, %v8181_v48, %v13575_v27  ;;  %v13577_v27 = vunpack.i.h.bf16 %v10866_v41  ;;  %v8268_v41 = vpack.i.bf16 %v5337_v62, %v5340_v2 }
0x12be   : > { %8259 = vrot.lane.b32.xlu0 %v8258_v26, %s13564_s10  ;;  %8264 = vrot.lane.b32.xlu1 %v8263_v18, %s13489_s24  ;;  %v4947_v18 = vmul.f32 %v12075_v24, %v11551_v59  ;;  %v7762_v26 = vunpack.i.h.bf16 %v10886_v36  ;;  %v12112_v39 = vpop.permute.xlu2 %8209  ;;  %v7656_v59 = vunpack.i.l.bf16 %v10831_v12  ;;  %v7721_v12 = vunpack.i.l.bf16 %v10845_v53 }
0x12bf   : > { %6299 = vmatpush.msra.mxu3 %v5573_v11  ;;  %v12095_v29 = vpop.permute.xlu0 %8184  ;;  %v12097_v60 = vpop.permute.xlu1 %8189  ;;  %6248 = vmatmul.f32.vlgmr.msra.gmra.mxu1 %v12068_v23  ;;  %v3846_v11 = vsel %vm13578_vm11, %v13577_v27, %v7726_v44  ;;  %v8273_v15 = vpack.i.bf16 %v5715_v57, %v5718_v31  ;;  %v13583_v44 = vunpack.i.h.bf16 %v12041_v50  ;;  %vm13588_vm9 = vcmask 1031168  }
0x12c0   : > { %v13130_v45 = vunpack.i.h.bf16 %v12095_v29  ;;  %v8186_v33 = vunpack.i.l.bf16 %v12095_v29  ;;  %v13136_v58 = vunpack.i.h.bf16 %v12097_v60  ;;  %v8191_v48 = vunpack.i.l.bf16 %v12097_v60  ;;  %6348 = vmatpush.msrb.mxu1 %v3848_v10  ;;  %vm13590_vm11 = vmmov %vm13588_vm9 }
0x12c1   : > { %v13581_v10 = vunpack.i.l.bf16 %v10839_v38  ;;  %v5095_v27 = vsel %vm13584_vm0, %v8196_v20, %v13583_v44  ;;  %v12135_v38 = vld [vmem:[#allocation2 + $0x10] sm:$0xff]  ;;  %v7702_v62 = vunpack.i.h.bf16 %v10847_v30  ;;  %v5628_v53 = vmul.f32 %v12028_v14, %v11579_v8 }
0x12c2   : > { %v5185_v13 = vsel %vm13579_vm10, %v8186_v33, %v13130_v45  ;;  %v5571_v55 = vsel %vm13580_vm2, %v8191_v48, %v13136_v58  ;;  %6349 = vmatpush.msrb.mxu1 %v3846_v11  ;;  %v8278_v33 = vpack.i.bf16 %v4947_v18, %v4950_v1  ;;  %v12130_v45 = vld [vmem:[#allocation9 + $0x50] sm:$0xff]  ;;  %v5331_v2 = vmul.f32 %v11568_v47, %v12135_v38  ;;  %v12167_v11 = vld [vmem:[#allocation9 + $0x80] sm:$0xff]  ;;  %vm13591_vm10 = vmmov %vm13584_vm0 }
0x12c3   : > { %6272 = vmatpush.msra.mxu2 %v5185_v13  ;;  %v3844_v23 = vsel %vm13582_vm1, %v13581_v10, %v7707_v7  ;;  %6300 = vmatpush.msra.mxu3 %v5571_v55  ;;  %v5625_v13 = vmul.f32 %v12015_v17, %v11579_v8  ;;  %v13585_v7 = vunpack.i.h.bf16 %v10841_v37  ;;  %v5334_v37 = vmul.f32 %v12079_v35, %v11568_v47  ;;  %vm13593_vm1 = vmmov %vm13588_vm9  ;;  %v13612_v58 = vld [vmem:[#allocation19_spill] sm:$0xff] }
0x12c4   : > { %6350 = vmatpush.msrb.mxu1 %v3844_v23  ;;  %v13587_v23 = vunpack.i.l.bf16 %v10886_v36  ;;  %v7757_v1 = vunpack.i.h.bf16 %v10888_v63  ;;  %v4854_v47 = vmul.f32 %v12079_v35, %v11484_v54  ;;  %6225 = vmatmul.f32.gmra.mxu0 %v12167_v11  ;;  %vm13595_vm0 = vmmov %vm13593_vm1 }
0x12c5   : > { %6273 = vmatpush.msra.mxu2 %v5095_v27  ;;  %v3842_v57 = vsel %vm13586_vm4, %v13585_v7, %v7656_v59  ;;  %8269 = vrot.lane.b32.xlu2 %v8268_v41, %s13486_s20  ;;  %v13589_v59 = vunpack.i.h.bf16 %v10869_v49  ;;  %v7651_v27 = vunpack.i.l.bf16 %v10823_v4  ;;  %v13594_v4 = vunpack.i.h.bf16 %v10837_v5 }
0x12c6   : > { %8274 = vrot.lane.b32.xlu0 %v8273_v15, %s13481_s23  ;;  %v3752_v31 = vsel %vm13588_vm9, %v13587_v23, %v7762_v26  ;;  %6351 = vmatpush.msrb.mxu1 %v3842_v57  ;;  %v4857_v26 = vmul.f32 %v12015_v17, %v11484_v54  ;;  %v13132_v54 = vunpack.i.h.bf16 %v12112_v39  ;;  %v12182_v49 = vpop.permute.xlu2 %8224  ;;  %v8283_v57 = vpack.i.bf16 %v5331_v2, %v5334_v37  ;;  %v13600_v2 = vld [vmem:[#allocation72_spill] sm:$0xff]  ;;  %s6799_s23 = sshll.u32 %s8658_s9, 2  ;;  %s6617_s9 = scalar_lea.sflag [#allocation6], %s8733_s19 }
0x12c7   : > { %8279 = vrot.lane.b32.xlu1 %v8278_v33, %s13489_s24  ;;  %v12153_v55 = vpop.permute.xlu0 %8199  ;;  %v12155_v15 = vpop.permute.xlu1 %8204  ;;  %6251 = vmatmul.f32.gmra.mxu1 %v12130_v45  ;;  %v3750_v10 = vsel %vm13590_vm11, %v13589_v59, %v7721_v12  ;;  %v8211_v33 = vunpack.i.l.bf16 %v12112_v39  ;;  %v13592_v12 = vunpack.i.l.bf16 %v10847_v30  ;;  %v8288_v23 = vpack.i.bf16 %v5625_v13, %v5628_v53 }
0x12c8   : > { %v13133_v36 = vunpack.i.h.bf16 %v12153_v55  ;;  %v8201_v20 = vunpack.i.l.bf16 %v12153_v55  ;;  %v13131_v48 = vunpack.i.h.bf16 %v12155_v15  ;;  %v8206_v18 = vunpack.i.l.bf16 %v12155_v15  ;;  %6352 = vmatpush.msrb.mxu1 %v3752_v31 }
0x12c9   : > { %v3748_v7 = vsel %vm13593_vm1, %v13592_v12, %v7702_v62  ;;  %v7697_v31 = vunpack.i.h.bf16 %v10849_v28  ;;  %v8293_v59 = vpack.i.bf16 %v4854_v47, %v4857_v26  ;;  %vm13598_vm4 = vcmask 1039360   ;;  %v13599_v62 = vld [vmem:[#allocation34_spill] sm:$0xff] }
0x12ca   : > { %v5093_v41 = vsel %vm13591_vm10, %v8206_v18, %v13131_v48  ;;  %v5569_v44 = vsel %vm13580_vm2, %v8201_v20, %v13133_v36  ;;  %6353 = vmatpush.msrb.mxu1 %v3750_v10  ;;  %v12188_v20 = vld [vmem:[#allocation2 + $0x40] sm:$0xff]  ;;  %v3746_v18 = vsel %vm13595_vm0, %v13594_v4, %v7651_v27  ;;  %v12193_v10 = vld [vmem:[#allocation9 + $0x88] sm:$0xff]  ;;  %v5619_v13 = vmul.f32 %v12075_v24, %v11579_v8  ;;  %vm13604_vm11 = vmmov %vm13598_vm4 }
0x12cb   : > { %6274 = vmatpush.msra.mxu2 %v5093_v41  ;;  %6301 = vmatpush.msra.mxu3 %v5569_v44  ;;  %13596 = vst [vmem:[#allocation93_spill] sm:$0xff] %v12193_v10  ;;  %v13597_v41 = vunpack.i.l.bf16 %v10888_v63  ;;  %v7716_v44 = vunpack.i.l.bf16 %v13599_v62  ;;  %v5622_v53 = vmul.f32 %v12079_v35, %v11579_v8  ;;  %v5241_v5 = vmul.f32 %v12188_v20, %v13600_v2  ;;  %v12219_v27 = vld [vmem:[#allocation2 + $0x28] sm:$0xff]  ;;  %vm13609_vm1 = vmmov %vm13598_vm4 }
0x12cc   : > { %6354 = vmatpush.msrb.mxu1 %v3748_v7  ;;  %v5244_v63 = vmul.f32 %v12028_v14, %v13600_v2  ;;  %v13137_v37 = vunpack.i.h.bf16 %v12182_v49  ;;  %vm13601_vm9 = vcmask 523264   ;;  %v5238_v4 = vmul.f32 %v12219_v27, %v13600_v2  ;;  %vm13610_vm0 = vmmov %vm13591_vm10 }
0x12cd   : > { %v3656_v30 = vsel %vm13598_vm4, %v13597_v41, %v7757_v1  ;;  %8284 = vrot.lane.b32.xlu2 %v8283_v57, %s13486_s20  ;;  %v8226_v1 = vunpack.i.l.bf16 %v12182_v49  ;;  %v5479_v8 = vsel %vm13601_vm9, %v8211_v33, %v13132_v54  ;;  %v5235_v33 = vmul.f32 %v13600_v2, %v12135_v38  ;;  %vm13605_vm2 = vmmov %vm13601_vm9  ;;  %v13606_v54 = vld [vmem:[#allocation38_spill] sm:$0xff]  ;;  %v13607_v2 = vld [vmem:[#allocation15_spill] sm:$0xff] }
0x12ce   : > { %8289 = vrot.lane.b32.xlu0 %v8288_v23, %s13488_s2  ;;  %6355 = vmatpush.msrb.mxu1 %v3746_v18  ;;  %v12230_v18 = vld [vmem:[#allocation9 + $0xb8] sm:$0xff]  ;;  %v7646_v36 = vunpack.i.l.bf16 %v13606_v54  ;;  %vm13614_vm4 = vmmov %vm13609_vm1 }
0x12cf   : > { %8294 = vrot.lane.b32.xlu1 %v8293_v59, %s13476_s16  ;;  %v12215_v47 = vpop.permute.xlu0 %8214  ;;  %v12217_v26 = vpop.permute.xlu1 %8219  ;;  %6302 = vmatpush.msra.mxu3 %v5479_v8  ;;  %v13602_v59 = vld [vmem:[#allocation33_spill] sm:$0xff]  ;;  %v5089_v54 = vsel %vm13610_vm0, %v8226_v1, %v13137_v37  ;;  %vm13626_vm9 = vmmov %vm13605_vm2  ;;  %vm13701_vm0 = vcmask 654336   ;;  %s6734_s16 = sshll.u32 %s8733_s19, 2 }
0x12d0   : > { %6254 = vmatmul.f32.gmra.mxu1 %v12193_v10  ;;  %v13134_v12 = vunpack.i.h.bf16 %v12215_v47  ;;  %v8216_v7 = vunpack.i.l.bf16 %v12215_v47  ;;  %v13135_v57 = vunpack.i.h.bf16 %v12217_v26  ;;  %v8221_v23 = vunpack.i.l.bf16 %v12217_v26  ;;  %6228 = vmatmul.f32.gmra.mxu0 %v12230_v18  ;;  %v13636_v10 = vld [vmem:[#allocation42_spill] sm:$0xff]  ;;  %s358_s24 = scalar_lea.vmem [#allocation10], %s6734_s16 }
0x12d1   : > { %6356 = vmatpush.msrb.mxu1 %v3656_v30  ;;  %v13603_v41 = vunpack.i.h.bf16 %v13602_v59  ;;  %v7852_v30 = vunpack.i.h.bf16 %v13607_v2 }
0x12d2   : > { %v5091_v8 = vsel %vm13591_vm10, %v8216_v7, %v13134_v12  ;;  %v5477_v48 = vsel %vm13605_vm2, %v8221_v23, %v13135_v57  ;;  %v8298_v12 = vpack.i.bf16 %v5241_v5, %v5244_v63  ;;  %v8303_v23 = vpack.i.bf16 %v5619_v13, %v5622_v53  ;;  %v13616_v5 = vld [vmem:[#allocation74_spill] sm:$0xff] }
0x12d3   : > { %v3654_v62 = vsel %vm13604_vm11, %v13603_v41, %v7716_v44  ;;  %6275 = vmatpush.msra.mxu2 %v5091_v8  ;;  %v8372_v44 = vld [vmem:[%s12733_s1] ss:$8 sm:$0x3]  ;;  %v13608_v41 = vunpack.i.l.bf16 %v10849_v28  ;;  %6303 = vmatpush.msra.mxu3 %v5477_v48  ;;  %v8308_v57 = vpack.i.bf16 %v5235_v33, %v5238_v4  ;;  %v5148_v13 = vmul.f32 %v12028_v14, %v11642_v32 }
0x12d4   : > { %6357 = vmatpush.msrb.mxu1 %v3654_v62  ;;  %v3558_v59 = vperm.slane %v8372_v44, 1  ;;  %v12253_v62 = vld [vmem:[#allocation9 + $0xc0] sm:$0xff]  ;;  %v13613_v44 = vunpack.i.h.bf16 %v13612_v58  ;;  %v13615_v53 = vunpack.i.l.bf16 %v13607_v2  ;;  %v5529_v63 = vmul.f32 %v13616_v5, %v12188_v20 }
0x12d5   : > { %v3652_v7 = vsel %vm13609_vm1, %v13608_v41, %v7697_v31  ;;  %6276 = vmatpush.msra.mxu2 %v5089_v54  ;;  %13611 = vst [vmem:[#allocation34_spill] sm:$0xff] %v12253_v62  ;;  %v12255_v8 = vld [vmem:[#allocation9 + $0x20] sm:$0xff]  ;;  %8299 = vrot.lane.b32.xlu2 %v8298_v12, %s13492_s17  ;;  %v5145_v31 = vmul.f32 %v12015_v17, %v11642_v32  ;;  %vm13698_vm1 = vcmask 629760  }
0x12d6   : > { %6358 = vmatpush.msrb.mxu1 %v3652_v7  ;;  %v3650_v28 = vsel %vm13614_vm4, %v13613_v44, %v7646_v36  ;;  %8304 = vrot.lane.b32.xlu0 %v8303_v23, %s13488_s2  ;;  %v3568_v48 = vmul.f32 %v11586_v56, %v3558_v59  ;;  %v4232_v58 = vsel %vm1129_vm13, %v13615_v53, %v7852_v30  ;;  %vm13617_vm13 = vmmov %vm13605_vm2  ;;  %v13618_v23 = vld [vmem:[#allocation30_spill] sm:$0xff]  ;;  %v8373_v54 = vld [vmem:[#allocation2 + $0x20] sm:$0xff]  ;;  %s6628_s2 = scalar_lea.hbm %s12740_s8, %s6799_s23 }
0x12d7   : > { %8309 = vrot.lane.b32.xlu1 %v8308_v57, %s13492_s17  ;;  %v12271_v36 = vpop.permute.xlu0 %8229  ;;  %v5532_v56 = vmul.f32 %v12028_v14, %v13616_v5  ;;  %6277 = vmatmul.f32.vlgmr.msra.gmra.mxu2 %v12255_v8  ;;  %v12281_v57 = vpop.permute.xlu1 %8234  ;;  %v3566_v33 = vmul.f32 %v11600_v19, %v3558_v59  ;;  %v5523_v4 = vmul.f32 %v13616_v5, %v12135_v38  ;;  %vm13704_vm4 = vmmov %vm13698_vm1  ;;  %s6630_s17 = sshll.u32 %s358_s24, 4  ;;  %s6631_s17 = int_to_ptr.vmem [resolvable:$true] %s6630_s17 }
0x12d8   : > { %6359 = vmatpush.msrb.mxu1 %v3650_v28  ;;  %v13138_v1 = vunpack.i.h.bf16 %v12271_v36  ;;  %v8231_v12 = vunpack.i.l.bf16 %v12271_v36  ;;  %6377 = vmatpush.msrb.mxu2 %v4232_v58  ;;  %v5526_v2 = vmul.f32 %v13616_v5, %v12219_v27  ;;  %v8236_v7 = vunpack.i.l.bf16 %v12281_v57  ;;  %v13620_v58 = vld [vmem:[#allocation31_spill] sm:$0xff]  ;;  %v8374_v5 = vld [vmem:[#allocation2 + $0x8] sm:$0xff] }
0x12d9   : > { %6257 = vmatmul.f32.gmra.mxu1 %v12253_v62  ;;  %v3564_v44 = vmul.f32 %v8373_v54, %v3558_v59  ;;  %v8313_v19 = vpack.i.bf16 %v5529_v63, %v5532_v56  ;;  %v8318_v28 = vpack.i.bf16 %v5145_v31, %v5148_v13  ;;  %v3562_v37 = vmul.f32 %v8374_v5, %v3558_v59  ;;  %v13623_v63 = vld [vmem:[#allocation17_spill] sm:$0xff]  ;;  %v13624_v13 = vld [vmem:[#allocation20_spill] sm:$0xff] }
0x12da   : > { %6360 = vmatpush.msrb.mxu1 %v3568_v48  ;;  %v5475_v30 = vsel %vm13617_vm13, %v8231_v12, %v13138_v1  ;;  %6378 = vmatpush.msrb.mxu2 %v13618_v23  ;;  %v13619_v48 = vld [vmem:[#allocation16_spill] sm:$0xff]  ;;  %v13621_v12 = vld [vmem:[#allocation45_spill] sm:$0xff]  ;;  %v8323_v41 = vpack.i.bf16 %v5523_v4, %v5526_v2  ;;  %v12301_v23 = vld [vmem:[#allocation9 + $0x28] sm:$0xff]  ;;  %v7816_v31 = vunpack.i.l.bf16 %v13623_v63  ;;  %v13625_v56 = vunpack.i.h.bf16 %v12281_v57 }
0x12db   : > { %6304 = vmatpush.msra.mxu3 %v5475_v30  ;;  %v7822_v53 = vunpack.i.h.bf16 %v13619_v48  ;;  %v7972_v1 = vunpack.i.h.bf16 %v13621_v12  ;;  %v5139_v30 = vmul.f32 %v11642_v32, %v12135_v38  ;;  %v5142_v4 = vmul.f32 %v12079_v35, %v11642_v32  ;;  %v13627_v2 = vld [vmem:[#allocation24_spill] sm:$0xff]  ;;  %vm13707_vm13 = vmmov %vm13701_vm0 }
0x12dc   : > { %6361 = vmatpush.msrb.mxu1 %v3566_v33  ;;  %6379 = vmatpush.msrb.mxu2 %v13620_v58  ;;  %v12299_v33 = vld [vmem:[#allocation9 + $0x58] sm:$0xff]  ;;  %v5473_v59 = vsel %vm13626_vm9, %v8236_v7, %v13625_v56  ;;  %v7807_v54 = vunpack.i.h.bf16 %v13627_v2  ;;  %v13629_v7 = vunpack.i.l.bf16 %v13619_v48  ;;  %v13630_v5 = vunpack.i.l.bf16 %v13621_v12 }
0x12dd   : > { %8314 = vrot.lane.b32.xlu2 %v8313_v19, %s13499_s21  ;;  %13622 = vst [vmem:[#allocation72_spill] sm:$0xff] %v12299_v33  ;;  %6305 = vmatpush.msra.mxu3 %v5473_v59  ;;  %v13632_v59 = vld [vmem:[#allocation22_spill] sm:$0xff] }
0x12de   : > { %6362 = vmatpush.msrb.mxu1 %v3564_v44  ;;  %8319 = vrot.lane.b32.xlu0 %v8318_v28, %s13496_s4  ;;  %v13628_v44 = vld [vmem:[#allocation70_spill] sm:$0xff]  ;;  %v5796_v28 = vld [vmem:[#allocation2 + $0x58] sm:$0xff]  ;;  %v4136_v32 = vsel %vm1031_vm15, %v13629_v7, %v7822_v53  ;;  %v4616_v63 = vsel %vm1521_vm6, %v13630_v5, %v7972_v1  ;;  %v13633_v62 = vunpack.i.h.bf16 %v13632_v59  ;;  %v8328_v53 = vpack.i.bf16 %v5139_v30, %v5142_v4  ;;  %v12341_v5 = vld [vmem:[#allocation9 + $0x90] sm:$0xff] }
0x12df   : > { %6380 = vmatpush.msrb.mxu2 %v13624_v13  ;;  %8324 = vrot.lane.b32.xlu1 %v8323_v41, %s13499_s21  ;;  %v5436_v19 = vmul.f32 %v12028_v14, %v13628_v44  ;;  %v5817_v41 = vmul.f32 %v11989_v51, %v12188_v20  ;;  %v5820_v58 = vmul.f32 %v11989_v51, %v5796_v28  ;;  %v13631_v13 = vld [vmem:[#allocation21_spill] sm:$0xff]  ;;  %v13634_v7 = vld [vmem:[#allocation18_spill] sm:$0xff] }
0x12e0   : > { %6363 = vmatpush.msrb.mxu1 %v3562_v37  ;;  %v5433_v37 = vmul.f32 %v13628_v44, %v12188_v20  ;;  %6280 = vmatmul.f32.gmra.mxu2 %v12299_v33  ;;  %v7801_v56 = vunpack.i.l.bf16 %v13631_v13  ;;  %v4134_v48 = vsel %vm1031_vm15, %v13633_v62, %v7816_v31  ;;  %v7792_v20 = vunpack.i.h.bf16 %v13634_v7  ;;  %v13635_v33 = vld [vmem:[#allocation50_spill] sm:$0xff]  ;;  %v13638_v62 = vld [vmem:[#allocation47_spill] sm:$0xff]  ;;  %v13639_v31 = vld [vmem:[#allocation25_spill] sm:$0xff] }
0x12e1   : > { %6306 = vmatmul.f32.vlgmr.msra.gmra.mxu3 %v12301_v23  ;;  %6364 = vmatmul.f32.vlgmr.msrb.gmra.mxu1 %v11916_v34  ;;  %v7942_v28 = vunpack.i.h.bf16 %v13635_v33  ;;  %v13637_v34 = vunpack.i.l.bf16 %v13627_v2  ;;  %v13640_v30 = vunpack.i.h.bf16 %v13639_v31  ;;  %v13641_v2 = vld [vmem:[#allocation71_spill] sm:$0xff]  ;;  %v13644_v13 = vunpack.i.l.bf16 %v13634_v7  ;;  %v13646_v59 = vld [vmem:[#allocation26_spill] sm:$0xff] }
0x12e2   : > { %6381 = vmatpush.msrb.mxu2 %v4136_v32  ;;  %6406 = vmatpush.msrb.mxu3 %v4616_v63  ;;  %v8333_v1 = vpack.i.bf16 %v5433_v37, %v5436_v19  ;;  %v8338_v32 = vpack.i.bf16 %v5817_v41, %v5820_v58  ;;  %v5052_v37 = vmul.f32 %v12028_v14, %v13641_v2  ;;  %v13642_v19 = vld [vmem:[#allocation28_spill] sm:$0xff] }
0x12e3   : > { %v4132_v12 = vsel %vm1031_vm15, %v13637_v34, %v7807_v54  ;;  %v4130_v4 = vsel %vm1031_vm15, %v13640_v30, %v7801_v56  ;;  %v5049_v54 = vmul.f32 %v12015_v17, %v13641_v2  ;;  %v7786_v41 = vunpack.i.l.bf16 %v13642_v19  ;;  %v13643_v63 = vld [vmem:[#allocation48_spill] sm:$0xff]  ;;  %v13653_v30 = vld [vmem:[#allocation53_spill] sm:$0xff] }
0x12e4   : > { %6382 = vmatpush.msrb.mxu2 %v4134_v48  ;;  %6407 = vmatpush.msrb.mxu3 %v13636_v10  ;;  %v12348_v10 = vld [vmem:[#allocation9 + $0x60] sm:$0xff]  ;;  %v5427_v58 = vmul.f32 %v13628_v44, %v12135_v38  ;;  %v4040_v56 = vsel %vm933_vm14, %v13644_v13, %v7792_v20  ;;  %v13645_v17 = vunpack.i.l.bf16 %v13635_v33  ;;  %v7767_v48 = vunpack.i.h.bf16 %v13646_v59  ;;  %v13647_v33 = vld [vmem:[#allocation23_spill] sm:$0xff] }
0x12e5   : > { %8329 = vrot.lane.b32.xlu2 %v8328_v53, %s13496_s4  ;;  %v5430_v53 = vmul.f32 %v13628_v44, %v12219_v27  ;;  %v5811_v34 = vmul.f32 %v11989_v51, %v12135_v38  ;;  %v13648_v7 = vunpack.i.h.bf16 %v13647_v33  ;;  %v13650_v44 = vld [vmem:[#allocation52_spill] sm:$0xff]  ;;  %v13651_v38 = vld [vmem:[#allocation27_spill] sm:$0xff]  ;;  %v13654_v19 = vld [vmem:[#allocation49_spill] sm:$0xff]  ;;  %v5043_v13 = vmul.f32 %v12075_v24, %v13641_v2  ;;  %s6632_s4 = sshll.u32 %s6628_s2, 4  ;;  %s6633_s4 = int_to_ptr.hbm [resolvable:$true] %s6632_s4 }
0x12e6   : > { %6383 = vmatpush.msrb.mxu2 %v4132_v12  ;;  %6408 = vmatpush.msrb.mxu3 %v13638_v62  ;;  %v4520_v14 = vsel %vm1423_vm3, %v13645_v17, %v7942_v28  ;;  %v5814_v12 = vmul.f32 %v11989_v51, %v12219_v27  ;;  %v8343_v28 = vpack.i.bf16 %v5049_v54, %v5052_v37  ;;  %v7777_v62 = vunpack.i.h.bf16 %v13651_v38  ;;  %v12387_v54 = vld [vmem:[#allocation9 + $0xc8] sm:$0xff]  ;;  %v12389_v37 = vld [vmem:[#allocation9 + $0x98] sm:$0xff]  ;;  %v13656_v17 = vld [vmem:[#allocation39_spill] sm:$0xff]  ;;  %s8479_s21 = sshra.s32 %s6633_s4, 4  ;;  %s8480_s21 = int_to_ptr.hbm [resolvable:$true] %s8479_s21 }
0x12e7   : > { %8334 = vrot.lane.b32.xlu0 %v8333_v1, %s13479_s11  ;;  %8339 = vrot.lane.b32.xlu1 %v8338_v32, %s13564_s10  ;;  %v4038_v20 = vsel %vm933_vm14, %v13648_v7, %v7786_v41  ;;  %v13649_v1 = vld [vmem:[#allocation14_spill] sm:$0xff]  ;;  %v13652_v51 = vunpack.i.l.bf16 %v13646_v59  ;;  %v8348_v31 = vpack.i.bf16 %v5427_v58, %v5430_v53  ;;  %v13655_v41 = vld [vmem:[#allocation32_spill] sm:$0xff]  ;;  %v13658_v59 = vld [vmem:[#allocation51_spill] sm:$0xff]  ;;  %v13660_v24 = vunpack.i.l.bf16 %v13651_v38  ;;  %p8486_p11 = scmp.lt.s32.totalorder %s8480_s21, %s12740_s8 }
0x12e8   : > { %6384 = vmatpush.msrb.mxu2 %v4130_v4  ;;  %6409 = vmatpush.msrb.mxu3 %v13643_v63  ;;  %v7666_v32 = vunpack.i.l.bf16 %v13649_v1  ;;  %v7912_v4 = vunpack.i.h.bf16 %v13653_v30  ;;  %v7731_v63 = vunpack.i.l.bf16 %v13655_v41  ;;  %v13663_v7 = vld [vmem:[#allocation36_spill] sm:$0xff]  ;;  %v13671_v41 = vld [vmem:[#allocation54_spill] sm:$0xff]  ;;  %vm13676_vm3 = vcmask 490496  }
0x12e9   : > { %6283 = vmatmul.f32.gmra.mxu2 %v12341_v5  ;;  %6309 = vmatmul.f32.gmra.mxu3 %v12348_v10  ;;  %v4036_v27 = vsel %vm933_vm14, %v13652_v51, %v7767_v48  ;;  %v13659_v48 = vld [vmem:[#allocation29_spill] sm:$0xff]  ;;  %v13667_v51 = vld [vmem:[#allocation60_spill] sm:$0xff]  ;;  %vm13691_vm11 = vmmov %vm13676_vm3 }
0x12ea   : > { %6367 = vmatmul.f32.gmra.mxu1 %v11930_v21  ;;  %6385 = vmatpush.msrb.mxu2 %v4040_v56  ;;  %v8353_v21 = vpack.i.bf16 %v5811_v34, %v5814_v12  ;;  %v5046_v56 = vmul.f32 %v12079_v35, %v13641_v2  ;;  %v7712_v53 = vunpack.i.h.bf16 %v13659_v48  ;;  %v3944_v35 = vsel %vm835_vm12, %v13660_v24, %v7777_v62  ;;  %v13662_v12 = vld [vmem:[#allocation35_spill] sm:$0xff]  ;;  %v6112_v62 = vld [vmem:[%s12737_s5 + $0x18] sm:$0xff]  ;;  %vm13695_vm2 = vmmov %vm13676_vm3 }
0x12eb   : > { %6410 = vmatpush.msrb.mxu3 %v4520_v14  ;;  %v13657_v14 = vunpack.i.h.bf16 %v13656_v17  ;;  %v13661_v2 = vunpack.i.l.bf16 %v13653_v30  ;;  %v7661_v33 = vunpack.i.l.bf16 %v13662_v12  ;;  %v6560_v17 = vld [vmem:[%s12739_s7] sm:$0x3] }
0x12ec   : > { %6386 = vmatpush.msrb.mxu2 %v4038_v20  ;;  %v13664_v20 = vunpack.i.h.bf16 %v13663_v7  ;;  %v8358_v1 = vpack.i.bf16 %v5043_v13, %v5046_v56  ;;  %v6110_v56 = vld [vmem:[%s12737_s5 + $0x8] sm:$0xff]  ;;  %v13682_v7 = vunpack.i.h.bf16 %v11834_v22 }
0x12ed   : > { %6411 = vmatpush.msrb.mxu3 %v13650_v44  ;;  %8344 = vrot.lane.b32.xlu2 %v8343_v28, %s13502_s13  ;;  %v4034_v58 = vsel %vm933_vm14, %v13657_v14, %v7666_v32  ;;  %v4424_v34 = vsel %vm1325_vm7, %v13661_v2, %v7912_v4  ;;  %v6111_v32 = vld [vmem:[%s12737_s5 + $0x10] sm:$0xff]  ;;  %v13665_v44 = vld [vmem:[#allocation57_spill] sm:$0xff]  ;;  %vm13683_vm7 = vcmask 621568   ;;  %vm13687_vm14 = vmmov %vm13676_vm3 }
0x12ee   : > { %6387 = vmatpush.msrb.mxu2 %v4036_v27  ;;  %v3942_v28 = vsel %vm835_vm12, %v13664_v20, %v7731_v63  ;;  %v7882_v27 = vunpack.i.h.bf16 %v13667_v51  ;;  %v13672_v63 = vunpack.i.l.bf16 %v13667_v51  ;;  %v13673_v14 = vld [vmem:[#allocation55_spill] sm:$0xff]  ;;  %vm13690_vm15 = vmmov %vm13683_vm7 }
0x12ef   : > { %6412 = vmatpush.msrb.mxu3 %v13654_v19  ;;  %8354 = vrot.lane.b32.xlu1 %v8353_v21, %s13564_s10  ;;  %v13668_v21 = vld [vmem:[#allocation56_spill] sm:$0xff]  ;;  %v12432_v19 = vld [vmem:[#allocation9 + $0xd0] sm:$0xff]  ;;  %vm13694_vm10 = vmmov %vm13683_vm7 }
0x12f0   : > { %8349 = vrot.lane.b32.xlu0 %v8348_v31, %s13479_s11  ;;  %6388 = vmatpush.msrb.mxu2 %v4034_v58  ;;  %v13669_v31 = vld [vmem:[#allocation37_spill] sm:$0xff]  ;;  %v4328_v13 = vsel %vm1227_vm5, %v13672_v63, %v7882_v27  ;;  %v13675_v58 = vld [vmem:[#allocation59_spill] sm:$0xff]  ;;  %vm13679_vm5 = vcmask 498688  }
0x12f1   : > { %6413 = vmatpush.msrb.mxu3 %v13658_v59  ;;  %6286 = vmatmul.f32.gmra.mxu2 %v12387_v54  ;;  %v13670_v30 = vunpack.i.h.bf16 %v13669_v31  ;;  %vm13681_vm6 = vmmov %vm13679_vm5  ;;  %v13688_v31 = vld [vmem:[#allocation77_spill] sm:$0xff]  ;;  %v13692_v63 = vld [vmem:[#allocation79_spill] sm:$0xff] }
0x12f2   : > { %6312 = vmatmul.f32.gmra.mxu3 %v12389_v37  ;;  %6370 = vmatmul.f32.gmra.mxu1 %v11955_v0  ;;  %v13666_v0 = vunpack.i.l.bf16 %v13659_v48  ;;  %vm13710_vm9 = vmmov %vm13679_vm5 }
0x12f3   : > { %6389 = vmatpush.msrb.mxu2 %v3944_v35  ;;  %6414 = vmatpush.msrb.mxu3 %v4424_v34  ;;  %v3938_v4 = vsel %vm835_vm12, %v13670_v30, %v7661_v33  ;;  %v13680_v34 = vunpack.i.h.bf16 %v11757_v46  ;;  %v13689_v30 = vunpack.i.h.bf16 %v13688_v31 }
0x12f4   : > { %v3940_v38 = vsel %vm835_vm12, %v13666_v0, %v7712_v53  ;;  %vm13686_vm12 = vmmov %vm13683_vm7 }
0x12f5   : > { %6390 = vmatpush.msrb.mxu2 %v3942_v28  ;;  %6415 = vmatpush.msrb.mxu3 %v13665_v44  ;;  %v13684_v28 = vld [vmem:[#allocation62_spill] sm:$0xff] }
0x12f6   : > { %8359 = vrot.lane.b32.xlu2 %v8358_v1, %s13502_s13  ;;  %s8481_s13 = scalar_lea.hbm %s8480_s21, 4 }
0x12f7   : > { %6391 = vmatpush.msrb.mxu2 %v3940_v38  ;;  %6416 = vmatpush.msrb.mxu3 %v13668_v21  ;;  %p8482_p1 = scmp.ne.s32.totalorder %s8480_s21, %s8481_s13  ;;  %p8487_p2 = scmp.lt.s32.totalorder %s8485_s25, %s8481_s13 }
0x12f8   : > { %6125 = vperm.xlu1 %7642, %v6111_v32   ;;  %6130 = vperm.xlu0 %7641, %v6112_v62  }
0x12f9   : > { %6392 = vmatpush.msrb.mxu2 %v3938_v4  ;;  %6417 = vmatpush.msrb.mxu3 %v13671_v41  ;;  %p8483_p4 = pnand %p8482_p1, %p8703_p3  ;;  %p8488_p9 = por %p8487_p2, %p8486_p11 }
0x12fa   : > { %6393 = vmatmul.f32.vlgmr.msrb.gmra.mxu2 %v11932_v6  ;;  %6315 = vmatmul.f32.gmra.mxu3 %v12432_v19  ;;  %v6109_v6 = vld [vmem:[%s12737_s5] sm:$0xff] }
0x12fb   : > { %6373 = vmatmul.f32.gmra.mxu1 %v11997_v42  ;;  %6418 = vmatpush.msrb.mxu3 %v4328_v13  ;;  %v13674_v42 = vld [vmem:[#allocation58_spill] sm:$0xff]  ;;  %v13693_v13 = vunpack.i.h.bf16 %v13692_v63  ;;  %p8484_p8 = pneg %p8483_p4 }
0x12fc   : > { %v12527_v63 = vld [vmem:[#allocation9 + $0x68] sm:$0xff] }
0x12fd   : > { %6419 = vmatpush.msrb.mxu3 %v13673_v14  ;;  %p8489_p10 = pnand %p8488_p9, %p8484_p8 }
0x12fe   : > { %6120 = vperm.xlu2 %7640, %v6110_v56  }
0x12ff   : > { %6420 = vmatpush.msrb.mxu3 %v13674_v42 }
0x1300   : > { %6563 = vperm.xlu1 %7642, %v6560_v17   ;;  %6115 = vperm.xlu0 %7641, %v6109_v6  }
0x1301   : > { %6421 = vmatpush.msrb.mxu3 %v13675_v58 }
0x1302   : > { %6396 = vmatmul.f32.gmra.mxu2 %v11957_v16  ;;  %6422 = vmatmul.f32.vlgmr.msrb.gmra.mxu3 %v12039_v52 }
0x130a   : > { %6399 = vmatmul.f32.gmra.mxu2 %v11999_v61  ;;  %6425 = vmatmul.f32.gmra.mxu3 %v12104_v9  ;;  %v13677_v9 = vld [vmem:[#allocation69_spill] sm:$0xff] }
0x130b   : > { %v13678_v35 = vunpack.i.h.bf16 %v13677_v9 }
0x130f   : > { %v12457_v59 = vpop.permute.xlu2 %8239 }
0x1310   : > { %v8242_v48 = vunpack.i.h.bf16 %v12457_v59  ;;  %v8241_v53 = vunpack.i.l.bf16 %v12457_v59 }
0x1312   : > { %6402 = vmatmul.f32.gmra.mxu2 %v12061_v43  ;;  %6428 = vmatmul.f32.gmra.mxu3 %v12167_v11  ;;  %v5863_v16 = vsel %vm13676_vm3, %v8241_v53, %v8242_v48  ;;  %vm13713_vm3 = vmmov %vm13701_vm0 }
0x1313   : > { %6331 = vmatpush.msrb.mxu0 %v5863_v16 }
0x1317   : > { %v8255_v52 = vpop.permute.xlu2 %8254 }
0x1318   : > { %v8257_v24 = vunpack.i.h.bf16 %v8255_v52  ;;  %v8256_v61 = vunpack.i.l.bf16 %v8255_v52 }
0x131a   : > { %6431 = vmatmul.f32.gmra.mxu3 %v12230_v18  ;;  %v5768_v2 = vsel %vm13679_vm5, %v13678_v35, %v8256_v61  ;;  %v5766_v43 = vsel %vm13681_vm6, %v13680_v34, %v8257_v24  ;;  %v13685_v18 = vunpack.i.h.bf16 %v13684_v28  ;;  %v12503_v24 = vld [vmem:[#allocation9 + $0x30] sm:$0xff]  ;;  %v13696_v35 = vld [vmem:[#allocation81_spill] sm:$0xff]  ;;  %v13705_v28 = vld [vmem:[#allocation78_spill] sm:$0xff] }
0x131b   : > { %6493 = vmatpush.msra.mxu2 %v5768_v2  ;;  %v13697_v2 = vunpack.i.h.bf16 %v13696_v35  ;;  %vm13718_vm6 = vmmov %vm13701_vm0 }
0x131d   : > { %6494 = vmatpush.msra.mxu2 %v5766_v43  ;;  %v13699_v43 = vld [vmem:[#allocation61_spill] sm:$0xff] }
0x131f   : > { %v8270_v11 = vpop.permute.xlu2 %8269 }
0x1320   : > { %v8272_v12 = vunpack.i.h.bf16 %v8270_v11  ;;  %v8271_v33 = vunpack.i.l.bf16 %v8270_v11  ;;  %v13700_v11 = vunpack.i.h.bf16 %v13699_v43 }
0x1322   : > { %v5384_v20 = vsel %vm13683_vm7, %v13682_v7, %v8271_v33  ;;  %v5382_v1 = vsel %vm13686_vm12, %v13685_v18, %v8272_v12  ;;  %v13702_v33 = vld [vmem:[#allocation83_spill] sm:$0xff]  ;;  %v13706_v18 = vunpack.i.h.bf16 %v13705_v28  ;;  %vm13721_vm7 = vcmask 506880  }
0x1323   : > { %6464 = vmatpush.msra.mxu1 %v5384_v20  ;;  %v13703_v7 = vunpack.i.h.bf16 %v13702_v33  ;;  %vm13724_vm12 = vcmask 752640  }
0x1325   : > { %6465 = vmatpush.msra.mxu1 %v5382_v1 }
0x1327   : > { %v8285_v32 = vpop.permute.xlu2 %8284 }
0x1328   : > { %v12479_v44 = vpop.permute.xlu0 %8244  ;;  %v8287_v46 = vunpack.i.h.bf16 %v8285_v32  ;;  %v8286_v0 = vunpack.i.l.bf16 %v8285_v32  ;;  %v12483_v51 = vpop.permute.xlu1 %8249 }
0x1329   : > { %v8247_v38 = vunpack.i.h.bf16 %v12479_v44  ;;  %v8246_v62 = vunpack.i.l.bf16 %v12479_v44  ;;  %v8252_v22 = vunpack.i.h.bf16 %v12483_v51  ;;  %v8251_v27 = vunpack.i.l.bf16 %v12483_v51  ;;  %v6162_v51 = vpop.f32.mrf.mxu2 }
0x132a   : > { %v5380_v4 = vsel %vm13690_vm15, %v13689_v30, %v8286_v0  ;;  %v5378_v56 = vsel %vm13694_vm10, %v13693_v13, %v8287_v46  ;;  %v13708_v30 = vld [vmem:[#allocation66_spill] sm:$0xff]  ;;  %v13711_v13 = vld [vmem:[#allocation80_spill] sm:$0xff]  ;;  %vm13730_vm15 = vmmov %vm13724_vm12 }
0x132b   : > { %v5861_v21 = vsel %vm13687_vm14, %v8246_v62, %v8247_v38  ;;  %6466 = vmatpush.msra.mxu1 %v5380_v4  ;;  %v5859_v41 = vsel %vm13691_vm11, %v8251_v27, %v8252_v22  ;;  %v13709_v4 = vunpack.i.h.bf16 %v13708_v30  ;;  %vm13727_vm14 = vmmov %vm13721_vm7  ;;  %vm13733_vm11 = vcmask 760832  }
0x132c   : > { %6332 = vmatpush.msrb.mxu0 %v5861_v21  ;;  %vm13736_vm10 = vmmov %vm13721_vm7 }
0x132d   : > { %6467 = vmatpush.msra.mxu1 %v5378_v56  ;;  %v13712_v56 = vunpack.i.h.bf16 %v13711_v13 }
0x132e   : > { %6333 = vmatpush.msrb.mxu0 %v5859_v41 }
0x132f   : > { %v8300_v17 = vpop.permute.xlu2 %8299 }
0x1330   : > { %v12499_v14 = vpop.permute.xlu0 %8259  ;;  %v8302_v6 = vunpack.i.h.bf16 %v8300_v17  ;;  %v8301_v42 = vunpack.i.l.bf16 %v8300_v17  ;;  %v8265_v16 = vpop.permute.xlu1 %8264 }
0x1331   : > { %v8262_v58 = vunpack.i.h.bf16 %v12499_v14  ;;  %v8261_v53 = vunpack.i.l.bf16 %v12499_v14  ;;  %v8266_v52 = vunpack.i.l.bf16 %v8265_v16  ;;  %v8267_v61 = vunpack.i.h.bf16 %v8265_v16  ;;  %v13716_v16 = vld [vmem:[#allocation82_spill] sm:$0xff] }
0x1332   : > { %v5288_v34 = vsel %vm13698_vm1, %v13697_v2, %v8301_v42  ;;  %v5286_v20 = vsel %vm13704_vm4, %v13703_v7, %v8302_v6  ;;  %v13714_v6 = vld [vmem:[#allocation67_spill] sm:$0xff]  ;;  %vm13750_vm4 = vcmask 515072  }
0x1333   : > { %v5857_v9 = vsel %vm13695_vm2, %v8261_v53, %v8262_v58  ;;  %6468 = vmatpush.msra.mxu1 %v5288_v34  ;;  %v5000_v12 = vsel %vm13701_vm0, %v13700_v11, %v8266_v52  ;;  %v4998_v1 = vsel %vm13707_vm13, %v13706_v18, %v8267_v61  ;;  %v13715_v42 = vunpack.i.h.bf16 %v13714_v6  ;;  %v13722_v18 = vld [vmem:[#allocation85_spill] sm:$0xff]  ;;  %vm13739_vm2 = vmmov %vm13698_vm1 }
0x1334   : > { %6334 = vmatpush.msrb.mxu0 %v5857_v9  ;;  %v13717_v52 = vunpack.i.h.bf16 %v13716_v16  ;;  %vm13743_vm1 = vmmov %vm13721_vm7 }
0x1335   : > { %6783 = vmatmul.msk.f32.vlgmr.msrb.gmra.mxu0 %vm1370_vm8, %v12503_v24  ;;  %6469 = vmatpush.msra.mxu1 %v5286_v20  ;;  %v12544_v20 = vld [vmem:[#allocation9 + $0xa0] sm:$0xff]  ;;  %vm13747_vm0 = vmmov %vm13739_vm2 }
0x1336   : > { %6435 = vmatpush.msra.mxu0 %v5000_v12  ;;  %v13719_v12 = vld [vmem:[#allocation64_spill] sm:$0xff]  ;;  %vm13754_vm13 = vmmov %vm13750_vm4 }
0x1337   : > { %v12522_v27 = vpop.permute.xlu2 %8314  ;;  %v13720_v33 = vunpack.i.h.bf16 %v13719_v12 }
0x1338   : > { %6436 = vmatpush.msra.mxu0 %v4998_v1  ;;  %v8275_v32 = vpop.permute.xlu0 %8274  ;;  %v13723_v1 = vunpack.i.l.bf16 %v13722_v18  ;;  %v8317_v12 = vunpack.i.h.bf16 %v12522_v27 }
0x1339   : > { %v8277_v46 = vunpack.i.h.bf16 %v8275_v32  ;;  %v8276_v0 = vunpack.i.l.bf16 %v8275_v32  ;;  %v8280_v62 = vpop.permute.xlu1 %8279 }
0x133a   : > { %v8282_v21 = vunpack.i.h.bf16 %v8280_v62  ;;  %v8281_v31 = vunpack.i.l.bf16 %v8280_v62  ;;  %v8032_v62 = vunpack.i.h.bf16 %v11547_v25 }
0x133b   : > { %v5764_v41 = vsel %vm13710_vm9, %v13709_v4, %v8276_v0  ;;  %v5762_v53 = vsel %vm13679_vm5, %v13715_v42, %v8277_v46  ;;  %v13725_v46 = vld [vmem:[#allocation68_spill] sm:$0xff]  ;;  %vm13756_vm9 = vcmask 769024   ;;  %vm13762_vm5 = vmmov %vm13750_vm4 }
0x133c   : > { %v4996_v17 = vsel %vm13713_vm3, %v13712_v56, %v8281_v31  ;;  %6495 = vmatpush.msra.mxu2 %v5764_v41  ;;  %v4994_v61 = vsel %vm13718_vm6, %v13717_v52, %v8282_v21  ;;  %v13726_v0 = vunpack.i.h.bf16 %v13725_v46  ;;  %v13728_v21 = vld [vmem:[#allocation88_spill] sm:$0xff]  ;;  %v8316_v52 = vunpack.i.l.bf16 %v12522_v27 }
0x133d   : > { %6437 = vmatpush.msra.mxu0 %v4996_v17  ;;  %v13729_v31 = vunpack.i.l.bf16 %v13728_v21  ;;  %v13731_v17 = vld [vmem:[#allocation73_spill] sm:$0xff]  ;;  %v13748_v21 = vld [vmem:[#allocation76_spill] sm:$0xff]  ;;  %v13749_v27 = vunpack.i.h.bf16 %v12034_v3  ;;  %vm13759_vm3 = vcmask 637952  }
0x133e   : > { %6784 = vmatmul.msk.f32.gmra.mxu0 %vm1370_vm8, %v12527_v63  ;;  %6496 = vmatpush.msra.mxu2 %v5762_v53  ;;  %v13732_v53 = vunpack.i.l.bf16 %v11547_v25  ;;  %v13741_v25 = vld [vmem:[#allocation63_spill] sm:$0xff]  ;;  %vm13765_vm6 = vmmov %vm13759_vm3 }
0x133f   : > { %6438 = vmatpush.msra.mxu0 %v4994_v61  ;;  %v12546_v28 = vpop.permute.xlu2 %8329  ;;  %v13734_v61 = vld [vmem:[#allocation65_spill] sm:$0xff] }
0x1340   : > { %v8290_v9 = vpop.permute.xlu0 %8289  ;;  %v4808_v16 = vsel %vm13733_vm11, %v13732_v53, %v8032_v62  ;;  %v8331_v3 = vunpack.i.l.bf16 %v12546_v28  ;;  %vm13779_vm11 = vcmask 523264  }
0x1341   : > { %v8292_v35 = vunpack.i.h.bf16 %v8290_v9  ;;  %v8291_v2 = vunpack.i.l.bf16 %v8290_v9  ;;  %v8295_v34 = vpop.permute.xlu1 %8294  ;;  %6439 = vmatpush.msra.mxu0 %v11974_v40  ;;  %v13735_v9 = vunpack.i.h.bf16 %v13734_v61 }
0x1342   : > { %v8297_v43 = vunpack.i.h.bf16 %v8295_v34  ;;  %v8296_v11 = vunpack.i.l.bf16 %v8295_v34  ;;  %v13737_v34 = vld [vmem:[#allocation84_spill] sm:$0xff] }
0x1343   : > { %v5672_v7 = vsel %vm13721_vm7, %v13720_v33, %v8291_v2  ;;  %v5670_v40 = vsel %vm13727_vm14, %v13726_v0, %v8292_v35  ;;  %v12568_v2 = vld [vmem:[#allocation9 + $0xd8] sm:$0xff]  ;;  %v13740_v33 = vld [vmem:[#allocation75_spill] sm:$0xff]  ;;  %v13745_v0 = vld [vmem:[#allocation86_spill] sm:$0xff] }
0x1344   : > { %v4902_v32 = vsel %vm13724_vm12, %v13723_v1, %v8296_v11  ;;  %6497 = vmatpush.msra.mxu2 %v5672_v7  ;;  %v4900_v30 = vsel %vm13730_vm15, %v13729_v31, %v8297_v43  ;;  %v13738_v43 = vunpack.i.h.bf16 %v13737_v34  ;;  %v13742_v7 = vunpack.i.h.bf16 %v13741_v25  ;;  %v13744_v1 = vld [vmem:[#allocation43_spill] sm:$0xff]  ;;  %vm13768_vm7 = vmmov %vm13750_vm4 }
0x1345   : > { %6440 = vmatpush.msra.mxu0 %v4902_v32  ;;  %v8002_v32 = vunpack.i.h.bf16 %v13744_v1  ;;  %v5576_v31 = vsel %vm13750_vm4, %v13749_v27, %v8316_v52  ;;  %v13763_v25 = vld [vmem:[#allocation87_spill] sm:$0xff]  ;;  %vm13771_vm12 = vmmov %vm13759_vm3  ;;  %vm13777_vm15 = vcmask 646144  }
0x1346   : > { %6785 = vmatmul.msk.f32.gmra.mxu0 %vm1370_vm8, %v12544_v20  ;;  %6498 = vmatpush.msra.mxu2 %v5670_v40  ;;  %v13746_v40 = vunpack.i.h.bf16 %v13745_v0  ;;  %v13767_v0 = vunpack.i.h.bf16 %v12153_v55  ;;  %vm13774_vm14 = vmmov %vm13759_vm3 }
0x1347   : > { %6441 = vmatpush.msra.mxu0 %v4900_v30  ;;  %v8345_v46 = vpop.permute.xlu2 %8344 }
0x1348   : > { %v8305_v4 = vpop.permute.xlu0 %8304  ;;  %v8347_v27 = vunpack.i.h.bf16 %v8345_v46 }
0x1349   : > { %v8307_v41 = vunpack.i.h.bf16 %v8305_v4  ;;  %v8306_v13 = vunpack.i.l.bf16 %v8305_v4  ;;  %v8310_v56 = vpop.permute.xlu1 %8309  ;;  %6442 = vmatpush.msra.mxu0 %v13731_v17 }
0x134a   : > { %v8312_v6 = vunpack.i.h.bf16 %v8310_v56  ;;  %v8311_v42 = vunpack.i.l.bf16 %v8310_v56  ;;  %v13752_v56 = vld [vmem:[#allocation90_spill] sm:$0xff] }
0x134b   : > { %6443 = vmatpush.msra.mxu0 %v4808_v16  ;;  %v5668_v35 = vsel %vm13736_vm10, %v13735_v9, %v8306_v13  ;;  %v5666_v18 = vsel %vm13743_vm1, %v13742_v7, %v8307_v41  ;;  %v13751_v13 = vld [vmem:[#allocation41_spill] sm:$0xff]  ;;  %v13753_v17 = vunpack.i.h.bf16 %v13752_v56  ;;  %v13764_v7 = vunpack.i.h.bf16 %v13763_v25  ;;  %vm13784_vm1 = vmmov %vm13779_vm11 }
0x134c   : > { %v5284_v11 = vsel %vm13739_vm2, %v13738_v43, %v8311_v42  ;;  %6499 = vmatpush.msra.mxu2 %v5668_v35  ;;  %v5282_v62 = vsel %vm13747_vm0, %v13746_v40, %v8312_v6  ;;  %v13755_v6 = vunpack.i.l.bf16 %v13744_v1  ;;  %v13757_v9 = vld [vmem:[#allocation89_spill] sm:$0xff]  ;;  %v8332_v43 = vunpack.i.h.bf16 %v12546_v28  ;;  %v13769_v28 = vld [vmem:[#allocation91_spill] sm:$0xff]  ;;  %vm13782_vm2 = vmmov %vm13777_vm15 }
0x134d   : > { %6444 = vmatpush.msra.mxu0 %v13740_v33  ;;  %6470 = vmatpush.msra.mxu1 %v5284_v11  ;;  %v5574_v42 = vsel %vm13754_vm13, %v13753_v17, %v8317_v12  ;;  %v13758_v35 = vunpack.i.h.bf16 %v13757_v9  ;;  %v13760_v11 = vld [vmem:[#allocation40_spill] sm:$0xff]  ;;  %v13761_v12 = vunpack.i.h.bf16 %v12097_v60  ;;  %v8346_v1 = vunpack.i.l.bf16 %v8345_v46  ;;  %vm13787_vm4 = vmmov %vm13782_vm2 }
0x134e   : > { %6786 = vmatmul.msk.f32.gmra.mxu0 %vm1370_vm8, %v12568_v2  ;;  %6500 = vmatpush.msra.mxu2 %v5666_v18  ;;  %v4712_v16 = vsel %vm13756_vm9, %v13755_v6, %v8002_v32  ;;  %v13766_v32 = vld [vmem:[#allocation46_spill] sm:$0xff]  ;;  %v13775_v17 = vld [vmem:[#allocation92_spill] sm:$0xff]  ;;  %vm13780_vm10 = vcmask 490496   ;;  %v13781_v9 = vunpack.i.h.bf16 %v12155_v15  ;;  %v13788_v15 = vunpack.i.h.bf16 %v12182_v49  ;;  %vm13789_vm13 = vmmov %vm13782_vm2 }
0x134f   : > { %6445 = vmatpush.msra.mxu0 %v13748_v21  ;;  %6471 = vmatpush.msra.mxu1 %v5282_v62  ;;  %v13770_v62 = vunpack.i.h.bf16 %v13769_v28  ;;  %vm13785_vm0 = vmmov %vm13780_vm10 }
0x1350   : > { %v8320_v30 = vpop.permute.xlu0 %8319  ;;  %6501 = vmatpush.msra.mxu2 %v5576_v31  ;;  %v8360_v60 = vpop.permute.xlu2 %8359  ;;  %vm13791_vm9 = vmmov %vm13784_vm1 }
0x1351   : > { %v8322_v4 = vunpack.i.h.bf16 %v8320_v30  ;;  %v8321_v41 = vunpack.i.l.bf16 %v8320_v30  ;;  %6446 = vmatpush.msra.mxu0 %v13751_v13  ;;  %v8325_v53 = vpop.permute.xlu1 %8324  ;;  %v5188_v21 = vsel %vm13771_vm12, %v13770_v62, %v8331_v3  ;;  %v13772_v30 = vld [vmem:[#allocation44_spill] sm:$0xff]  ;;  %v13778_v3 = vunpack.i.h.bf16 %v12112_v39 }
0x1352   : > { %6502 = vmatpush.msra.mxu2 %v5574_v42  ;;  %v8327_v61 = vunpack.i.h.bf16 %v8325_v53  ;;  %v8326_v52 = vunpack.i.l.bf16 %v8325_v53  ;;  %v8361_v42 = vunpack.i.l.bf16 %v8360_v60 }
0x1353   : > { %6447 = vmatpush.msra.mxu0 %v4712_v16  ;;  %v5192_v34 = vsel %vm13759_vm3, %v13758_v35, %v8321_v41  ;;  %v5190_v18 = vsel %vm13765_vm6, %v13764_v7, %v8322_v4  ;;  %v13773_v4 = vunpack.i.h.bf16 %v12095_v29  ;;  %v13776_v16 = vunpack.i.h.bf16 %v12041_v50  ;;  %vm13792_vm3 = vmmov %vm13785_vm0 }
0x1354   : > { %6472 = vmatpush.msra.mxu1 %v5192_v34  ;;  %v5572_v33 = vsel %vm13762_vm5, %v13761_v12, %v8326_v52  ;;  %v5570_v40 = vsel %vm13768_vm7, %v13767_v0, %v8327_v61  ;;  %v8362_v61 = vunpack.i.h.bf16 %v8360_v60  ;;  %v5094_v35 = vsel %vm13782_vm2, %v13781_v9, %v8347_v27  ;;  %vm13794_vm5 = vmmov %vm13784_vm1 }
0x1355   : > { %6448 = vmatpush.msra.mxu0 %v13760_v11  ;;  %6503 = vmatpush.msra.mxu2 %v5572_v33  ;;  %v5186_v41 = vsel %vm13774_vm14, %v13773_v4, %v8332_v43  ;;  %v5096_v46 = vsel %vm13777_vm15, %v13776_v16, %v8346_v1  ;;  %v13783_v50 = vunpack.i.h.bf16 %v12217_v26  ;;  %v13786_v43 = vunpack.i.h.bf16 %v12215_v47  ;;  %vm13795_vm6 = vmmov %vm13785_vm0 }
0x1356   : > { %6473 = vmatpush.msra.mxu1 %v5190_v18  ;;  %v13790_v47 = vunpack.i.h.bf16 %v12271_v36  ;;  %v13793_v7 = vunpack.i.h.bf16 %v12281_v57  ;;  %v13797_v36 = vld [vmem:[#allocation72_spill] sm:$0xff]  ;;  %v13798_v57 = vld [vmem:[#allocation34_spill] sm:$0xff]  ;;  %vm6612_vm7 = vcmask 1041408  }
0x1357   : > { %6449 = vmatpush.msra.mxu0 %v13766_v32  ;;  %6504 = vmatpush.msra.mxu2 %v5570_v40  ;;  %v5092_v59 = vsel %vm13787_vm4, %v13786_v43, %v8361_v42 }
0x1358   : > { %6474 = vmatpush.msra.mxu1 %v5188_v21 }
0x1359   : > { %v8335_v31 = vpop.permute.xlu0 %8334  ;;  %6450 = vmatpush.msra.mxu0 %v13772_v30  ;;  %v8340_v55 = vpop.permute.xlu1 %8339 }
0x135a   : > { %v8337_v13 = vunpack.i.h.bf16 %v8335_v31  ;;  %v8336_v56 = vunpack.i.l.bf16 %v8335_v31  ;;  %6451 = vmatmul.f32.vlgmr.msra.gmra.mxu0 %v13775_v17  ;;  %6475 = vmatpush.msra.mxu1 %v5186_v41  ;;  %v8342_v53 = vunpack.i.h.bf16 %v8340_v55  ;;  %v8341_v6 = vunpack.i.l.bf16 %v8340_v55 }
0x135c   : > { %6476 = vmatpush.msra.mxu1 %v5096_v46  ;;  %v5480_v29 = vsel %vm13779_vm11, %v13778_v3, %v8336_v56  ;;  %v5864_v52 = vsel %vm13780_vm10, %v8242_v48, %v8341_v6  ;;  %v5478_v34 = vsel %vm13784_vm1, %v13783_v50, %v8337_v13  ;;  %v5862_v39 = vsel %vm13785_vm0, %v8247_v38, %v8342_v53  ;;  %v12681_v13 = vpop.permute.xlu2 %6120 }
0x135d   : > { %6505 = vmatpush.msra.mxu2 %v5480_v29  ;;  %6534 = vmatpush.msra.mxu3 %v5864_v52  ;;  %v5090_v48 = vsel %vm13789_vm13, %v13788_v15, %v8362_v61 }
0x135e   : > { %6477 = vmatpush.msra.mxu1 %v5094_v35 }
0x135f   : > { %6506 = vmatpush.msra.mxu2 %v5478_v34  ;;  %6535 = vmatpush.msra.mxu3 %v5862_v39 }
0x1360   : > { %6478 = vmatpush.msra.mxu1 %v5092_v59 }
0x1361   : > { %v8355_v12 = vpop.permute.xlu1 %8354 }
0x1362   : > { %v8350_v11 = vpop.permute.xlu0 %8349  ;;  %6454 = vmatmul.f32.gmra.mxu0 %v12130_v45  ;;  %6479 = vmatpush.msra.mxu1 %v5090_v48  ;;  %v8357_v44 = vunpack.i.h.bf16 %v8355_v12  ;;  %v8356_v25 = vunpack.i.l.bf16 %v8355_v12 }
0x1363   : > { %v8352_v26 = vunpack.i.h.bf16 %v8350_v11  ;;  %v8351_v33 = vunpack.i.l.bf16 %v8350_v11  ;;  %6480 = vmatmul.f32.vlgmr.msra.gmra.mxu1 %v12255_v8  ;;  %v13796_v8 = vld [vmem:[#allocation93_spill] sm:$0xff] }
0x1364   : > { %v5860_v49 = vsel %vm13792_vm3, %v8252_v22, %v8356_v25  ;;  %v5858_v18 = vsel %vm13795_vm6, %v8262_v58, %v8357_v44  ;;  %v6191_v22 = vpop.f32.mrf.mxu3 }
0x1365   : > { %v5476_v38 = vsel %vm13791_vm9, %v13790_v47, %v8351_v33  ;;  %6536 = vmatpush.msra.mxu3 %v5860_v49  ;;  %v5474_v45 = vsel %vm13794_vm5, %v13793_v7, %v8352_v26 }
0x1366   : > { %6507 = vmatpush.msra.mxu2 %v5476_v38 }
0x1367   : > { %6537 = vmatpush.msra.mxu3 %v5858_v18 }
0x1368   : > { %6508 = vmatpush.msra.mxu2 %v5474_v45  ;;  %6787 = vmatmul.msk.f32.vlgmr.msra.gmra.mxu3 %vm1370_vm8, %v12503_v24  ;;  %v6220_v24 = vpop.f32.mrf.mxu0 }
0x1369   : > { %6509 = vmatmul.f32.vlgmr.msra.gmra.mxu2 %v12301_v23  ;;  %v6165_v23 = vpop.f32.mrf.mxu2 }
0x136a   : > { %6457 = vmatmul.f32.gmra.mxu0 %v13796_v8  ;;  %v12674_v60 = vpop.permute.xlu0 %6130  ;;  %v12676_v30 = vpop.permute.xlu1 %6125  ;;  %v6166_v6 = vadd.f32 %v6165_v23, %v12681_v13 }
0x136b   : > { %6483 = vmatmul.f32.gmra.mxu1 %v13797_v36 }
0x136c   : > { %v6194_v14 = vpop.f32.mrf.mxu3 }
0x136d   : > { %v6195_v52 = vadd.f32 %v6194_v14, %v6166_v6 }
0x1370   : > { %6788 = vmatmul.msk.f32.gmra.mxu3 %vm1370_vm8, %v12527_v63  ;;  %v6223_v32 = vpop.f32.mrf.mxu0 }
0x1371   : > { %6512 = vmatmul.f32.gmra.mxu2 %v12348_v10  ;;  %v6168_v10 = vpop.f32.mrf.mxu2  ;;  %v6224_v39 = vadd.f32 %v6223_v32, %v6195_v52 }
0x1372   : > { %6460 = vmatmul.f32.gmra.mxu0 %v13798_v57  ;;  %v6169_v4 = vadd.f32 %v6168_v10, %v12676_v30  ;;  %v12679_v41 = vpop.permute.xlu0 %6115 }
0x1373   : > { %6486 = vmatmul.f32.gmra.mxu1 %v12341_v5  ;;  %v6249_v5 = vpop.f32.mrf.mxu1  ;;  %v6163_v17 = vadd.f32 %v6162_v51, %v12679_v41 }
0x1374   : > { %v6197_v58 = vpop.f32.mrf.mxu3 }
0x1375   : > { %v6198_v55 = vadd.f32 %v6197_v58, %v6169_v4  ;;  %v6192_v61 = vadd.f32 %v6191_v22, %v6163_v17 }
0x1377   : > { %v6221_v50 = vadd.f32 %v6220_v24, %v6192_v61 }
0x1378   : > { %6789 = vmatmul.msk.f32.gmra.mxu3 %vm1370_vm8, %v12544_v20  ;;  %v6226_v20 = vpop.f32.mrf.mxu0 }
0x1379   : > { %6515 = vmatmul.f32.gmra.mxu2 %v12389_v37  ;;  %v6171_v63 = vpop.f32.mrf.mxu2  ;;  %v6227_v3 = vadd.f32 %v6226_v20, %v6198_v55  ;;  %v6250_v12 = vadd.f32 %v6249_v5, %v6221_v50  ;;  %v6559_v5 = vld [vmem:[%s12738_s6] sm:$0x3] }
0x137a   : > { %v6172_v56 = vadd.f32 %v6171_v63, %v12674_v60 }
0x137b   : > { %6489 = vmatmul.f32.gmra.mxu1 %v12387_v54  ;;  %v6252_v37 = vpop.f32.mrf.mxu1 }
0x137c   : > { %v6200_v1 = vpop.f32.mrf.mxu3  ;;  %v6253_v26 = vadd.f32 %v6252_v37, %v6224_v39 }
0x137d   : > { %v6201_v29 = vadd.f32 %v6200_v1, %v6172_v56 }
0x1380   : > { %6790 = vmatmul.msk.f32.gmra.mxu3 %vm1370_vm8, %v12568_v2  ;;  %v6229_v21 = vpop.f32.mrf.mxu0 }
0x1381   : > { %6518 = vmatmul.f32.gmra.mxu2 %v12432_v19  ;;  %v6278_v0 = vpop.f32.mrf.mxu2  ;;  %v6230_v35 = vadd.f32 %v6229_v21, %v6201_v29 }
0x1382   : > { %v6279_v38 = vadd.f32 %v6278_v0, %v6250_v12 }
0x1383   : > { %v6255_v28 = vpop.f32.mrf.mxu1 }
0x1384   : > { %v6307_v40 = vpop.f32.mrf.mxu3  ;;  %v6256_v9 = vadd.f32 %v6255_v28, %v6227_v3 }
0x1385   : > { %v6308_v8 = vadd.f32 %v6307_v40, %v6279_v38 }
0x1389   : > { %v6281_v54 = vpop.f32.mrf.mxu2 }
0x138a   : > { %v6282_v44 = vadd.f32 %v6281_v54, %v6253_v26 }
0x138b   : > { %v6258_v19 = vpop.f32.mrf.mxu1 }
0x138c   : > { %v6310_v62 = vpop.f32.mrf.mxu3  ;;  %v6259_v15 = vadd.f32 %v6258_v19, %v6230_v35 }
0x138d   : > { %v6311_v7 = vadd.f32 %v6310_v62, %v6282_v44 }
0x1391   : > { %v6284_v27 = vpop.f32.mrf.mxu2 }
0x1392   : > { %v6285_v59 = vadd.f32 %v6284_v27, %v6256_v9 }
0x1393   : > { %v12685_v42 = vpop.f32.mrf.mxu1 }
0x1394   : > { %v6313_v2 = vpop.f32.mrf.mxu3 }
0x1395   : > { %v6314_v25 = vadd.f32 %v6313_v2, %v6285_v59 }
0x1399   : > { %v6287_v16 = vpop.f32.mrf.mxu2 }
0x139a   : > { %v6288_v33 = vadd.f32 %v6287_v16, %v6259_v15  ;;  %v6366_v16 = vadd.f32 %v12685_v42, %v12679_v41 }
0x139b   : > { %v6368_v43 = vpop.f32.mrf.mxu1 }
0x139c   : > { %v6316_v46 = vpop.f32.mrf.mxu3  ;;  %v6369_v56 = vadd.f32 %v6368_v43, %v12681_v13 }
0x139d   : > { %v6317_v47 = vadd.f32 %v6316_v46, %v6288_v33 }
0x13a1   : > { %v6394_v48 = vpop.f32.mrf.mxu2 }
0x13a2   : > { %v6395_v52 = vadd.f32 %v6394_v48, %v6366_v16 }
0x13a3   : > { %v6371_v51 = vpop.f32.mrf.mxu1 }
0x13a4   : > { %v6423_v11 = vpop.f32.mrf.mxu3  ;;  %v6372_v4 = vadd.f32 %v6371_v51, %v12676_v30 }
0x13a5   : > { %v6424_v30 = vadd.f32 %v6423_v11, %v6395_v52 }
0x13a9   : > { %v6397_v22 = vpop.f32.mrf.mxu2 }
0x13aa   : > { %v6398_v46 = vadd.f32 %v6397_v22, %v6369_v56 }
0x13ab   : > { %v6374_v63 = vpop.f32.mrf.mxu1 }
0x13ac   : > { %v6426_v23 = vpop.f32.mrf.mxu3  ;;  %v6375_v55 = vadd.f32 %v6374_v63, %v12674_v60 }
0x13ad   : > { %v6427_v9 = vadd.f32 %v6426_v23, %v6398_v46 }
0x13b1   : > { %v6400_v1 = vpop.f32.mrf.mxu2 }
0x13b2   : > { %v6336_v31 = vpop.f32.mrf.mxu0  ;;  %v6401_v17 = vadd.f32 %v6400_v1, %v6372_v4 }
0x13b3   : > { %v6337_v14 = vadd.f32 %v6336_v31, %v6308_v8  ;;  %v6564_v8 = vpop.permute.xlu1 %6563 }
0x13b4   : > { %v6429_v32 = vpop.f32.mrf.mxu3 }
0x13b5   : > { %v6551_v24 = vmax.f32 %v6337_v14, 0.0  ;;  %v6430_v29 = vadd.f32 %v6429_v32, %v6401_v17 }
0x13b9   : > { %v6403_v40 = vpop.f32.mrf.mxu2 }
0x13ba   : > { %v6404_v3 = vadd.f32 %v6403_v40, %v6375_v55 }
0x13bb   : > { %v6339_v53 = vpop.f32.mrf.mxu0 }
0x13bc   : > { %v6340_v36 = vadd.f32 %v6339_v53, %v6311_v7  ;;  %v6432_v20 = vpop.f32.mrf.mxu3 }
0x13bd   : > { %v6433_v35 = vadd.f32 %v6432_v20, %v6404_v3 }
0x13be   : > { %v6553_v58 = vmax.f32 %v6340_v36, 0.0 }
0x13c3   : > { %v6342_v34 = vpop.f32.mrf.mxu0 }
0x13c4   : > { %v6343_v45 = vadd.f32 %v6342_v34, %v6314_v25 }
0x13c6   : > { %v6555_v10 = vmax.f32 %v6343_v45, 0.0 }
0x13cb   : > { %v6345_v49 = vpop.f32.mrf.mxu0 }
0x13cc   : > { %v6346_v18 = vadd.f32 %v6345_v49, %v6317_v47 }
0x13ce   : > { %v6557_v57 = vmax.f32 %v6346_v18, 0.0 }
0x13d0   : > { %6581 = vmatpush.msrb.mxu0 %v6557_v57 }
0x13d2   : > { %6582 = vmatpush.msrb.mxu0 %v6555_v10 }
0x13d4   : > { %6583 = vmatpush.msrb.mxu0 %v6553_v58 }
0x13d6   : > { %6584 = vmatpush.msrb.mxu0 %v6551_v24 }
0x13d7   : > { %6791 = vmatmul.msk.f32.vlgmr.msrb.gmra.mxu0 %vm1370_vm8, %v6559_v5  ;;  %v6452_v37 = vpop.f32.mrf.mxu0 }
0x13d8   : > { %v6453_v60 = vadd.f32 %v6452_v37, %v6424_v30 }
0x13df   : > { %v6455_v28 = vpop.f32.mrf.mxu0 }
0x13e0   : > { %v6481_v0 = vpop.f32.mrf.mxu1  ;;  %v6456_v39 = vadd.f32 %v6455_v28, %v6427_v9 }
0x13e1   : > { %v6482_v41 = vadd.f32 %v6481_v0, %v6453_v60 }
0x13e7   : > { %v6458_v19 = vpop.f32.mrf.mxu0 }
0x13e8   : > { %v6484_v54 = vpop.f32.mrf.mxu1  ;;  %v6459_v50 = vadd.f32 %v6458_v19, %v6430_v29 }
0x13e9   : > { %v6485_v59 = vadd.f32 %v6484_v54, %v6456_v39 }
0x13eb   : > { %v6539_v21 = vpop.f32.mrf.mxu3 }
0x13ec   : > { %v6510_v62 = vpop.f32.mrf.mxu2 }
0x13ed   : > { %v6511_v48 = vadd.f32 %v6510_v62, %v6482_v41 }
0x13ef   : > { %v6461_v61 = vpop.f32.mrf.mxu0  ;;  %v6540_v11 = vadd.f32 %v6539_v21, %v6511_v48 }
0x13f0   : > { %v6487_v31 = vpop.f32.mrf.mxu1  ;;  %v6462_v13 = vadd.f32 %v6461_v61, %v6433_v35 }
0x13f1   : > { %v6488_v43 = vadd.f32 %v6487_v31, %v6459_v50  ;;  %v6552_v18 = vmax.f32 %v6540_v11, 0.0 }
0x13f3   : > { %v6542_v2 = vpop.f32.mrf.mxu3 }
0x13f4   : > { %v6513_v27 = vpop.f32.mrf.mxu2 }
0x13f5   : > { %v6514_v42 = vadd.f32 %v6513_v27, %v6485_v59 }
0x13f7   : > { %v6543_v38 = vadd.f32 %v6542_v2, %v6514_v42 }
0x13f8   : > { %v6490_v34 = vpop.f32.mrf.mxu1 }
0x13f9   : > { %v6491_v15 = vadd.f32 %v6490_v34, %v6462_v13  ;;  %v6554_v45 = vmax.f32 %v6543_v38, 0.0 }
0x13fb   : > { %v6545_v6 = vpop.f32.mrf.mxu3 }
0x13fc   : > { %v6516_v53 = vpop.f32.mrf.mxu2 }
0x13fd   : > { %v6517_v12 = vadd.f32 %v6516_v53, %v6488_v43 }
0x13ff   : > { %v6546_v25 = vadd.f32 %v6545_v6, %v6517_v12 }
0x1401   : > { %v6556_v7 = vmax.f32 %v6546_v25, 0.0 }
0x1403   : > { %v6548_v33 = vpop.f32.mrf.mxu3 }
0x1404   : > { %v6519_v26 = vpop.f32.mrf.mxu2 }
0x1405   : > { %v6520_v44 = vadd.f32 %v6519_v26, %v6491_v15 }
0x1407   : > { %v6549_v47 = vadd.f32 %v6548_v33, %v6520_v44 }
0x1409   : > { %v6558_v49 = vmax.f32 %v6549_v47, 0.0 }
0x140b   : > { %6601 = vmatpush.msrb.mxu1 %v6558_v49 }
0x140d   : > { %6602 = vmatpush.msrb.mxu1 %v6556_v7 }
0x140f   : > { %6603 = vmatpush.msrb.mxu1 %v6554_v45 }
0x1411   : > { %6604 = vmatpush.msrb.mxu1 %v6552_v18 }
0x1412   : > { %6792 = vmatmul.msk.f32.vlgmr.msrb.gmra.mxu1 %vm1370_vm8, %v6559_v5 }
0x1454   : > { %v6586_v36 = vpop.f32.mrf.mxu0 }
0x1455   : > { %v6587_v22 = vadd.f32 %v6586_v36, %v6564_v8 }
0x148f   : > { %v6606_v57 = vpop.f32.mrf.mxu1 }
0x1490   : > { %v6607_v51 = vadd.f32 %v6606_v57, %v6564_v8 }
0x1492   : > { %v6611_v23 = vrot.slane %v6607_v51, 6 }
0x1494   : > { %v6613_v14 = vsel %vm6612_vm7, %v6587_v22, %v6611_v23 }
0x1495   : > { %6615 = vst [vmem:[%s358_s24] sm:$0xf] %v6613_v14 }
0x1496   : > { %8492 = shalt.err (!%p8489_p10)
}
0x1497   : > { %6810 = dma.vmem_to_hbm [thread:$0]  (%p8703_p3), %s6631_s17, 64, %s6633_s4, %s6617_s9  }
0x1498 PF: > { %s6644_s19 = sand.u32 1, %s8523_s27   ;;  %p13799_p12 = scmp.ge.s32.totalorder %s8535_s30, 2 }
0x1499   : > { %s6645_s23 = scalar_lea.sflag [#allocation6], %s6644_s19 }
0x149a   : > { %p6824_p13 = pnand %p13799_p12, %p8672_p6 }
0x149c   : > { %p6825_p0 = pneg %p6824_p13 }
0x149e   : > { %8518 = dma.done.wait (%p6825_p0), %s6645_s23, 64  }
0x149f   : > { %8520 = vsyncadd (%p6825_p0), %s6645_s23, 4294967232  ;;  %p22_p5 = scmp.ge.s32.totalorder %s8693_s26, 4   ;;  %s13800_s27 = smov %s8527_s28 }
0x14a0   : > { %s13801_s28 = smov %s8531_s29  ;;  %s13802_s29 = smov %s8709_s15 }
0x14a1   : > { %s13803_s30 = smov %s8693_s26  ;;  %24 = sbr.rel (!%p22_p5) target bundleno = 9 (0x9), region = 109 }
0x14a6   :  { %6651 = vsyncpa [#allocation5], 1 }
0x14a7   :  { %6653 = vsyncpa [#allocation5 + $0x1], 1 }
0x14a8   :  { %6654 = vsyncpa [#allocation8], 1 }
0x14a9   :  { %6655 = vsyncpa [#allocation6], 1 }
0x14aa   :  { %6657 = vsyncpa [#allocation6 + $0x1], 1 }

</bundles_post_ra>
